<compile_context>
chip_gen: v5e
topology: v5e:2x2
jax: 0.10.0
libtpu: 0.0.40
codegen_flags: <defaults>
</compile_context>

<pallas_src>
import jax
import jax.numpy as jnp
from jax.experimental import pallas as pl
from jax.experimental.pallas import tpu as pltpu

MAX_ATOM = 50       # real number of node slots (readout sums exactly these)
NP = 64             # node dim padded to a multiple of 8 for clean layouts
ATOM_DIM = 14       # atom_type_dim
IN_CH = 14          # in_channels
OUT_CH = 32         # out_channels / emb_size
L1, L2, L3, L4 = 128, 256, 128, 10
BN_EPS = 1e-5
NORM_EPS = 1e-12    # F.normalize eps
TB_TARGET = 128     # molecules per grid step (compile-time / unroll friendly)


def _round_up(x, m):
    return ((x + m - 1) // m) * m


def gcn_none_kernel(adj_ref, node_ref, wv1_ref, bv1_ref, v2_ref, v3_ref,
                    w1_ref, b1_ref, w2_ref, b2_ref, w3_ref, b3_ref,
                    w4_ref, b4_ref, w5t_ref, b5_ref, out_ref):
    tb, n, _ = node_ref.shape
    adj = adj_ref[...]                                    # (tb, 64, 64) bf16

    def gcn_layer(x2d, v_ref, bias, act):
        cout = v_ref.shape[-1]
        # Shared projection collapsed across molecules: (tb*n, cin)@(cin, cout).
        # (adj @ x) @ V == adj @ (x @ V), so projecting first is exact.
        p = jnp.dot(x2d, v_ref[...], preferred_element_type=jnp.float32)
        if bias is not None:
            p = p + bias
        # Adjacency mix, batched per molecule (edge_dim==1 -> 'mean' is identity).
        p3 = p.astype(jnp.bfloat16).reshape(tb, n, cout)
        e = jnp.einsum('bnm,bmc->bnc', adj, p3,
                       preferred_element_type=jnp.float32)
        e = e.reshape(tb * n, cout)
        if act:
            e = jnp.maximum(e, 0.0)
        # F.normalize(p=2, dim=-1): x / max(||x||, eps)   (rsqrt -> EUP slot)
        inv = jax.lax.rsqrt(
            jnp.maximum(jnp.sum(e * e, axis=-1, keepdims=True),
                        NORM_EPS * NORM_EPS))
        return e * inv                                    # (tb*n, cout) f32

    node = node_ref[...].reshape(tb * n, ATOM_DIM)        # leading-dim reshape
    # Layer 1: Dense0 (+BN0) folded into V1 at param-build time.
    e = gcn_layer(node, wv1_ref, bv1_ref[...], act=True)
    # Layers 2/3: BN1/BN2 scales folded into V2/V3 (shift==0 under eval stats).
    e = gcn_layer(e.astype(jnp.bfloat16), v2_ref, None, act=True)
    e = gcn_layer(e.astype(jnp.bfloat16), v3_ref, None, act=False)

    # Graph readout: sum over node slots.  Padded rows 50..63 are exactly zero
    # (their adjacency rows/cols were zero-padded), so summing all 64 rows
    # equals summing the 50 real node slots of the original model.
    g = jnp.sum(e.reshape(tb, n, OUT_CH), axis=1)         # (tb, 32) f32

    def mlp(x, w_ref, b_ref):
        y = jnp.dot(x.astype(jnp.bfloat16), w_ref[...],
                    preferred_element_type=jnp.float32) + b_ref[...]
        return jnp.maximum(y, 0.0)

    # Dropout = identity (eval); every BatchNorm1d is folded into the next W/b.
    y = mlp(g, w1_ref, b1_ref)        # (tb, 128)  BN3 folded in via readout
    y = mlp(y, w2_ref, b2_ref)        # (tb, 256)
    y = mlp(y, w3_ref, b3_ref)        # (tb, 128)
    y = mlp(y, w4_ref, b4_ref)        # (tb, 10)
    # Final linear emitted lane-dense: out[0, i] = y[i, :] @ w5 + b5
    out_ref[...] = jax.lax.dot_general(
        w5t_ref[...], y.astype(jnp.bfloat16),
        dimension_numbers=(((1,), (1,)), ((), ())),
        preferred_element_type=jnp.float32) + b5_ref[...]   # (1, tb)


def _w(shape):
    return pl.BlockSpec(shape, lambda g: (0,) * len(shape))


def _pick_tile(batch):
    b8 = _round_up(batch, 8)
    tb = min(TB_TARGET, b8)
    n_steps = _round_up(b8, tb) // tb
    # Prefer >=2 grid steps so dimension_semantics=("parallel",) can split the
    # grid across a v7x megacore (a no-op on single-TC v5e / v6e).
    if n_steps == 1 and tb >= 16:
        tb = _round_up(tb // 2, 8)
    b_pad = _round_up(b8, tb)
    return tb, b_pad


@jax.jit
def gcn_none_forward(adj_raw, node, params):
    """adj_raw: (B, 50*50*8) multi-hot edges (uint8/bool preferred);
       node:    (B, 50, 14) float.  Returns (B, 1) float32 logits."""
    B = adj_raw.shape[0]
    TB, B_pad = _pick_tile(B)
    n_steps = B_pad // TB

    # forward() preprocessing: sum the 8 edge bins -> (B, 50, 50); values <= 8
    # so bf16 is exact.  Pad node slots 50 -> 64 and batch -> multiple of TB.
    adj = jnp.sum(adj_raw.reshape(B, MAX_ATOM, MAX_ATOM, 8), axis=-1,
                  dtype=jnp.float32).astype(jnp.bfloat16)
    node = node.astype(jnp.bfloat16)
    pn = NP - MAX_ATOM
    adj = jnp.pad(adj, ((0, B_pad - B), (0, pn), (0, pn)))
    node = jnp.pad(node, ((0, B_pad - B), (0, pn), (0, 0)))

    in_specs = [
        pl.BlockSpec((TB, NP, NP), lambda g: (g, 0, 0)),        # adj
        pl.BlockSpec((TB, NP, ATOM_DIM), lambda g: (g, 0, 0)),  # node
        _w((ATOM_DIM, OUT_CH)), _w((1, OUT_CH)),                # W0V1 (+BN0), bias
        _w((OUT_CH, OUT_CH)),                                   # V2 (BN1 scale folded)
        _w((OUT_CH, OUT_CH)),                                   # V3 (BN2 scale folded)
        _w((OUT_CH, L1)), _w((1, L1)),                          # linear1 (+BN3)
        _w((L1, L2)),     _w((1, L2)),                          # linear2 (+BN_L1)
        _w((L2, L3)),     _w((1, L3)),                          # linear3 (+BN_L2)
        _w((L3, L4)),     _w((1, L4)),                          # linear4 (+BN_L3)
        _w((1, L4)),      _w((1, 1)),                           # linear5^T (+BN_L4)
    ]
    out_spec = pl.BlockSpec((1, TB), lambda g: (g, 0))          # lane-dense row

    out = pl.pallas_call(
        gcn_none_kernel,
        out_shape=jax.ShapeDtypeStruct((n_steps, TB), jnp.float32),
        grid_spec=pltpu.PrefetchScalarGridSpec(
            num_scalar_prefetch=0,
            grid=(n_steps,),
            in_specs=in_specs,
            out_specs=out_spec,
        ),
        compiler_params=pltpu.CompilerParams(
            dimension_semantics=("parallel",),
            vmem_limit_bytes=48 * 1024 * 1024),
    )(adj, node, *params)
    return out.reshape(B_pad, 1)[:B]


def _bn_eval(c):
    # BatchNorm in eval with default init: gamma=1, beta=0, mean=0, var=1.
    gamma = jnp.ones((c,), jnp.float32)
    beta = jnp.zeros((c,), jnp.float32)
    mean = jnp.zeros((c,), jnp.float32)
    var = jnp.ones((c,), jnp.float32)
    scale = gamma / jnp.sqrt(var + BN_EPS)
    shift = beta - mean * scale
    return scale, shift


def init_params(key):
    ks = jax.random.split(key, 9)

    def xavier(k, fi, fo):
        a = (6.0 / (fi + fo)) ** 0.5
        return jax.random.uniform(k, (fi, fo), jnp.float32, -a, a)

    def linear(k, fi, fo):
        k1, k2 = jax.random.split(k)
        bound = 1.0 / (fi ** 0.5)
        w = jax.random.uniform(k1, (fi, fo), jnp.float32, -bound, bound)
        b = jax.random.uniform(k2, (1, fo), jnp.float32, -bound, bound)
        return w, b

    w0 = xavier(ks[0], ATOM_DIM, IN_CH)                   # Dense0 (bias=False)
    v1 = xavier(ks[1], IN_CH, OUT_CH)
    v2 = xavier(ks[2], OUT_CH, OUT_CH)
    v3 = xavier(ks[3], OUT_CH, OUT_CH)
    w1, b1 = linear(ks[4], OUT_CH, L1)
    w2, b2 = linear(ks[5], L1, L2)
    w3, b3 = linear(ks[6], L2, L3)
    w4, b4 = linear(ks[7], L3, L4)
    w5, b5 = linear(ks[8], L4, 1)

    # ---- fold eval-mode BatchNorms into adjacent affine weights ----
    s0, t0 = _bn_eval(IN_CH)      # BN0
    s1, _ = _bn_eval(OUT_CH)      # BN1 (shift == 0 under default eval stats)
    s2, _ = _bn_eval(OUT_CH)      # BN2 (shift == 0 under default eval stats)
    s3, t3 = _bn_eval(OUT_CH)     # BN3

    # Dense0(+BN0) folded into V1:  adj @ (node @ (W0*s0) @ V1 + t0 @ V1)
    wv1 = (w0 * s0[None, :]) @ v1                         # (14, 32)
    bv1 = t0[None, :] @ v1                                # (1, 32)  (== 0 here)
    # BN1/BN2 scales folded into V2/V3 (exact only because their shift is 0).
    v2f = s1[:, None] * v2
    v3f = s2[:, None] * v3
    # BN3 -> MLP linear1 (original readout sums the 50 real node slots).
    w1f = s3[:, None] * w1
    b1f = b1 + float(MAX_ATOM) * (t3[None, :] @ w1)
    # Each MLP BatchNorm1d (after ReLU) -> next linear.
    sA, tA = _bn_eval(L1)
    w2f, b2f = sA[:, None] * w2, b2 + tA[None, :] @ w2
    sB, tB = _bn_eval(L2)
    w3f, b3f = sB[:, None] * w3, b3 + tB[None, :] @ w3
    sC, tC = _bn_eval(L3)
    w4f, b4f = sC[:, None] * w4, b4 + tC[None, :] @ w4
    sD, tD = _bn_eval(L4)
    w5f, b5f = sD[:, None] * w5, b5 + tD[None, :] @ w5
    w5t = w5f.T                                           # (1, 10) pre-transposed

    bf = lambda x: x.astype(jnp.bfloat16)
    # TODO(synk): Dense1 (max_atom*4*2 -> max_atom) exists in __init__ but is
    # never used in forward(), so it is intentionally omitted.
    return (bf(wv1), bv1, bf(v2f), bf(v3f),
            bf(w1f), b1f, bf(w2f), b2f, bf(w3f), b3f,
            bf(w4f), b4f, bf(w5t), b5f)


if __name__ == "__main__":
    key = jax.random.PRNGKey(0)
    kp, ka, kn = jax.random.split(key, 3)
    params = init_params(kp)

    B = 2
    # multi-hot edge tensor supplied in a narrow dtype (4x less HBM than f32)
    adj_raw = (jax.random.uniform(ka, (B, MAX_ATOM * MAX_ATOM * 8)) < 0.05
               ).astype(jnp.uint8)
    node = jax.random.uniform(kn, (B, MAX_ATOM, ATOM_DIM), dtype=jnp.float32)

    out = gcn_none_forward(adj_raw, node, params)
    jax.block_until_ready(out)
    assert out.shape == (B, 1) and out.dtype == jnp.float32
    assert bool(jnp.all(jnp.isfinite(out)))
    print("KERNEL_OK")
</pallas_src>

<mosaic_0001>
module attributes {stable_mosaic.version = 11 : i64} {
  func.func @gcn_none_kernel(%arg0: i32, %arg1: memref<8x64x64xbf16, #tpu.memory_space<vmem>>, %arg2: memref<8x64x14xbf16, #tpu.memory_space<vmem>>, %arg3: memref<14x32xbf16, #tpu.memory_space<vmem>>, %arg4: memref<1x32xf32, #tpu.memory_space<vmem>>, %arg5: memref<32x32xbf16, #tpu.memory_space<vmem>>, %arg6: memref<32x32xbf16, #tpu.memory_space<vmem>>, %arg7: memref<32x128xbf16, #tpu.memory_space<vmem>>, %arg8: memref<1x128xf32, #tpu.memory_space<vmem>>, %arg9: memref<128x256xbf16, #tpu.memory_space<vmem>>, %arg10: memref<1x256xf32, #tpu.memory_space<vmem>>, %arg11: memref<256x128xbf16, #tpu.memory_space<vmem>>, %arg12: memref<1x128xf32, #tpu.memory_space<vmem>>, %arg13: memref<128x10xbf16, #tpu.memory_space<vmem>>, %arg14: memref<1x10xf32, #tpu.memory_space<vmem>>, %arg15: memref<1x10xbf16, #tpu.memory_space<vmem>>, %arg16: memref<1x1xf32, #tpu.memory_space<vmem>>, %arg17: memref<1x8xf32, #tpu.memory_space<vmem>>) attributes {dimension_semantics = [#tpu.dimension_semantics<parallel>], iteration_bounds = array<i64: 1>, scalar_prefetch = 0 : i64, scratch_operands = 0 : i64, tpu.core_type = #tpu.core_type<tc>, window_params = [{transform_indices = @transform_0, window_bounds = array<i64: 8, 64, 64>}, {transform_indices = @transform_1, window_bounds = array<i64: 8, 64, 14>}, {pipeline_mode = #tpu.pipeline_mode<synchronous>, transform_indices = @transform_2, window_bounds = array<i64: 14, 32>}, {pipeline_mode = #tpu.pipeline_mode<synchronous>, transform_indices = @transform_3, window_bounds = array<i64: 1, 32>}, {pipeline_mode = #tpu.pipeline_mode<synchronous>, transform_indices = @transform_4, window_bounds = array<i64: 32, 32>}, {pipeline_mode = #tpu.pipeline_mode<synchronous>, transform_indices = @transform_5, window_bounds = array<i64: 32, 32>}, {pipeline_mode = #tpu.pipeline_mode<synchronous>, transform_indices = @transform_6, window_bounds = array<i64: 32, 128>}, {pipeline_mode = #tpu.pipeline_mode<synchronous>, transform_indices = @transform_7, window_bounds = array<i64: 1, 128>}, {pipeline_mode = #tpu.pipeline_mode<synchronous>, transform_indices = @transform_8, window_bounds = array<i64: 128, 256>}, {pipeline_mode = #tpu.pipeline_mode<synchronous>, transform_indices = @transform_9, window_bounds = array<i64: 1, 256>}, {pipeline_mode = #tpu.pipeline_mode<synchronous>, transform_indices = @transform_10, window_bounds = array<i64: 256, 128>}, {pipeline_mode = #tpu.pipeline_mode<synchronous>, transform_indices = @transform_11, window_bounds = array<i64: 1, 128>}, {pipeline_mode = #tpu.pipeline_mode<synchronous>, transform_indices = @transform_12, window_bounds = array<i64: 128, 10>}, {pipeline_mode = #tpu.pipeline_mode<synchronous>, transform_indices = @transform_13, window_bounds = array<i64: 1, 10>}, {pipeline_mode = #tpu.pipeline_mode<synchronous>, transform_indices = @transform_14, window_bounds = array<i64: 1, 10>}, {pipeline_mode = #tpu.pipeline_mode<synchronous>, transform_indices = @transform_15, window_bounds = array<i64: 1, 1>}, {transform_indices = @transform_16, window_bounds = array<i64: 1, 8>}]} {
    %c0 = arith.constant 0 : index
    %c0_0 = arith.constant 0 : index
    %c0_1 = arith.constant 0 : index
    %0 = vector.load %arg1[%c0, %c0_0, %c0_1] : memref<8x64x64xbf16, #tpu.memory_space<vmem>>, vector<8x64x64xbf16>
    %c0_2 = arith.constant 0 : index
    %c0_3 = arith.constant 0 : index
    %c0_4 = arith.constant 0 : index
    %1 = vector.load %arg2[%c0_2, %c0_3, %c0_4] : memref<8x64x14xbf16, #tpu.memory_space<vmem>>, vector<8x64x14xbf16>
    %2 = vector.shape_cast %1 : vector<8x64x14xbf16> to vector<512x14xbf16>
    %c0_5 = arith.constant 0 : index
    %c0_6 = arith.constant 0 : index
    %3 = vector.load %arg4[%c0_5, %c0_6] : memref<1x32xf32, #tpu.memory_space<vmem>>, vector<1x32xf32>
    %c0_7 = arith.constant 0 : index
    %c0_8 = arith.constant 0 : index
    %4 = vector.load %arg3[%c0_7, %c0_8] : memref<14x32xbf16, #tpu.memory_space<vmem>>, vector<14x32xbf16>
    %cst = arith.constant dense<0.000000e+00> : vector<512x32xf32>
    %5 = tpu.matmul %2, %4, %cst {dimension_numbers = #tpu.dot_dimension_numbers<[1], [0], [0], [1], [0, 0, 1, 1], [], []>} : vector<512x14xbf16>, vector<14x32xbf16>, vector<512x32xf32> -> vector<512x32xf32>
    %6 = vector.broadcast %3 : vector<1x32xf32> to vector<512x32xf32>
    %7 = arith.addf %5, %6 : vector<512x32xf32>
    %8 = arith.truncf %7 : vector<512x32xf32> to vector<512x32xbf16>
    %9 = vector.shape_cast %8 : vector<512x32xbf16> to vector<8x64x32xbf16>
    "tpu.trace_start"() <{level = 10 : i32, message = "bnm,bmc->bnc"}> : () -> ()
    %cst_9 = arith.constant dense<0.000000e+00> : vector<8x64x32xf32>
    %10 = tpu.matmul %0, %9, %cst_9 {dimension_numbers = #tpu.dot_dimension_numbers<[2], [1], [1], [2], [0, 0, 0, 1, 1, 2], [0], [0]>} : vector<8x64x64xbf16>, vector<8x64x32xbf16>, vector<8x64x32xf32> -> vector<8x64x32xf32>
    "tpu.trace_stop"() : () -> ()
    %11 = vector.shape_cast %10 : vector<8x64x32xf32> to vector<512x32xf32>
    %cst_10 = arith.constant 0.000000e+00 : f32
    %12 = vector.broadcast %cst_10 : f32 to vector<512x32xf32>
    %13 = arith.maximumf %11, %12 : vector<512x32xf32>
    %14 = arith.mulf %13, %13 : vector<512x32xf32>
    %cst_11 = arith.constant dense<0.000000e+00> : vector<512xf32>
    %15 = vector.multi_reduction <add>, %14, %cst_11 [1] : vector<512x32xf32> to vector<512xf32>
    %16 = vector.shape_cast %15 : vector<512xf32> to vector<512x1xf32>
    %cst_12 = arith.constant 1.000000e-24 : f32
    %17 = vector.broadcast %cst_12 : f32 to vector<512x1xf32>
    %18 = arith.maximumf %16, %17 : vector<512x1xf32>
    %19 = math.rsqrt %18 : vector<512x1xf32>
    %20 = vector.broadcast %19 : vector<512x1xf32> to vector<512x32xf32>
    %21 = arith.mulf %13, %20 : vector<512x32xf32>
    %22 = arith.truncf %21 : vector<512x32xf32> to vector<512x32xbf16>
    %c0_13 = arith.constant 0 : index
    %c0_14 = arith.constant 0 : index
    %23 = vector.load %arg5[%c0_13, %c0_14] : memref<32x32xbf16, #tpu.memory_space<vmem>>, vector<32x32xbf16>
    %cst_15 = arith.constant dense<0.000000e+00> : vector<512x32xf32>
    %24 = tpu.matmul %22, %23, %cst_15 {dimension_numbers = #tpu.dot_dimension_numbers<[1], [0], [0], [1], [0, 0, 1, 1], [], []>} : vector<512x32xbf16>, vector<32x32xbf16>, vector<512x32xf32> -> vector<512x32xf32>
    %25 = arith.truncf %24 : vector<512x32xf32> to vector<512x32xbf16>
    %26 = vector.shape_cast %25 : vector<512x32xbf16> to vector<8x64x32xbf16>
    "tpu.trace_start"() <{level = 10 : i32, message = "bnm,bmc->bnc"}> : () -> ()
    %cst_16 = arith.constant dense<0.000000e+00> : vector<8x64x32xf32>
    %27 = tpu.matmul %0, %26, %cst_16 {dimension_numbers = #tpu.dot_dimension_numbers<[2], [1], [1], [2], [0, 0, 0, 1, 1, 2], [0], [0]>} : vector<8x64x64xbf16>, vector<8x64x32xbf16>, vector<8x64x32xf32> -> vector<8x64x32xf32>
    "tpu.trace_stop"() : () -> ()
    %28 = vector.shape_cast %27 : vector<8x64x32xf32> to vector<512x32xf32>
    %cst_17 = arith.constant 0.000000e+00 : f32
    %29 = vector.broadcast %cst_17 : f32 to vector<512x32xf32>
    %30 = arith.maximumf %28, %29 : vector<512x32xf32>
    %31 = arith.mulf %30, %30 : vector<512x32xf32>
    %cst_18 = arith.constant dense<0.000000e+00> : vector<512xf32>
    %32 = vector.multi_reduction <add>, %31, %cst_18 [1] : vector<512x32xf32> to vector<512xf32>
    %33 = vector.shape_cast %32 : vector<512xf32> to vector<512x1xf32>
    %cst_19 = arith.constant 1.000000e-24 : f32
    %34 = vector.broadcast %cst_19 : f32 to vector<512x1xf32>
    %35 = arith.maximumf %33, %34 : vector<512x1xf32>
    %36 = math.rsqrt %35 : vector<512x1xf32>
    %37 = vector.broadcast %36 : vector<512x1xf32> to vector<512x32xf32>
    %38 = arith.mulf %30, %37 : vector<512x32xf32>
    %39 = arith.truncf %38 : vector<512x32xf32> to vector<512x32xbf16>
    %c0_20 = arith.constant 0 : index
    %c0_21 = arith.constant 0 : index
    %40 = vector.load %arg6[%c0_20, %c0_21] : memref<32x32xbf16, #tpu.memory_space<vmem>>, vector<32x32xbf16>
    %cst_22 = arith.constant dense<0.000000e+00> : vector<512x32xf32>
    %41 = tpu.matmul %39, %40, %cst_22 {dimension_numbers = #tpu.dot_dimension_numbers<[1], [0], [0], [1], [0, 0, 1, 1], [], []>} : vector<512x32xbf16>, vector<32x32xbf16>, vector<512x32xf32> -> vector<512x32xf32>
    %42 = arith.truncf %41 : vector<512x32xf32> to vector<512x32xbf16>
    %43 = vector.shape_cast %42 : vector<512x32xbf16> to vector<8x64x32xbf16>
    "tpu.trace_start"() <{level = 10 : i32, message = "bnm,bmc->bnc"}> : () -> ()
    %cst_23 = arith.constant dense<0.000000e+00> : vector<8x64x32xf32>
    %44 = tpu.matmul %0, %43, %cst_23 {dimension_numbers = #tpu.dot_dimension_numbers<[2], [1], [1], [2], [0, 0, 0, 1, 1, 2], [0], [0]>} : vector<8x64x64xbf16>, vector<8x64x32xbf16>, vector<8x64x32xf32> -> vector<8x64x32xf32>
    "tpu.trace_stop"() : () -> ()
    %45 = vector.shape_cast %44 : vector<8x64x32xf32> to vector<512x32xf32>
    %46 = arith.mulf %45, %45 : vector<512x32xf32>
    %cst_24 = arith.constant dense<0.000000e+00> : vector<512xf32>
    %47 = vector.multi_reduction <add>, %46, %cst_24 [1] : vector<512x32xf32> to vector<512xf32>
    %48 = vector.shape_cast %47 : vector<512xf32> to vector<512x1xf32>
    %cst_25 = arith.constant 1.000000e-24 : f32
    %49 = vector.broadcast %cst_25 : f32 to vector<512x1xf32>
    %50 = arith.maximumf %48, %49 : vector<512x1xf32>
    %51 = math.rsqrt %50 : vector<512x1xf32>
    %52 = vector.broadcast %51 : vector<512x1xf32> to vector<512x32xf32>
    %53 = arith.mulf %45, %52 : vector<512x32xf32>
    %54 = vector.shape_cast %53 : vector<512x32xf32> to vector<8x64x32xf32>
    %cst_26 = arith.constant dense<0.000000e+00> : vector<8x32xf32>
    %55 = vector.multi_reduction <add>, %54, %cst_26 [1] : vector<8x64x32xf32> to vector<8x32xf32>
    %56 = arith.truncf %55 : vector<8x32xf32> to vector<8x32xbf16>
    %c0_27 = arith.constant 0 : index
    %c0_28 = arith.constant 0 : index
    %57 = vector.load %arg7[%c0_27, %c0_28] : memref<32x128xbf16, #tpu.memory_space<vmem>>, vector<32x128xbf16>
    %cst_29 = arith.constant dense<0.000000e+00> : vector<8x128xf32>
    %58 = tpu.matmul %56, %57, %cst_29 {dimension_numbers = #tpu.dot_dimension_numbers<[1], [0], [0], [1], [0, 0, 1, 1], [], []>} : vector<8x32xbf16>, vector<32x128xbf16>, vector<8x128xf32> -> vector<8x128xf32>
    %c0_30 = arith.constant 0 : index
    %c0_31 = arith.constant 0 : index
    %59 = vector.load %arg8[%c0_30, %c0_31] : memref<1x128xf32, #tpu.memory_space<vmem>>, vector<1x128xf32>
    %60 = vector.broadcast %59 : vector<1x128xf32> to vector<8x128xf32>
    %61 = arith.addf %58, %60 : vector<8x128xf32>
    %cst_32 = arith.constant 0.000000e+00 : f32
    %62 = vector.broadcast %cst_32 : f32 to vector<8x128xf32>
    %63 = arith.maximumf %61, %62 : vector<8x128xf32>
    %64 = arith.truncf %63 : vector<8x128xf32> to vector<8x128xbf16>
    %c0_33 = arith.constant 0 : index
    %c0_34 = arith.constant 0 : index
    %65 = vector.load %arg9[%c0_33, %c0_34] : memref<128x256xbf16, #tpu.memory_space<vmem>>, vector<128x256xbf16>
    %cst_35 = arith.constant dense<0.000000e+00> : vector<8x256xf32>
    %66 = tpu.matmul %64, %65, %cst_35 {dimension_numbers = #tpu.dot_dimension_numbers<[1], [0], [0], [1], [0, 0, 1, 1], [], []>} : vector<8x128xbf16>, vector<128x256xbf16>, vector<8x256xf32> -> vector<8x256xf32>
    %c0_36 = arith.constant 0 : index
    %c0_37 = arith.constant 0 : index
    %67 = vector.load %arg10[%c0_36, %c0_37] : memref<1x256xf32, #tpu.memory_space<vmem>>, vector<1x256xf32>
    %68 = vector.broadcast %67 : vector<1x256xf32> to vector<8x256xf32>
    %69 = arith.addf %66, %68 : vector<8x256xf32>
    %cst_38 = arith.constant 0.000000e+00 : f32
    %70 = vector.broadcast %cst_38 : f32 to vector<8x256xf32>
    %71 = arith.maximumf %69, %70 : vector<8x256xf32>
    %72 = arith.truncf %71 : vector<8x256xf32> to vector<8x256xbf16>
    %c0_39 = arith.constant 0 : index
    %c0_40 = arith.constant 0 : index
    %73 = vector.load %arg11[%c0_39, %c0_40] : memref<256x128xbf16, #tpu.memory_space<vmem>>, vector<256x128xbf16>
    %cst_41 = arith.constant dense<0.000000e+00> : vector<8x128xf32>
    %74 = tpu.matmul %72, %73, %cst_41 {dimension_numbers = #tpu.dot_dimension_numbers<[1], [0], [0], [1], [0, 0, 1, 1], [], []>} : vector<8x256xbf16>, vector<256x128xbf16>, vector<8x128xf32> -> vector<8x128xf32>
    %c0_42 = arith.constant 0 : index
    %c0_43 = arith.constant 0 : index
    %75 = vector.load %arg12[%c0_42, %c0_43] : memref<1x128xf32, #tpu.memory_space<vmem>>, vector<1x128xf32>
    %76 = vector.broadcast %75 : vector<1x128xf32> to vector<8x128xf32>
    %77 = arith.addf %74, %76 : vector<8x128xf32>
    %cst_44 = arith.constant 0.000000e+00 : f32
    %78 = vector.broadcast %cst_44 : f32 to vector<8x128xf32>
    %79 = arith.maximumf %77, %78 : vector<8x128xf32>
    %80 = arith.truncf %79 : vector<8x128xf32> to vector<8x128xbf16>
    %c0_45 = arith.constant 0 : index
    %c0_46 = arith.constant 0 : index
    %81 = vector.load %arg13[%c0_45, %c0_46] : memref<128x10xbf16, #tpu.memory_space<vmem>>, vector<128x10xbf16>
    %cst_47 = arith.constant dense<0.000000e+00> : vector<8x10xf32>
    %82 = tpu.matmul %80, %81, %cst_47 {dimension_numbers = #tpu.dot_dimension_numbers<[1], [0], [0], [1], [0, 0, 1, 1], [], []>} : vector<8x128xbf16>, vector<128x10xbf16>, vector<8x10xf32> -> vector<8x10xf32>
    %c0_48 = arith.constant 0 : index
    %c0_49 = arith.constant 0 : index
    %83 = vector.load %arg14[%c0_48, %c0_49] : memref<1x10xf32, #tpu.memory_space<vmem>>, vector<1x10xf32>
    %84 = vector.broadcast %83 : vector<1x10xf32> to vector<8x10xf32>
    %85 = arith.addf %82, %84 : vector<8x10xf32>
    %cst_50 = arith.constant 0.000000e+00 : f32
    %86 = vector.broadcast %cst_50 : f32 to vector<8x10xf32>
    %87 = arith.maximumf %85, %86 : vector<8x10xf32>
    %c0_51 = arith.constant 0 : index
    %c0_52 = arith.constant 0 : index
    %88 = vector.load %arg15[%c0_51, %c0_52] : memref<1x10xbf16, #tpu.memory_space<vmem>>, vector<1x10xbf16>
    %89 = arith.truncf %87 : vector<8x10xf32> to vector<8x10xbf16>
    %cst_53 = arith.constant dense<0.000000e+00> : vector<1x8xf32>
    %90 = tpu.matmul %88, %89, %cst_53 {dimension_numbers = #tpu.dot_dimension_numbers<[1], [1], [0], [0], [0, 0, 1, 0], [], []>} : vector<1x10xbf16>, vector<8x10xbf16>, vector<1x8xf32> -> vector<1x8xf32>
    %c0_54 = arith.constant 0 : index
    %c0_55 = arith.constant 0 : index
    %91 = vector.load %arg16[%c0_54, %c0_55] : memref<1x1xf32, #tpu.memory_space<vmem>>, vector<1x1xf32>
    %92 = vector.broadcast %91 : vector<1x1xf32> to vector<1x8xf32>
    %93 = arith.addf %90, %92 : vector<1x8xf32>
    %c0_56 = arith.constant 0 : index
    %c0_57 = arith.constant 0 : index
    %94 = vector.load %arg17[%c0_56, %c0_57] : memref<1x8xf32, #tpu.memory_space<vmem>>, vector<1x8xf32>
    tpu.vector_store %arg17[%c0_56, %c0_57], %93 {strides = array<i32>} : memref<1x8xf32, #tpu.memory_space<vmem>>, vector<1x8xf32>,
    return
  }
  func.func @transform_0(%arg0: i32) -> (i32, i32, i32) {
    %c0_i32 = arith.constant 0 : i32
    %c0_i32_0 = arith.constant 0 : i32
    %c0_i32_1 = arith.constant 0 : i32
    return %arg0, %c0_i32, %c0_i32_0 : i32, i32, i32
  }
  func.func @transform_1(%arg0: i32) -> (i32, i32, i32) {
    %c0_i32 = arith.constant 0 : i32
    %c0_i32_0 = arith.constant 0 : i32
    %c0_i32_1 = arith.constant 0 : i32
    return %arg0, %c0_i32, %c0_i32_0 : i32, i32, i32
  }
  func.func @transform_2(%arg0: i32) -> (i32, i32) {
    %c0_i32 = arith.constant 0 : i32
    %c0_i32_0 = arith.constant 0 : i32
    %c0_i32_1 = arith.constant 0 : i32
    return %c0_i32, %c0_i32_0 : i32, i32
  }
  func.func @transform_3(%arg0: i32) -> (i32, i32) {
    %c0_i32 = arith.constant 0 : i32
    %c0_i32_0 = arith.constant 0 : i32
    %c0_i32_1 = arith.constant 0 : i32
    return %c0_i32, %c0_i32_0 : i32, i32
  }
  func.func @transform_4(%arg0: i32) -> (i32, i32) {
    %c0_i32 = arith.constant 0 : i32
    %c0_i32_0 = arith.constant 0 : i32
    %c0_i32_1 = arith.constant 0 : i32
    return %c0_i32, %c0_i32_0 : i32, i32
  }
  func.func @transform_5(%arg0: i32) -> (i32, i32) {
    %c0_i32 = arith.constant 0 : i32
    %c0_i32_0 = arith.constant 0 : i32
    %c0_i32_1 = arith.constant 0 : i32
    return %c0_i32, %c0_i32_0 : i32, i32
  }
  func.func @transform_6(%arg0: i32) -> (i32, i32) {
    %c0_i32 = arith.constant 0 : i32
    %c0_i32_0 = arith.constant 0 : i32
    %c0_i32_1 = arith.constant 0 : i32
    return %c0_i32, %c0_i32_0 : i32, i32
  }
  func.func @transform_7(%arg0: i32) -> (i32, i32) {
    %c0_i32 = arith.constant 0 : i32
    %c0_i32_0 = arith.constant 0 : i32
    %c0_i32_1 = arith.constant 0 : i32
    return %c0_i32, %c0_i32_0 : i32, i32
  }
  func.func @transform_8(%arg0: i32) -> (i32, i32) {
    %c0_i32 = arith.constant 0 : i32
    %c0_i32_0 = arith.constant 0 : i32
    %c0_i32_1 = arith.constant 0 : i32
    return %c0_i32, %c0_i32_0 : i32, i32
  }
  func.func @transform_9(%arg0: i32) -> (i32, i32) {
    %c0_i32 = arith.constant 0 : i32
    %c0_i32_0 = arith.constant 0 : i32
    %c0_i32_1 = arith.constant 0 : i32
    return %c0_i32, %c0_i32_0 : i32, i32
  }
  func.func @transform_10(%arg0: i32) -> (i32, i32) {
    %c0_i32 = arith.constant 0 : i32
    %c0_i32_0 = arith.constant 0 : i32
    %c0_i32_1 = arith.constant 0 : i32
    return %c0_i32, %c0_i32_0 : i32, i32
  }
  func.func @transform_11(%arg0: i32) -> (i32, i32) {
    %c0_i32 = arith.constant 0 : i32
    %c0_i32_0 = arith.constant 0 : i32
    %c0_i32_1 = arith.constant 0 : i32
    return %c0_i32, %c0_i32_0 : i32, i32
  }
  func.func @transform_12(%arg0: i32) -> (i32, i32) {
    %c0_i32 = arith.constant 0 : i32
    %c0_i32_0 = arith.constant 0 : i32
    %c0_i32_1 = arith.constant 0 : i32
    return %c0_i32, %c0_i32_0 : i32, i32
  }
  func.func @transform_13(%arg0: i32) -> (i32, i32) {
    %c0_i32 = arith.constant 0 : i32
    %c0_i32_0 = arith.constant 0 : i32
    %c0_i32_1 = arith.constant 0 : i32
    return %c0_i32, %c0_i32_0 : i32, i32
  }
  func.func @transform_14(%arg0: i32) -> (i32, i32) {
    %c0_i32 = arith.constant 0 : i32
    %c0_i32_0 = arith.constant 0 : i32
    %c0_i32_1 = arith.constant 0 : i32
    return %c0_i32, %c0_i32_0 : i32, i32
  }
  func.func @transform_15(%arg0: i32) -> (i32, i32) {
    %c0_i32 = arith.constant 0 : i32
    %c0_i32_0 = arith.constant 0 : i32
    %c0_i32_1 = arith.constant 0 : i32
    return %c0_i32, %c0_i32_0 : i32, i32
  }
  func.func @transform_16(%arg0: i32) -> (i32, i32) {
    %c0_i32 = arith.constant 0 : i32
    %c0_i32_0 = arith.constant 0 : i32
    return %arg0, %c0_i32 : i32, i32
  }
}

</mosaic_0001>

<bundles_post_ra>
// kernel: gcn_none_forward.1
= control target key start
LH: loop header
LB: loop body
LE: loop exit
PB: predicated region body
PF: predicated region fallthrough
CT: control target
= control target key end

     0   :  { %vm452_vm0 = vcmask 1046528   ;;  %vm355_vm1 = vcmask 113664   ;;  %vm733_vm2 = vcmask 523264   ;;  %vm1498_vm3 = vcmask 261120   ;;  %s13205_s2 = inlined_call_operand.vmem [shape: bf16[14,32], index: 2, kind: input, shape index: {}]   ;;  %s13206_s1 = inlined_call_operand.vmem [shape: bf16[8,64,14], index: 1, kind: input, shape index: {}]   ;;  %s13207_s3 = inlined_call_operand.vmem [shape: f32[1,32], index: 3, kind: input, shape index: {}]   ;;  %s13208_s0 = inlined_call_operand.vmem [shape: bf16[8,64,64], index: 0, kind: input, shape index: {}]   ;;  %s13209_s4 = inlined_call_operand.vmem [shape: bf16[32,32], index: 4, kind: input, shape index: {}]   ;;  %s13210_s5 = inlined_call_operand.vmem [shape: bf16[32,32], index: 5, kind: input, shape index: {}]   ;;  %s13211_s7 = inlined_call_operand.vmem [shape: f32[1,128], index: 7, kind: input, shape index: {}]   ;;  %s13212_s6 = inlined_call_operand.vmem [shape: bf16[32,128], index: 6, kind: input, shape index: {}]   ;;  %s13213_s8 = inlined_call_operand.vmem [shape: bf16[128,256], index: 8, kind: input, shape index: {}]   ;;  %s13214_s10 = inlined_call_operand.vmem [shape: bf16[256,128], index: 10, kind: input, shape index: {}]   ;;  %s13215_s11 = inlined_call_operand.vmem [shape: f32[1,128], index: 11, kind: input, shape index: {}]   ;;  %s13216_s12 = inlined_call_operand.vmem [shape: bf16[128,10], index: 12, kind: input, shape index: {}]   ;;  %s13217_s9 = inlined_call_operand.vmem [shape: f32[1,256], index: 9, kind: input, shape index: {}]   ;;  %s13218_s13 = inlined_call_operand.vmem [shape: f32[1,10], index: 13, kind: input, shape index: {}]   ;;  %s13219_s15 = inlined_call_operand.<no memory space> [shape: f32[1,1], index: 15, kind: input, shape index: {}]   ;;  %s13220_s14 = inlined_call_operand.vmem [shape: bf16[1,10], index: 14, kind: input, shape index: {}]   ;;  %s13221_s16 = inlined_call_operand.vmem [shape: f32[1,8], index: 16, kind: output, shape index: {}]  }
   0x1   :  { %13230 = sst [smem:[#allocation10_spill]] %s13205_s2  ;;  %v7497_v4 = vld [vmem:[%s13206_s1] sm:$0xff]  ;;  %v7498_v5 = vld [vmem:[%s13206_s1 + $0x8] sm:$0xff]  ;;  %v7499_v6 = vld [vmem:[%s13206_s1 + $0x10] sm:$0xff] }
   0x2   :  { %s13231_s23 = sld [smem:[#allocation10_spill]]  ;;  %v7500_v7 = vld [vmem:[%s13206_s1 + $0x18] sm:$0xff]  ;;  %v7501_v8 = vld [vmem:[%s13206_s1 + $0x20] sm:$0xff]  ;;  %v7502_v9 = vld [vmem:[%s13206_s1 + $0x28] sm:$0xff] }
   0x3   :  { %v7503_v10 = vld [vmem:[%s13206_s1 + $0x30] sm:$0xff]  ;;  %v7504_v11 = vld [vmem:[%s13206_s1 + $0x38] sm:$0xff]  ;;  %v7505_v12 = vld [vmem:[%s13206_s1 + $0x40] sm:$0xff] }
   0x4   :  { %v7506_v15 = vld [vmem:[%s13206_s1 + $0x48] sm:$0xff]  ;;  %v7507_v18 = vld [vmem:[%s13206_s1 + $0x50] sm:$0xff]  ;;  %v7508_v21 = vld [vmem:[%s13206_s1 + $0x58] sm:$0xff] }
   0x5   :  { %v8177_v23 = vld [vmem:[%s13207_s3] ss:$0 sm:$0xff]  ;;  %v7510_v57 = vld [vmem:[%s13206_s1 + $0x68] sm:$0xff]  ;;  %v7511_v61 = vld [vmem:[%s13206_s1 + $0x70] sm:$0xff] }
   0x6   :  { %v7509_v41 = vld [vmem:[%s13206_s1 + $0x60] sm:$0xff]  ;;  %v7466_v60 = vld [vmem:[%s13208_s0 + $0x8] sm:$0xff] }
   0x7   :  { %v7465_v56 = vld [vmem:[%s13208_s0] sm:$0xff] }
   0x8   :  { %v6957_v0 = vld [vmem:[%s13231_s23] sm:$0xf]  ;;  %v7529_v1 = vld [vmem:[%s13231_s23] sm:$0x70] }
   0x9   :  { %v6958_v2 = vor.u32 %v7529_v1, %v6957_v0  ;;  %v7467_v0 = vld [vmem:[%s13208_s0 + $0x10] sm:$0xff]  ;;  %v7512_v1 = vld [vmem:[%s13206_s1 + $0x78] sm:$0xff] }
   0xb   :  { %v454_v3 = vsel %vm452_vm0, %v6958_v2, 0 }
   0xc   :  { %463 = vmatpush.bf16.msra.mxu0 %v454_v3 }
   0xf   :  { %6959 = vmatmul.msk.bf16.vlgmr.msra.gmra.mxu0 %vm355_vm1, %v7497_v4 }
  0x1f   :  { %6960 = vmatmul.msk.bf16.gmra.mxu0 %vm355_vm1, %v7498_v5 }
  0x2f   :  { %6961 = vmatmul.msk.bf16.gmra.mxu0 %vm355_vm1, %v7499_v6 }
  0x3f   :  { %6962 = vmatmul.msk.bf16.gmra.mxu0 %vm355_vm1, %v7500_v7 }
  0x4f   :  { %6963 = vmatmul.msk.bf16.gmra.mxu0 %vm355_vm1, %v7501_v8 }
  0x5f   :  { %6964 = vmatmul.msk.bf16.gmra.mxu0 %vm355_vm1, %v7502_v9 }
  0x6f   :  { %6965 = vmatmul.msk.bf16.gmra.mxu0 %vm355_vm1, %v7503_v10 }
  0x7f   :  { %6966 = vmatmul.msk.bf16.gmra.mxu0 %vm355_vm1, %v7504_v11 }
  0x8c   :  { %v465_v13 = vpop.f32.mrf.mxu0 }
  0x8d   :  { %v466_v43 = vadd.f32 %v8177_v23, %v465_v13 }
  0x8f   :  { %6967 = vmatmul.msk.bf16.gmra.mxu0 %vm355_vm1, %v7505_v12  ;;  %v625_v49 = vpack.c.bf16 %v466_v43, %v466_v43  ;;  %v7468_v12 = vld [vmem:[%s13208_s0 + $0x18] sm:$0xff] }
  0x91   :  { %v717_v54 = vunpack.c.l.b16 %v625_v49 }
  0x94   :  { %v467_v14 = vpop.f32.mrf.mxu0 }
  0x95   :  { %v468_v37 = vadd.f32 %v8177_v23, %v467_v14 }
  0x97   :  { %v626_v46 = vpack.c.bf16 %v468_v37, %v468_v37  ;;  %v7469_v37 = vld [vmem:[%s13208_s0 + $0x20] sm:$0xff] }
  0x99   :  { %v718_v51 = vunpack.c.l.b16 %v626_v46  ;;  %v7516_v46 = vld [vmem:[%s13206_s1 + $0x98] sm:$0xff] }
  0x9b   :  { %v725_v55 = vpack.c.b16 %v718_v51, %v717_v54 }
  0x9c   :  { %v470_v16 = vpop.f32.mrf.mxu0 }
  0x9d   :  { %v471_v33 = vadd.f32 %v8177_v23, %v470_v16 }
  0x9f   :  { %6968 = vmatmul.msk.bf16.gmra.mxu0 %vm355_vm1, %v7506_v15  ;;  %v627_v44 = vpack.c.bf16 %v471_v33, %v471_v33 }
  0xa1   :  { %v719_v50 = vunpack.c.l.b16 %v627_v44 }
  0xa4   :  { %v472_v17 = vpop.f32.mrf.mxu0 }
  0xa5   :  { %v473_v30 = vadd.f32 %v8177_v23, %v472_v17 }
  0xa7   :  { %v628_v38 = vpack.c.bf16 %v473_v30, %v473_v30 }
  0xa9   :  { %v720_v47 = vunpack.c.l.b16 %v628_v38  ;;  %v7514_v38 = vld [vmem:[%s13206_s1 + $0x88] sm:$0xff] }
  0xab   :  { %v726_v52 = vpack.c.b16 %v720_v47, %v719_v50 }
  0xac   :  { %v475_v19 = vpop.f32.mrf.mxu0 }
  0xad   :  { %v476_v27 = vadd.f32 %v8177_v23, %v475_v19 }
  0xaf   :  { %6969 = vmatmul.msk.bf16.gmra.mxu0 %vm355_vm1, %v7507_v18  ;;  %v629_v34 = vpack.c.bf16 %v476_v27, %v476_v27 }
  0xb1   :  { %v721_v45 = vunpack.c.l.b16 %v629_v34 }
  0xb4   :  { %v477_v20 = vpop.f32.mrf.mxu0 }
  0xb5   :  { %v478_v25 = vadd.f32 %v8177_v23, %v477_v20 }
  0xb7   :  { %v630_v31 = vpack.c.bf16 %v478_v25, %v478_v25 }
  0xb9   :  { %v722_v39 = vunpack.c.l.b16 %v630_v31 }
  0xbb   :  { %v727_v48 = vpack.c.b16 %v722_v39, %v721_v45  ;;  %v7471_v45 = vld [vmem:[%s13208_s0 + $0x30] sm:$0xff] }
  0xbc   :  { %v480_v22 = vpop.f32.mrf.mxu0 }
  0xbd   :  { %v481_v24 = vadd.f32 %v8177_v23, %v480_v22 }
  0xbf   :  { %6970 = vmatmul.msk.bf16.gmra.mxu0 %vm355_vm1, %v7508_v21  ;;  %v631_v28 = vpack.c.bf16 %v481_v24, %v481_v24  ;;  %v7513_v21 = vld [vmem:[%s13206_s1 + $0x80] sm:$0xff] }
  0xc1   :  { %v723_v35 = vunpack.c.l.b16 %v631_v28 }
  0xc4   :  { %v482_v26 = vpop.f32.mrf.mxu0 }
  0xc5   :  { %v483_v29 = vadd.f32 %v8177_v23, %v482_v26 }
  0xc7   :  { %v632_v32 = vpack.c.bf16 %v483_v29, %v483_v29 }
  0xc9   :  { %v724_v36 = vunpack.c.l.b16 %v632_v32 }
  0xcb   :  { %v728_v40 = vpack.c.b16 %v724_v36, %v723_v35 }
  0xcc   :  { %v485_v42 = vpop.f32.mrf.mxu0 }
  0xcd   :  { %750 = vmatpush.bf16.msra.mxu2 %v728_v40  ;;  %v486_v24 = vadd.f32 %v8177_v23, %v485_v42  ;;  %v7515_v42 = vld [vmem:[%s13206_s1 + $0x90] sm:$0xff] }
  0xcf   :  { %6971 = vmatmul.msk.bf16.gmra.mxu0 %vm355_vm1, %v7509_v41  ;;  %v633_v30 = vpack.c.bf16 %v486_v24, %v486_v24  ;;  %v7470_v41 = vld [vmem:[%s13208_s0 + $0x28] sm:$0xff] }
  0xd1   :  { %751 = vmatpush.bf16.msra.mxu2 %v727_v48  ;;  %v803_v35 = vunpack.c.l.b16 %v633_v30  ;;  %v7519_v30 = vld [vmem:[%s13206_s1 + $0xb0] sm:$0xff] }
  0xd4   :  { %v487_v53 = vpop.f32.mrf.mxu0 }
  0xd5   :  { %752 = vmatpush.bf16.msra.mxu2 %v726_v52  ;;  %v488_v17 = vadd.f32 %v8177_v23, %v487_v53 }
  0xd7   :  { %v634_v27 = vpack.c.bf16 %v488_v17, %v488_v17  ;;  %v7473_v17 = vld [vmem:[%s13208_s0 + $0x40] sm:$0xff] }
  0xd9   :  { %753 = vmatpush.bf16.msra.mxu2 %v725_v55  ;;  %v804_v32 = vunpack.c.l.b16 %v634_v27 }
  0xdb   :  { %v811_v36 = vpack.c.b16 %v804_v32, %v803_v35 }
  0xdc   :  { %v490_v58 = vpop.f32.mrf.mxu0  ;;  %7007 = vmatmul.msk.bf16.vlgmr.msra.gmra.mxu2 %vm733_vm2, %v7465_v56 }
  0xdd   :  { %v491_v13 = vadd.f32 %v8177_v23, %v490_v58 }
  0xdf   :  { %6972 = vmatmul.msk.bf16.gmra.mxu0 %vm355_vm1, %v7510_v57  ;;  %v635_v25 = vpack.c.bf16 %v491_v13, %v491_v13  ;;  %v7472_v57 = vld [vmem:[%s13208_s0 + $0x38] sm:$0xff] }
  0xe1   :  { %v805_v31 = vunpack.c.l.b16 %v635_v25 }
  0xe4   :  { %v492_v59 = vpop.f32.mrf.mxu0 }
  0xe5   :  { %v493_v9 = vadd.f32 %v8177_v23, %v492_v59 }
  0xe7   :  { %v636_v18 = vpack.c.bf16 %v493_v9, %v493_v9 }
  0xe9   :  { %v806_v28 = vunpack.c.l.b16 %v636_v18  ;;  %v7518_v18 = vld [vmem:[%s13206_s1 + $0xa8] sm:$0xff] }
  0xeb   :  { %v812_v33 = vpack.c.b16 %v806_v28, %v805_v31  ;;  %v7474_v28 = vld [vmem:[%s13208_s0 + $0x48] sm:$0xff] }
  0xec   :  { %v495_v62 = vpop.f32.mrf.mxu0  ;;  %7008 = vmatmul.msk.bf16.gmra.mxu2 %vm733_vm2, %v7466_v60 }
  0xed   :  { %v496_v6 = vadd.f32 %v8177_v23, %v495_v62 }
  0xef   :  { %6973 = vmatmul.msk.bf16.gmra.mxu0 %vm355_vm1, %v7511_v61  ;;  %v637_v14 = vpack.c.bf16 %v496_v6, %v496_v6 }
  0xf1   :  { %v807_v26 = vunpack.c.l.b16 %v637_v14 }
  0xf4   :  { %v497_v63 = vpop.f32.mrf.mxu0 }
  0xf5   :  { %v498_v4 = vadd.f32 %v8177_v23, %v497_v63 }
  0xf7   :  { %v638_v10 = vpack.c.bf16 %v498_v4, %v498_v4 }
  0xf9   :  { %v808_v19 = vunpack.c.l.b16 %v638_v10 }
  0xfb   :  { %v813_v29 = vpack.c.b16 %v808_v19, %v807_v26 }
  0xfc   :  { %v500_v2 = vpop.f32.mrf.mxu0  ;;  %7009 = vmatmul.msk.bf16.gmra.mxu2 %vm733_vm2, %v7467_v0 }
  0xfd   :  { %v501_v3 = vadd.f32 %v8177_v23, %v500_v2  ;;  %v7517_v2 = vld [vmem:[%s13206_s1 + $0xa0] sm:$0xff] }
  0xff   :  { %6974 = vmatmul.msk.bf16.gmra.mxu0 %vm355_vm1, %v7512_v1  ;;  %v639_v7 = vpack.c.bf16 %v501_v3, %v501_v3 }
 0x101   :  { %v809_v15 = vunpack.c.l.b16 %v639_v7 }
 0x104   :  { %v502_v5 = vpop.f32.mrf.mxu0 }
 0x105   :  { %v503_v8 = vadd.f32 %v8177_v23, %v502_v5 }
 0x107   :  { %v640_v11 = vpack.c.bf16 %v503_v8, %v503_v8 }
 0x109   :  { %v810_v16 = vunpack.c.l.b16 %v640_v11 }
 0x10b   :  { %v814_v20 = vpack.c.b16 %v810_v16, %v809_v15 }
 0x10c   :  { %v505_v22 = vpop.f32.mrf.mxu0  ;;  %7010 = vmatmul.msk.bf16.gmra.mxu2 %vm733_vm2, %v7468_v12 }
 0x10d   :  { %835 = vmatpush.bf16.msrb.mxu2 %v814_v20  ;;  %v506_v4 = vadd.f32 %v8177_v23, %v505_v22 }
 0x10f   :  { %6975 = vmatmul.msk.bf16.gmra.mxu0 %vm355_vm1, %v7513_v21  ;;  %v641_v10 = vpack.c.bf16 %v506_v4, %v506_v4 }
 0x111   :  { %836 = vmatpush.bf16.msrb.mxu2 %v813_v29  ;;  %v888_v15 = vunpack.c.l.b16 %v641_v10 }
 0x114   :  { %v507_v34 = vpop.f32.mrf.mxu0 }
 0x115   :  { %837 = vmatpush.bf16.msrb.mxu2 %v812_v33  ;;  %v508_v62 = vadd.f32 %v8177_v23, %v507_v34 }
 0x117   :  { %v642_v7 = vpack.c.bf16 %v508_v62, %v508_v62 }
 0x119   :  { %838 = vmatpush.bf16.msrb.mxu2 %v811_v36  ;;  %v889_v12 = vunpack.c.l.b16 %v642_v7  ;;  %v7521_v7 = vld [vmem:[%s13206_s1 + $0xc0] sm:$0xff] }
 0x11b   :  { %v896_v16 = vpack.c.b16 %v889_v12, %v888_v15 }
 0x11c   :  { %v510_v39 = vpop.f32.mrf.mxu0  ;;  %7027 = vmatmul.msk.bf16.vlgmr.msrb.gmra.mxu2 %vm733_vm2, %v7469_v37 }
 0x11d   :  { %v511_v58 = vadd.f32 %v8177_v23, %v510_v39 }
 0x11f   :  { %6976 = vmatmul.msk.bf16.gmra.mxu0 %vm355_vm1, %v7514_v38  ;;  %v643_v5 = vpack.c.bf16 %v511_v58, %v511_v58 }
 0x121   :  { %v890_v11 = vunpack.c.l.b16 %v643_v5 }
 0x124   :  { %v512_v40 = vpop.f32.mrf.mxu0 }
 0x125   :  { %v513_v54 = vadd.f32 %v8177_v23, %v512_v40  ;;  %v7475_v40 = vld [vmem:[%s13208_s0 + $0x50] sm:$0xff] }
 0x127   :  { %v644_v63 = vpack.c.bf16 %v513_v54, %v513_v54 }
 0x129   :  { %v891_v8 = vunpack.c.l.b16 %v644_v63 }
 0x12b   :  { %v897_v13 = vpack.c.b16 %v891_v8, %v890_v11 }
 0x12c   :  { %v515_v43 = vpop.f32.mrf.mxu0  ;;  %7028 = vmatmul.msk.bf16.gmra.mxu2 %vm733_vm2, %v7470_v41 }
 0x12d   :  { %v516_v51 = vadd.f32 %v8177_v23, %v515_v43 }
 0x12f   :  { %6977 = vmatmul.msk.bf16.gmra.mxu0 %vm355_vm1, %v7515_v42  ;;  %v645_v59 = vpack.c.bf16 %v516_v51, %v516_v51  ;;  %v7520_v42 = vld [vmem:[%s13206_s1 + $0xb8] sm:$0xff] }
 0x131   :  { %v892_v6 = vunpack.c.l.b16 %v645_v59 }
 0x134   :  { %v517_v44 = vpop.f32.mrf.mxu0 }
 0x135   :  { %v518_v49 = vadd.f32 %v8177_v23, %v517_v44 }
 0x137   :  { %v646_v55 = vpack.c.bf16 %v518_v49, %v518_v49 }
 0x139   :  { %v893_v0 = vunpack.c.l.b16 %v646_v55 }
 0x13b   :  { %v898_v9 = vpack.c.b16 %v893_v0, %v892_v6 }
 0x13c   :  { %v520_v47 = vpop.f32.mrf.mxu0  ;;  %7029 = vmatmul.msk.bf16.gmra.mxu2 %vm733_vm2, %v7471_v45 }
 0x13d   :  { %v521_v48 = vadd.f32 %v8177_v23, %v520_v47 }
 0x13f   :  { %6978 = vmatmul.msk.bf16.gmra.mxu0 %vm355_vm1, %v7516_v46  ;;  %v647_v52 = vpack.c.bf16 %v521_v48, %v521_v48 }
 0x141   :  { %v894_v60 = vunpack.c.l.b16 %v647_v52 }
 0x144   :  { %v522_v50 = vpop.f32.mrf.mxu0 }
 0x145   :  { %v523_v53 = vadd.f32 %v8177_v23, %v522_v50 }
 0x147   :  { %v648_v56 = vpack.c.bf16 %v523_v53, %v523_v53 }
 0x149   :  { %v895_v61 = vunpack.c.l.b16 %v648_v56 }
 0x14b   :  { %v899_v1 = vpack.c.b16 %v895_v61, %v894_v60  ;;  %v7476_v60 = vld [vmem:[%s13208_s0 + $0x58] sm:$0xff] }
 0x14c   :  { %v8269_v3 = vpop.f32.mrf.mxu0  ;;  %7030 = vmatmul.msk.bf16.gmra.mxu2 %vm733_vm2, %v7472_v57 }
 0x14d   :  { %920 = vmatpush.bf16.msra.mxu3 %v899_v1  ;;  %v526_v10 = vadd.f32 %v8177_v23, %v8269_v3 }
 0x14f   :  { %6979 = vmatmul.msk.bf16.gmra.mxu0 %vm355_vm1, %v7517_v2 }
 0x151   :  { %921 = vmatpush.bf16.msra.mxu3 %v898_v9 }
 0x154   :  { %v8274_v14 = vpop.f32.mrf.mxu0 }
 0x155   :  { %922 = vmatpush.bf16.msra.mxu3 %v897_v13  ;;  %v528_v2 = vadd.f32 %v8177_v23, %v8274_v14 }
 0x157   :  { %v650_v13 = vpack.c.bf16 %v528_v2, %v528_v2 }
 0x159   :  { %923 = vmatpush.bf16.msra.mxu3 %v896_v16 }
 0x15c   :  { %v530_v19 = vpop.f32.mrf.mxu0  ;;  %7047 = vmatmul.msk.bf16.vlgmr.msra.gmra.mxu3 %vm733_vm2, %v7473_v17 }
 0x15d   :  { %v531_v61 = vadd.f32 %v8177_v23, %v530_v19 }
 0x15f   :  { %6980 = vmatmul.msk.bf16.gmra.mxu0 %vm355_vm1, %v7518_v18  ;;  %v755_v20 = vpop.f32.mrf.mxu2  ;;  %v651_v11 = vpack.c.bf16 %v531_v61, %v531_v61  ;;  %v649_v18 = vpack.c.bf16 %v526_v10, %v526_v10  ;;  %v7524_v61 = vld [vmem:[%s13206_s1 + $0xd8] sm:$0xff] }
 0x160   :  { %v8284_v21 = vmax.f32 %v755_v20, 0.0 }
 0x161   :  { %v975_v19 = vunpack.c.l.b16 %v651_v11 }
 0x162   :  { %v1434_v22 = vmul.f32 %v8284_v21, %v8284_v21 }
 0x164   :  { %v532_v24 = vpop.f32.mrf.mxu0  ;;  %v1499_v25 = vsel %vm1498_vm3, %v1434_v22, 0.0  ;;  %v974_v22 = vunpack.c.l.b16 %v650_v13 }
 0x165   :  { %1500 = vadd.xlane.f32.xlu0 %v1499_v25  ;;  %v533_v55 = vadd.f32 %v8177_v23, %v532_v24 }
 0x167   :  { %v757_v26 = vpop.f32.mrf.mxu2  ;;  %v652_v4 = vpack.c.bf16 %v533_v55, %v533_v55 }
 0x168   :  { %v8289_v27 = vmax.f32 %v757_v26, 0.0  ;;  %v973_v26 = vunpack.c.l.b16 %v649_v18  ;;  %v7480_v18 = vld [vmem:[%s13208_s0 + $0x78] sm:$0xff] }
 0x169   :  { %v976_v14 = vunpack.c.l.b16 %v652_v4 }
 0x16a   :  { %v1435_v29 = vmul.f32 %v8289_v27, %v8289_v27 }
 0x16b   :  { %v982_v3 = vpack.c.b16 %v976_v14, %v975_v19 }
 0x16c   :  { %v535_v31 = vpop.f32.mrf.mxu0  ;;  %7048 = vmatmul.msk.bf16.gmra.mxu3 %vm733_vm2, %v7474_v28  ;;  %v1502_v32 = vsel %vm1498_vm3, %v1435_v29, 0.0  ;;  %v981_v29 = vpack.c.b16 %v974_v22, %v973_v26 }
 0x16d   :  { %1503 = vadd.xlane.f32.xlu0 %v1502_v32  ;;  %v536_v52 = vadd.f32 %v8177_v23, %v535_v31  ;;  %v7477_v31 = vld [vmem:[%s13208_s0 + $0x60] sm:$0xff] }
 0x16f   :  { %6981 = vmatmul.msk.bf16.gmra.mxu0 %vm355_vm1, %v7519_v30  ;;  %v760_v33 = vpop.f32.mrf.mxu2  ;;  %v653_v62 = vpack.c.bf16 %v536_v52, %v536_v52 }
 0x170   :  { %v8302_v34 = vmax.f32 %v760_v33, 0.0  ;;  %v7522_v33 = vld [vmem:[%s13206_s1 + $0xc8] sm:$0xff] }
 0x171   :  { %v977_v12 = vunpack.c.l.b16 %v653_v62 }
 0x172   :  { %v1436_v35 = vmul.f32 %v8302_v34, %v8302_v34 }
 0x174   :  { %v537_v36 = vpop.f32.mrf.mxu0  ;;  %v1505_v37 = vsel %vm1498_vm3, %v1436_v35, 0.0 }
 0x175   :  { %1506 = vadd.xlane.f32.xlu1 %v1505_v37  ;;  %v538_v49 = vadd.f32 %v8177_v23, %v537_v36 }
 0x177   :  { %v762_v38 = vpop.f32.mrf.mxu2  ;;  %v654_v56 = vpack.c.bf16 %v538_v49, %v538_v49 }
 0x178   :  { %v8307_v39 = vmax.f32 %v762_v38, 0.0 }
 0x179   :  { %v978_v5 = vunpack.c.l.b16 %v654_v56 }
 0x17a   :  { %v1437_v41 = vmul.f32 %v8307_v39, %v8307_v39 }
 0x17b   :  { %v983_v16 = vpack.c.b16 %v978_v5, %v977_v12 }
 0x17c   :  { %v540_v43 = vpop.f32.mrf.mxu0  ;;  %7049 = vmatmul.msk.bf16.gmra.mxu3 %vm733_vm2, %v7475_v40  ;;  %v1508_v44 = vsel %vm1498_vm3, %v1437_v41, 0.0 }
 0x17d   :  { %1509 = vadd.xlane.f32.xlu1 %v1508_v44  ;;  %v541_v47 = vadd.f32 %v8177_v23, %v540_v43 }
 0x17f   :  { %6982 = vmatmul.msk.bf16.gmra.mxu0 %vm355_vm1, %v7520_v42  ;;  %v765_v45 = vpop.f32.mrf.mxu2  ;;  %v655_v53 = vpack.c.bf16 %v541_v47, %v541_v47 }
 0x180   :  { %v8320_v46 = vmax.f32 %v765_v45, 0.0  ;;  %v7478_v45 = vld [vmem:[%s13208_s0 + $0x68] sm:$0xff] }
 0x181   :  { %v979_v63 = vunpack.c.l.b16 %v655_v53 }
 0x182   :  { %v1438_v48 = vmul.f32 %v8320_v46, %v8320_v46 }
 0x184   :  { %v542_v50 = vpop.f32.mrf.mxu0  ;;  %v1511_v51 = vsel %vm1498_vm3, %v1438_v48, 0.0  ;;  %v7523_v48 = vld [vmem:[%s13206_s1 + $0xd0] sm:$0xff] }
 0x185   :  { %v543_v54 = vadd.f32 %v8177_v23, %v542_v50  ;;  %1512 = vadd.xlane.f32.xlu2 %v1511_v51 }
 0x187   :  { %v656_v57 = vpack.c.bf16 %v543_v54, %v543_v54  ;;  %v767_v58 = vpop.f32.mrf.mxu2 }
 0x188   :  { %v8330_v59 = vmax.f32 %v767_v58, 0.0  ;;  %v7479_v58 = vld [vmem:[%s13208_s0 + $0x70] sm:$0xff] }
 0x189   :  { %v980_v0 = vunpack.c.l.b16 %v656_v57 }
 0x18a   :  { %v1439_v1 = vmul.f32 %v8330_v59, %v8330_v59 }
 0x18b   :  { %v984_v6 = vpack.c.b16 %v980_v0, %v979_v63 }
 0x18c   :  { %v8343_v8 = vpop.f32.mrf.mxu0  ;;  %7050 = vmatmul.msk.bf16.gmra.mxu3 %vm733_vm2, %v7476_v60  ;;  %v1514_v9 = vsel %vm1498_vm3, %v1439_v1, 0.0 }
 0x18d   :  { %1005 = vmatpush.bf16.msrb.mxu3 %v984_v6  ;;  %1515 = vadd.xlane.f32.xlu2 %v1514_v9 }
 0x18f   :  { %6983 = vmatmul.msk.bf16.gmra.mxu0 %vm355_vm1, %v7521_v7  ;;  %v770_v15 = vpop.f32.mrf.mxu2 }
 0x190   :  { %v8350_v17 = vmax.f32 %v770_v15, 0.0 }
 0x191   :  { %1006 = vmatpush.bf16.msrb.mxu3 %v983_v16 }
 0x192   :  { %v1440_v20 = vmul.f32 %v8350_v17, %v8350_v17 }
 0x194   :  { %v8354_v24 = vpop.f32.mrf.mxu0  ;;  %v1517_v25 = vsel %vm1498_vm3, %v1440_v20, 0.0 }
 0x195   :  { %1007 = vmatpush.bf16.msrb.mxu3 %v982_v3  ;;  %1518 = vadd.xlane.f32.xlu0 %v1517_v25  ;;  %v548_v26 = vadd.f32 %v8177_v23, %v8354_v24 }
 0x197   :  { %v772_v28 = vpop.f32.mrf.mxu2 }
 0x198   :  { %v8357_v30 = vmax.f32 %v772_v28, 0.0 }
 0x199   :  { %1008 = vmatpush.bf16.msrb.mxu3 %v981_v29 }
 0x19a   :  { %v1441_v32 = vmul.f32 %v8357_v30, %v8357_v30 }
 0x19c   :  { %v550_v35 = vpop.f32.mrf.mxu0  ;;  %7067 = vmatmul.msk.bf16.vlgmr.msrb.gmra.mxu3 %vm733_vm2, %v7477_v31  ;;  %v1520_v36 = vsel %vm1498_vm3, %v1441_v32, 0.0 }
 0x19d   :  { %1521 = vadd.xlane.f32.xlu1 %v1520_v36  ;;  %v551_v19 = vadd.f32 %v8177_v23, %v550_v35  ;;  %v546_v35 = vadd.f32 %v8177_v23, %v8343_v8 }
 0x19f   :  { %6984 = vmatmul.msk.bf16.gmra.mxu0 %vm355_vm1, %v7522_v33  ;;  %v840_v37 = vpop.f32.mrf.mxu2  ;;  %v659_v36 = vpack.c.bf16 %v551_v19, %v551_v19 }
 0x1a0   :  { %v8370_v38 = vmax.f32 %v840_v37, 0.0 }
 0x1a2   :  { %v1442_v40 = vmul.f32 %v8370_v38, %v8370_v38 }
 0x1a4   :  { %v552_v41 = vpop.f32.mrf.mxu0  ;;  %v1523_v42 = vsel %vm1498_vm3, %v1442_v40, 0.0  ;;  %v658_v40 = vpack.c.bf16 %v548_v26, %v548_v26  ;;  %v7525_v26 = vld [vmem:[%s13206_s1 + $0xe0] sm:$0xff] }
 0x1a5   :  { %1524 = vadd.xlane.f32.xlu2 %v1523_v42  ;;  %v553_v12 = vadd.f32 %v8177_v23, %v552_v41 }
 0x1a7   :  { %v842_v43 = vpop.f32.mrf.mxu2  ;;  %v660_v28 = vpack.c.bf16 %v553_v12, %v553_v12 }
 0x1a8   :  { %v8375_v44 = vmax.f32 %v842_v43, 0.0 }
 0x1a9   :  { %v1061_v41 = vunpack.c.l.b16 %v660_v28 }
 0x1aa   :  { %v1443_v47 = vmul.f32 %v8375_v44, %v8375_v44 }
 0x1ac   :  { %v555_v49 = vpop.f32.mrf.mxu0  ;;  %7068 = vmatmul.msk.bf16.gmra.mxu3 %vm733_vm2, %v7478_v45  ;;  %v1526_v50 = vsel %vm1498_vm3, %v1443_v47, 0.0  ;;  %v657_v45 = vpack.c.bf16 %v546_v35, %v546_v35  ;;  %v1060_v47 = vunpack.c.l.b16 %v659_v36 }
 0x1ad   :  { %1527 = vadd.xlane.f32.xlu0 %v1526_v50  ;;  %v556_v9 = vadd.f32 %v8177_v23, %v555_v49  ;;  %v1059_v49 = vunpack.c.l.b16 %v658_v40 }
 0x1ae   :  { %v1067_v50 = vpack.c.b16 %v1061_v41, %v1060_v47 }
 0x1af   :  { %6985 = vmatmul.msk.bf16.gmra.mxu0 %vm355_vm1, %v7523_v48  ;;  %v845_v51 = vpop.f32.mrf.mxu2  ;;  %v661_v20 = vpack.c.bf16 %v556_v9, %v556_v9  ;;  %v7482_v9 = vld [vmem:[%s13208_s0 + $0x88] sm:$0xff] }
 0x1b0   :  { %v8388_v52 = vmax.f32 %v845_v51, 0.0 }
 0x1b1   :  { %v1062_v37 = vunpack.c.l.b16 %v661_v20 }
 0x1b2   :  { %v1444_v53 = vmul.f32 %v8388_v52, %v8388_v52 }
 0x1b4   :  { %v557_v54 = vpop.f32.mrf.mxu0  ;;  %v1529_v55 = vsel %vm1498_vm3, %v1444_v53, 0.0  ;;  %v1058_v53 = vunpack.c.l.b16 %v657_v45 }
 0x1b5   :  { %1530 = vadd.xlane.f32.xlu1 %v1529_v55  ;;  %v558_v5 = vadd.f32 %v8177_v23, %v557_v54 }
 0x1b6   :  { %v1066_v55 = vpack.c.b16 %v1059_v49, %v1058_v53  ;;  %v7484_v53 = vld [vmem:[%s13208_s0 + $0x98] sm:$0xff] }
 0x1b7   :  { %v847_v56 = vpop.f32.mrf.mxu2  ;;  %v662_v13 = vpack.c.bf16 %v558_v5, %v558_v5 }
 0x1b8   :  { %v8393_v57 = vmax.f32 %v847_v56, 0.0 }
 0x1b9   :  { %v1063_v29 = vunpack.c.l.b16 %v662_v13 }
 0x1ba   :  { %v1445_v60 = vmul.f32 %v8393_v57, %v8393_v57 }
 0x1bb   :  { %v1068_v24 = vpack.c.b16 %v1063_v29, %v1062_v37 }
 0x1bc   :  { %v560_v62 = vpop.f32.mrf.mxu0  ;;  %7069 = vmatmul.msk.bf16.gmra.mxu3 %vm733_vm2, %v7479_v58  ;;  %v1532_v63 = vsel %vm1498_vm3, %v1445_v60, 0.0  ;;  %v7481_v58 = vld [vmem:[%s13208_s0 + $0x80] sm:$0xff] }
 0x1bd   :  { %1533 = vadd.xlane.f32.xlu2 %v1532_v63  ;;  %v561_v2 = vadd.f32 %v8177_v23, %v560_v62 }
 0x1bf   :  { %6986 = vmatmul.msk.bf16.gmra.mxu0 %vm355_vm1, %v7524_v61  ;;  %v850_v0 = vpop.f32.mrf.mxu2  ;;  %v663_v10 = vpack.c.bf16 %v561_v2, %v561_v2 }
 0x1c0   :  { %v8406_v1 = vmax.f32 %v850_v0, 0.0 }
 0x1c1   :  { %v1064_v22 = vunpack.c.l.b16 %v663_v10 }
 0x1c2   :  { %v1446_v4 = vmul.f32 %v8406_v1, %v8406_v1 }
 0x1c4   :  { %v562_v6 = vpop.f32.mrf.mxu0  ;;  %v1535_v7 = vsel %vm1498_vm3, %v1446_v4, 0.0 }
 0x1c5   :  { %v563_v11 = vadd.f32 %v8177_v23, %v562_v6  ;;  %1536 = vadd.xlane.f32.xlu0 %v1535_v7 }
 0x1c7   :  { %v664_v14 = vpack.c.bf16 %v563_v11, %v563_v11  ;;  %v852_v15 = vpop.f32.mrf.mxu2 }
 0x1c8   :  { %v8416_v16 = vmax.f32 %v852_v15, 0.0 }
 0x1c9   :  { %v1065_v3 = vunpack.c.l.b16 %v664_v14 }
 0x1ca   :  { %v1447_v25 = vmul.f32 %v8416_v16, %v8416_v16 }
 0x1cb   :  { %v1069_v31 = vpack.c.b16 %v1065_v3, %v1064_v22  ;;  %v7483_v3 = vld [vmem:[%s13208_s0 + $0x90] sm:$0xff] }
 0x1cc   :  { %v8426_v32 = vpop.f32.mrf.mxu0  ;;  %7070 = vmatmul.msk.bf16.gmra.mxu3 %vm733_vm2, %v7480_v18  ;;  %v1538_v33 = vsel %vm1498_vm3, %v1447_v25, 0.0 }
 0x1cd   :  { %1090 = vmatpush.bf16.msra.mxu2 %v1069_v31  ;;  %1539 = vadd.xlane.f32.xlu1 %v1538_v33 }
 0x1cf   :  { %v855_v42 = vpop.f32.mrf.mxu2  ;;  %6987 = vmatmul.msk.bf16.gmra.mxu0 %vm355_vm1, %v7525_v26 }
 0x1d0   :  { %v8432_v43 = vmax.f32 %v855_v42, 0.0 }
 0x1d1   :  { %1091 = vmatpush.bf16.msra.mxu2 %v1068_v24 }
 0x1d2   :  { %v1448_v48 = vmul.f32 %v8432_v43, %v8432_v43 }
 0x1d4   :  { %v8436_v51 = vpop.f32.mrf.mxu0  ;;  %v1541_v8 = vsel %vm1498_vm3, %v1448_v48, 0.0 }
 0x1d5   :  { %1092 = vmatpush.bf16.msra.mxu2 %v1067_v50  ;;  %1542 = vadd.xlane.f32.xlu2 %v1541_v8 }
 0x1d7   :  { %v857_v54 = vpop.f32.mrf.mxu2 }
 0x1d8   :  { %v8439_v56 = vmax.f32 %v857_v54, 0.0 }
 0x1d9   :  { %1093 = vmatpush.bf16.msra.mxu2 %v1066_v55 }
 0x1da   :  { %v1449_v60 = vmul.f32 %v8439_v56, %v8439_v56 }
 0x1dc   :  { %v570_v61 = vpop.f32.mrf.mxu0  ;;  %7087 = vmatmul.msk.bf16.vlgmr.msra.gmra.mxu2 %vm733_vm2, %v7481_v58  ;;  %v1544_v62 = vsel %vm1498_vm3, %v1449_v60, 0.0 }
 0x1dd   :  { %1545 = vadd.xlane.f32.xlu0 %v1544_v62  ;;  %v571_v54 = vadd.f32 %v8177_v23, %v570_v61 }
 0x1df   :  { %v925_v63 = vpop.f32.mrf.mxu3 }
 0x1e0   :  { %v8448_v0 = vmax.f32 %v925_v63, 0.0  ;;  %v7526_v63 = vld [vmem:[%s13206_s1 + $0xe8] sm:$0xff] }
 0x1e1   :  { %6988 = vmatmul.msk.bf16.gmra.mxu0 %vm355_vm1, %v7526_v63  ;;  %v7528_v63 = vld [vmem:[%s13206_s1 + $0xf8] sm:$0xff] }
 0x1e2   :  { %v1450_v2 = vmul.f32 %v8448_v0, %v8448_v0 }
 0x1e4   :  { %v572_v4 = vpop.f32.mrf.mxu0  ;;  %v1547_v5 = vsel %vm1498_vm3, %v1450_v2, 0.0  ;;  %v568_v2 = vadd.f32 %v8177_v23, %v8436_v51 }
 0x1e5   :  { %1548 = vadd.xlane.f32.xlu1 %v1547_v5  ;;  %v573_v47 = vadd.f32 %v8177_v23, %v572_v4 }
 0x1e7   :  { %v927_v6 = vpop.f32.mrf.mxu3  ;;  %v668_v4 = vpack.c.bf16 %v573_v47, %v573_v47 }
 0x1e8   :  { %v8453_v7 = vmax.f32 %v927_v6, 0.0 }
 0x1e9   :  { %v1146_v51 = vunpack.c.l.b16 %v668_v4 }
 0x1ea   :  { %v1451_v10 = vmul.f32 %v8453_v7, %v8453_v7 }
 0x1ec   :  { %v575_v11 = vpop.f32.mrf.mxu0  ;;  %7088 = vmatmul.msk.bf16.gmra.mxu2 %vm733_vm2, %v7482_v9  ;;  %v1550_v12 = vsel %vm1498_vm3, %v1451_v10, 0.0  ;;  %v566_v10 = vadd.f32 %v8177_v23, %v8426_v32 }
 0x1ed   :  { %1551 = vadd.xlane.f32.xlu2 %v1550_v12  ;;  %v576_v42 = vadd.f32 %v8177_v23, %v575_v11  ;;  %v667_v11 = vpack.c.bf16 %v571_v54, %v571_v54  ;;  %v1501_v54 = vpop.xlane.xlu0 %1500 }
 0x1ef   :  { %v930_v13 = vpop.f32.mrf.mxu3  ;;  %v669_v55 = vpack.c.bf16 %v576_v42, %v576_v42  ;;  %v7527_v42 = vld [vmem:[%s13206_s1 + $0xf0] sm:$0xff] }
 0x1f0   :  { %v8462_v14 = vmax.f32 %v930_v13, 0.0  ;;  %v666_v13 = vpack.c.bf16 %v568_v2, %v568_v2 }
 0x1f1   :  { %v1147_v12 = vunpack.c.l.b16 %v669_v55  ;;  %6989 = vmatmul.msk.bf16.gmra.mxu0 %vm355_vm1, %v7527_v42 }
 0x1f2   :  { %v1452_v15 = vmul.f32 %v8462_v14, %v8462_v14  ;;  %v1144_v26 = vunpack.c.l.b16 %v666_v13  ;;  %v7531_v13 = vld [vmem:[%s13209_s4 + $0x8] sm:$0xff] }
 0x1f4   :  { %v577_v18 = vpop.f32.mrf.mxu0  ;;  %v1553_v19 = vsel %vm1498_vm3, %v1452_v15, 0.0 }
 0x1f5   :  { %1554 = vadd.xlane.f32.xlu0 %v1553_v19  ;;  %v578_v37 = vadd.f32 %v8177_v23, %v577_v18 }
 0x1f7   :  { %v932_v20 = vpop.f32.mrf.mxu3  ;;  %v670_v48 = vpack.c.bf16 %v578_v37, %v578_v37 }
 0x1f8   :  { %v8467_v22 = vmax.f32 %v932_v20, 0.0  ;;  %v665_v20 = vpack.c.bf16 %v566_v10, %v566_v10  ;;  %v8552_v10 = vmax.f32 %v1501_v54, 1e-24 }
 0x1f9   :  { %v1148_v5 = vunpack.c.l.b16 %v670_v48 }
 0x1fa   :  { %v1453_v25 = vmul.f32 %v8467_v22, %v8467_v22  ;;  %7586 = vrsqrt.f32 %v8552_v10  ;;  %vm1761_vm6 = vweird.f32 %v8552_v10 }
 0x1fb   :  { %v1153_v18 = vpack.c.b16 %v1148_v5, %v1147_v12  ;;  %v1504_v5 = vpop.xlane.xlu0 %1503 }
 0x1fc   :  { %v580_v28 = vpop.f32.mrf.mxu0  ;;  %7089 = vmatmul.msk.bf16.gmra.mxu2 %vm733_vm2, %v7483_v3  ;;  %v1556_v29 = vsel %vm1498_vm3, %v1453_v25, 0.0  ;;  %v1145_v3 = vunpack.c.l.b16 %v667_v11  ;;  %v8554_v11 = vmax.f32 %v1504_v5, 1e-24 }
 0x1fd   :  { %1557 = vadd.xlane.f32.xlu1 %v1556_v29  ;;  %v581_v35 = vadd.f32 %v8177_v23, %v580_v28 }
 0x1fe   :  { %v1152_v28 = vpack.c.b16 %v1146_v51, %v1145_v3  ;;  %7588 = vrsqrt.f32 %v8554_v11  ;;  %v7530_v3 = vld [vmem:[%s13209_s4] sm:$0xff]  ;;  %vm1771_vm4 = vweird.f32 %v8554_v11 }
 0x1ff   :  { %v935_v31 = vpop.f32.mrf.mxu3  ;;  %v671_v24 = vpack.c.bf16 %v581_v35, %v581_v35 }
 0x200   :  { %v8480_v33 = vmax.f32 %v935_v31, 0.0  ;;  %v1143_v31 = vunpack.c.l.b16 %v665_v20 }
 0x201   :  { %v1149_v58 = vunpack.c.l.b16 %v671_v24  ;;  %6990 = vmatmul.msk.bf16.gmra.mxu0 %vm355_vm1, %v7528_v63 }
 0x202   :  { %v1454_v36 = vmul.f32 %v8480_v33, %v8480_v33 }
 0x204   :  { %v582_v40 = vpop.f32.mrf.mxu0  ;;  %v1559_v41 = vsel %vm1498_vm3, %v1454_v36, 0.0  ;;  %v1151_v36 = vpack.c.b16 %v1144_v26, %v1143_v31  ;;  %v7487_v26 = vld [vmem:[%s13208_s0 + $0xb0] sm:$0xff] }
 0x205   :  { %v583_v45 = vadd.f32 %v8177_v23, %v582_v40  ;;  %1560 = vadd.xlane.f32.xlu2 %v1559_v41  ;;  %v7485_v40 = vld [vmem:[%s13208_s0 + $0xa0] sm:$0xff] }
 0x207   :  { %v672_v49 = vpack.c.bf16 %v583_v45, %v583_v45  ;;  %v937_v50 = vpop.f32.mrf.mxu3 }
 0x208   :  { %v8490_v8 = vmax.f32 %v937_v50, 0.0 }
 0x209   :  { %v1150_v60 = vunpack.c.l.b16 %v672_v49 }
 0x20a   :  { %v1455_v62 = vmul.f32 %v8490_v8, %v8490_v8 }
 0x20b   :  { %v1154_v6 = vpack.c.b16 %v1150_v60, %v1149_v58  ;;  %v7486_v60 = vld [vmem:[%s13208_s0 + $0xa8] sm:$0xff] }
 0x20c   :  { %v8503_v9 = vpop.f32.mrf.mxu0  ;;  %7090 = vmatmul.msk.bf16.gmra.mxu2 %vm733_vm2, %v7484_v53  ;;  %v1562_v61 = vsel %vm1498_vm3, %v1455_v62, 0.0 }
 0x20d   :  { %1175 = vmatpush.bf16.msra.mxu3 %v1154_v6  ;;  %1563 = vadd.xlane.f32.xlu0 %v1562_v61 }
 0x20f   :  { %v940_v15 = vpop.f32.mrf.mxu3 }
 0x210   :  { %v8510_v19 = vmax.f32 %v940_v15, 0.0 }
 0x211   :  { %1176 = vmatpush.bf16.msra.mxu3 %v1153_v18  ;;  %v1507_v18 = vpop.xlane.xlu1 %1506 }
 0x212   :  { %v1456_v25 = vmul.f32 %v8510_v19, %v8510_v19 }
 0x214   :  { %v8514_v29 = vpop.f32.mrf.mxu0  ;;  %v1565_v32 = vsel %vm1498_vm3, %v1456_v25, 0.0 }
 0x215   :  { %1177 = vmatpush.bf16.msra.mxu3 %v1152_v28  ;;  %1566 = vadd.xlane.f32.xlu1 %v1565_v32  ;;  %v8574_v32 = vpop.eup %7586 }
 0x216   :  { %v8576_v31 = vpop.eup %7588  ;;  %vm1762_vm7 = vweird.f32 %v8574_v32 }
 0x217   :  { %v942_v35 = vpop.f32.mrf.mxu3  ;;  %vm1772_vm5 = vweird.f32 %v8576_v31  ;;  %vm8646_vm9 = vmor %vm1761_vm6, %vm1762_vm7 }
 0x218   :  { %v8517_v37 = vmax.f32 %v942_v35, 0.0  ;;  %vm8638_vm8 = vmor %vm1771_vm4, %vm1772_vm5 }
 0x219   :  { %1178 = vmatpush.bf16.msra.mxu3 %v1151_v36  ;;  %v1510_v42 = vpop.xlane.xlu1 %1509 }
 0x21a   :  { %v1457_v41 = vmul.f32 %v8517_v37, %v8517_v37 }
 0x21c   :  { %v8527_v24 = vpop.f32.mrf.mxu0  ;;  %7107 = vmatmul.msk.bf16.vlgmr.msra.gmra.mxu3 %vm733_vm2, %v7485_v40  ;;  %v1568_v45 = vsel %vm1498_vm3, %v1457_v41, 0.0  ;;  %v1756_v40 = vmul.f32 %v8574_v32, %v8552_v10  ;;  %v1766_v41 = vmul.f32 %v8576_v31, %v8554_v11 }
 0x21d   :  { %1569 = vadd.xlane.f32.xlu2 %v1568_v45  ;;  %2609 = vmatpush.bf16.msrb.mxu3 %v7531_v13  ;;  %v1513_v13 = vpop.xlane.xlu2 %1512 }
 0x21e   :  { %v1767_v63 = vmul.f32 %v8576_v31, %v1766_v41 }
 0x21f   :  { %v1010_v47 = vpop.f32.mrf.mxu3 }
 0x220   :  { %v8532_v48 = vmax.f32 %v1010_v47, 0.0 }
 0x221   :  { %2610 = vmatpush.bf16.msrb.mxu3 %v7530_v3 }
 0x222   :  { %v1458_v49 = vmul.f32 %v8532_v48, %v8532_v48 }
 0x224   :  { %v592_v50 = vpop.f32.mrf.mxu0  ;;  %v1571_v53 = vsel %vm1498_vm3, %v1458_v49, 0.0 }
 0x225   :  { %1572 = vadd.xlane.f32.xlu0 %v1571_v53 }
 0x227   :  { %v1012_v55 = vpop.f32.mrf.mxu3 }
 0x228   :  { %v8537_v58 = vmax.f32 %v1012_v55, 0.0  ;;  %v1757_v55 = vmul.f32 %v8574_v32, %v1756_v40 }
 0x22a   :  { %v1459_v62 = vmul.f32 %v8537_v58, %v8537_v58 }
 0x22c   :  { %v595_v2 = vpop.f32.mrf.mxu0  ;;  %7108 = vmatmul.msk.bf16.gmra.mxu3 %vm733_vm2, %v7486_v60  ;;  %v1574_v4 = vsel %vm1498_vm3, %v1459_v62, 0.0  ;;  %v8590_v60 = vmax.f32 %v1510_v42, 1e-24  ;;  %v7488_v42 = vld [vmem:[%s13208_s0 + $0xb8] sm:$0xff] }
 0x22d   :  { %1575 = vadd.xlane.f32.xlu1 %v1574_v4  ;;  %v596_v53 = vadd.f32 %v8177_v23, %v595_v2  ;;  %v8595_v4 = vmax.f32 %v1507_v18, 1e-24  ;;  %v1768_v18 = vmul.f32 0.5, %v1767_v63 }
 0x22e   :  { %7590 = vrsqrt.f32 %v8590_v60  ;;  %vm1791_vm10 = vweird.f32 %v8590_v60 }
 0x22f   :  { %v1015_v6 = vpop.f32.mrf.mxu3  ;;  %7592 = vrsqrt.f32 %v8595_v4  ;;  %vm1781_vm12 = vweird.f32 %v8595_v4 }
 0x230   :  { %v8550_v61 = vmax.f32 %v1015_v6, 0.0  ;;  %v591_v6 = vadd.f32 %v8177_v23, %v8527_v24 }
 0x232   :  { %v1460_v12 = vmul.f32 %v8550_v61, %v8550_v61  ;;  %v675_v40 = vpack.c.bf16 %v591_v6, %v591_v6 }
 0x234   :  { %v597_v51 = vpop.f32.mrf.mxu0  ;;  %v1577_v15 = vsel %vm1498_vm3, %v1460_v12, 0.0  ;;  %v8621_v63 = vpop.eup %7590 }
 0x235   :  { %1578 = vadd.xlane.f32.xlu2 %v1577_v15  ;;  %v598_v54 = vadd.f32 %v8177_v23, %v597_v51  ;;  %v593_v51 = vadd.f32 %v8177_v23, %v592_v50  ;;  %v677_v15 = vpack.c.bf16 %v596_v53, %v596_v53  ;;  %vm1792_vm11 = vweird.f32 %v8621_v63 }
 0x236   :  { %vm8694_vm14 = vmor %vm1791_vm10, %vm1792_vm11 }
 0x237   :  { %v1017_v20 = vpop.f32.mrf.mxu3 }
 0x238   :  { %v8567_v25 = vmax.f32 %v1017_v20, 0.0  ;;  %v678_v20 = vpack.c.bf16 %v598_v54, %v598_v54 }
 0x23a   :  { %v1461_v28 = vmul.f32 %v8567_v25, %v8567_v25  ;;  %v1233_v53 = vunpack.c.l.b16 %v678_v20 }
 0x23c   :  { %v600_v35 = vpop.f32.mrf.mxu0  ;;  %7109 = vmatmul.msk.bf16.gmra.mxu3 %vm733_vm2, %v7487_v26  ;;  %v1580_v36 = vsel %vm1498_vm3, %v1461_v28, 0.0  ;;  %v1758_v26 = vmul.f32 0.5, %v1757_v55 }
 0x23d   :  { %1581 = vadd.xlane.f32.xlu0 %v1580_v36  ;;  %v601_v45 = vadd.f32 %v8177_v23, %v600_v35  ;;  %v8607_v36 = vld [vmem:[%s13207_s3] ss:$0 sm:$0xff] }
 0x23e   :  { %v586_v50 = vadd.f32 %v8607_v36, %v8503_v9 }
 0x23f   :  { %v1020_v47 = vpop.f32.mrf.mxu3  ;;  %v679_v5 = vpack.c.bf16 %v601_v45, %v601_v45  ;;  %v676_v45 = vpack.c.bf16 %v593_v51, %v593_v51  ;;  %v1230_v51 = vunpack.c.l.b16 %v675_v40 }
 0x240   :  { %v8585_v49 = vmax.f32 %v1020_v47, 0.0  ;;  %v1232_v47 = vunpack.c.l.b16 %v677_v15 }
 0x241   :  { %v1234_v28 = vunpack.c.l.b16 %v679_v5  ;;  %v673_v5 = vpack.c.bf16 %v586_v50, %v586_v50  ;;  %v1231_v15 = vunpack.c.l.b16 %v676_v45 }
 0x242   :  { %v1462_v62 = vmul.f32 %v8585_v49, %v8585_v49  ;;  %v1238_v20 = vpack.c.b16 %v1233_v53, %v1232_v47 }
 0x244   :  { %v602_v12 = vpop.f32.mrf.mxu0  ;;  %v1583_v2 = vsel %vm1498_vm3, %v1462_v62, 0.0  ;;  %v1769_v62 = vsub.f32 1.5, %v1768_v18  ;;  %v1516_v18 = vpop.xlane.xlu2 %1515 }
 0x245   :  { %v603_v3 = vadd.f32 %v8177_v23, %v602_v12  ;;  %1584 = vadd.xlane.f32.xlu1 %v1583_v2  ;;  %v588_v23 = vadd.f32 %v8607_v36, %v8514_v29  ;;  %v1759_v29 = vsub.f32 1.5, %v1758_v26  ;;  %v8626_v12 = vpop.eup %7592  ;;  %v1786_v26 = vmul.f32 %v8621_v63, %v8590_v60 }
 0x246   :  { %v1776_v50 = vmul.f32 %v8626_v12, %v8595_v4  ;;  %v8650_v47 = vmax.f32 %v1516_v18, 1e-24  ;;  %vm1782_vm13 = vweird.f32 %v8626_v12 }
 0x247   :  { %v680_v35 = vpack.c.bf16 %v603_v3, %v603_v3  ;;  %v1022_v24 = vpop.f32.mrf.mxu3  ;;  %v674_v2 = vpack.c.bf16 %v588_v23, %v588_v23  ;;  %v1770_v3 = vmul.f32 %v8576_v31, %v1769_v62  ;;  %v1228_v23 = vunpack.c.l.b16 %v673_v5  ;;  %vm8703_vm15 = vmor %vm1781_vm12, %vm1782_vm13 }
 0x248   :  { %v8613_v41 = vmax.f32 %v1022_v24, 0.0  ;;  %7594 = vrsqrt.f32 %v8650_v47  ;;  %vm1811_vm0 = vweird.f32 %v8650_v47 }
 0x249   :  { %v1235_v54 = vunpack.c.l.b16 %v680_v35  ;;  %v1760_v35 = vmul.f32 %v8574_v32, %v1759_v29  ;;  %v1229_v40 = vunpack.c.l.b16 %v674_v2  ;;  %v1774_v53 = vsel %vm8638_vm8, %v8576_v31, %v1770_v3  ;;  %v7492_v3 = vld [vmem:[%s13208_s0 + $0xd8] sm:$0xff] }
 0x24a   :  { %v1463_v55 = vmul.f32 %v8613_v41, %v8613_v41  ;;  %v1777_v29 = vmul.f32 %v8626_v12, %v1776_v50 }
 0x24b   :  { %v1239_v9 = vpack.c.b16 %v1235_v54, %v1234_v28  ;;  %v1787_v54 = vmul.f32 %v8621_v63, %v1786_v26  ;;  %v1236_v5 = vpack.c.b16 %v1229_v40, %v1228_v23  ;;  %v1522_v23 = vpop.xlane.xlu1 %1521 }
 0x24c   :  { %7110 = vmatmul.msk.bf16.gmra.mxu3 %vm733_vm2, %v7488_v42  ;;  %v1586_v6 = vsel %vm1498_vm3, %v1463_v55, 0.0  ;;  %v1237_v42 = vpack.c.b16 %v1231_v15, %v1230_v51  ;;  %v8658_v55 = vmax.f32 %v1513_v13, 1e-24  ;;  %v1778_v15 = vmul.f32 0.5, %v1777_v29 }
 0x24d   :  { %1260 = vmatpush.bf16.msrb.mxu0 %v1239_v9  ;;  %1587 = vadd.xlane.f32.xlu2 %v1586_v6  ;;  %v2396_v6 = vmul.f32 %v1774_v53, %v8289_v27  ;;  %v1788_v31 = vmul.f32 0.5, %v1787_v54  ;;  %v8707_v54 = vmax.f32 %v1522_v23, 1e-24 }
 0x24e   :  { %7576 = vmatpush.bf16.msra.mxu1 %v1239_v9  ;;  %v1764_v9 = vsel %vm8646_vm9, %v8574_v32, %v1760_v35  ;;  %7596 = vrsqrt.f32 %v8658_v55  ;;  %v7489_v32 = vld [vmem:[%s13208_s0 + $0xc0] sm:$0xff]  ;;  %v8679_v26 = vpop.eup %7594  ;;  %vm1801_vm4 = vweird.f32 %v8658_v55 }
 0x24f   :  { %v1025_v28 = vpop.f32.mrf.mxu3  ;;  %v2395_v13 = vmul.f32 %v1764_v9, %v8284_v21  ;;  %v1789_v21 = vsub.f32 1.5, %v1788_v31  ;;  %v1806_v50 = vmul.f32 %v8679_v26, %v8650_v47  ;;  %7598 = vrsqrt.f32 %v8707_v54 }
 0x250   :  { %v8642_v10 = vmax.f32 %v1025_v28, 0.0  ;;  %v1779_v28 = vsub.f32 1.5, %v1778_v15  ;;  %vm1812_vm1 = vweird.f32 %v8679_v26  ;;  %vm1831_vm8 = vweird.f32 %v8707_v54 }
 0x251   :  { %1261 = vmatpush.bf16.msrb.mxu0 %v1238_v20  ;;  %v1790_v24 = vmul.f32 %v8621_v63, %v1789_v21  ;;  %v1807_v29 = vmul.f32 %v8679_v26, %v1806_v50  ;;  %vm8747_vm6 = vmor %vm1811_vm0, %vm1812_vm1 }
 0x252   :  { %v1464_v11 = vmul.f32 %v8642_v10, %v8642_v10  ;;  %7577 = vmatpush.bf16.msra.mxu1 %v1238_v20  ;;  %v2459_v20 = vpack.c.bf16 %v2396_v6, %v2395_v13  ;;  %v1780_v45 = vmul.f32 %v8626_v12, %v1779_v28 }
 0x253   :  { %v1794_v9 = vsel %vm8694_vm14, %v8621_v63, %v1790_v24  ;;  %v1531_v53 = vpop.xlane.xlu1 %1530 }
 0x254   :  { %v1589_v62 = vsel %vm1498_vm3, %v1464_v11, 0.0  ;;  %v8687_v35 = vpop.eup %7596  ;;  %v1519_v11 = vpop.xlane.xlu0 %1518  ;;  %v1784_v31 = vsel %vm8703_vm15, %v8626_v12, %v1780_v45  ;;  %v2398_v13 = vmul.f32 %v1794_v9, %v8307_v39 }
 0x255   :  { %1262 = vmatpush.bf16.msrb.mxu0 %v1237_v42  ;;  %1590 = vadd.xlane.f32.xlu0 %v1589_v62  ;;  %v1796_v4 = vmul.f32 %v8687_v35, %v8658_v55  ;;  %v8733_v28 = vpop.eup %7598  ;;  %vm1802_vm5 = vweird.f32 %v8687_v35 }
 0x256   :  { %7578 = vmatpush.bf16.msra.mxu1 %v1237_v42  ;;  %v1826_v23 = vmul.f32 %v8733_v28, %v8707_v54  ;;  %vm8756_vm7 = vmor %vm1801_vm4, %vm1802_vm5  ;;  %vm1832_vm9 = vweird.f32 %v8733_v28 }
 0x257   :  { %v1027_v2 = vpop.f32.mrf.mxu3  ;;  %vm8802_vm12 = vmor %vm1831_vm8, %vm1832_vm9 }
 0x258   :  { %v8669_v51 = vmax.f32 %v1027_v2, 0.0  ;;  %v1797_v2 = vmul.f32 %v8687_v35, %v1796_v4 }
 0x259   :  { %1263 = vmatpush.bf16.msrb.mxu0 %v1236_v5 }
 0x25a   :  { %v1465_v27 = vmul.f32 %v8669_v51, %v8669_v51  ;;  %7579 = vmatpush.bf16.msra.mxu1 %v1236_v5  ;;  %v8715_v5 = vmax.f32 %v1519_v11, 1e-24  ;;  %v1798_v12 = vmul.f32 0.5, %v1797_v2  ;;  %v1525_v11 = vpop.xlane.xlu2 %1524 }
 0x25b   :  { %v1540_v54 = vpop.xlane.xlu1 %1539 }
 0x25c   :  { %7127 = vmatmul.msk.bf16.vlgmr.msrb.gmra.mxu0 %vm733_vm2, %v7489_v32  ;;  %7159 = vmatmul.msk.bf16.vlgmr.msrb.gmra.mxu3 %vm1498_vm3, %v2459_v20  ;;  %v1592_v18 = vsel %vm1498_vm3, %v1465_v27, 0.0  ;;  %v1808_v32 = vmul.f32 0.5, %v1807_v29  ;;  %7600 = vrsqrt.f32 %v8715_v5  ;;  %v7490_v20 = vld [vmem:[%s13208_s0 + $0xc8] sm:$0xff]  ;;  %v2397_v27 = vmul.f32 %v1784_v31, %v8302_v34 }
 0x25d   :  { %1593 = vadd.xlane.f32.xlu1 %v1592_v18  ;;  %7130 = vmatmul.msk.bf16.vlgmr.msra.gmra.mxu1 %vm733_vm2, %v7492_v3  ;;  %v1799_v24 = vsub.f32 1.5, %v1798_v12  ;;  %v8768_v31 = vmax.f32 %v1525_v11, 1e-24  ;;  %v7491_v12 = vld [vmem:[%s13208_s0 + $0xd0] sm:$0xff]  ;;  %vm1821_vm10 = vweird.f32 %v8715_v5 }
 0x25e   :  { %v2460_v3 = vpack.c.bf16 %v2398_v13, %v2397_v27  ;;  %v1809_v18 = vsub.f32 1.5, %v1808_v32 }
 0x25f   :  { %v1095_v40 = vpop.f32.mrf.mxu2  ;;  %v1800_v4 = vmul.f32 %v8687_v35, %v1799_v24  ;;  %vm1841_vm0 = vweird.f32 %v8768_v31 }
 0x260   :  { %v8698_v42 = vmax.f32 %v1095_v40, 0.0  ;;  %v1810_v50 = vmul.f32 %v8679_v26, %v1809_v18  ;;  %v1528_v40 = vpop.xlane.xlu0 %1527 }
 0x261   :  { %v1804_v13 = vsel %vm8756_vm7, %v8687_v35, %v1800_v4 }
 0x262   :  { %v1466_v62 = vmul.f32 %v8698_v42, %v8698_v42  ;;  %v8740_v34 = vpop.eup %7600  ;;  %v1814_v29 = vsel %vm8747_vm6, %v8679_v26, %v1810_v50  ;;  %v1534_v45 = vpop.xlane.xlu2 %1533 }
 0x263   :  { %v1816_v55 = vmul.f32 %v8740_v34, %v8715_v5  ;;  %vm1822_vm11 = vweird.f32 %v8740_v34 }
 0x264   :  { %v1595_v6 = vsel %vm1498_vm3, %v1466_v62, 0.0  ;;  %v8760_v62 = vmax.f32 %v1528_v40, 1e-24  ;;  %vm8811_vm13 = vmor %vm1821_vm10, %vm1822_vm11 }
 0x265   :  { %1596 = vadd.xlane.f32.xlu2 %v1595_v6  ;;  %v1827_v6 = vmul.f32 %v8733_v28, %v1826_v23  ;;  %v1817_v32 = vmul.f32 %v8740_v34, %v1816_v55 }
 0x266   :  { %7602 = vrsqrt.f32 %v8760_v62  ;;  %vm1851_vm14 = vweird.f32 %v8760_v62 }
 0x267   :  { %v1097_v15 = vpop.f32.mrf.mxu2  ;;  %7604 = vrsqrt.f32 %v8768_v31  ;;  %v1818_v35 = vmul.f32 0.5, %v1817_v32  ;;  %v8823_v32 = vmax.f32 %v1531_v53, 1e-24 }
 0x268   :  { %v8725_v63 = vmax.f32 %v1097_v15, 0.0  ;;  %v2400_v15 = vmul.f32 %v1814_v29, %v8330_v59  ;;  %v8815_v29 = vmax.f32 %v1534_v45, 1e-24 }
 0x269   :  { %v1819_v50 = vsub.f32 1.5, %v1818_v35  ;;  %vm1861_vm8 = vweird.f32 %v8823_v32 }
 0x26a   :  { %v1467_v21 = vmul.f32 %v8725_v63, %v8725_v63  ;;  %7606 = vrsqrt.f32 %v8815_v29  ;;  %vm1871_vm6 = vweird.f32 %v8815_v29 }
 0x26b   :  { %v1820_v11 = vmul.f32 %v8740_v34, %v1819_v50  ;;  %7608 = vrsqrt.f32 %v8823_v32 }
 0x26c   :  { %7128 = vmatmul.msk.bf16.gmra.mxu0 %vm733_vm2, %v7490_v20  ;;  %7160 = vmatmul.msk.bf16.gmra.mxu3 %vm1498_vm3, %v2460_v3  ;;  %v1598_v39 = vsel %vm1498_vm3, %v1467_v21, 0.0  ;;  %v1828_v20 = vmul.f32 0.5, %v1827_v6  ;;  %v2399_v3 = vmul.f32 %v1804_v13, %v8320_v46  ;;  %v8786_v24 = vpop.eup %7602  ;;  %v8793_v46 = vpop.f32.mrf.mxu0 }
 0x26d   :  { %1599 = vadd.xlane.f32.xlu0 %v1598_v39  ;;  %v8795_v23 = vpop.eup %7604  ;;  %vm1852_vm15 = vweird.f32 %v8786_v24 }
 0x26e   :  { %v2461_v21 = vpack.c.bf16 %v2400_v15, %v2399_v3  ;;  %v1829_v39 = vsub.f32 1.5, %v1828_v20  ;;  %v1836_v5 = vmul.f32 %v8795_v23, %v8768_v31  ;;  %v1824_v20 = vsel %vm8811_vm13, %v8740_v34, %v1820_v11  ;;  %vm8853_vm4 = vmor %vm1851_vm14, %vm1852_vm15 }
 0x26f   :  { %v1100_v60 = vpop.f32.mrf.mxu2  ;;  %vm1842_vm1 = vweird.f32 %v8795_v23 }
 0x270   :  { %v8751_v47 = vmax.f32 %v1100_v60, 0.0  ;;  %v1830_v40 = vmul.f32 %v8733_v28, %v1829_v39  ;;  %v1846_v60 = vmul.f32 %v8786_v24, %v8760_v62  ;;  %vm8864_vm5 = vmor %vm1841_vm0, %vm1842_vm1 }
 0x272   :  { %v1468_v9 = vmul.f32 %v8751_v47, %v8751_v47  ;;  %v1847_v13 = vmul.f32 %v8786_v24, %v1846_v60 }
 0x274   :  { %v1601_v2 = vsel %vm1498_vm3, %v1468_v9, 0.0  ;;  %v1848_v3 = vmul.f32 0.5, %v1847_v13  ;;  %v1537_v9 = vpop.xlane.xlu0 %1536  ;;  %v8868_v13 = vmax.f32 %v1540_v54, 1e-24 }
 0x275   :  { %1602 = vadd.xlane.f32.xlu1 %v1601_v2  ;;  %v1834_v2 = vsel %vm8802_vm12, %v8733_v28, %v1830_v40  ;;  %v8832_v28 = vpop.f32.mrf.mxu0  ;;  %v8840_v40 = vpop.eup %7606 }
 0x276   :  { %v1849_v50 = vsub.f32 1.5, %v1848_v3  ;;  %v8846_v45 = vpop.eup %7608  ;;  %7610 = vrsqrt.f32 %v8868_v13  ;;  %vm1872_vm7 = vweird.f32 %v8840_v40  ;;  %vm1891_vm12 = vweird.f32 %v8868_v13 }
 0x277   :  { %v1102_v27 = vpop.f32.mrf.mxu2  ;;  %v1856_v31 = vmul.f32 %v8846_v45, %v8823_v32  ;;  %vm1862_vm9 = vweird.f32 %v8846_v45  ;;  %vm8906_vm10 = vmor %vm1871_vm6, %vm1872_vm7 }
 0x278   :  { %v8778_v26 = vmax.f32 %v1102_v27, 0.0  ;;  %v1837_v27 = vmul.f32 %v8795_v23, %v1836_v5  ;;  %v1543_v5 = vpop.xlane.xlu2 %1542  ;;  %vm8917_vm11 = vmor %vm1861_vm8, %vm1862_vm9 }
 0x27a   :  { %v1469_v18 = vmul.f32 %v8778_v26, %v8778_v26  ;;  %v1838_v39 = vmul.f32 0.5, %v1837_v27 }
 0x27c   :  { %7129 = vmatmul.msk.bf16.gmra.mxu0 %vm733_vm2, %v7491_v12  ;;  %7161 = vmatmul.msk.bf16.gmra.mxu3 %vm1498_vm3, %v2461_v21  ;;  %v1604_v59 = vsel %vm1498_vm3, %v1469_v18, 0.0  ;;  %v2402_v12 = vmul.f32 %v1834_v2, %v8357_v30  ;;  %v2401_v18 = vmul.f32 %v1824_v20, %v8350_v17  ;;  %v1839_v60 = vsub.f32 1.5, %v1838_v39  ;;  %v8893_v54 = vpop.eup %7610 }
 0x27d   :  { %1605 = vadd.xlane.f32.xlu2 %v1604_v59  ;;  %v1850_v17 = vmul.f32 %v8786_v24, %v1849_v50  ;;  %vm1892_vm13 = vweird.f32 %v8893_v54 }
 0x27e   :  { %v2462_v59 = vpack.c.bf16 %v2402_v12, %v2401_v18  ;;  %v1840_v53 = vmul.f32 %v8795_v23, %v1839_v60  ;;  %v8876_v12 = vmax.f32 %v1537_v9, 1e-24  ;;  %v1857_v18 = vmul.f32 %v8846_v45, %v1856_v31  ;;  %v1546_v9 = vpop.xlane.xlu0 %1545  ;;  %vm1893_vm0 = vmor %vm1891_vm12, %vm1892_vm13 }
 0x27f   :  { %v1105_v4 = vpop.f32.mrf.mxu2  ;;  %v1854_v20 = vsel %vm8853_vm4, %v8786_v24, %v1850_v17  ;;  %v1886_v31 = vmul.f32 %v8893_v54, %v8868_v13  ;;  %v1549_v13 = vpop.xlane.xlu1 %1548 }
 0x280   :  { %v8806_v55 = vmax.f32 %v1105_v4, 0.0  ;;  %v1866_v4 = vmul.f32 %v8840_v40, %v8815_v29  ;;  %v2404_v39 = vmul.f32 %v1854_v20, %v8375_v44  ;;  %7612 = vrsqrt.f32 %v8876_v12 }
 0x281   :  { %vm1881_vm14 = vweird.f32 %v8876_v12 }
 0x282   :  { %v1470_v6 = vmul.f32 %v8806_v55, %v8806_v55  ;;  %v1867_v27 = vmul.f32 %v8840_v40, %v1866_v4 }
 0x284   :  { %v1607_v15 = vsel %vm1498_vm3, %v1470_v6, 0.0  ;;  %v8862_v6 = vpop.f32.mrf.mxu0 }
 0x285   :  { %1608 = vadd.xlane.f32.xlu0 %v1607_v15 }
 0x287   :  { %v1107_v35 = vpop.f32.mrf.mxu2 }
 0x288   :  { %v8835_v21 = vmax.f32 %v1107_v35, 0.0  ;;  %v1844_v35 = vsel %vm8864_vm5, %v8795_v23, %v1840_v53 }
 0x289   :  { %v2403_v50 = vmul.f32 %v1844_v35, %v8370_v38  ;;  %v8899_v38 = vpop.eup %7612  ;;  %v8921_v35 = vmax.f32 %v1546_v9, 1e-24 }
 0x28a   :  { %v1471_v34 = vmul.f32 %v8835_v21, %v8835_v21  ;;  %v1876_v32 = vmul.f32 %v8899_v38, %v8876_v12  ;;  %vm1882_vm15 = vweird.f32 %v8899_v38 }
 0x28b   :  { %v2463_v60 = vpack.c.bf16 %v2404_v39, %v2403_v50  ;;  %vm8966_vm1 = vmor %vm1881_vm14, %vm1882_vm15  ;;  %vm1911_vm6 = vweird.f32 %v8921_v35 }
 0x28c   :  { %7162 = vmatmul.msk.bf16.gmra.mxu3 %vm1498_vm3, %v2462_v59  ;;  %v1610_v30 = vsel %vm1498_vm3, %v1471_v34, 0.0  ;;  %v1868_v59 = vmul.f32 0.5, %v1867_v27  ;;  %v8891_v4 = vpop.f32.mrf.mxu0  ;;  %v8915_v27 = vmax.f32 %v1543_v5, 1e-24 }
 0x28d   :  { %1611 = vadd.xlane.f32.xlu1 %v1610_v30  ;;  %v1858_v30 = vmul.f32 0.5, %v1857_v18 }
 0x28e   :  { %v1869_v17 = vsub.f32 1.5, %v1868_v59  ;;  %v1887_v59 = vmul.f32 %v8893_v54, %v1886_v31  ;;  %7614 = vrsqrt.f32 %v8915_v27  ;;  %vm1901_vm4 = vweird.f32 %v8915_v27 }
 0x28f   :  { %v1110_v11 = vpop.f32.mrf.mxu2  ;;  %7616 = vrsqrt.f32 %v8921_v35 }
 0x290   :  { %v8857_v62 = vmax.f32 %v1110_v11, 0.0  ;;  %v1859_v11 = vsub.f32 1.5, %v1858_v30  ;;  %v1870_v53 = vmul.f32 %v8840_v40, %v1869_v17  ;;  %v1877_v30 = vmul.f32 %v8899_v38, %v1876_v32 }
 0x292   :  { %v1472_v15 = vmul.f32 %v8857_v62, %v8857_v62  ;;  %v1860_v20 = vmul.f32 %v8846_v45, %v1859_v11  ;;  %v1874_v39 = vsel %vm8906_vm10, %v8840_v40, %v1870_v53  ;;  %v1888_v40 = vmul.f32 0.5, %v1887_v59 }
 0x293   :  { %v1878_v5 = vmul.f32 0.5, %v1877_v30 }
 0x294   :  { %v1613_v3 = vsel %vm1498_vm3, %v1472_v15, 0.0  ;;  %v1864_v50 = vsel %vm8917_vm11, %v8846_v45, %v1860_v20  ;;  %v8944_v31 = vpop.eup %7614  ;;  %v1889_v9 = vsub.f32 1.5, %v1888_v40 }
 0x295   :  { %1614 = vadd.xlane.f32.xlu2 %v1613_v3  ;;  %v2405_v11 = vmul.f32 %v1864_v50, %v8388_v52  ;;  %v1879_v15 = vsub.f32 1.5, %v1878_v5  ;;  %v1552_v52 = vpop.xlane.xlu2 %1551  ;;  %v1896_v32 = vmul.f32 %v8944_v31, %v8915_v27  ;;  %vm1902_vm5 = vweird.f32 %v8944_v31  ;;  %v1558_v50 = vpop.xlane.xlu1 %1557 }
 0x296   :  { %v1890_v20 = vmul.f32 %v8893_v54, %v1889_v9  ;;  %vm9002_vm8 = vmor %vm1901_vm4, %vm1902_vm5 }
 0x297   :  { %v1112_v34 = vpop.f32.mrf.mxu2  ;;  %v1880_v12 = vmul.f32 %v8899_v38, %v1879_v15  ;;  %v1897_v40 = vmul.f32 %v8944_v31, %v1896_v32 }
 0x298   :  { %v8886_v24 = vmax.f32 %v1112_v34, 0.0 }
 0x299   :  { %v1898_v9 = vmul.f32 0.5, %v1897_v40 }
 0x29a   :  { %v1473_v23 = vmul.f32 %v8886_v24, %v8886_v24 }
 0x29c   :  { %7163 = vmatmul.msk.bf16.gmra.mxu3 %vm1498_vm3, %v2463_v60  ;;  %v1616_v44 = vsel %vm1498_vm3, %v1473_v23, 0.0  ;;  %v8935_v60 = vpop.f32.mrf.mxu0  ;;  %v2406_v23 = vmul.f32 %v1874_v39, %v8393_v57 }
 0x29d   :  { %1617 = vadd.xlane.f32.xlu0 %v1616_v44 }
 0x29e   :  { %v2464_v53 = vpack.c.bf16 %v2406_v23, %v2405_v11  ;;  %v1894_v23 = vsel %vm1893_vm0, %v8893_v54, %v1890_v20  ;;  %v8975_v11 = vmax.f32 %v1549_v13, 1e-24 }
 0x29f   :  { %v1180_v2 = vpop.f32.mrf.mxu3 }
 0x2a0   :  { %v8910_v29 = vmax.f32 %v1180_v2, 0.0  ;;  %v8946_v2 = vpop.eup %7616  ;;  %vm1921_vm12 = vweird.f32 %v8975_v11 }
 0x2a1   :  { %v1906_v3 = vmul.f32 %v8946_v2, %v8921_v35  ;;  %vm1912_vm7 = vweird.f32 %v8946_v2 }
 0x2a2   :  { %v1474_v18 = vmul.f32 %v8910_v29, %v8910_v29  ;;  %vm9008_vm9 = vmor %vm1911_vm6, %vm1912_vm7 }
 0x2a4   :  { %v1619_v34 = vsel %vm1498_vm3, %v1474_v18, 0.0  ;;  %v8959_v39 = vpop.f32.mrf.mxu0 }
 0x2a5   :  { %1620 = vadd.xlane.f32.xlu1 %v1619_v34  ;;  %v8964_v34 = vmax.f32 %v1552_v52, 1e-24 }
 0x2a7   :  { %v1182_v17 = vpop.f32.mrf.mxu3  ;;  %7618 = vrsqrt.f32 %v8964_v34  ;;  %vm1931_vm10 = vweird.f32 %v8964_v34 }
 0x2a8   :  { %v8939_v44 = vmax.f32 %v1182_v17, 0.0  ;;  %v1907_v17 = vmul.f32 %v8946_v2, %v1906_v3  ;;  %7620 = vrsqrt.f32 %v8975_v11 }
 0x2aa   :  { %v1475_v45 = vmul.f32 %v8939_v44, %v8939_v44 }
 0x2ac   :  { %7164 = vmatmul.msk.bf16.gmra.mxu3 %vm1498_vm3, %v2464_v53  ;;  %v1622_v57 = vsel %vm1498_vm3, %v1475_v45, 0.0  ;;  %v1884_v53 = vsel %vm8966_vm1, %v8899_v38, %v1880_v12  ;;  %v2408_v45 = vmul.f32 %v1894_v23, %v8416_v16  ;;  %v620_v20 = vpop.f32.mrf.mxu0 }
 0x2ad   :  { %1623 = vadd.xlane.f32.xlu2 %v1622_v57  ;;  %v1908_v57 = vmul.f32 0.5, %v1907_v17  ;;  %v2407_v52 = vmul.f32 %v1884_v53, %v8406_v1  ;;  %v8989_v38 = vpop.eup %7618  ;;  %v621_v17 = vadd.f32 %v8607_v36, %v620_v20 }
 0x2ae   :  { %v8995_v12 = vpop.eup %7620  ;;  %v1926_v1 = vmul.f32 %v8989_v38, %v8964_v34  ;;  %vm1932_vm11 = vweird.f32 %v8989_v38 }
 0x2af   :  { %v1185_v18 = vpop.f32.mrf.mxu3  ;;  %v2465_v32 = vpack.c.bf16 %v2408_v45, %v2407_v52  ;;  %v1909_v13 = vsub.f32 1.5, %v1908_v57  ;;  %v1555_v45 = vpop.xlane.xlu0 %1554  ;;  %vm1922_vm13 = vweird.f32 %v8995_v12  ;;  %vm9053_vm14 = vmor %vm1931_vm10, %vm1932_vm11 }
 0x2b0   :  { %v8961_v59 = vmax.f32 %v1185_v18, 0.0  ;;  %v1899_v18 = vsub.f32 1.5, %v1898_v9  ;;  %v9016_v9 = vmax.f32 %v1558_v50, 1e-24  ;;  %v1927_v57 = vmul.f32 %v8989_v38, %v1926_v1  ;;  %vm9060_vm15 = vmor %vm1921_vm12, %vm1922_vm13 }
 0x2b1   :  { %v1910_v23 = vmul.f32 %v8946_v2, %v1909_v13  ;;  %v9028_v13 = vmax.f32 %v1555_v45, 1e-24 }
 0x2b2   :  { %v1476_v30 = vmul.f32 %v8961_v59, %v8961_v59  ;;  %7622 = vrsqrt.f32 %v9016_v9  ;;  %v1928_v50 = vmul.f32 0.5, %v1927_v57  ;;  %vm1951_vm0 = vweird.f32 %v9016_v9 }
 0x2b3   :  { %v1914_v20 = vsel %vm9008_vm9, %v8946_v2, %v1910_v23  ;;  %7624 = vrsqrt.f32 %v9028_v13  ;;  %vm1941_vm4 = vweird.f32 %v9028_v13 }
 0x2b4   :  { %v1625_v5 = vsel %vm1498_vm3, %v1476_v30, 0.0  ;;  %v1900_v30 = vmul.f32 %v8944_v31, %v1899_v18 }
 0x2b5   :  { %1626 = vadd.xlane.f32.xlu0 %v1625_v5  ;;  %v1916_v5 = vmul.f32 %v8995_v12, %v8975_v11 }
 0x2b6   :  { %v1904_v52 = vsel %vm9002_vm8, %v8944_v31, %v1900_v30  ;;  %v2410_v31 = vmul.f32 %v1914_v20, %v8439_v56 }
 0x2b7   :  { %v1187_v54 = vpop.f32.mrf.mxu3  ;;  %v1917_v18 = vmul.f32 %v8995_v12, %v1916_v5  ;;  %v2409_v2 = vmul.f32 %v1904_v52, %v8432_v43  ;;  %v1929_v5 = vsub.f32 1.5, %v1928_v50 }
 0x2b8   :  { %v8984_v15 = vmax.f32 %v1187_v54, 0.0 }
 0x2b9   :  { %v1918_v23 = vmul.f32 0.5, %v1917_v18  ;;  %v2466_v45 = vpack.c.bf16 %v2410_v31, %v2409_v2  ;;  %v1930_v20 = vmul.f32 %v8989_v38, %v1929_v5  ;;  %v1564_v18 = vpop.xlane.xlu0 %1563 }
 0x2ba   :  { %v1477_v3 = vmul.f32 %v8984_v15, %v8984_v15  ;;  %v9070_v2 = vmax.f32 %v1564_v18, 1e-24 }
 0x2bb   :  { %v1919_v56 = vsub.f32 1.5, %v1918_v23 }
 0x2bc   :  { %7165 = vmatmul.msk.bf16.gmra.mxu3 %vm1498_vm3, %v2465_v32  ;;  %v1628_v16 = vsel %vm1498_vm3, %v1477_v3, 0.0  ;;  %v687_v32 = vpack.c.bf16 %v621_v17, %v621_v17  ;;  %v622_v3 = vpop.f32.mrf.mxu0  ;;  %7626 = vrsqrt.f32 %v9070_v2  ;;  %vm1971_vm8 = vweird.f32 %v9070_v2 }
 0x2bd   :  { %1629 = vadd.xlane.f32.xlu1 %v1628_v16  ;;  %v623_v1 = vadd.f32 %v8607_v36, %v622_v3  ;;  %v9040_v3 = vpop.eup %7622 }
 0x2be   :  { %v9046_v52 = vpop.eup %7624  ;;  %vm1952_vm1 = vweird.f32 %v9040_v3 }
 0x2bf   :  { %v1190_v40 = vpop.f32.mrf.mxu3  ;;  %v688_v30 = vpack.c.bf16 %v623_v1, %v623_v1  ;;  %v1920_v1 = vmul.f32 %v8995_v12, %v1919_v56  ;;  %v1936_v11 = vmul.f32 %v9046_v52, %v9028_v13  ;;  %vm1942_vm5 = vweird.f32 %v9046_v52  ;;  %vm9117_vm6 = vmor %vm1951_vm0, %vm1952_vm1 }
 0x2c0   :  { %v9014_v53 = vmax.f32 %v1190_v40, 0.0  ;;  %v1319_v40 = vunpack.c.l.b16 %v687_v32  ;;  %v1946_v32 = vmul.f32 %v9040_v3, %v9016_v9  ;;  %vm9136_vm7 = vmor %vm1941_vm4, %vm1942_vm5 }
 0x2c1   :  { %v1320_v35 = vunpack.c.l.b16 %v688_v30  ;;  %v1561_v30 = vpop.xlane.xlu2 %1560 }
 0x2c2   :  { %v1478_v54 = vmul.f32 %v9014_v53, %v9014_v53  ;;  %v9077_v5 = vmax.f32 %v1561_v30, 1e-24 }
 0x2c3   :  { %v1324_v57 = vpack.c.b16 %v1320_v35, %v1319_v40  ;;  %v1947_v40 = vmul.f32 %v9040_v3, %v1946_v32  ;;  %v1924_v35 = vsel %vm9060_vm15, %v8995_v12, %v1920_v1  ;;  %v616_v12 = vadd.f32 %v8607_v36, %v8935_v60 }
 0x2c4   :  { %v1631_v16 = vsel %vm1498_vm3, %v1478_v54, 0.0  ;;  %7628 = vrsqrt.f32 %v9077_v5  ;;  %v611_v1 = vadd.f32 %v8607_v36, %v8862_v6  ;;  %vm1961_vm10 = vweird.f32 %v9077_v5 }
 0x2c5   :  { %1632 = vadd.xlane.f32.xlu2 %v1631_v16  ;;  %1345 = vmatpush.bf16.msrb.mxu2 %v1324_v57  ;;  %v1948_v57 = vmul.f32 0.5, %v1947_v40 }
 0x2c7   :  { %v1192_v27 = vpop.f32.mrf.mxu3 }
 0x2c8   :  { %v9036_v17 = vmax.f32 %v1192_v27, 0.0  ;;  %v1934_v27 = vsel %vm9053_vm14, %v8989_v38, %v1930_v20  ;;  %v618_v20 = vadd.f32 %v8607_v36, %v8959_v39  ;;  %v9100_v39 = vpop.eup %7626 }
 0x2c9   :  { %v2412_v38 = vmul.f32 %v1934_v27, %v8453_v7  ;;  %v1949_v7 = vsub.f32 1.5, %v1948_v57  ;;  %vm1972_vm9 = vweird.f32 %v9100_v39 }
 0x2ca   :  { %v1479_v54 = vmul.f32 %v9036_v17, %v9036_v17  ;;  %v686_v30 = vpack.c.bf16 %v618_v20, %v618_v20  ;;  %v9108_v40 = vpop.eup %7628  ;;  %v608_v20 = vadd.f32 %v8607_v36, %v8832_v28  ;;  %vm9180_vm12 = vmor %vm1971_vm8, %vm1972_vm9 }
 0x2cb   :  { %vm1962_vm11 = vweird.f32 %v9108_v40 }
 0x2cc   :  { %7166 = vmatmul.msk.bf16.gmra.mxu3 %vm1498_vm3, %v2466_v45  ;;  %v1634_v43 = vsel %vm1498_vm3, %v1479_v54, 0.0  ;;  %v1937_v54 = vmul.f32 %v9046_v52, %v1936_v11  ;;  %v685_v11 = vpack.c.bf16 %v616_v12, %v616_v12  ;;  %v606_v12 = vadd.f32 %v8607_v36, %v8793_v46  ;;  %vm9189_vm13 = vmor %vm1961_vm10, %vm1962_vm11 }
 0x2cd   :  { %1635 = vadd.xlane.f32.xlu0 %v1634_v43  ;;  %v2411_v43 = vmul.f32 %v1924_v35, %v8448_v0  ;;  %v613_v0 = vadd.f32 %v8607_v36, %v8891_v4  ;;  %v1567_v35 = vpop.xlane.xlu1 %1566 }
 0x2ce   :  { %v1938_v34 = vmul.f32 0.5, %v1937_v54 }
 0x2cf   :  { %v1195_v16 = vpop.f32.mrf.mxu3  ;;  %v684_v54 = vpack.c.bf16 %v613_v0, %v613_v0 }
 0x2d0   :  { %v9058_v50 = vmax.f32 %v1195_v16, 0.0  ;;  %v2467_v16 = vpack.c.bf16 %v2412_v38, %v2411_v43  ;;  %v1939_v27 = vsub.f32 1.5, %v1938_v34  ;;  %v1570_v43 = vpop.xlane.xlu2 %1569 }
 0x2d1   :  { %v9143_v28 = vmax.f32 %v1570_v43, 1e-24 }
 0x2d2   :  { %v1480_v23 = vmul.f32 %v9058_v50, %v9058_v50  ;;  %v1940_v9 = vmul.f32 %v9046_v52, %v1939_v27  ;;  %v682_v27 = vpack.c.bf16 %v608_v20, %v608_v20 }
 0x2d3   :  { %vm1991_vm14 = vweird.f32 %v9143_v28 }
 0x2d4   :  { %v1637_v45 = vsel %vm1498_vm3, %v1480_v23, 0.0  ;;  %v1950_v23 = vmul.f32 %v9040_v3, %v1949_v7  ;;  %v1956_v7 = vmul.f32 %v9108_v40, %v9077_v5  ;;  %v1944_v13 = vsel %vm9136_vm7, %v9046_v52, %v1940_v9 }
 0x2d5   :  { %1638 = vadd.xlane.f32.xlu1 %v1637_v45  ;;  %v683_v45 = vpack.c.bf16 %v611_v1, %v611_v1  ;;  %v9132_v1 = vmax.f32 %v1567_v35, 1e-24 }
 0x2d6   :  { %v1954_v36 = vsel %vm9117_vm6, %v9040_v3, %v1950_v23 }
 0x2d7   :  { %v1197_v56 = vpop.f32.mrf.mxu3  ;;  %7630 = vrsqrt.f32 %v9132_v1  ;;  %v2414_v23 = vmul.f32 %v1954_v36, %v8467_v22  ;;  %vm1981_vm0 = vweird.f32 %v9132_v1 }
 0x2d8   :  { %v9089_v32 = vmax.f32 %v1197_v56, 0.0  ;;  %v1966_v56 = vmul.f32 %v9100_v39, %v9070_v2  ;;  %7632 = vrsqrt.f32 %v9143_v28 }
 0x2d9   :  { %v1265_v18 = vpop.f32.mrf.mxu0 }
 0x2da   :  { %v9095_v31 = vmax.f32 %v1265_v18, 0.0  ;;  %v1481_v60 = vmul.f32 %v9089_v32, %v9089_v32  ;;  %v1317_v18 = vunpack.c.l.b16 %v685_v11  ;;  %v1316_v11 = vunpack.c.l.b16 %v684_v54 }
 0x2dc   :  { %7167 = vmatmul.msk.bf16.gmra.mxu3 %vm1498_vm3, %v2467_v16  ;;  %v1482_v6 = vmul.f32 %v9095_v31, %v9095_v31  ;;  %v1640_v4 = vsel %vm1498_vm3, %v1481_v60, 0.0  ;;  %v1318_v16 = vunpack.c.l.b16 %v686_v30  ;;  %v1315_v60 = vunpack.c.l.b16 %v683_v45 }
 0x2dd   :  { %1641 = vadd.xlane.f32.xlu2 %v1640_v4  ;;  %v1967_v30 = vmul.f32 %v9100_v39, %v1966_v56  ;;  %v1314_v56 = vunpack.c.l.b16 %v682_v27  ;;  %v9161_v9 = vpop.eup %7630 }
 0x2de   :  { %v1643_v38 = vsel %vm1498_vm3, %v1482_v6, 0.0  ;;  %v681_v6 = vpack.c.bf16 %v606_v12, %v606_v12  ;;  %v1323_v35 = vpack.c.b16 %v1318_v16, %v1317_v18  ;;  %v1322_v45 = vpack.c.b16 %v1316_v11, %v1315_v60  ;;  %v9165_v46 = vpop.eup %7632 }
 0x2df   :  { %v9127_v34 = vpop.f32.mrf.mxu3  ;;  %1644 = vadd.xlane.f32.xlu0 %v1643_v38  ;;  %v1957_v38 = vmul.f32 %v9108_v40, %v1956_v7  ;;  %v1968_v54 = vmul.f32 0.5, %v1967_v30  ;;  %v2413_v12 = vmul.f32 %v1944_v13, %v8462_v14  ;;  %v1986_v11 = vmul.f32 %v9165_v46, %v9143_v28  ;;  %v1576_v30 = vpop.xlane.xlu1 %1575 }
 0x2e0   :  { %1346 = vmatpush.bf16.msrb.mxu2 %v1323_v35  ;;  %v1313_v57 = vunpack.c.l.b16 %v681_v6  ;;  %v1976_v35 = vmul.f32 %v9161_v9, %v9132_v1  ;;  %v1280_v13 = vpop.f32.mrf.mxu1  ;;  %vm1992_vm15 = vweird.f32 %v9165_v46  ;;  %vm1982_vm1 = vweird.f32 %v9161_v9 }
 0x2e1   :  { %v1267_v0 = vpop.f32.mrf.mxu0  ;;  %v1958_v20 = vmul.f32 0.5, %v1957_v38  ;;  %v2468_v16 = vpack.c.bf16 %v2414_v23, %v2413_v12  ;;  %v1969_v7 = vsub.f32 1.5, %v1968_v54  ;;  %v9193_v54 = vmax.f32 %v1576_v30, 1e-24  ;;  %vm9242_vm4 = vmor %vm1991_vm14, %vm1992_vm15 }
 0x2e2   :  { %v9146_v4 = vmax.f32 %v1267_v0, 0.0  ;;  %v1321_v0 = vpack.c.b16 %v1314_v56, %v1313_v57  ;;  %v1987_v56 = vmul.f32 %v9165_v46, %v1986_v11  ;;  %v1977_v12 = vmul.f32 %v9161_v9, %v1976_v35  ;;  %vm9253_vm5 = vmor %vm1981_vm0, %vm1982_vm1 }
 0x2e3   :  { %v1959_v36 = vsub.f32 1.5, %v1958_v20  ;;  %v1970_v60 = vmul.f32 %v9100_v39, %v1969_v7  ;;  %7634 = vrsqrt.f32 %v9193_v54  ;;  %vm2011_vm6 = vweird.f32 %v9193_v54 }
 0x2e4   :  { %v1483_v3 = vmul.f32 %v9146_v4, %v9146_v4  ;;  %1347 = vmatpush.bf16.msrb.mxu2 %v1322_v45  ;;  %v1988_v7 = vmul.f32 0.5, %v1987_v56 }
 0x2e5   :  { %v1960_v38 = vmul.f32 %v9108_v40, %v1959_v36  ;;  %v1974_v57 = vsel %vm9180_vm12, %v9100_v39, %v1970_v60 }
 0x2e6   :  { %v1646_v52 = vsel %vm1498_vm3, %v1483_v3, 0.0  ;;  %v1573_v3 = vpop.xlane.xlu0 %1572  ;;  %v2416_v39 = vmul.f32 %v1974_v57, %v8490_v8  ;;  %v1989_v27 = vsub.f32 1.5, %v1988_v7  ;;  %v1579_v7 = vpop.xlane.xlu2 %1578 }
 0x2e7   :  { %v9157_v43 = vpop.f32.mrf.mxu3  ;;  %1647 = vadd.xlane.f32.xlu1 %v1646_v52  ;;  %v9202_v20 = vmax.f32 %v1573_v3, 1e-24  ;;  %v1964_v5 = vsel %vm9189_vm13, %v9108_v40, %v1960_v38 }
 0x2e8   :  { %1348 = vmatpush.bf16.msrb.mxu2 %v1321_v0  ;;  %v2415_v40 = vmul.f32 %v1964_v5, %v8480_v33  ;;  %v1990_v45 = vmul.f32 %v9165_v46, %v1989_v27  ;;  %v9265_v27 = vmax.f32 %v1579_v7, 1e-24 }
 0x2e9   :  { %v1270_v18 = vpop.f32.mrf.mxu0  ;;  %7636 = vrsqrt.f32 %v9202_v20  ;;  %v9222_v8 = vpop.eup %7634  ;;  %vm2001_vm8 = vweird.f32 %v9202_v20 }
 0x2ea   :  { %v9163_v22 = vmax.f32 %v1270_v18, 0.0  ;;  %v2469_v30 = vpack.c.bf16 %v2416_v39, %v2415_v40  ;;  %v2006_v28 = vmul.f32 %v9222_v8, %v9193_v54  ;;  %vm2012_vm7 = vweird.f32 %v9222_v8 }
 0x2eb   :  { %vm2013_vm10 = vmor %vm2011_vm6, %vm2012_vm7  ;;  %vm2021_vm14 = vweird.f32 %v9265_v27 }
 0x2ec   :  { %7168 = vmatmul.msk.bf16.gmra.mxu3 %vm1498_vm3, %v2468_v16  ;;  %v1484_v14 = vmul.f32 %v9163_v22, %v9163_v22  ;;  %v9209_v16 = vmax.f32 %v1280_v13, 0.0 }
 0x2ee   :  { %v1649_v2 = vsel %vm1498_vm3, %v1484_v14, 0.0  ;;  %v1978_v14 = vmul.f32 0.5, %v1977_v12  ;;  %v1488_v11 = vmul.f32 %v9209_v16, %v9209_v16  ;;  %v1582_v57 = vpop.xlane.xlu0 %1581  ;;  %v1588_v40 = vpop.xlane.xlu2 %1587 }
 0x2ef   :  { %v9177_v6 = vpop.f32.mrf.mxu3  ;;  %1650 = vadd.xlane.f32.xlu2 %v1649_v2  ;;  %v1282_v2 = vpop.f32.mrf.mxu1 }
 0x2f0   :  { %v1979_v13 = vsub.f32 1.5, %v1978_v14  ;;  %v1661_v38 = vsel %vm1498_vm3, %v1488_v11, 0.0  ;;  %v9230_v3 = vmax.f32 %v1282_v2, 0.0  ;;  %v1994_v11 = vsel %vm9242_vm4, %v9165_v46, %v1990_v45 }
 0x2f1   :  { %v1272_v23 = vpop.f32.mrf.mxu0  ;;  %v2418_v46 = vmul.f32 %v1994_v11, %v8517_v37  ;;  %v7493_v37 = vld [vmem:[%s13208_s0 + $0xe0] sm:$0xff] }
 0x2f2   :  { %v9199_v52 = vmax.f32 %v1272_v23, 0.0  ;;  %v9232_v23 = vpop.eup %7636  ;;  %v1489_v14 = vmul.f32 %v9230_v3, %v9230_v3  ;;  %7147 = vmatmul.msk.bf16.vlgmr.msrb.gmra.mxu2 %vm733_vm2, %v7493_v37 }
 0x2f3   :  { %v1996_v39 = vmul.f32 %v9232_v23, %v9202_v20  ;;  %vm2002_vm9 = vweird.f32 %v9232_v23 }
 0x2f4   :  { %v1485_v18 = vmul.f32 %v9199_v52, %v9199_v52  ;;  %vm2003_vm11 = vmor %vm2001_vm8, %vm2002_vm9 }
 0x2f6   :  { %v1652_v36 = vsel %vm1498_vm3, %v1485_v18, 0.0  ;;  %v1980_v18 = vmul.f32 %v9161_v9, %v1979_v13  ;;  %v1997_v13 = vmul.f32 %v9232_v23, %v1996_v39 }
 0x2f7   :  { %v9213_v0 = vpop.f32.mrf.mxu3  ;;  %1653 = vadd.xlane.f32.xlu0 %v1652_v36 }
 0x2f8   :  { %v1984_v1 = vsel %vm9253_vm5, %v9161_v9, %v1980_v18 }
 0x2f9   :  { %v1275_v60 = vpop.f32.mrf.mxu0  ;;  %v2417_v9 = vmul.f32 %v1984_v1, %v8510_v19  ;;  %v1585_v1 = vpop.xlane.xlu1 %1584 }
 0x2fa   :  { %v9220_v35 = vmax.f32 %v1275_v60, 0.0  ;;  %v9257_v60 = vmax.f32 %v1582_v57, 1e-24 }
 0x2fb   :  { %v2470_v5 = vpack.c.bf16 %v2418_v46, %v2417_v9 }
 0x2fc   :  { %7169 = vmatmul.msk.bf16.gmra.mxu3 %vm1498_vm3, %v2469_v30  ;;  %v1486_v33 = vmul.f32 %v9220_v35, %v9220_v35  ;;  %v2007_v30 = vmul.f32 %v9222_v8, %v2006_v28  ;;  %7638 = vrsqrt.f32 %v9257_v60  ;;  %vm2031_vm12 = vweird.f32 %v9257_v60 }
 0x2fd   :  { %7640 = vrsqrt.f32 %v9265_v27 }
 0x2fe   :  { %v1655_v12 = vsel %vm1498_vm3, %v1486_v33, 0.0  ;;  %v1664_v33 = vsel %vm1498_vm3, %v1489_v14, 0.0  ;;  %v2008_v45 = vmul.f32 0.5, %v2007_v30 }
 0x2ff   :  { %v9239_v56 = vpop.f32.mrf.mxu3  ;;  %1656 = vadd.xlane.f32.xlu1 %v1655_v12  ;;  %1662 = vadd.xlane.f32.xlu0 %v1661_v38  ;;  %v1998_v12 = vmul.f32 0.5, %v1997_v13  ;;  %v9298_v13 = vmax.f32 %v1588_v40, 1e-24 }
 0x300   :  { %v2009_v18 = vsub.f32 1.5, %v2008_v45 }
 0x301   :  { %v1277_v36 = vpop.f32.mrf.mxu0  ;;  %v1999_v7 = vsub.f32 1.5, %v1998_v12  ;;  %7642 = vrsqrt.f32 %v9298_v13  ;;  %vm2051_vm4 = vweird.f32 %v9298_v13 }
 0x302   :  { %v9263_v2 = vmax.f32 %v1277_v36, 0.0  ;;  %v9279_v39 = vpop.eup %7638  ;;  %v2010_v19 = vmul.f32 %v9222_v8, %v2009_v18 }
 0x303   :  { %v9287_v36 = vpop.eup %7640  ;;  %v2026_v14 = vmul.f32 %v9279_v39, %v9257_v60  ;;  %v2000_v54 = vmul.f32 %v9232_v23, %v1999_v7  ;;  %vm2032_vm13 = vweird.f32 %v9279_v39 }
 0x304   :  { %v1487_v38 = vmul.f32 %v9263_v2, %v9263_v2  ;;  %v2016_v30 = vmul.f32 %v9287_v36, %v9265_v27  ;;  %v2014_v20 = vsel %vm2013_vm10, %v9222_v8, %v2010_v19  ;;  %v2776_v19 = vpack.c.bf16 %v9239_v56, %v9239_v56  ;;  %vm9334_vm0 = vmor %vm2031_vm12, %vm2032_vm13 }
 0x305   :  { %v2004_v46 = vsel %vm2003_vm11, %v9232_v23, %v2000_v54  ;;  %v2420_v9 = vmul.f32 %v2014_v20, %v8537_v58  ;;  %v2775_v58 = vpack.c.bf16 %v9213_v0, %v9213_v0  ;;  %v2774_v20 = vpack.c.bf16 %v9177_v6, %v9177_v6 }
 0x306   :  { %v1658_v57 = vsel %vm1498_vm3, %v1487_v38, 0.0  ;;  %v9302_v38 = vmax.f32 %v1585_v1, 1e-24  ;;  %v2017_v45 = vmul.f32 %v9287_v36, %v2016_v30  ;;  %v2419_v8 = vmul.f32 %v2004_v46, %v8532_v48  ;;  %v7494_v48 = vld [vmem:[%s13208_s0 + $0xe8] sm:$0xff]  ;;  %v1594_v46 = vpop.xlane.xlu1 %1593 }
 0x307   :  { %v2624_v28 = vpop.f32.mrf.mxu3  ;;  %1665 = vadd.xlane.f32.xlu1 %v1664_v33  ;;  %1659 = vadd.xlane.f32.xlu2 %v1658_v57  ;;  %v2027_v33 = vmul.f32 %v9279_v39, %v2026_v14  ;;  %v9312_v30 = vpop.eup %7642  ;;  %vm2022_vm15 = vweird.f32 %v9287_v36  ;;  %v2773_v6 = vpack.c.bf16 %v9157_v43, %v9157_v43 }
 0x308   :  { %7644 = vrsqrt.f32 %v9302_v38  ;;  %v2777_v18 = vpack.c.bf16 %v2624_v28, %v2624_v28  ;;  %v2018_v7 = vmul.f32 0.5, %v2017_v45  ;;  %v2471_v40 = vpack.c.bf16 %v2420_v9, %v2419_v8  ;;  %7148 = vmatmul.msk.bf16.gmra.mxu2 %vm733_vm2, %v7494_v48  ;;  %vm9343_vm1 = vmor %vm2021_vm14, %vm2022_vm15 }
 0x309   :  { %v2028_v12 = vmul.f32 0.5, %v2027_v33  ;;  %v2848_v33 = vunpack.c.l.b16 %v2776_v19  ;;  %v2046_v60 = vmul.f32 %v9312_v30, %v9298_v13  ;;  %v2847_v9 = vunpack.c.l.b16 %v2775_v58 }
 0x30a   :  { %v2019_v1 = vsub.f32 1.5, %v2018_v7  ;;  %v9347_v8 = vmax.f32 %v1594_v46, 1e-24  ;;  %v2772_v7 = vpack.c.bf16 %v9127_v34, %v9127_v34  ;;  %v2846_v19 = vunpack.c.l.b16 %v2774_v20 }
 0x30b   :  { %v2029_v54 = vsub.f32 1.5, %v2028_v12  ;;  %vm2052_vm5 = vweird.f32 %v9312_v30  ;;  %vm2041_vm6 = vweird.f32 %v9302_v38 }
 0x30c   :  { %7170 = vmatmul.msk.bf16.gmra.mxu3 %vm1498_vm3, %v2470_v5  ;;  %v2020_v27 = vmul.f32 %v9287_v36, %v2019_v1  ;;  %7646 = vrsqrt.f32 %v9347_v8  ;;  %v2844_v34 = vunpack.c.l.b16 %v2772_v7  ;;  %vm2053_vm8 = vmor %vm2051_vm4, %vm2052_vm5  ;;  %vm2071_vm10 = vweird.f32 %v9347_v8 }
 0x30d   :  { %v2030_v0 = vmul.f32 %v9279_v39, %v2029_v54  ;;  %v2853_v54 = vpack.c.b16 %v2847_v9, %v2846_v19 }
 0x30e   :  { %v9322_v56 = vpop.eup %7644  ;;  %v2024_v58 = vsel %vm9343_vm1, %v9287_v36, %v2020_v27 }
 0x30f   :  { %v2627_v11 = vpop.f32.mrf.mxu3  ;;  %v2034_v43 = vsel %vm9334_vm0, %v9279_v39, %v2030_v0  ;;  %v2421_v20 = vmul.f32 %v2024_v58, %v8550_v61  ;;  %v7971_v61 = vld [vmem:[%s13208_s0] sm:$0xff]  ;;  %vm2042_vm7 = vweird.f32 %v9322_v56 }
 0x310   :  { %v2778_v57 = vpack.c.bf16 %v2627_v11, %v2627_v11  ;;  %v2849_v11 = vunpack.c.l.b16 %v2777_v18  ;;  %v1591_v18 = vpop.xlane.xlu0 %1590  ;;  %vm2043_vm9 = vmor %vm2041_vm6, %vm2042_vm7 }
 0x312   :  { %v2850_v23 = vunpack.c.l.b16 %v2778_v57  ;;  %v2854_v12 = vpack.c.b16 %v2849_v11, %v2848_v33 }
 0x317   :  { %v2629_v5 = vpop.f32.mrf.mxu3 }
 0x318   :  { %v2779_v37 = vpack.c.bf16 %v2629_v5, %v2629_v5  ;;  %v2036_v5 = vmul.f32 %v9322_v56, %v9302_v38  ;;  %v1600_v9 = vpop.xlane.xlu0 %1599 }
 0x31a   :  { %v2851_v14 = vunpack.c.l.b16 %v2779_v37  ;;  %v2037_v11 = vmul.f32 %v9322_v56, %v2036_v5  ;;  %v9389_v37 = vmax.f32 %v1600_v9, 1e-24 }
 0x31c   :  { %7171 = vmatmul.msk.bf16.gmra.mxu3 %vm1498_vm3, %v2471_v40  ;;  %v2855_v28 = vpack.c.b16 %v2851_v14, %v2850_v23  ;;  %v2047_v23 = vmul.f32 %v9312_v30, %v2046_v60  ;;  %v9355_v14 = vmax.f32 %v1591_v18, 1e-24  ;;  %v2845_v40 = vunpack.c.l.b16 %v2773_v6  ;;  %v9367_v60 = vpop.eup %7646  ;;  %v1597_v18 = vpop.xlane.xlu2 %1596 }
 0x31d   :  { %v2038_v33 = vmul.f32 0.5, %v2037_v11  ;;  %v2066_v13 = vmul.f32 %v9367_v60, %v9347_v8  ;;  %v9393_v19 = vmax.f32 %v1597_v18, 1e-24  ;;  %vm2072_vm11 = vweird.f32 %v9367_v60 }
 0x31e   :  { %2864 = vmatpush.bf16.msrb.mxu1 %v2855_v28  ;;  %v2422_v28 = vmul.f32 %v2034_v43, %v8567_v25  ;;  %v2048_v48 = vmul.f32 0.5, %v2047_v23  ;;  %7648 = vrsqrt.f32 %v9355_v14  ;;  %v2852_v1 = vpack.c.b16 %v2845_v40, %v2844_v34  ;;  %v7495_v25 = vld [vmem:[%s13208_s0 + $0xf0] sm:$0xff]  ;;  %vm2073_vm14 = vmor %vm2071_vm10, %vm2072_vm11 }
 0x31f   :  { %v9332_v45 = vpop.f32.mrf.mxu3  ;;  %v2039_v46 = vsub.f32 1.5, %v2038_v33  ;;  %7149 = vmatmul.msk.bf16.gmra.mxu2 %vm733_vm2, %v7495_v25  ;;  %v2067_v7 = vmul.f32 %v9367_v60, %v2066_v13  ;;  %7650 = vrsqrt.f32 %v9389_v37  ;;  %vm2061_vm12 = vweird.f32 %v9355_v14 }
 0x320   :  { %v2472_v0 = vpack.c.bf16 %v2422_v28, %v2421_v20  ;;  %v2049_v36 = vsub.f32 1.5, %v2048_v48  ;;  %7652 = vrsqrt.f32 %v9393_v19  ;;  %vm2091_vm0 = vweird.f32 %v9389_v37 }
 0x321   :  { %v2040_v27 = vmul.f32 %v9322_v56, %v2039_v46  ;;  %v1603_v46 = vpop.xlane.xlu1 %1602  ;;  %vm2081_vm4 = vweird.f32 %v9393_v19 }
 0x322   :  { %2865 = vmatpush.bf16.msrb.mxu1 %v2854_v12  ;;  %v2050_v6 = vmul.f32 %v9312_v30, %v2049_v36  ;;  %v9426_v13 = vmax.f32 %v1603_v46, 1e-24 }
 0x323   :  { %v2044_v43 = vsel %vm2043_vm9, %v9322_v56, %v2040_v27 }
 0x324   :  { %v7649_v57 = vpop.eup %7648  ;;  %v2054_v38 = vsel %vm2053_vm8, %v9312_v30, %v2050_v6  ;;  %v2423_v11 = vmul.f32 %v2044_v43, %v8585_v49  ;;  %v7496_v49 = vld [vmem:[%s13208_s0 + $0xf8] sm:$0xff]  ;;  %v1606_v33 = vpop.xlane.xlu2 %1605  ;;  %vm2101_vm10 = vweird.f32 %v9426_v13 }
 0x325   :  { %v2056_v5 = vmul.f32 %v7649_v57, %v9355_v14  ;;  %v2424_v40 = vmul.f32 %v2054_v38, %v8613_v41  ;;  %v9402_v48 = vpop.eup %7650  ;;  %v7972_v41 = vld [vmem:[%s13208_s0 + $0x8] sm:$0xff]  ;;  %vm2062_vm13 = vweird.f32 %v7649_v57 }
 0x326   :  { %2866 = vmatpush.bf16.msrb.mxu1 %v2853_v54  ;;  %v2068_v54 = vmul.f32 0.5, %v2067_v7  ;;  %v2086_v8 = vmul.f32 %v9402_v48, %v9389_v37  ;;  %vm2063_vm15 = vmor %vm2061_vm12, %vm2062_vm13  ;;  %vm2092_vm1 = vweird.f32 %v9402_v48 }
 0x327   :  { %v9363_v39 = vpop.f32.mrf.mxu3  ;;  %v2057_v23 = vmul.f32 %v7649_v57, %v2056_v5  ;;  %v2473_v30 = vpack.c.bf16 %v2424_v40, %v2423_v11  ;;  %vm2093_vm6 = vmor %vm2091_vm0, %vm2092_vm1 }
 0x328   :  { %v2069_v28 = vsub.f32 1.5, %v2068_v54  ;;  %v2087_v6 = vmul.f32 %v9402_v48, %v2086_v8 }
 0x329   :  { %v2058_v34 = vmul.f32 0.5, %v2057_v23 }
 0x32a   :  { %2867 = vmatpush.bf16.msrb.mxu1 %v2852_v1  ;;  %v7653_v1 = vpop.eup %7652  ;;  %v2070_v20 = vmul.f32 %v9367_v60, %v2069_v28  ;;  %v2088_v18 = vmul.f32 0.5, %v2087_v6 }
 0x32b   :  { %v2059_v56 = vsub.f32 1.5, %v2058_v34  ;;  %v2076_v25 = vmul.f32 %v7653_v1, %v9393_v19  ;;  %vm2082_vm5 = vweird.f32 %v7653_v1  ;;  %v1612_v34 = vpop.xlane.xlu1 %1611 }
 0x32c   :  { %7172 = vmatmul.msk.bf16.gmra.mxu3 %vm1498_vm3, %v2472_v0  ;;  %v2074_v14 = vsel %vm2073_vm14, %v9367_v60, %v2070_v20  ;;  %v2089_v40 = vsub.f32 1.5, %v2088_v18  ;;  %vm2083_vm7 = vmor %vm2081_vm4, %vm2082_vm5 }
 0x32d   :  { %7191 = vmatmul.msk.bf16.vlgmr.msrb.gmra.mxu1 %vm733_vm2, %v7971_v61  ;;  %v2060_v36 = vmul.f32 %v7649_v57, %v2059_v56  ;;  %v9422_v61 = vmax.f32 %v1606_v33, 1e-24  ;;  %v2077_v27 = vmul.f32 %v7653_v1, %v2076_v25  ;;  %v2426_v5 = vmul.f32 %v2074_v14, %v8669_v51  ;;  %v7973_v51 = vld [vmem:[%s13208_s0 + $0x10] sm:$0xff]  ;;  %v1609_v56 = vpop.xlane.xlu0 %1608 }
 0x32e   :  { %v9453_v20 = vmax.f32 %v1609_v56, 1e-24 }
 0x32f   :  { %v9385_v12 = vpop.f32.mrf.mxu3  ;;  %7150 = vmatmul.msk.bf16.gmra.mxu2 %vm733_vm2, %v7496_v49  ;;  %v2064_v9 = vsel %vm2063_vm15, %v7649_v57, %v2060_v36  ;;  %7654 = vrsqrt.f32 %v9422_v61  ;;  %v2078_v43 = vmul.f32 0.5, %v2077_v27  ;;  %vm2111_vm8 = vweird.f32 %v9422_v61 }
 0x330   :  { %7656 = vrsqrt.f32 %v9426_v13  ;;  %v2425_v7 = vmul.f32 %v2064_v9, %v8642_v10  ;;  %v2090_v10 = vmul.f32 %v9402_v48, %v2089_v40  ;;  %vm2121_vm0 = vweird.f32 %v9453_v20 }
 0x331   :  { %v2079_v54 = vsub.f32 1.5, %v2078_v43 }
 0x332   :  { %v2474_v23 = vpack.c.bf16 %v2426_v5, %v2425_v7  ;;  %v2094_v49 = vsel %vm2093_vm6, %v9402_v48, %v2090_v10 }
 0x333   :  { %v2428_v25 = vmul.f32 %v2094_v49, %v8725_v63  ;;  %v1615_v49 = vpop.xlane.xlu2 %1614 }
 0x335   :  { %v9432_v60 = vpop.eup %7654 }
 0x336   :  { %v9441_v57 = vpop.eup %7656  ;;  %v2106_v11 = vmul.f32 %v9432_v60, %v9422_v61  ;;  %vm2112_vm9 = vweird.f32 %v9432_v60 }
 0x337   :  { %v9398_v58 = vpop.f32.mrf.mxu3  ;;  %v2096_v28 = vmul.f32 %v9441_v57, %v9426_v13  ;;  %vm2102_vm11 = vweird.f32 %v9441_v57  ;;  %vm9484_vm12 = vmor %vm2111_vm8, %vm2112_vm9 }
 0x338   :  { %v2107_v19 = vmul.f32 %v9432_v60, %v2106_v11  ;;  %v2783_v63 = vpack.c.bf16 %v9398_v58, %v9398_v58  ;;  %v2782_v58 = vpack.c.bf16 %v9385_v12, %v9385_v12  ;;  %v1618_v11 = vpop.xlane.xlu0 %1617  ;;  %v2781_v12 = vpack.c.bf16 %v9363_v39, %v9363_v39  ;;  %vm9493_vm13 = vmor %vm2101_vm10, %vm2102_vm11 }
 0x339   :  { %v2097_v33 = vmul.f32 %v9441_v57, %v2096_v28 }
 0x33a   :  { %v2108_v46 = vmul.f32 0.5, %v2107_v19 }
 0x33b   :  { %v2098_v27 = vmul.f32 0.5, %v2097_v33  ;;  %v2780_v33 = vpack.c.bf16 %v9332_v45, %v9332_v45 }
 0x33c   :  { %7173 = vmatmul.msk.bf16.gmra.mxu3 %vm1498_vm3, %v2473_v30  ;;  %v2080_v30 = vmul.f32 %v7653_v1, %v2079_v54  ;;  %v2109_v43 = vsub.f32 1.5, %v2108_v46  ;;  %v9505_v46 = vmax.f32 %v1615_v49, 1e-24 }
 0x33d   :  { %7192 = vmatmul.msk.bf16.gmra.mxu1 %vm733_vm2, %v7972_v41  ;;  %v9449_v41 = vmax.f32 %v1612_v34, 1e-24  ;;  %v2897_v45 = vunpack.c.l.b16 %v2780_v33 }
 0x33e   :  { %v2084_v8 = vsel %vm2083_vm7, %v7653_v1, %v2080_v30  ;;  %v2110_v61 = vmul.f32 %v9432_v60, %v2109_v43  ;;  %v2900_v30 = vunpack.c.l.b16 %v2783_v63  ;;  %vm2141_vm8 = vweird.f32 %v9505_v46 }
 0x33f   :  { %v9418_v0 = vpop.f32.mrf.mxu3  ;;  %7658 = vrsqrt.f32 %v9449_v41  ;;  %v2427_v48 = vmul.f32 %v2084_v8, %v8698_v42  ;;  %v7974_v42 = vld [vmem:[%s13208_s0 + $0x18] sm:$0xff]  ;;  %v9497_v8 = vmax.f32 %v1618_v11, 1e-24  ;;  %vm2131_vm14 = vweird.f32 %v9449_v41 }
 0x340   :  { %7660 = vrsqrt.f32 %v9453_v20  ;;  %v2784_v5 = vpack.c.bf16 %v9418_v0, %v9418_v0  ;;  %v2114_v39 = vsel %vm9484_vm12, %v9432_v60, %v2110_v61  ;;  %v1621_v61 = vpop.xlane.xlu1 %1620 }
 0x341   :  { %v2475_v7 = vpack.c.bf16 %v2428_v25, %v2427_v48  ;;  %7662 = vrsqrt.f32 %v9497_v8  ;;  %vm2151_vm6 = vweird.f32 %v9497_v8 }
 0x342   :  { %7664 = vrsqrt.f32 %v9505_v46 }
 0x347   :  { %v2644_v38 = vpop.f32.mrf.mxu3 }
 0x348   :  { %v2785_v6 = vpack.c.bf16 %v2644_v38, %v2644_v38  ;;  %v2099_v38 = vsub.f32 1.5, %v2098_v27  ;;  %v2430_v27 = vmul.f32 %v2114_v39, %v8778_v26  ;;  %v7975_v26 = vld [vmem:[%s13208_s0 + $0x20] sm:$0xff] }
 0x34a   :  { %v2902_v40 = vunpack.c.l.b16 %v2785_v6  ;;  %v2100_v13 = vmul.f32 %v9441_v57, %v2099_v38 }
 0x34c   :  { %7174 = vmatmul.msk.bf16.gmra.mxu3 %vm1498_vm3, %v2474_v23  ;;  %v9462_v23 = vpop.eup %7658 }
 0x34d   :  { %7193 = vmatmul.msk.bf16.gmra.mxu1 %vm733_vm2, %v7973_v51  ;;  %v9473_v0 = vpop.eup %7660  ;;  %v2901_v51 = vunpack.c.l.b16 %v2784_v5  ;;  %v2126_v10 = vmul.f32 %v9462_v23, %v9449_v41  ;;  %vm2132_vm15 = vweird.f32 %v9462_v23 }
 0x34e   :  { %v2116_v56 = vmul.f32 %v9473_v0, %v9453_v20  ;;  %v7663_v63 = vpop.eup %7662  ;;  %vm2122_vm1 = vweird.f32 %v9473_v0  ;;  %vm2133_vm4 = vmor %vm2131_vm14, %vm2132_vm15 }
 0x34f   :  { %v2647_v37 = vpop.f32.mrf.mxu3  ;;  %v2907_v28 = vpack.c.b16 %v2902_v40, %v2901_v51  ;;  %v2127_v25 = vmul.f32 %v9462_v23, %v2126_v10  ;;  %v2146_v38 = vmul.f32 %v7663_v63, %v9497_v8  ;;  %vm2123_vm5 = vmor %vm2121_vm0, %vm2122_vm1  ;;  %vm2152_vm7 = vweird.f32 %v7663_v63 }
 0x350   :  { %v2786_v36 = vpack.c.bf16 %v2647_v37, %v2647_v37  ;;  %v2117_v48 = vmul.f32 %v9473_v0, %v2116_v56  ;;  %v9535_v37 = vmax.f32 %v1621_v61, 1e-24  ;;  %vm2153_vm10 = vmor %vm2151_vm6, %vm2152_vm7 }
 0x351   :  { %v2128_v5 = vmul.f32 0.5, %v2127_v25  ;;  %v2147_v11 = vmul.f32 %v7663_v63, %v2146_v38 }
 0x352   :  { %v2903_v1 = vunpack.c.l.b16 %v2786_v36  ;;  %v2899_v36 = vunpack.c.l.b16 %v2782_v58  ;;  %vm2161_vm0 = vweird.f32 %v9535_v37 }
 0x354   :  { %v2906_v6 = vpack.c.b16 %v2900_v30, %v2899_v36 }
 0x357   :  { %v2649_v14 = vpop.f32.mrf.mxu3 }
 0x358   :  { %v2787_v9 = vpack.c.bf16 %v2649_v14, %v2649_v14  ;;  %v2898_v14 = vunpack.c.l.b16 %v2781_v12 }
 0x35a   :  { %v2904_v18 = vunpack.c.l.b16 %v2787_v9  ;;  %v2104_v9 = vsel %vm9493_vm13, %v9441_v57, %v2100_v13  ;;  %v2129_v57 = vsub.f32 1.5, %v2128_v5  ;;  %v2148_v13 = vmul.f32 0.5, %v2147_v11 }
 0x35c   :  { %v2908_v54 = vpack.c.b16 %v2904_v18, %v2903_v1  ;;  %7175 = vmatmul.msk.bf16.gmra.mxu3 %vm1498_vm3, %v2475_v7  ;;  %v2905_v1 = vpack.c.b16 %v2898_v14, %v2897_v45  ;;  %v2429_v18 = vmul.f32 %v2104_v9, %v8751_v47  ;;  %v2118_v7 = vmul.f32 0.5, %v2117_v48  ;;  %v1630_v14 = vpop.xlane.xlu1 %1629  ;;  %v1627_v48 = vpop.xlane.xlu0 %1626 }
 0x35d   :  { %7194 = vmatmul.msk.bf16.gmra.mxu1 %vm733_vm2, %v7974_v42  ;;  %v2130_v47 = vmul.f32 %v9462_v23, %v2129_v57  ;;  %v1624_v42 = vpop.xlane.xlu2 %1623  ;;  %v9555_v45 = vmax.f32 %v1630_v14, 1e-24 }
 0x35e   :  { %2917 = vmatpush.bf16.msra.mxu2 %v2908_v54  ;;  %v2476_v43 = vpack.c.bf16 %v2430_v27, %v2429_v18  ;;  %v2119_v40 = vsub.f32 1.5, %v2118_v7  ;;  %v7665_v54 = vpop.eup %7664  ;;  %v9532_v10 = vmax.f32 %v1624_v42, 1e-24 }
 0x35f   :  { %v9482_v34 = vpop.f32.mrf.mxu3  ;;  %v2136_v51 = vmul.f32 %v7665_v54, %v9505_v46  ;;  %v2134_v20 = vsel %vm2133_vm4, %v9462_v23, %v2130_v47  ;;  %v2149_v23 = vsub.f32 1.5, %v2148_v13  ;;  %vm2142_vm9 = vweird.f32 %v7665_v54 }
 0x360   :  { %v2120_v41 = vmul.f32 %v9473_v0, %v2119_v40  ;;  %7666 = vrsqrt.f32 %v9532_v10  ;;  %vm2143_vm11 = vmor %vm2141_vm8, %vm2142_vm9  ;;  %vm2171_vm14 = vweird.f32 %v9532_v10  ;;  %vm2191_vm6 = vweird.f32 %v9555_v45 }
 0x361   :  { %v2137_v30 = vmul.f32 %v7665_v54, %v2136_v51  ;;  %7668 = vrsqrt.f32 %v9535_v37 }
 0x362   :  { %2918 = vmatpush.bf16.msra.mxu2 %v2907_v28  ;;  %v2124_v12 = vsel %vm2123_vm5, %v9473_v0, %v2120_v41  ;;  %v2432_v28 = vmul.f32 %v2134_v20, %v8835_v21  ;;  %v7976_v21 = vld [vmem:[%s13208_s0 + $0x28] sm:$0xff]  ;;  %7670 = vrsqrt.f32 %v9555_v45 }
 0x363   :  { %v2431_v49 = vmul.f32 %v2124_v12, %v8806_v55  ;;  %v2138_v19 = vmul.f32 0.5, %v2137_v30  ;;  %v2150_v55 = vmul.f32 %v7663_v63, %v2149_v23 }
 0x364   :  { %v1636_v51 = vpop.xlane.xlu0 %1635 }
 0x365   :  { %v2477_v33 = vpack.c.bf16 %v2432_v28, %v2431_v49  ;;  %v2139_v39 = vsub.f32 1.5, %v2138_v19  ;;  %v2154_v27 = vsel %vm2153_vm10, %v7663_v63, %v2150_v55  ;;  %v1633_v12 = vpop.xlane.xlu2 %1632  ;;  %v9577_v30 = vmax.f32 %v1636_v51, 1e-24 }
 0x366   :  { %2919 = vmatpush.bf16.msra.mxu2 %v2906_v6  ;;  %v7667_v36 = vpop.eup %7666  ;;  %v2434_v7 = vmul.f32 %v2154_v27, %v8886_v24  ;;  %v9581_v49 = vmax.f32 %v1633_v12, 1e-24 }
 0x367   :  { %v9513_v60 = vpop.f32.mrf.mxu3  ;;  %v7669_v0 = vpop.eup %7668  ;;  %v2166_v25 = vmul.f32 %v7667_v36, %v9532_v10  ;;  %v2140_v9 = vmul.f32 %v7665_v54, %v2139_v39  ;;  %vm2172_vm12 = vweird.f32 %v7667_v36 }
 0x368   :  { %v2156_v8 = vmul.f32 %v7669_v0, %v9535_v37  ;;  %v9563_v42 = vpop.eup %7670  ;;  %vm2162_vm13 = vweird.f32 %v7669_v0  ;;  %vm2173_vm15 = vmor %vm2171_vm14, %vm2172_vm12  ;;  %vm2211_vm12 = vweird.f32 %v9577_v30 }
 0x369   :  { %v2167_v5 = vmul.f32 %v7667_v36, %v2166_v25  ;;  %v2144_v46 = vsel %vm2143_vm11, %v7665_v54, %v2140_v9  ;;  %v7977_v54 = vld [vmem:[%s13208_s0 + $0x30] sm:$0xff]  ;;  %vm2163_vm1 = vmor %vm2161_vm0, %vm2162_vm13  ;;  %vm2192_vm4 = vweird.f32 %v9563_v42  ;;  %vm2201_vm13 = vweird.f32 %v9581_v49 }
 0x36a   :  { %2920 = vmatpush.bf16.msra.mxu2 %v2905_v1  ;;  %v9557_v1 = vmax.f32 %v1627_v48, 1e-24  ;;  %v2157_v18 = vmul.f32 %v7669_v0, %v2156_v8  ;;  %v2433_v40 = vmul.f32 %v2144_v46, %v8857_v62  ;;  %v2186_v62 = vmul.f32 %v9563_v42, %v9555_v45  ;;  %vm9618_vm7 = vmor %vm2191_vm6, %vm2192_vm4 }
 0x36c   :  { %7176 = vmatmul.msk.bf16.gmra.mxu3 %vm1498_vm3, %v2476_v43  ;;  %v2168_v43 = vmul.f32 0.5, %v2167_v5  ;;  %7672 = vrsqrt.f32 %v9557_v1  ;;  %v2478_v47 = vpack.c.bf16 %v2434_v7, %v2433_v40  ;;  %v2187_v13 = vmul.f32 %v9563_v42, %v2186_v62  ;;  %v1639_v62 = vpop.xlane.xlu1 %1638 }
 0x36d   :  { %7195 = vmatmul.msk.bf16.vlgmr.msra.gmra.mxu2 %vm733_vm2, %v7975_v26  ;;  %v2158_v26 = vmul.f32 0.5, %v2157_v18  ;;  %7674 = vrsqrt.f32 %v9577_v30  ;;  %v1642_v40 = vpop.xlane.xlu2 %1641  ;;  %vm2181_vm8 = vweird.f32 %v9557_v1  ;;  %v9631_v12 = vmax.f32 %v1639_v62, 1e-24 }
 0x36e   :  { %v2169_v38 = vsub.f32 1.5, %v2168_v43  ;;  %v2188_v39 = vmul.f32 0.5, %v2187_v13  ;;  %7676 = vrsqrt.f32 %v9581_v49 }
 0x36f   :  { %v9528_v58 = vpop.f32.mrf.mxu3  ;;  %v2159_v63 = vsub.f32 1.5, %v2158_v26 }
 0x370   :  { %v2170_v41 = vmul.f32 %v7667_v36, %v2169_v38  ;;  %v2189_v48 = vsub.f32 1.5, %v2188_v39  ;;  %v2790_v7 = vpack.c.bf16 %v9528_v58, %v9528_v58 }
 0x371   :  { %v2160_v20 = vmul.f32 %v7669_v0, %v2159_v63 }
 0x372   :  { %v9570_v24 = vpop.eup %7672  ;;  %v2174_v28 = vsel %vm2173_vm15, %v7667_v36, %v2170_v41 }
 0x373   :  { %v2176_v11 = vmul.f32 %v9570_v24, %v9557_v1  ;;  %v2164_v19 = vsel %vm2163_vm1, %v7669_v0, %v2160_v20  ;;  %v2436_v23 = vmul.f32 %v2174_v28, %v8939_v44  ;;  %v9590_v27 = vpop.eup %7674  ;;  %vm2182_vm5 = vweird.f32 %v9570_v24 }
 0x374   :  { %v2435_v36 = vmul.f32 %v2164_v19, %v8910_v29  ;;  %v7978_v29 = vld [vmem:[%s13208_s0 + $0x38] sm:$0xff]  ;;  %v2952_v20 = vunpack.c.l.b16 %v2790_v7  ;;  %vm2183_vm9 = vmor %vm2181_vm8, %vm2182_vm5  ;;  %vm2212_vm10 = vweird.f32 %v9590_v27  ;;  %vm2221_vm5 = vweird.f32 %v9631_v12 }
 0x375   :  { %vm2213_vm14 = vmor %vm2211_vm12, %vm2212_vm10 }
 0x376   :  { %v2479_v8 = vpack.c.bf16 %v2436_v23, %v2435_v36 }
 0x377   :  { %v9540_v56 = vpop.f32.mrf.mxu3 }
 0x378   :  { %v2791_v44 = vpack.c.bf16 %v9540_v56, %v9540_v56  ;;  %v2190_v56 = vmul.f32 %v9563_v42, %v2189_v48 }
 0x37a   :  { %v2953_v38 = vunpack.c.l.b16 %v2791_v44  ;;  %v2194_v45 = vsel %vm9618_vm7, %v9563_v42, %v2190_v56  ;;  %v1648_v44 = vpop.xlane.xlu1 %1647 }
 0x37b   :  { %v2438_v1 = vmul.f32 %v2194_v45, %v8984_v15 }
 0x37c   :  { %7177 = vmatmul.msk.bf16.gmra.mxu3 %vm1498_vm3, %v2477_v33  ;;  %v2177_v33 = vmul.f32 %v9570_v24, %v2176_v11  ;;  %v2959_v13 = vpack.c.b16 %v2953_v38, %v2952_v20 }
 0x37d   :  { %7196 = vmatmul.msk.bf16.gmra.mxu2 %vm733_vm2, %v7976_v21 }
 0x37e   :  { %v2178_v25 = vmul.f32 0.5, %v2177_v33 }
 0x37f   :  { %v9552_v6 = vpop.f32.mrf.mxu3 }
 0x380   :  { %v2792_v14 = vpack.c.bf16 %v9552_v6, %v9552_v6  ;;  %v2179_v18 = vsub.f32 1.5, %v2178_v25  ;;  %v9599_v6 = vpop.eup %7676 }
 0x381   :  { %v2196_v41 = vmul.f32 %v9599_v6, %v9581_v49  ;;  %vm2202_vm11 = vweird.f32 %v9599_v6 }
 0x382   :  { %v2954_v43 = vunpack.c.l.b16 %v2792_v14  ;;  %v2180_v58 = vmul.f32 %v9570_v24, %v2179_v18  ;;  %v1645_v18 = vpop.xlane.xlu0 %1644  ;;  %vm2203_vm15 = vmor %vm2201_vm13, %vm2202_vm11 }
 0x383   :  { %v2197_v33 = vmul.f32 %v9599_v6, %v2196_v41 }
 0x384   :  { %v2184_v19 = vsel %vm2183_vm9, %v9570_v24, %v2180_v58 }
 0x385   :  { %v2437_v39 = vmul.f32 %v2184_v19, %v8961_v59 }
 0x387   :  { %v2664_v57 = vpop.f32.mrf.mxu3  ;;  %v2480_v24 = vpack.c.bf16 %v2438_v1, %v2437_v39 }
 0x388   :  { %v2793_v55 = vpack.c.bf16 %v2664_v57, %v2664_v57  ;;  %v2206_v57 = vmul.f32 %v9590_v27, %v9577_v30 }
 0x38a   :  { %v2955_v5 = vunpack.c.l.b16 %v2793_v55  ;;  %v2207_v11 = vmul.f32 %v9590_v27, %v2206_v57 }
 0x38c   :  { %7178 = vmatmul.msk.bf16.gmra.mxu3 %vm1498_vm3, %v2478_v47  ;;  %v2789_v47 = vpack.c.bf16 %v9513_v60, %v9513_v60  ;;  %v2960_v63 = vpack.c.b16 %v2955_v5, %v2954_v43  ;;  %v2788_v60 = vpack.c.bf16 %v9482_v34, %v9482_v34  ;;  %v9667_v43 = vmax.f32 %v1648_v44, 1e-24 }
 0x38d   :  { %7197 = vmatmul.msk.bf16.gmra.mxu2 %vm733_vm2, %v7977_v54  ;;  %v9611_v54 = vpop.f32.mrf.mxu2 }
 0x38e   :  { %v2951_v28 = vunpack.c.l.b16 %v2789_v47  ;;  %v2950_v34 = vunpack.c.l.b16 %v2788_v60  ;;  %v9671_v47 = vmax.f32 %v1645_v18, 1e-24  ;;  %v9678_v49 = vmax.f32 %v9611_v54, 0.0 }
 0x38f   :  { %v2667_v61 = vpop.f32.mrf.mxu3  ;;  %vm2251_vm8 = vweird.f32 %v9667_v43 }
 0x390   :  { %v2794_v10 = vpack.c.bf16 %v2667_v61, %v2667_v61  ;;  %v9622_v61 = vmax.f32 %v1642_v40, 1e-24  ;;  %v2958_v42 = vpack.c.b16 %v2951_v28, %v2950_v34  ;;  %v1490_v54 = vmul.f32 %v9678_v49, %v9678_v49 }
 0x391   :  { %vm2241_vm10 = vweird.f32 %v9671_v47 }
 0x392   :  { %v2956_v0 = vunpack.c.l.b16 %v2794_v10  ;;  %7678 = vrsqrt.f32 %v9622_v61  ;;  %v2208_v10 = vmul.f32 0.5, %v2207_v11  ;;  %vm2231_vm4 = vweird.f32 %v9622_v61 }
 0x393   :  { %7680 = vrsqrt.f32 %v9631_v12 }
 0x394   :  { %v2209_v36 = vsub.f32 1.5, %v2208_v10  ;;  %7682 = vrsqrt.f32 %v9667_v43  ;;  %v1667_v10 = vsel %vm1498_vm3, %v1490_v54, 0.0 }
 0x395   :  { %7684 = vrsqrt.f32 %v9671_v47 }
 0x397   :  { %v2669_v21 = vpop.f32.mrf.mxu3 }
 0x398   :  { %v2795_v37 = vpack.c.bf16 %v2669_v21, %v2669_v21  ;;  %v2198_v21 = vmul.f32 0.5, %v2197_v33  ;;  %v9643_v14 = vpop.eup %7678 }
 0x399   :  { %v2226_v48 = vmul.f32 %v9643_v14, %v9622_v61  ;;  %vm2232_vm0 = vweird.f32 %v9643_v14 }
 0x39a   :  { %v2957_v9 = vunpack.c.l.b16 %v2795_v37  ;;  %v1352_v37 = vpop.f32.mrf.mxu2  ;;  %v2199_v15 = vsub.f32 1.5, %v2198_v21  ;;  %vm2233_vm6 = vmor %vm2231_vm4, %vm2232_vm0 }
 0x39b   :  { %v2227_v40 = vmul.f32 %v9643_v14, %v2226_v48  ;;  %v9698_v34 = vmax.f32 %v1352_v37, 0.0 }
 0x39c   :  { %v2961_v46 = vpack.c.b16 %v2957_v9, %v2956_v0  ;;  %7179 = vmatmul.msk.bf16.gmra.mxu3 %vm1498_vm3, %v2479_v8  ;;  %v7979_v0 = vld [vmem:[%s13208_s0 + $0x40] sm:$0xff]  ;;  %v9652_v9 = vpop.eup %7680  ;;  %v2210_v8 = vmul.f32 %v9590_v27, %v2209_v36 }
 0x39d   :  { %7198 = vmatmul.msk.bf16.gmra.mxu2 %vm733_vm2, %v7978_v29  ;;  %v2200_v29 = vmul.f32 %v9599_v6, %v2199_v15  ;;  %v2216_v7 = vmul.f32 %v9652_v9, %v9631_v12  ;;  %v2228_v62 = vmul.f32 0.5, %v2227_v40  ;;  %v1651_v15 = vpop.xlane.xlu2 %1650  ;;  %vm2222_vm1 = vweird.f32 %v9652_v9 }
 0x39e   :  { %2970 = vmatpush.bf16.msra.mxu1 %v2961_v46  ;;  %v2214_v57 = vsel %vm2213_vm14, %v9590_v27, %v2210_v8  ;;  %v9726_v18 = vmax.f32 %v1651_v15, 1e-24  ;;  %vm2223_vm7 = vmor %vm2221_vm5, %vm2222_vm1 }
 0x39f   :  { %v9607_v26 = vpop.f32.mrf.mxu3  ;;  %v2204_v30 = vsel %vm2203_vm15, %v9599_v6, %v2200_v29  ;;  %v2217_v58 = vmul.f32 %v9652_v9, %v2216_v7  ;;  %v2440_v27 = vmul.f32 %v2214_v57, %v9036_v17  ;;  %v2229_v28 = vsub.f32 1.5, %v2228_v62  ;;  %v9693_v17 = vpop.eup %7682 }
 0x3a0   :  { %v2439_v6 = vmul.f32 %v2204_v30, %v9014_v53  ;;  %v9696_v19 = vpop.eup %7684  ;;  %v7980_v53 = vld [vmem:[%s13208_s0 + $0x48] sm:$0xff]  ;;  %v2246_v21 = vmul.f32 %v9693_v17, %v9667_v43  ;;  %vm2252_vm9 = vweird.f32 %v9693_v17  ;;  %vm2261_vm0 = vweird.f32 %v9726_v18 }
 0x3a1   :  { %v2218_v20 = vmul.f32 0.5, %v2217_v58  ;;  %v2230_v39 = vmul.f32 %v9643_v14, %v2229_v28  ;;  %v2236_v36 = vmul.f32 %v9696_v19, %v9671_v47  ;;  %vm2242_vm11 = vweird.f32 %v9696_v19  ;;  %vm9773_vm12 = vmor %vm2251_vm8, %vm2252_vm9 }
 0x3a2   :  { %2971 = vmatpush.bf16.msra.mxu1 %v2960_v63  ;;  %v1355_v63 = vpop.f32.mrf.mxu2  ;;  %v2481_v11 = vpack.c.bf16 %v2440_v27, %v2439_v6  ;;  %vm9779_vm13 = vmor %vm2241_vm10, %vm2242_vm11 }
 0x3a3   :  { %v2219_v33 = vsub.f32 1.5, %v2218_v20  ;;  %v2234_v44 = vsel %vm2233_vm6, %v9643_v14, %v2230_v39  ;;  %v2237_v61 = vmul.f32 %v9696_v19, %v2236_v36  ;;  %v1657_v36 = vpop.xlane.xlu1 %1656 }
 0x3a4   :  { %v2442_v14 = vmul.f32 %v2234_v44, %v9089_v32 }
 0x3a6   :  { %2972 = vmatpush.bf16.msra.mxu1 %v2959_v13 }
 0x3a7   :  { %v9637_v23 = vpop.f32.mrf.mxu3 }
 0x3aa   :  { %v2869_v55 = vpop.f32.mrf.mxu1  ;;  %2973 = vmatpush.bf16.msra.mxu1 %v2958_v42  ;;  %v1357_v42 = vpop.f32.mrf.mxu2 }
 0x3ab   :  { %v9641_v25 = vmax.f32 %v2869_v55, 0.0  ;;  %v1654_v55 = vpop.xlane.xlu0 %1653 }
 0x3ac   :  { %7180 = vmatmul.msk.bf16.gmra.mxu3 %vm1498_vm3, %v2480_v24  ;;  %v9722_v8 = vmax.f32 %v1654_v55, 1e-24  ;;  %v7982_v55 = vld [vmem:[%s13208_s0 + $0x58] sm:$0xff] }
 0x3ad   :  { %7199 = vmatmul.msk.bf16.vlgmr.msra.gmra.mxu1 %vm733_vm2, %v7979_v0  ;;  %v3324_v59 = vmul.f32 %v9641_v25, %v9641_v25  ;;  %v2220_v0 = vmul.f32 %v9652_v9, %v2219_v33 }
 0x3ae   :  { %7686 = vrsqrt.f32 %v9722_v8  ;;  %vm2271_vm14 = vweird.f32 %v9722_v8 }
 0x3af   :  { %v9658_v5 = vpop.f32.mrf.mxu3  ;;  %v3388_v46 = vsel %vm1498_vm3, %v3324_v59, 0.0  ;;  %v1491_v59 = vmul.f32 %v9698_v34, %v9698_v34  ;;  %v2224_v7 = vsel %vm2223_vm7, %v9652_v9, %v2220_v0  ;;  %7688 = vrsqrt.f32 %v9726_v18 }
 0x3b0   :  { %3389 = vadd.xlane.f32.xlu2 %v3388_v46  ;;  %v2247_v46 = vmul.f32 %v9693_v17, %v2246_v21  ;;  %v2441_v9 = vmul.f32 %v2224_v7, %v9058_v50 }
 0x3b1   :  { %v1670_v57 = vsel %vm1498_vm3, %v1491_v59, 0.0 }
 0x3b2   :  { %v2871_v56 = vpop.f32.mrf.mxu1  ;;  %v2248_v40 = vmul.f32 0.5, %v2247_v46  ;;  %v2482_v32 = vpack.c.bf16 %v2442_v14, %v2441_v9 }
 0x3b3   :  { %v9673_v38 = vmax.f32 %v2871_v56, 0.0  ;;  %v9732_v56 = vmax.f32 %v1355_v63, 0.0  ;;  %v2238_v63 = vmul.f32 0.5, %v2237_v61 }
 0x3b4   :  { %v9748_v20 = vpop.eup %7686 }
 0x3b5   :  { %v3325_v41 = vmul.f32 %v9673_v38, %v9673_v38  ;;  %v1492_v27 = vmul.f32 %v9732_v56, %v9732_v56  ;;  %v2239_v54 = vsub.f32 1.5, %v2238_v63  ;;  %v9752_v50 = vpop.eup %7688  ;;  %vm2272_vm15 = vweird.f32 %v9748_v20 }
 0x3b6   :  { %v2256_v47 = vmul.f32 %v9752_v50, %v9726_v18  ;;  %vm2262_vm1 = vweird.f32 %v9752_v50  ;;  %vm9850_vm4 = vmor %vm2271_vm14, %vm2272_vm15 }
 0x3b7   :  { %v9685_v51 = vpop.f32.mrf.mxu3  ;;  %v3391_v60 = vsel %vm1498_vm3, %v3325_v41, 0.0  ;;  %v1360_v41 = vpop.f32.mrf.mxu2  ;;  %v1673_v33 = vsel %vm1498_vm3, %v1492_v27, 0.0  ;;  %v2240_v21 = vmul.f32 %v9696_v19, %v2239_v54  ;;  %vm9860_vm5 = vmor %vm2261_vm0, %vm2262_vm1 }
 0x3b8   :  { %3392 = vadd.xlane.f32.xlu0 %v3391_v60  ;;  %v2249_v60 = vsub.f32 1.5, %v2248_v40  ;;  %v2257_v7 = vmul.f32 %v9752_v50, %v2256_v47 }
 0x3b9   :  { %v2244_v61 = vsel %vm9779_vm13, %v9696_v19, %v2240_v21 }
 0x3ba   :  { %v2874_v45 = vpop.f32.mrf.mxu1  ;;  %v2443_v9 = vmul.f32 %v2244_v61, %v9095_v31 }
 0x3bb   :  { %v9691_v13 = vmax.f32 %v2874_v45, 0.0  ;;  %v9755_v45 = vmax.f32 %v1357_v42, 0.0 }
 0x3bc   :  { %7181 = vmatmul.msk.bf16.gmra.mxu3 %vm1498_vm3, %v2481_v11  ;;  %v7981_v11 = vld [vmem:[%s13208_s0 + $0x50] sm:$0xff] }
 0x3bd   :  { %7200 = vmatmul.msk.bf16.gmra.mxu1 %vm733_vm2, %v7980_v53  ;;  %v3326_v1 = vmul.f32 %v9691_v13, %v9691_v13  ;;  %v2250_v53 = vmul.f32 %v9693_v17, %v2249_v60  ;;  %v1493_v15 = vmul.f32 %v9755_v45, %v9755_v45 }
 0x3bf   :  { %v9711_v24 = vpop.f32.mrf.mxu3  ;;  %v3394_v37 = vsel %vm1498_vm3, %v3326_v1, 0.0  ;;  %v2266_v1 = vmul.f32 %v9748_v20, %v9722_v8  ;;  %v1362_v59 = vpop.f32.mrf.mxu2  ;;  %v1676_v40 = vsel %vm1498_vm3, %v1493_v15, 0.0 }
 0x3c0   :  { %3395 = vadd.xlane.f32.xlu1 %v3394_v37  ;;  %1668 = vadd.xlane.f32.xlu0 %v1667_v10  ;;  %v1660_v10 = vpop.xlane.xlu2 %1659  ;;  %v2800_v60 = vpack.c.bf16 %v9711_v24, %v9711_v24  ;;  %v9824_v21 = vmax.f32 %v1362_v59, 0.0  ;;  %v1666_v59 = vpop.xlane.xlu1 %1665 }
 0x3c1   :  { %v9785_v0 = vmax.f32 %v1660_v10, 1e-24  ;;  %v2267_v44 = vmul.f32 %v9748_v20, %v2266_v1  ;;  %v2799_v10 = vpack.c.bf16 %v9685_v51, %v9685_v51 }
 0x3c2   :  { %v2876_v48 = vpop.f32.mrf.mxu1  ;;  %v3007_v15 = vunpack.c.l.b16 %v2800_v60 }
 0x3c3   :  { %v9728_v29 = vmax.f32 %v2876_v48, 0.0  ;;  %v2254_v48 = vsel %vm9773_vm12, %v9693_v17, %v2250_v53  ;;  %7690 = vrsqrt.f32 %v9785_v0  ;;  %v2268_v63 = vmul.f32 0.5, %v2267_v44 }
 0x3c4   :  { %v2444_v17 = vmul.f32 %v2254_v48, %v9146_v4  ;;  %vm2291_vm6 = vweird.f32 %v9785_v0 }
 0x3c5   :  { %v3327_v12 = vmul.f32 %v9728_v29, %v9728_v29 }
 0x3c7   :  { %v9740_v30 = vpop.f32.mrf.mxu3  ;;  %v3397_v58 = vsel %vm1498_vm3, %v3327_v12, 0.0  ;;  %v9797_v12 = vmax.f32 %v1657_v36, 1e-24  ;;  %v1365_v24 = vpop.f32.mrf.mxu2  ;;  %v2798_v36 = vpack.c.bf16 %v9658_v5, %v9658_v5 }
 0x3c8   :  { %3398 = vadd.xlane.f32.xlu2 %v3397_v58  ;;  %1671 = vadd.xlane.f32.xlu1 %v1670_v57  ;;  %v9799_v57 = vmax.f32 %v1360_v41, 0.0  ;;  %v2801_v41 = vpack.c.bf16 %v9740_v30, %v9740_v30 }
 0x3c9   :  { %7692 = vrsqrt.f32 %v9797_v12  ;;  %v9818_v1 = vpop.eup %7690  ;;  %vm2281_vm8 = vweird.f32 %v9797_v12 }
 0x3ca   :  { %v2879_v62 = vpop.f32.mrf.mxu1  ;;  %v1494_v4 = vmul.f32 %v9799_v57, %v9799_v57  ;;  %v2286_v48 = vmul.f32 %v9818_v1, %v9785_v0  ;;  %vm2292_vm7 = vweird.f32 %v9818_v1 }
 0x3cb   :  { %v9746_v6 = vmax.f32 %v2879_v62, 0.0  ;;  %v2258_v62 = vmul.f32 0.5, %v2257_v7  ;;  %vm2293_vm10 = vmor %vm2291_vm6, %vm2292_vm7 }
 0x3cc   :  { %7182 = vmatmul.msk.bf16.gmra.mxu3 %vm1498_vm3, %v2482_v32  ;;  %v1679_v51 = vsel %vm1498_vm3, %v1494_v4, 0.0 }
 0x3cd   :  { %7201 = vmatmul.msk.bf16.gmra.mxu1 %vm733_vm2, %v7981_v11  ;;  %v3328_v28 = vmul.f32 %v9746_v6, %v9746_v6  ;;  %v2259_v30 = vsub.f32 1.5, %v2258_v62 }
 0x3cf   :  { %v2687_v42 = vpop.f32.mrf.mxu3  ;;  %v3400_v39 = vsel %vm1498_vm3, %v3328_v28, 0.0  ;;  %v2483_v28 = vpack.c.bf16 %v2444_v17, %v2443_v9  ;;  %v9833_v37 = vpop.eup %7692  ;;  %v2260_v7 = vmul.f32 %v9752_v50, %v2259_v30 }
 0x3d0   :  { %3401 = vadd.xlane.f32.xlu2 %v3400_v39  ;;  %1674 = vadd.xlane.f32.xlu1 %v1673_v33  ;;  %v2802_v58 = vpack.c.bf16 %v2687_v42, %v2687_v42  ;;  %v2269_v33 = vsub.f32 1.5, %v2268_v63  ;;  %v3008_v42 = vunpack.c.l.b16 %v2801_v41  ;;  %v2276_v8 = vmul.f32 %v9833_v37, %v9797_v12  ;;  %v1663_v9 = vpop.xlane.xlu0 %1662 }
 0x3d1   :  { %v1495_v63 = vmul.f32 %v9824_v21, %v9824_v21  ;;  %v2287_v41 = vmul.f32 %v9818_v1, %v2286_v48  ;;  %v2264_v4 = vsel %vm9860_vm5, %v9752_v50, %v2260_v7  ;;  %v9881_v60 = vmax.f32 %v1663_v9, 1e-24  ;;  %v1367_v50 = vpop.f32.mrf.mxu2 }
 0x3d2   :  { %v2881_v43 = vpop.f32.mrf.mxu1  ;;  %v3009_v31 = vunpack.c.l.b16 %v2802_v58  ;;  %v3013_v17 = vpack.c.b16 %v3008_v42, %v3007_v15  ;;  %vm2282_vm9 = vweird.f32 %v9833_v37 }
 0x3d3   :  { %v9791_v46 = vmax.f32 %v2881_v43, 0.0  ;;  %v2270_v43 = vmul.f32 %v9748_v20, %v2269_v33  ;;  %vm2283_vm11 = vmor %vm2281_vm8, %vm2282_vm9  ;;  %vm2301_vm14 = vweird.f32 %v9881_v60 }
 0x3d5   :  { %v3329_v14 = vmul.f32 %v9791_v46, %v9791_v46  ;;  %v2274_v18 = vsel %vm9850_vm4, %v9748_v20, %v2270_v43  ;;  %v1682_v20 = vsel %vm1498_vm3, %v1495_v63, 0.0 }
 0x3d6   :  { %v2446_v33 = vmul.f32 %v2274_v18, %v9199_v52 }
 0x3d7   :  { %v2689_v19 = vpop.f32.mrf.mxu3  ;;  %v3403_v27 = vsel %vm1498_vm3, %v3329_v14, 0.0  ;;  %v2797_v14 = vpack.c.bf16 %v9637_v23, %v9637_v23  ;;  %v9868_v23 = vmax.f32 %v1666_v59, 1e-24  ;;  %v7983_v59 = vld [vmem:[%s13208_s0 + $0x60] sm:$0xff] }
 0x3d8   :  { %v2803_v32 = vpack.c.bf16 %v2689_v19, %v2689_v19  ;;  %3404 = vadd.xlane.f32.xlu0 %v3403_v27  ;;  %1677 = vadd.xlane.f32.xlu2 %v1676_v40  ;;  %v3006_v40 = vunpack.c.l.b16 %v2799_v10  ;;  %v2796_v19 = vpack.c.bf16 %v9607_v26, %v9607_v26  ;;  %v3005_v27 = vunpack.c.l.b16 %v2798_v36 }
 0x3d9   :  { %v2277_v26 = vmul.f32 %v9833_v37, %v2276_v8  ;;  %7694 = vrsqrt.f32 %v9868_v23  ;;  %v2288_v10 = vmul.f32 0.5, %v2287_v41  ;;  %v9921_v8 = vmax.f32 %v1367_v50, 0.0 }
 0x3da   :  { %v3010_v54 = vunpack.c.l.b16 %v2803_v32  ;;  %v2884_v11 = vpop.f32.mrf.mxu1  ;;  %v3003_v30 = vunpack.c.l.b16 %v2796_v19  ;;  %7696 = vrsqrt.f32 %v9881_v60  ;;  %vm2311_vm12 = vweird.f32 %v9868_v23 }
 0x3db   :  { %v9816_v53 = vmax.f32 %v2884_v11, 0.0  ;;  %v9884_v11 = vmax.f32 %v1365_v24, 0.0  ;;  %v2445_v24 = vmul.f32 %v2264_v4, %v9163_v22  ;;  %v2289_v36 = vsub.f32 1.5, %v2288_v10 }
 0x3dc   :  { %v3014_v39 = vpack.c.b16 %v3010_v54, %v3009_v31  ;;  %7183 = vmatmul.msk.bf16.gmra.mxu3 %vm1498_vm3, %v2483_v28  ;;  %v3004_v31 = vunpack.c.l.b16 %v2797_v14  ;;  %v3012_v54 = vpack.c.b16 %v3006_v40, %v3005_v27  ;;  %v1497_v4 = vmul.f32 %v9921_v8, %v9921_v8 }
 0x3dd   :  { %7202 = vmatmul.msk.bf16.gmra.mxu1 %vm733_vm2, %v7982_v55  ;;  %v3330_v47 = vmul.f32 %v9816_v53, %v9816_v53  ;;  %v1496_v52 = vmul.f32 %v9884_v11, %v9884_v11  ;;  %v2290_v0 = vmul.f32 %v9818_v1, %v2289_v36 }
 0x3de   :  { %3023 = vmatpush.bf16.msrb.mxu2 %v3014_v39  ;;  %v3011_v55 = vpack.c.b16 %v3004_v31, %v3003_v30  ;;  %v7984_v30 = vld [vmem:[%s13208_s0 + $0x68] sm:$0xff] }
 0x3df   :  { %v9842_v44 = vpop.f32.mrf.mxu3  ;;  %v3406_v61 = vsel %vm1498_vm3, %v3330_v47, 0.0  ;;  %v2278_v47 = vmul.f32 0.5, %v2277_v26  ;;  %v9898_v15 = vpop.eup %7694  ;;  %v1685_v22 = vsel %vm1498_vm3, %v1496_v52, 0.0  ;;  %v2294_v58 = vsel %vm2293_vm10, %v9818_v1, %v2290_v0 }
 0x3e0   :  { %3407 = vadd.xlane.f32.xlu0 %v3406_v61  ;;  %1680 = vadd.xlane.f32.xlu2 %v1679_v51  ;;  %v2484_v51 = vpack.c.bf16 %v2446_v33, %v2445_v24  ;;  %v7697_v48 = vpop.eup %7696  ;;  %v2306_v61 = vmul.f32 %v9898_v15, %v9868_v23  ;;  %vm2312_vm13 = vweird.f32 %v9898_v15 }
 0x3e1   :  { %v2279_v43 = vsub.f32 1.5, %v2278_v47  ;;  %v2296_v40 = vmul.f32 %v7697_v48, %v9881_v60  ;;  %vm2302_vm15 = vweird.f32 %v7697_v48  ;;  %vm2313_vm0 = vmor %vm2311_vm12, %vm2312_vm13 }
 0x3e2   :  { %v2886_v62 = vpop.f32.mrf.mxu1  ;;  %3024 = vmatpush.bf16.msrb.mxu2 %v3013_v17  ;;  %v2307_v12 = vmul.f32 %v9898_v15, %v2306_v61  ;;  %vm2303_vm1 = vmor %vm2301_vm14, %vm2302_vm15 }
 0x3e3   :  { %v9876_v32 = vmax.f32 %v2886_v62, 0.0  ;;  %v2280_v14 = vmul.f32 %v9833_v37, %v2279_v43  ;;  %v2297_v19 = vmul.f32 %v7697_v48, %v2296_v40  ;;  %v2448_v62 = vmul.f32 %v2294_v58, %v9263_v2 }
 0x3e4   :  { %v2308_v18 = vmul.f32 0.5, %v2307_v12  ;;  %v1688_v2 = vsel %vm1498_vm3, %v1497_v4, 0.0 }
 0x3e5   :  { %v3331_v28 = vmul.f32 %v9876_v32, %v9876_v32  ;;  %v2284_v63 = vsel %vm2283_vm11, %v9833_v37, %v2280_v14 }
 0x3e6   :  { %3025 = vmatpush.bf16.msrb.mxu2 %v3012_v54  ;;  %v2447_v1 = vmul.f32 %v2284_v63, %v9220_v35  ;;  %v2298_v54 = vmul.f32 0.5, %v2297_v19  ;;  %v2309_v37 = vsub.f32 1.5, %v2308_v18 }
 0x3e7   :  { %v9891_v42 = vpop.f32.mrf.mxu3  ;;  %v3409_v39 = vsel %vm1498_vm3, %v3331_v28, 0.0 }
 0x3e8   :  { %3410 = vadd.xlane.f32.xlu1 %v3409_v39  ;;  %1683 = vadd.xlane.f32.xlu0 %v1682_v20  ;;  %v2485_v28 = vpack.c.bf16 %v2448_v62, %v2447_v1  ;;  %v2299_v33 = vsub.f32 1.5, %v2298_v54  ;;  %v2310_v50 = vmul.f32 %v9898_v15, %v2309_v37  ;;  %v7986_v37 = vld [vmem:[%s13208_s0 + $0x78] sm:$0xff] }
 0x3ea   :  { %3026 = vmatpush.bf16.msrb.mxu2 %v3011_v55  ;;  %v2300_v39 = vmul.f32 %v7697_v48, %v2299_v33  ;;  %v2314_v55 = vsel %vm2313_vm0, %v9898_v15, %v2310_v50  ;;  %v7985_v15 = vld [vmem:[%s13208_s0 + $0x70] sm:$0xff] }
 0x3eb   :  { %v2450_v60 = vmul.f32 %v2314_v55, %v9230_v3 }
 0x3ec   :  { %7184 = vmatmul.msk.bf16.gmra.mxu3 %vm1498_vm3, %v2484_v51  ;;  %v2304_v52 = vsel %vm2303_vm1, %v7697_v48, %v2300_v39  ;;  %v2804_v39 = vpack.c.bf16 %v9842_v44, %v9842_v44 }
 0x3ed   :  { %7203 = vmatmul.msk.bf16.vlgmr.msrb.gmra.mxu2 %vm733_vm2, %v7983_v59  ;;  %v2449_v43 = vmul.f32 %v2304_v52, %v9209_v16 }
 0x3ef   :  { %v9913_v7 = vpop.f32.mrf.mxu3  ;;  %v2486_v61 = vpack.c.bf16 %v2450_v60, %v2449_v43 }
 0x3f0   :  { %1686 = vadd.xlane.f32.xlu0 %v1685_v22  ;;  %v2922_v5 = vpop.f32.mrf.mxu2 }
 0x3f1   :  { %v9917_v17 = vmax.f32 %v2922_v5, 0.0 }
 0x3f3   :  { %v3332_v9 = vmul.f32 %v9917_v17, %v9917_v17 }
 0x3f5   :  { %v3412_v27 = vsel %vm1498_vm3, %v3332_v9, 0.0 }
 0x3f6   :  { %3413 = vadd.xlane.f32.xlu1 %v3412_v27 }
 0x3f7   :  { %v9928_v41 = vpop.f32.mrf.mxu3 }
 0x3f8   :  { %v2924_v31 = vpop.f32.mrf.mxu2 }
 0x3f9   :  { %v9933_v26 = vmax.f32 %v2924_v31, 0.0  ;;  %v2807_v31 = vpack.c.bf16 %v9928_v41, %v9928_v41  ;;  %v2805_v41 = vpack.c.bf16 %v9891_v42, %v9891_v42  ;;  %v3056_v42 = vunpack.c.l.b16 %v2804_v39 }
 0x3fb   :  { %v3333_v20 = vmul.f32 %v9933_v26, %v9933_v26  ;;  %v3057_v52 = vunpack.c.l.b16 %v2805_v41 }
 0x3fc   :  { %7185 = vmatmul.msk.bf16.gmra.mxu3 %vm1498_vm3, %v2485_v28 }
 0x3fd   :  { %v3415_v35 = vsel %vm1498_vm3, %v3333_v20, 0.0  ;;  %7204 = vmatmul.msk.bf16.gmra.mxu2 %vm733_vm2, %v7984_v30  ;;  %v3059_v30 = vunpack.c.l.b16 %v2807_v31 }
 0x3fe   :  { %3416 = vadd.xlane.f32.xlu2 %v3415_v35  ;;  %1689 = vadd.xlane.f32.xlu1 %v1688_v2  ;;  %v2806_v2 = vpack.c.bf16 %v9913_v7, %v9913_v7 }
 0x3ff   :  { %v2702_v10 = vpop.f32.mrf.mxu3 }
 0x400   :  { %v2927_v23 = vpop.f32.mrf.mxu2  ;;  %v2808_v62 = vpack.c.bf16 %v2702_v10, %v2702_v10  ;;  %v3058_v55 = vunpack.c.l.b16 %v2806_v2 }
 0x401   :  { %v9948_v24 = vmax.f32 %v2927_v23, 0.0 }
 0x402   :  { %v3060_v33 = vunpack.c.l.b16 %v2808_v62  ;;  %v3065_v60 = vpack.c.b16 %v3059_v30, %v3058_v55 }
 0x403   :  { %v3334_v47 = vmul.f32 %v9948_v24, %v9948_v24 }
 0x405   :  { %v3418_v51 = vsel %vm1498_vm3, %v3334_v47, 0.0 }
 0x406   :  { %3419 = vadd.xlane.f32.xlu2 %v3418_v51 }
 0x407   :  { %v2704_v36 = vpop.f32.mrf.mxu3 }
 0x408   :  { %v2929_v22 = vpop.f32.mrf.mxu2  ;;  %v2809_v9 = vpack.c.bf16 %v2704_v36, %v2704_v36 }
 0x409   :  { %v9956_v59 = vmax.f32 %v2929_v22, 0.0  ;;  %v3064_v22 = vpack.c.b16 %v3057_v52, %v3056_v42 }
 0x40a   :  { %v3061_v54 = vunpack.c.l.b16 %v2809_v9 }
 0x40b   :  { %v3335_v0 = vmul.f32 %v9956_v59, %v9956_v59 }
 0x40c   :  { %7186 = vmatmul.msk.bf16.gmra.mxu3 %vm1498_vm3, %v2486_v61  ;;  %v3066_v50 = vpack.c.b16 %v3061_v54, %v3060_v33 }
 0x40d   :  { %7205 = vmatmul.msk.bf16.gmra.mxu2 %vm733_vm2, %v7985_v15  ;;  %v3421_v3 = vsel %vm1498_vm3, %v3335_v0, 0.0 }
 0x40e   :  { %3422 = vadd.xlane.f32.xlu0 %v3421_v3 }
 0x40f   :  { %v2707_v48 = vpop.f32.mrf.mxu3 }
 0x410   :  { %v2932_v16 = vpop.f32.mrf.mxu2  ;;  %v2810_v12 = vpack.c.bf16 %v2707_v48, %v2707_v48 }
 0x411   :  { %v9966_v5 = vmax.f32 %v2932_v16, 0.0 }
 0x412   :  { %v3062_v18 = vunpack.c.l.b16 %v2810_v12  ;;  %v7987_v12 = vld [vmem:[%s13208_s0 + $0x80] sm:$0xff] }
 0x413   :  { %v3336_v14 = vmul.f32 %v9966_v5, %v9966_v5 }
 0x415   :  { %v3424_v40 = vsel %vm1498_vm3, %v3336_v14, 0.0 }
 0x416   :  { %3425 = vadd.xlane.f32.xlu1 %v3424_v40 }
 0x417   :  { %v2709_v58 = vpop.f32.mrf.mxu3 }
 0x418   :  { %v2811_v63 = vpack.c.bf16 %v2709_v58, %v2709_v58  ;;  %v2934_v19 = vpop.f32.mrf.mxu2 }
 0x419   :  { %v9971_v27 = vmax.f32 %v2934_v19, 0.0 }
 0x41a   :  { %v3063_v4 = vunpack.c.l.b16 %v2811_v63 }
 0x41b   :  { %v3337_v1 = vmul.f32 %v9971_v27, %v9971_v27 }
 0x41c   :  { %v3067_v28 = vpack.c.b16 %v3063_v4, %v3062_v18 }
 0x41d   :  { %7206 = vmatmul.msk.bf16.gmra.mxu2 %vm733_vm2, %v7986_v37  ;;  %v3427_v20 = vsel %vm1498_vm3, %v3337_v1, 0.0 }
 0x41e   :  { %3076 = vmatpush.bf16.msrb.mxu1 %v3067_v28  ;;  %3428 = vadd.xlane.f32.xlu2 %v3427_v20 }
 0x41f   :  { %v9984_v35 = vpop.f32.mrf.mxu3 }
 0x420   :  { %v2937_v10 = vpop.f32.mrf.mxu2 }
 0x421   :  { %v9988_v23 = vmax.f32 %v2937_v10, 0.0 }
 0x422   :  { %3077 = vmatpush.bf16.msrb.mxu1 %v3066_v50 }
 0x423   :  { %v3390_v47 = vpop.xlane.xlu2 %3389  ;;  %v3338_v7 = vmul.f32 %v9988_v23, %v9988_v23 }
 0x424   :  { %v3580_v51 = vmax.f32 %v3390_v47, 1e-24 }
 0x425   :  { %v3430_v36 = vsel %vm1498_vm3, %v3338_v7, 0.0 }
 0x426   :  { %7698 = vrsqrt.f32 %v3580_v51  ;;  %3078 = vmatpush.bf16.msrb.mxu1 %v3065_v60  ;;  %3431 = vadd.xlane.f32.xlu0 %v3430_v36  ;;  %vm3650_vm4 = vweird.f32 %v3580_v51 }
 0x427   :  { %v9995_v43 = vpop.f32.mrf.mxu3 }
 0x428   :  { %v2939_v61 = vpop.f32.mrf.mxu2 }
 0x429   :  { %v9997_v44 = vmax.f32 %v2939_v61, 0.0 }
 0x42a   :  { %v2975_v0 = vpop.f32.mrf.mxu1  ;;  %3079 = vmatpush.bf16.msrb.mxu1 %v3064_v22 }
 0x42b   :  { %v9999_v15 = vmax.f32 %v2975_v0, 0.0  ;;  %v3393_v3 = vpop.xlane.xlu0 %3392  ;;  %v3339_v48 = vmul.f32 %v9997_v44, %v9997_v44 }
 0x42c   :  { %v7699_v16 = vpop.eup %7698  ;;  %v3581_v14 = vmax.f32 %v3393_v3, 1e-24 }
 0x42d   :  { %v3645_v40 = vmul.f32 %v7699_v16, %v3580_v51  ;;  %7207 = vmatmul.msk.bf16.vlgmr.msrb.gmra.mxu1 %vm733_vm2, %v7987_v12  ;;  %v3340_v58 = vmul.f32 %v9999_v15, %v9999_v15  ;;  %v3433_v9 = vsel %vm1498_vm3, %v3339_v48, 0.0  ;;  %vm3651_vm5 = vweird.f32 %v7699_v16  ;;  %v7988_v12 = vld [vmem:[%s13208_s0 + $0x88] sm:$0xff] }
 0x42e   :  { %7700 = vrsqrt.f32 %v3581_v14  ;;  %3434 = vadd.xlane.f32.xlu1 %v3433_v9  ;;  %vm3660_vm6 = vweird.f32 %v3581_v14  ;;  %vm10026_vm8 = vmor %vm3650_vm4, %vm3651_vm5 }
 0x42f   :  { %v3646_v63 = vmul.f32 %v7699_v16, %v3645_v40  ;;  %v10010_v19 = vpop.f32.mrf.mxu3  ;;  %v3436_v62 = vsel %vm1498_vm3, %v3340_v58, 0.0 }
 0x430   :  { %3437 = vadd.xlane.f32.xlu2 %v3436_v62 }
 0x431   :  { %v3647_v18 = vmul.f32 0.5, %v3646_v63 }
 0x432   :  { %v2977_v4 = vpop.f32.mrf.mxu1 }
 0x433   :  { %v10013_v1 = vmax.f32 %v2977_v4, 0.0  ;;  %v3396_v31 = vpop.xlane.xlu1 %3395  ;;  %v1669_v54 = vpop.xlane.xlu0 %1668  ;;  %v3648_v2 = vsub.f32 1.5, %v3647_v18 }
 0x434   :  { %v7701_v28 = vpop.eup %7700  ;;  %v10015_v37 = vmax.f32 %v3396_v31, 1e-24  ;;  %v10017_v20 = vmax.f32 %v1669_v54, 1e-24 }
 0x435   :  { %v3655_v33 = vmul.f32 %v7701_v28, %v3581_v14  ;;  %v3341_v41 = vmul.f32 %v10013_v1, %v10013_v1  ;;  %v3649_v39 = vmul.f32 %v7699_v16, %v3648_v2  ;;  %vm3661_vm7 = vweird.f32 %v7701_v28 }
 0x436   :  { %7702 = vrsqrt.f32 %v10015_v37  ;;  %vm10034_vm9 = vmor %vm3660_vm6, %vm3661_vm7  ;;  %vm3670_vm10 = vweird.f32 %v10015_v37  ;;  %vm2321_vm12 = vweird.f32 %v10017_v20 }
 0x437   :  { %v3656_v30 = vmul.f32 %v7701_v28, %v3655_v33  ;;  %7704 = vrsqrt.f32 %v10017_v20  ;;  %v10023_v50 = vpop.f32.mrf.mxu3  ;;  %v3439_v10 = vsel %vm1498_vm3, %v3341_v41, 0.0  ;;  %v3653_v48 = vsel %vm10026_vm8, %v7699_v16, %v3649_v39 }
 0x438   :  { %3440 = vadd.xlane.f32.xlu0 %v3439_v10  ;;  %v10064_v18 = vmul.f32 %v3653_v48, %v9641_v25 }
 0x439   :  { %v3657_v55 = vmul.f32 0.5, %v3656_v30 }
 0x43a   :  { %v2980_v7 = vpop.f32.mrf.mxu1 }
 0x43b   :  { %v3658_v52 = vsub.f32 1.5, %v3657_v55  ;;  %v10030_v51 = vmax.f32 %v2980_v7, 0.0  ;;  %v3399_v60 = vpop.xlane.xlu2 %3398  ;;  %v1672_v36 = vpop.xlane.xlu1 %1671 }
 0x43c   :  { %v10032_v42 = vpop.eup %7702  ;;  %v10038_v61 = vmax.f32 %v3399_v60, 1e-24  ;;  %v10040_v0 = vmax.f32 %v1672_v36, 1e-24 }
 0x43d   :  { %v10042_v3 = vpop.eup %7704  ;;  %v3659_v14 = vmul.f32 %v7701_v28, %v3658_v52  ;;  %v3665_v40 = vmul.f32 %v10032_v42, %v10015_v37  ;;  %7208 = vmatmul.msk.bf16.gmra.mxu1 %vm733_vm2, %v7988_v12  ;;  %v3342_v58 = vmul.f32 %v10030_v51, %v10030_v51  ;;  %vm3671_vm11 = vweird.f32 %v10032_v42 }
 0x43e   :  { %v2316_v9 = vmul.f32 %v10042_v3, %v10017_v20  ;;  %7706 = vrsqrt.f32 %v10038_v61  ;;  %vm2322_vm13 = vweird.f32 %v10042_v3  ;;  %vm3680_vm14 = vweird.f32 %v10038_v61  ;;  %vm10094_vm0 = vmor %vm3670_vm10, %vm3671_vm11 }
 0x43f   :  { %v3663_v16 = vsel %vm10034_vm9, %v7701_v28, %v3659_v14  ;;  %v3666_v63 = vmul.f32 %v10032_v42, %v3665_v40  ;;  %7708 = vrsqrt.f32 %v10040_v0  ;;  %v10061_v62 = vpop.f32.mrf.mxu3  ;;  %v3442_v54 = vsel %vm1498_vm3, %v3342_v58, 0.0  ;;  %vm10102_vm5 = vmor %vm2321_vm12, %vm2322_vm13 }
 0x440   :  { %v10067_v4 = vmul.f32 %v3663_v16, %v9673_v38  ;;  %v2317_v31 = vmul.f32 %v10042_v3, %v2316_v9  ;;  %3443 = vadd.xlane.f32.xlu1 %v3442_v54  ;;  %vm2331_vm1 = vweird.f32 %v10040_v0  ;;  %v2815_v9 = vpack.c.bf16 %v10023_v50, %v10023_v50 }
 0x441   :  { %v3667_v2 = vmul.f32 0.5, %v3666_v63 }
 0x442   :  { %v4348_v28 = vpack.c.bf16 %v10067_v4, %v10064_v18  ;;  %v2318_v33 = vmul.f32 0.5, %v2317_v31  ;;  %v2982_v41 = vpop.f32.mrf.mxu1 }
 0x443   :  { %v10073_v30 = vmax.f32 %v2982_v41, 0.0  ;;  %v3402_v10 = vpop.xlane.xlu2 %3401  ;;  %v1675_v39 = vpop.xlane.xlu1 %1674  ;;  %v3668_v7 = vsub.f32 1.5, %v3667_v2 }
 0x444   :  { %v7707_v25 = vpop.eup %7706  ;;  %v10075_v55 = vmax.f32 %v3402_v10, 1e-24  ;;  %v10077_v38 = vmax.f32 %v1675_v39, 1e-24  ;;  %v2319_v36 = vsub.f32 1.5, %v2318_v33 }
 0x445   :  { %v7709_v47 = vpop.eup %7708  ;;  %v3675_v52 = vmul.f32 %v7707_v25, %v10038_v61  ;;  %v3343_v60 = vmul.f32 %v10073_v30, %v10073_v30  ;;  %v3669_v12 = vmul.f32 %v10032_v42, %v3668_v7  ;;  %vm3681_vm15 = vweird.f32 %v7707_v25 }
 0x446   :  { %v2326_v22 = vmul.f32 %v7709_v47, %v10040_v0  ;;  %7710 = vrsqrt.f32 %v10075_v55  ;;  %v2320_v16 = vmul.f32 %v10042_v3, %v2319_v36  ;;  %vm2332_vm4 = vweird.f32 %v7709_v47  ;;  %vm10113_vm6 = vmor %vm3680_vm14, %vm3681_vm15 }
 0x447   :  { %v3676_v48 = vmul.f32 %v7707_v25, %v3675_v52  ;;  %7712 = vrsqrt.f32 %v10077_v38  ;;  %v10087_v14 = vpop.f32.mrf.mxu3  ;;  %v3445_v37 = vsel %vm1498_vm3, %v3343_v60, 0.0  ;;  %vm10129_vm7 = vmor %vm2331_vm1, %vm2332_vm4  ;;  %vm3690_vm8 = vweird.f32 %v10075_v55 }
 0x448   :  { %v2327_v40 = vmul.f32 %v7709_v47, %v2326_v22  ;;  %3446 = vadd.xlane.f32.xlu2 %v3445_v37  ;;  %v3673_v22 = vsel %vm10094_vm0, %v10032_v42, %v3669_v12  ;;  %v2324_v0 = vsel %vm10102_vm5, %v10042_v3, %v2320_v16  ;;  %vm2341_vm9 = vweird.f32 %v10077_v38 }
 0x449   :  { %v3677_v58 = vmul.f32 0.5, %v3676_v48  ;;  %v10154_v54 = vmul.f32 %v3673_v22, %v9691_v13  ;;  %v2451_v50 = vmul.f32 %v2324_v0, %v9678_v49  ;;  %v2814_v13 = vpack.c.bf16 %v10010_v19, %v10010_v19 }
 0x44a   :  { %v2328_v63 = vmul.f32 0.5, %v2327_v40  ;;  %v2985_v31 = vpop.f32.mrf.mxu1  ;;  %v10171_v22 = vunpack.c.l.b16 %v2815_v9 }
 0x44b   :  { %v3678_v2 = vsub.f32 1.5, %v3677_v58  ;;  %v10106_v33 = vmax.f32 %v2985_v31, 0.0  ;;  %v3405_v41 = vpop.xlane.xlu0 %3404  ;;  %v1678_v10 = vpop.xlane.xlu2 %1677  ;;  %v7989_v58 = vld [vmem:[%s13208_s0 + $0x90] sm:$0xff] }
 0x44c   :  { %v10108_v39 = vpop.eup %7710  ;;  %v2329_v52 = vsub.f32 1.5, %v2328_v63  ;;  %v10117_v20 = vmax.f32 %v3405_v41, 1e-24  ;;  %v10119_v60 = vmax.f32 %v1678_v10, 1e-24 }
 0x44d   :  { %v10121_v36 = vpop.eup %7712  ;;  %v3679_v48 = vmul.f32 %v7707_v25, %v3678_v2  ;;  %v3685_v40 = vmul.f32 %v10108_v39, %v10075_v55  ;;  %7209 = vmatmul.msk.bf16.gmra.mxu1 %vm733_vm2, %v7989_v58  ;;  %v3344_v42 = vmul.f32 %v10106_v33, %v10106_v33  ;;  %vm3691_vm10 = vweird.f32 %v10108_v39 }
 0x44e   :  { %v2330_v12 = vmul.f32 %v7709_v47, %v2329_v52  ;;  %v2336_v37 = vmul.f32 %v10121_v36, %v10077_v38  ;;  %7714 = vrsqrt.f32 %v10117_v20  ;;  %v2813_v52 = vpack.c.bf16 %v9995_v43, %v9995_v43  ;;  %vm10206_vm13 = vmor %vm3690_vm8, %vm3691_vm10 }
 0x44f   :  { %v3683_v63 = vsel %vm10113_vm6, %v7707_v25, %v3679_v48  ;;  %v3686_v31 = vmul.f32 %v10108_v39, %v3685_v40  ;;  %7716 = vrsqrt.f32 %v10119_v60  ;;  %v2727_v2 = vpop.f32.mrf.mxu3  ;;  %v3448_v7 = vsel %vm1498_vm3, %v3344_v42, 0.0 }
 0x450   :  { %v10157_v3 = vmul.f32 %v3683_v63, %v9728_v29  ;;  %v2334_v16 = vsel %vm10129_vm7, %v7709_v47, %v2330_v12  ;;  %v2337_v41 = vmul.f32 %v10121_v36, %v2336_v37  ;;  %3449 = vadd.xlane.f32.xlu0 %v3448_v7  ;;  %v2816_v42 = vpack.c.bf16 %v10061_v62, %v10061_v62 }
 0x451   :  { %v2452_v25 = vmul.f32 %v2334_v16, %v9698_v34  ;;  %v3687_v10 = vmul.f32 0.5, %v3686_v31  ;;  %v2817_v62 = vpack.c.bf16 %v10087_v14, %v10087_v14  ;;  %vm2342_vm11 = vweird.f32 %v10121_v36 }
 0x452   :  { %v2987_v29 = vpop.f32.mrf.mxu1  ;;  %v2338_v48 = vmul.f32 0.5, %v2337_v41  ;;  %vm3700_vm12 = vweird.f32 %v10117_v20  ;;  %vm2351_vm15 = vweird.f32 %v10119_v60  ;;  %vm10219_vm1 = vmor %vm2341_vm9, %vm2342_vm11  ;;  %v13324_v18 = vpack.c.bf16 %v10157_v3, %v10154_v54 }
 0x453   :  { %v10173_v49 = vmax.f32 %v2987_v29, 0.0  ;;  %v3408_v34 = vpop.xlane.xlu0 %3407  ;;  %v1681_v61 = vpop.xlane.xlu2 %1680  ;;  %v2487_v40 = vpack.c.bf16 %v2452_v25, %v2451_v50  ;;  %v3688_v0 = vsub.f32 1.5, %v3687_v10  ;;  %v2818_v25 = vpack.c.bf16 %v2727_v2, %v2727_v2 }
 0x454   :  { %v10175_v58 = vpop.eup %7714  ;;  %v10179_v12 = vmax.f32 %v3408_v34, 1e-24  ;;  %v10181_v37 = vmax.f32 %v1681_v61, 1e-24  ;;  %v2339_v41 = vsub.f32 1.5, %v2338_v48  ;;  %v3114_v61 = vunpack.c.l.b16 %v2817_v62 }
 0x455   :  { %v10183_v63 = vpop.eup %7716  ;;  %v3695_v9 = vmul.f32 %v10175_v58, %v10117_v20  ;;  %7187 = vmatmul.msk.bf16.gmra.mxu3 %vm1498_vm3, %v2487_v40  ;;  %v3345_v31 = vmul.f32 %v10173_v49, %v10173_v49  ;;  %v3689_v7 = vmul.f32 %v10108_v39, %v3688_v0  ;;  %vm3701_vm14 = vweird.f32 %v10175_v58 }
 0x456   :  { %v2346_v16 = vmul.f32 %v10183_v63, %v10119_v60  ;;  %7718 = vrsqrt.f32 %v10179_v12  ;;  %vm2352_vm0 = vweird.f32 %v10183_v63  ;;  %v2340_v55 = vmul.f32 %v10121_v36, %v2339_v41  ;;  %vm10232_vm4 = vmor %vm3700_vm12, %vm3701_vm14 }
 0x457   :  { %v3696_v50 = vmul.f32 %v10175_v58, %v3695_v9  ;;  %7720 = vrsqrt.f32 %v10181_v37  ;;  %v2729_v10 = vpop.f32.mrf.mxu3  ;;  %v3451_v34 = vsel %vm1498_vm3, %v3345_v31, 0.0  ;;  %v3115_v31 = vunpack.c.l.b16 %v2818_v25  ;;  %vm10247_vm5 = vmor %vm2351_vm15, %vm2352_vm0 }
 0x458   :  { %v2347_v14 = vmul.f32 %v10183_v63, %v2346_v16  ;;  %v2819_v2 = vpack.c.bf16 %v2729_v10, %v2729_v10  ;;  %3452 = vadd.xlane.f32.xlu1 %v3451_v34  ;;  %v3693_v34 = vsel %vm10206_vm13, %v10108_v39, %v3689_v7  ;;  %vm3710_vm6 = vweird.f32 %v10179_v12 }
 0x459   :  { %v3697_v48 = vmul.f32 0.5, %v3696_v50  ;;  %vm2361_vm8 = vweird.f32 %v10181_v37 }
 0x45a   :  { %v2348_v40 = vmul.f32 0.5, %v2347_v14  ;;  %v2990_v0 = vpop.f32.mrf.mxu1  ;;  %v3116_v62 = vunpack.c.l.b16 %v2819_v2 }
 0x45b   :  { %v3698_v16 = vsub.f32 1.5, %v3697_v48  ;;  %v3411_v50 = vpop.xlane.xlu1 %3410  ;;  %v1684_v10 = vpop.xlane.xlu0 %1683  ;;  %v10253_v29 = vmax.f32 %v2990_v0, 0.0 }
 0x45c   :  { %v10223_v14 = vpop.eup %7718  ;;  %v2349_v41 = vsub.f32 1.5, %v2348_v40  ;;  %v10236_v48 = vmax.f32 %v3411_v50, 1e-24  ;;  %v10238_v25 = vmax.f32 %v1684_v10, 1e-24  ;;  %v3120_v7 = vpack.c.b16 %v3116_v62, %v3115_v31  ;;  %v7990_v40 = vld [vmem:[%s13208_s0 + $0x98] sm:$0xff] }
 0x45d   :  { %v10240_v2 = vpop.eup %7720  ;;  %v3699_v47 = vmul.f32 %v10175_v58, %v3698_v16  ;;  %v3705_v20 = vmul.f32 %v10223_v14, %v10179_v12  ;;  %7210 = vmatmul.msk.bf16.gmra.mxu1 %vm733_vm2, %v7990_v40  ;;  %v3113_v16 = vunpack.c.l.b16 %v2816_v42  ;;  %v2344_v31 = vsel %vm10219_vm1, %v10121_v36, %v2340_v55 }
 0x45e   :  { %v2350_v50 = vmul.f32 %v10183_v63, %v2349_v41  ;;  %v2356_v60 = vmul.f32 %v10240_v2, %v10181_v37  ;;  %7722 = vrsqrt.f32 %v10236_v48  ;;  %3129 = vmatpush.bf16.msra.mxu2 %v3120_v7  ;;  %v10274_v10 = vmul.f32 %v3693_v34, %v9746_v6 }
 0x45f   :  { %v3703_v0 = vsel %vm10232_vm4, %v10175_v58, %v3699_v47  ;;  %v3706_v62 = vmul.f32 %v10223_v14, %v3705_v20  ;;  %7724 = vrsqrt.f32 %v10238_v25  ;;  %v10271_v42 = vpop.f32.mrf.mxu3  ;;  %v3346_v9 = vmul.f32 %v10253_v29, %v10253_v29 }
 0x460   :  { %v10277_v41 = vmul.f32 %v3703_v0, %v9791_v46  ;;  %v2354_v36 = vsel %vm10247_vm5, %v10183_v63, %v2350_v50  ;;  %v2357_v55 = vmul.f32 %v10240_v2, %v2356_v60  ;;  %v3119_v38 = vpack.c.b16 %v3114_v61, %v3113_v16 }
 0x461   :  { %v2454_v47 = vmul.f32 %v2354_v36, %v9755_v45  ;;  %v3707_v58 = vmul.f32 0.5, %v3706_v62  ;;  %v2812_v6 = vpack.c.bf16 %v9984_v35, %v9984_v35  ;;  %v2453_v34 = vmul.f32 %v2344_v31, %v9732_v56 }
 0x462   :  { %v2358_v46 = vmul.f32 0.5, %v2357_v55  ;;  %v2992_v20 = vpop.f32.mrf.mxu1  ;;  %v4350_v39 = vpack.c.bf16 %v10277_v41, %v10274_v10  ;;  %v3111_v63 = vunpack.c.l.b16 %v2814_v13  ;;  %v3454_v45 = vsel %vm1498_vm3, %v3346_v9, 0.0  ;;  %3130 = vmatpush.bf16.msra.mxu2 %v3119_v38 }
 0x463   :  { %v10295_v7 = vmax.f32 %v2992_v20, 0.0  ;;  %v1687_v61 = vpop.xlane.xlu0 %1686  ;;  %v3110_v56 = vunpack.c.l.b16 %v2813_v52  ;;  %3455 = vadd.xlane.f32.xlu2 %v3454_v45  ;;  %v2488_v16 = vpack.c.bf16 %v2454_v47, %v2453_v34  ;;  %v3708_v60 = vsub.f32 1.5, %v3707_v58 }
 0x464   :  { %v7723_v40 = vpop.eup %7722  ;;  %v10300_v35 = vmax.f32 %v1687_v61, 1e-24  ;;  %v3118_v13 = vpack.c.b16 %v10171_v22, %v3111_v63  ;;  %v3109_v0 = vunpack.c.l.b16 %v2812_v6  ;;  %v2359_v62 = vsub.f32 1.5, %v2358_v46 }
 0x465   :  { %v7725_v50 = vpop.eup %7724  ;;  %v3715_v19 = vmul.f32 %v7723_v40, %v10236_v48  ;;  %v3347_v31 = vmul.f32 %v10295_v7, %v10295_v7  ;;  %7188 = vmatmul.msk.bf16.gmra.mxu3 %vm1498_vm3, %v2488_v16  ;;  %vm3711_vm7 = vweird.f32 %v10223_v14  ;;  %vm2362_vm9 = vweird.f32 %v10240_v2 }
 0x466   :  { %v2366_v43 = vmul.f32 %v7725_v50, %v10238_v25  ;;  %7726 = vrsqrt.f32 %v10300_v35  ;;  %3131 = vmatpush.bf16.msra.mxu2 %v3118_v13  ;;  %v3117_v47 = vpack.c.b16 %v3110_v56, %v3109_v0  ;;  %v3709_v58 = vmul.f32 %v10223_v14, %v3708_v60  ;;  %vm10324_vm12 = vmor %vm3710_vm6, %vm3711_vm7  ;;  %v7991_v56 = vld [vmem:[%s13208_s0 + $0xa0] sm:$0xff] }
 0x467   :  { %v3716_v52 = vmul.f32 %v7723_v40, %v3715_v19  ;;  %v10311_v36 = vpop.f32.mrf.mxu3  ;;  %v3457_v22 = vsel %vm1498_vm3, %v3347_v31, 0.0  ;;  %vm3720_vm10 = vweird.f32 %v10236_v48  ;;  %vm3721_vm11 = vweird.f32 %v7723_v40  ;;  %vm10332_vm15 = vmor %vm2361_vm8, %vm2362_vm9 }
 0x468   :  { %v2367_v55 = vmul.f32 %v7725_v50, %v2366_v43  ;;  %3458 = vadd.xlane.f32.xlu0 %v3457_v22  ;;  %v2360_v34 = vmul.f32 %v10240_v2, %v2359_v62  ;;  %vm2371_vm13 = vweird.f32 %v10238_v25  ;;  %vm2372_vm14 = vweird.f32 %v7725_v50  ;;  %vm3722_vm0 = vmor %vm3720_vm10, %vm3721_vm11 }
 0x469   :  { %v3717_v9 = vmul.f32 0.5, %v3716_v52  ;;  %v10318_v38 = vpop.xlane.xlu1 %3413  ;;  %v3713_v45 = vsel %vm10324_vm12, %v10223_v14, %v3709_v58  ;;  %vm2373_vm1 = vmor %vm2371_vm13, %vm2372_vm14  ;;  %vm2381_vm4 = vweird.f32 %v10300_v35 }
 0x46a   :  { %v2368_v46 = vmul.f32 0.5, %v2367_v55  ;;  %3132 = vmatpush.bf16.msra.mxu2 %v3117_v47  ;;  %v2364_v25 = vsel %vm10332_vm15, %v10240_v2, %v2360_v34  ;;  %v10349_v19 = vmul.f32 %v3713_v45, %v9816_v53 }
 0x46b   :  { %v3718_v20 = vsub.f32 1.5, %v3717_v9  ;;  %v2455_v0 = vmul.f32 %v2364_v25, %v9799_v57 }
 0x46c   :  { %v2369_v12 = vsub.f32 1.5, %v2368_v46  ;;  %v7727_v63 = vpop.eup %7726 }
 0x46d   :  { %v3719_v61 = vmul.f32 %v7723_v40, %v3718_v20  ;;  %7211 = vmatmul.msk.bf16.vlgmr.msra.gmra.mxu2 %vm733_vm2, %v7991_v56  ;;  %v2376_v31 = vmul.f32 %v7727_v63, %v10300_v35  ;;  %vm2382_vm5 = vweird.f32 %v7727_v63 }
 0x46e   :  { %v2370_v37 = vmul.f32 %v7725_v50, %v2369_v12  ;;  %v7992_v12 = vld [vmem:[%s13208_s0 + $0xa8] sm:$0xff]  ;;  %vm2383_vm8 = vmor %vm2381_vm4, %vm2382_vm5 }
 0x46f   :  { %v3723_v16 = vsel %vm3722_vm0, %v7723_v40, %v3719_v61  ;;  %v10346_v60 = vpop.f32.mrf.mxu3  ;;  %v2377_v55 = vmul.f32 %v7727_v63, %v2376_v31 }
 0x470   :  { %v10352_v14 = vmul.f32 %v3723_v16, %v9876_v32  ;;  %v2374_v13 = vsel %vm2373_vm1, %v7725_v50, %v2370_v37  ;;  %v3028_v2 = vpop.f32.mrf.mxu2 }
 0x471   :  { %v2456_v62 = vmul.f32 %v2374_v13, %v9824_v21  ;;  %v1690_v43 = vpop.xlane.xlu1 %1689  ;;  %v10357_v52 = vmax.f32 %v3028_v2, 0.0  ;;  %v2378_v21 = vmul.f32 0.5, %v2377_v55 }
 0x472   :  { %v1754_v40 = vmax.f32 %v1690_v43, 1e-24 }
 0x473   :  { %v2489_v53 = vpack.c.bf16 %v2456_v62, %v2455_v0  ;;  %v3348_v32 = vmul.f32 %v10357_v52, %v10357_v52  ;;  %v2379_v34 = vsub.f32 1.5, %v2378_v21  ;;  %v7993_v21 = vld [vmem:[%s13208_s0 + $0xb0] sm:$0xff] }
 0x474   :  { %7728 = vrsqrt.f32 %v1754_v40  ;;  %vm2391_vm6 = vweird.f32 %v1754_v40 }
 0x475   :  { %7189 = vmatmul.msk.bf16.gmra.mxu3 %vm1498_vm3, %v2489_v53  ;;  %v3460_v50 = vsel %vm1498_vm3, %v3348_v32, 0.0  ;;  %v2380_v61 = vmul.f32 %v7727_v63, %v2379_v34 }
 0x476   :  { %3461 = vadd.xlane.f32.xlu1 %v3460_v50 }
 0x477   :  { %v10365_v57 = vpop.f32.mrf.mxu3  ;;  %v2384_v13 = vsel %vm2383_vm8, %v7727_v63, %v2380_v61 }
 0x478   :  { %v3030_v47 = vpop.f32.mrf.mxu2  ;;  %v2457_v62 = vmul.f32 %v2384_v13, %v9884_v11  ;;  %v2823_v13 = vpack.c.bf16 %v10365_v57, %v10365_v57 }
 0x479   :  { %v10367_v58 = vmax.f32 %v3030_v47, 0.0 }
 0x47a   :  { %v7729_v9 = vpop.eup %7728  ;;  %v3165_v57 = vunpack.c.l.b16 %v2823_v13 }
 0x47b   :  { %v3349_v6 = vmul.f32 %v10367_v58, %v10367_v58  ;;  %v2386_v46 = vmul.f32 %v7729_v9, %v1754_v40  ;;  %vm2392_vm7 = vweird.f32 %v7729_v9 }
 0x47c   :  { %vm2393_vm9 = vmor %vm2391_vm6, %vm2392_vm7 }
 0x47d   :  { %v3463_v48 = vsel %vm1498_vm3, %v3349_v6, 0.0  ;;  %v2387_v20 = vmul.f32 %v7729_v9, %v2386_v46  ;;  %7212 = vmatmul.msk.bf16.gmra.mxu2 %vm733_vm2, %v7992_v12 }
 0x47e   :  { %3464 = vadd.xlane.f32.xlu2 %v3463_v48 }
 0x47f   :  { %v2742_v45 = vpop.f32.mrf.mxu3  ;;  %v2388_v25 = vmul.f32 0.5, %v2387_v20 }
 0x480   :  { %v3033_v37 = vpop.f32.mrf.mxu2 }
 0x481   :  { %v10377_v56 = vmax.f32 %v3033_v37, 0.0  ;;  %v2389_v16 = vsub.f32 1.5, %v2388_v25  ;;  %v2824_v25 = vpack.c.bf16 %v2742_v45, %v2742_v45  ;;  %v7994_v45 = vld [vmem:[%s13208_s0 + $0xb8] sm:$0xff] }
 0x483   :  { %v3350_v35 = vmul.f32 %v10377_v56, %v10377_v56  ;;  %v2390_v31 = vmul.f32 %v7729_v9, %v2389_v16 }
 0x485   :  { %v3466_v2 = vsel %vm1498_vm3, %v3350_v35, 0.0  ;;  %v2394_v0 = vsel %vm2393_vm9, %v7729_v9, %v2390_v31 }
 0x486   :  { %3467 = vadd.xlane.f32.xlu0 %v3466_v2  ;;  %v2458_v43 = vmul.f32 %v2394_v0, %v9921_v8 }
 0x487   :  { %v2744_v40 = vpop.f32.mrf.mxu3 }
 0x488   :  { %v3035_v53 = vpop.f32.mrf.mxu2  ;;  %v2490_v55 = vpack.c.bf16 %v2458_v43, %v2457_v62  ;;  %v2825_v48 = vpack.c.bf16 %v2744_v40, %v2744_v40  ;;  %v2822_v62 = vpack.c.bf16 %v10346_v60, %v10346_v60  ;;  %v3166_v43 = vunpack.c.l.b16 %v2824_v25 }
 0x489   :  { %v10384_v32 = vmax.f32 %v3035_v53, 0.0  ;;  %v2821_v40 = vpack.c.bf16 %v10311_v36, %v10311_v36  ;;  %v2820_v60 = vpack.c.bf16 %v10271_v42, %v10271_v42 }
 0x48a   :  { %7190 = vmatmul.msk.bf16.gmra.mxu3 %vm1498_vm3, %v2490_v55  ;;  %v3167_v31 = vunpack.c.l.b16 %v2825_v48 }
 0x48b   :  { %v3351_v50 = vmul.f32 %v10384_v32, %v10384_v32 }
 0x48c   :  { %v3172_v53 = vpack.c.b16 %v3167_v31, %v3166_v43  ;;  %v7996_v43 = vld [vmem:[%s13208_s0 + $0xc8] sm:$0xff] }
 0x48d   :  { %v3469_v63 = vsel %vm1498_vm3, %v3351_v50, 0.0  ;;  %7213 = vmatmul.msk.bf16.gmra.mxu2 %vm733_vm2, %v7993_v21 }
 0x48e   :  { %3470 = vadd.xlane.f32.xlu1 %v3469_v63  ;;  %v3164_v63 = vunpack.c.l.b16 %v2822_v62 }
 0x48f   :  { %v2747_v11 = vpop.f32.mrf.mxu3 }
 0x490   :  { %v3038_v8 = vpop.f32.mrf.mxu2  ;;  %v2826_v34 = vpack.c.bf16 %v2747_v11, %v2747_v11  ;;  %v3163_v11 = vunpack.c.l.b16 %v2821_v40 }
 0x491   :  { %v10394_v47 = vmax.f32 %v3038_v8, 0.0  ;;  %v3171_v8 = vpack.c.b16 %v3165_v57, %v3164_v63 }
 0x492   :  { %v3168_v37 = vunpack.c.l.b16 %v2826_v34 }
 0x493   :  { %v3352_v9 = vmul.f32 %v10394_v47, %v10394_v47 }
 0x495   :  { %v3472_v6 = vsel %vm1498_vm3, %v3352_v9, 0.0 }
 0x496   :  { %3473 = vadd.xlane.f32.xlu2 %v3472_v6  ;;  %v3162_v6 = vunpack.c.l.b16 %v2820_v60 }
 0x497   :  { %v2749_v46 = vpop.f32.mrf.mxu3 }
 0x498   :  { %v2827_v20 = vpack.c.bf16 %v2749_v46, %v2749_v46  ;;  %v3040_v12 = vpop.f32.mrf.mxu2  ;;  %v3170_v36 = vpack.c.b16 %v3163_v11, %v3162_v6  ;;  %v7532_v6 = vld [vmem:[%s13210_s5] sm:$0xff] }
 0x499   :  { %v10399_v61 = vmax.f32 %v3040_v12, 0.0  ;;  %v7995_v12 = vld [vmem:[%s13208_s0 + $0xc0] sm:$0xff] }
 0x49a   :  { %v3169_v16 = vunpack.c.l.b16 %v2827_v20 }
 0x49b   :  { %v3353_v35 = vmul.f32 %v10399_v61, %v10399_v61 }
 0x49c   :  { %v3173_v2 = vpack.c.b16 %v3169_v16, %v3168_v37 }
 0x49d   :  { %v3475_v0 = vsel %vm1498_vm3, %v3353_v35, 0.0  ;;  %7214 = vmatmul.msk.bf16.gmra.mxu2 %vm733_vm2, %v7994_v45 }
 0x49e   :  { %3182 = vmatpush.bf16.msra.mxu1 %v3173_v2  ;;  %3476 = vadd.xlane.f32.xlu0 %v3475_v0 }
 0x4a0   :  { %v3043_v55 = vpop.f32.mrf.mxu2 }
 0x4a1   :  { %v10414_v50 = vmax.f32 %v3043_v55, 0.0 }
 0x4a2   :  { %3183 = vmatpush.bf16.msra.mxu1 %v3172_v53 }
 0x4a3   :  { %v3354_v21 = vmul.f32 %v10414_v50, %v10414_v50 }
 0x4a5   :  { %v3478_v9 = vsel %vm1498_vm3, %v3354_v21, 0.0  ;;  %v7533_v21 = vld [vmem:[%s13210_s5 + $0x8] sm:$0xff] }
 0x4a6   :  { %3184 = vmatpush.bf16.msra.mxu1 %v3171_v8  ;;  %3479 = vadd.xlane.f32.xlu1 %v3478_v9  ;;  %v7997_v8 = vld [vmem:[%s13208_s0 + $0xd0] sm:$0xff] }
 0x4a8   :  { %v3045_v34 = vpop.f32.mrf.mxu2 }
 0x4a9   :  { %v10421_v46 = vmax.f32 %v3045_v34, 0.0 }
 0x4aa   :  { %v3081_v48 = vpop.f32.mrf.mxu1  ;;  %3185 = vmatpush.bf16.msra.mxu1 %v3170_v36 }
 0x4ab   :  { %v10423_v20 = vmax.f32 %v3081_v48, 0.0  ;;  %v3355_v42 = vmul.f32 %v10421_v46, %v10421_v46 }
 0x4ad   :  { %7215 = vmatmul.msk.bf16.vlgmr.msra.gmra.mxu1 %vm733_vm2, %v7995_v12  ;;  %v3356_v25 = vmul.f32 %v10423_v20, %v10423_v20  ;;  %v3481_v37 = vsel %vm1498_vm3, %v3355_v42, 0.0 }
 0x4ae   :  { %3482 = vadd.xlane.f32.xlu2 %v3481_v37  ;;  %4498 = vmatpush.bf16.msrb.mxu1 %v7533_v21 }
 0x4af   :  { %v3484_v16 = vsel %vm1498_vm3, %v3356_v25, 0.0 }
 0x4b0   :  { %3485 = vadd.xlane.f32.xlu0 %v3484_v16 }
 0x4b2   :  { %v3083_v35 = vpop.f32.mrf.mxu1  ;;  %4499 = vmatpush.bf16.msrb.mxu1 %v7532_v6 }
 0x4b3   :  { %v10435_v13 = vmax.f32 %v3083_v35, 0.0  ;;  %v7998_v35 = vld [vmem:[%s13208_s0 + $0xd8] sm:$0xff] }
 0x4b5   :  { %v3357_v31 = vmul.f32 %v10435_v13, %v10435_v13 }
 0x4b7   :  { %v3487_v2 = vsel %vm1498_vm3, %v3357_v31, 0.0 }
 0x4b8   :  { %3488 = vadd.xlane.f32.xlu1 %v3487_v2 }
 0x4ba   :  { %v3086_v0 = vpop.f32.mrf.mxu1 }
 0x4bb   :  { %v10440_v62 = vmax.f32 %v3086_v0, 0.0 }
 0x4bd   :  { %7216 = vmatmul.msk.bf16.gmra.mxu1 %vm733_vm2, %v7996_v43  ;;  %v3358_v45 = vmul.f32 %v10440_v62, %v10440_v62 }
 0x4bf   :  { %v3490_v40 = vsel %vm1498_vm3, %v3358_v45, 0.0 }
 0x4c0   :  { %3491 = vadd.xlane.f32.xlu2 %v3490_v40 }
 0x4c2   :  { %v3088_v57 = vpop.f32.mrf.mxu1 }
 0x4c3   :  { %v10449_v53 = vmax.f32 %v3088_v57, 0.0 }
 0x4c5   :  { %v3359_v55 = vmul.f32 %v10449_v53, %v10449_v53 }
 0x4c7   :  { %v3493_v60 = vsel %vm1498_vm3, %v3359_v55, 0.0 }
 0x4c8   :  { %3494 = vadd.xlane.f32.xlu0 %v3493_v60 }
 0x4ca   :  { %v3091_v63 = vpop.f32.mrf.mxu1 }
 0x4cb   :  { %v10457_v11 = vmax.f32 %v3091_v63, 0.0 }
 0x4cd   :  { %7217 = vmatmul.msk.bf16.gmra.mxu1 %vm733_vm2, %v7997_v8  ;;  %v3360_v9 = vmul.f32 %v10457_v11, %v10457_v11 }
 0x4cf   :  { %v3496_v36 = vsel %vm1498_vm3, %v3360_v9, 0.0 }
 0x4d0   :  { %3497 = vadd.xlane.f32.xlu1 %v3496_v36 }
 0x4d2   :  { %v3093_v34 = vpop.f32.mrf.mxu1 }
 0x4d3   :  { %v10469_v48 = vmax.f32 %v3093_v34, 0.0 }
 0x4d5   :  { %v3361_v42 = vmul.f32 %v10469_v48, %v10469_v48 }
 0x4d7   :  { %v3499_v12 = vsel %vm1498_vm3, %v3361_v42, 0.0  ;;  %v3417_v42 = vpop.xlane.xlu2 %3416 }
 0x4d8   :  { %v10474_v25 = vpop.f32.mrf.mxu3  ;;  %3500 = vadd.xlane.f32.xlu2 %v3499_v12 }
 0x4da   :  { %v3096_v37 = vpop.f32.mrf.mxu1 }
 0x4db   :  { %v10476_v16 = vmax.f32 %v3096_v37, 0.0 }
 0x4dd   :  { %13320 = vst [vmem:[#allocation3_spill] sm:$0xff] %v10476_v16  ;;  %7218 = vmatmul.msk.bf16.gmra.mxu1 %vm733_vm2, %v7998_v35  ;;  %v3362_v31 = vmul.f32 %v10476_v16, %v10476_v16  ;;  %v10516_v35 = vmax.f32 %v3417_v42, 1e-24 }
 0x4df   :  { %v3502_v2 = vsel %vm1498_vm3, %v3362_v31, 0.0  ;;  %v10519_v31 = vmax.f32 %v10318_v38, 1e-24  ;;  %7730 = vrsqrt.f32 %v10516_v35  ;;  %v3420_v38 = vpop.xlane.xlu2 %3419  ;;  %vm3740_vm10 = vweird.f32 %v10516_v35 }
 0x4e0   :  { %v10485_v0 = vpop.f32.mrf.mxu3  ;;  %3503 = vadd.xlane.f32.xlu0 %v3502_v2 }
 0x4e1   :  { %7732 = vrsqrt.f32 %v10519_v31  ;;  %vm3730_vm12 = vweird.f32 %v10519_v31 }
 0x4e2   :  { %v3098_v43 = vpop.f32.mrf.mxu1 }
 0x4e3   :  { %v10487_v45 = vmax.f32 %v3098_v43, 0.0 }
 0x4e5   :  { %13321 = vst [vmem:[#allocation4_spill] sm:$0xff] %v10487_v45  ;;  %v3363_v40 = vmul.f32 %v10487_v45, %v10487_v45 }
 0x4e7   :  { %v3505_v57 = vsel %vm1498_vm3, %v3363_v40, 0.0 }
 0x4e8   :  { %v10492_v55 = vpop.f32.mrf.mxu3  ;;  %3506 = vadd.xlane.f32.xlu1 %v3505_v57 }
 0x4ed   :  { %7231 = vmatmul.msk.bf16.vlgmr.msrb.gmra.mxu1 %vm1498_vm3, %v4348_v28 }
 0x4f0   :  { %v3134_v60 = vpop.f32.mrf.mxu2  ;;  %v10498_v63 = vpop.f32.mrf.mxu3 }
 0x4f1   :  { %v10500_v21 = vmax.f32 %v3134_v60, 0.0  ;;  %v10530_v60 = vpop.eup %7730 }
 0x4f2   :  { %vm3741_vm11 = vweird.f32 %v10530_v60 }
 0x4f3   :  { %13322 = vst [vmem:[#allocation5_spill] sm:$0xff] %v10500_v21  ;;  %v3364_v8 = vmul.f32 %v10500_v21, %v10500_v21  ;;  %vm10584_vm14 = vmor %vm3740_vm10, %vm3741_vm11 }
 0x4f5   :  { %v3508_v9 = vsel %vm1498_vm3, %v3364_v8, 0.0 }
 0x4f6   :  { %3509 = vadd.xlane.f32.xlu2 %v3508_v9 }
 0x4f8   :  { %v3136_v6 = vpop.f32.mrf.mxu2  ;;  %v2762_v34 = vpop.f32.mrf.mxu3 }
 0x4f9   :  { %v10505_v36 = vmax.f32 %v3136_v6, 0.0  ;;  %v10537_v6 = vpop.eup %7732  ;;  %v2832_v22 = vpack.c.bf16 %v2762_v34, %v2762_v34 }
 0x4fa   :  { %vm3731_vm13 = vweird.f32 %v10537_v6 }
 0x4fb   :  { %13323 = vst [vmem:[#allocation6_spill] sm:$0xff] %v10505_v36  ;;  %v3365_v4 = vmul.f32 %v10505_v36, %v10505_v36  ;;  %v3219_v34 = vunpack.c.l.b16 %v2832_v22  ;;  %v2829_v22 = vpack.c.bf16 %v10485_v0, %v10485_v0  ;;  %v2828_v0 = vpack.c.bf16 %v10474_v25, %v10474_v25  ;;  %vm10595_vm15 = vmor %vm3730_vm12, %vm3731_vm13 }
 0x4fd   :  { %7232 = vmatmul.msk.bf16.gmra.mxu1 %vm1498_vm3, %v13324_v18  ;;  %v3511_v28 = vsel %vm1498_vm3, %v3365_v4, 0.0  ;;  %v3735_v18 = vmul.f32 %v10530_v60, %v10516_v35  ;;  %v3423_v4 = vpop.xlane.xlu0 %3422 }
 0x4fe   :  { %3512 = vadd.xlane.f32.xlu0 %v3511_v28  ;;  %v10541_v28 = vmax.f32 %v3420_v38, 1e-24  ;;  %v10547_v41 = vmax.f32 %v3423_v4, 1e-24 }
 0x500   :  { %v3139_v12 = vpop.f32.mrf.mxu2  ;;  %v2764_v3 = vpop.f32.mrf.mxu3  ;;  %7734 = vrsqrt.f32 %v10541_v28  ;;  %vm3750_vm0 = vweird.f32 %v10541_v28  ;;  %vm3760_vm4 = vweird.f32 %v10547_v41 }
 0x501   :  { %v10514_v37 = vmax.f32 %v3139_v12, 0.0  ;;  %v3725_v12 = vmul.f32 %v10537_v6, %v10519_v31  ;;  %7736 = vrsqrt.f32 %v10547_v41 }
 0x503   :  { %13325 = vst [vmem:[#allocation7_spill] sm:$0xff] %v10514_v37  ;;  %v3366_v54 = vmul.f32 %v10514_v37, %v10514_v37 }
 0x505   :  { %v3514_v2 = vsel %vm1498_vm3, %v3366_v54, 0.0 }
 0x506   :  { %3515 = vadd.xlane.f32.xlu1 %v3514_v2  ;;  %v10558_v21 = vpop.eup %7734 }
 0x507   :  { %v10562_v45 = vpop.eup %7736  ;;  %vm3751_vm1 = vweird.f32 %v10558_v21 }
 0x508   :  { %v3141_v43 = vpop.f32.mrf.mxu2  ;;  %vm3761_vm5 = vweird.f32 %v10562_v45  ;;  %vm10639_vm6 = vmor %vm3750_vm0, %vm3751_vm1 }
 0x509   :  { %v10526_v40 = vmax.f32 %v3141_v43, 0.0  ;;  %v3726_v43 = vmul.f32 %v10537_v6, %v3725_v12  ;;  %vm3762_vm7 = vmor %vm3760_vm4, %vm3761_vm5 }
 0x50b   :  { %13326 = vst [vmem:[#allocation8_spill] sm:$0xff] %v10526_v40  ;;  %v3367_v57 = vmul.f32 %v10526_v40, %v10526_v40  ;;  %v3727_v36 = vmul.f32 0.5, %v3726_v43 }
 0x50d   :  { %7233 = vmatmul.msk.bf16.gmra.mxu1 %vm1498_vm3, %v4350_v39  ;;  %v2767_v8 = vpop.f32.mrf.mxu3  ;;  %v3517_v9 = vsel %vm1498_vm3, %v3367_v57, 0.0  ;;  %v3736_v39 = vmul.f32 %v10530_v60, %v3735_v18 }
 0x50e   :  { %3518 = vadd.xlane.f32.xlu2 %v3517_v9  ;;  %v2834_v2 = vpack.c.bf16 %v2767_v8, %v2767_v8  ;;  %v2833_v9 = vpack.c.bf16 %v2764_v3, %v2764_v3  ;;  %v2831_v8 = vpack.c.bf16 %v10498_v63, %v10498_v63  ;;  %v2830_v3 = vpack.c.bf16 %v10492_v55, %v10492_v55 }
 0x50f   :  { %v3737_v4 = vmul.f32 0.5, %v3736_v39  ;;  %v13328_v39 = vpack.c.bf16 %v10352_v14, %v10349_v19  ;;  %v3745_v63 = vmul.f32 %v10558_v21, %v10541_v28 }
 0x510   :  { %v3144_v42 = vpop.f32.mrf.mxu2  ;;  %v3221_v37 = vunpack.c.l.b16 %v2834_v2  ;;  %v3220_v12 = vunpack.c.l.b16 %v2833_v9  ;;  %v3728_v2 = vsub.f32 1.5, %v3727_v36  ;;  %v3218_v55 = vunpack.c.l.b16 %v2831_v8  ;;  %v3429_v9 = vpop.xlane.xlu2 %3428 }
 0x511   :  { %v10545_v10 = vmax.f32 %v3144_v42, 0.0  ;;  %v3738_v16 = vsub.f32 1.5, %v3737_v4  ;;  %v3755_v36 = vmul.f32 %v10562_v45, %v10547_v41  ;;  %v10600_v8 = vmax.f32 %v3429_v9, 1e-24 }
 0x512   :  { %v3225_v43 = vpack.c.b16 %v3220_v12, %v3219_v34  ;;  %v3729_v31 = vmul.f32 %v10537_v6, %v3728_v2  ;;  %v3216_v12 = vunpack.c.l.b16 %v2829_v22 }
 0x513   :  { %13327 = vst [vmem:[#allocation9_spill] sm:$0xff] %v10545_v10  ;;  %v3368_v54 = vmul.f32 %v10545_v10, %v10545_v10  ;;  %v3739_v14 = vmul.f32 %v10530_v60, %v3738_v16  ;;  %vm3780_vm10 = vweird.f32 %v10600_v8 }
 0x515   :  { %v2769_v57 = vpop.f32.mrf.mxu3  ;;  %v3520_v38 = vsel %vm1498_vm3, %v3368_v54, 0.0 }
 0x516   :  { %v2835_v42 = vpack.c.bf16 %v2769_v57, %v2769_v57  ;;  %3521 = vadd.xlane.f32.xlu0 %v3520_v38  ;;  %v3217_v57 = vunpack.c.l.b16 %v2830_v3  ;;  %v3756_v3 = vmul.f32 %v10562_v45, %v3755_v36 }
 0x518   :  { %v3222_v18 = vunpack.c.l.b16 %v2835_v42  ;;  %v3146_v40 = vpop.f32.mrf.mxu2  ;;  %v3224_v25 = vpack.c.b16 %v3218_v55, %v3217_v57  ;;  %v3757_v22 = vmul.f32 0.5, %v3756_v3  ;;  %v7999_v57 = vld [vmem:[%s13208_s0 + $0xe0] sm:$0xff] }
 0x519   :  { %v10556_v10 = vmax.f32 %v3146_v40, 0.0 }
 0x51a   :  { %v3226_v54 = vpack.c.b16 %v3222_v18, %v3221_v37  ;;  %v3426_v37 = vpop.xlane.xlu1 %3425  ;;  %v3746_v18 = vmul.f32 %v10558_v21, %v3745_v63 }
 0x51b   :  { %v3369_v40 = vmul.f32 %v10556_v10, %v10556_v10  ;;  %v10591_v42 = vmax.f32 %v3426_v37, 1e-24 }
 0x51c   :  { %3235 = vmatpush.bf16.msrb.mxu2 %v3226_v54  ;;  %v3743_v54 = vsel %vm10584_vm14, %v10530_v60, %v3739_v14  ;;  %v3747_v37 = vmul.f32 0.5, %v3746_v18 }
 0x51d   :  { %7234 = vmatmul.msk.bf16.gmra.mxu1 %vm1498_vm3, %v13328_v39  ;;  %v3523_v19 = vsel %vm1498_vm3, %v3369_v40, 0.0  ;;  %v3215_v39 = vunpack.c.l.b16 %v2828_v0  ;;  %v3733_v40 = vsel %vm10595_vm15, %v10537_v6, %v3729_v31  ;;  %7738 = vrsqrt.f32 %v10591_v42 }
 0x51e   :  { %3524 = vadd.xlane.f32.xlu1 %v3523_v19  ;;  %v4293_v63 = vmul.f32 %v3743_v54, %v9933_v26  ;;  %7740 = vrsqrt.f32 %v10600_v8  ;;  %v4292_v55 = vmul.f32 %v3733_v40, %v9917_v17  ;;  %v3748_v6 = vsub.f32 1.5, %v3747_v37  ;;  %v3432_v54 = vpop.xlane.xlu0 %3431 }
 0x51f   :  { %v3223_v60 = vpack.c.b16 %v3216_v12, %v3215_v39  ;;  %v3758_v26 = vsub.f32 1.5, %v3757_v22  ;;  %v10649_v3 = vmax.f32 %v3432_v54, 1e-24  ;;  %vm3770_vm8 = vweird.f32 %v10591_v42 }
 0x520   :  { %3236 = vmatpush.bf16.msrb.mxu2 %v3225_v43  ;;  %v3149_v38 = vpop.f32.mrf.mxu2  ;;  %v4352_v35 = vpack.c.bf16 %v4293_v63, %v4292_v55  ;;  %v3749_v9 = vmul.f32 %v10558_v21, %v3748_v6 }
 0x521   :  { %v10593_v16 = vmax.f32 %v3149_v38, 0.0  ;;  %v3759_v28 = vmul.f32 %v10562_v45, %v3758_v26  ;;  %7742 = vrsqrt.f32 %v10649_v3  ;;  %vm3790_vm14 = vweird.f32 %v10649_v3 }
 0x522   :  { %v3753_v63 = vsel %vm10639_vm6, %v10558_v21, %v3749_v9 }
 0x523   :  { %v3370_v34 = vmul.f32 %v10593_v16, %v10593_v16  ;;  %v10620_v0 = vpop.eup %7738  ;;  %v3763_v37 = vsel %vm3762_vm7, %v10562_v45, %v3759_v28 }
 0x524   :  { %3237 = vmatpush.bf16.msrb.mxu2 %v3224_v25  ;;  %v10628_v38 = vpop.eup %7740  ;;  %v3765_v41 = vmul.f32 %v10620_v0, %v10591_v42  ;;  %vm3771_vm9 = vweird.f32 %v10620_v0 }
 0x525   :  { %v3526_v2 = vsel %vm1498_vm3, %v3370_v34, 0.0  ;;  %v3775_v12 = vmul.f32 %v10628_v38, %v10600_v8  ;;  %v3435_v34 = vpop.xlane.xlu1 %3434  ;;  %vm3781_vm11 = vweird.f32 %v10628_v38  ;;  %vm10688_vm12 = vmor %vm3770_vm8, %vm3771_vm9  ;;  %v3438_v8 = vpop.xlane.xlu2 %3437 }
 0x526   :  { %3527 = vadd.xlane.f32.xlu2 %v3526_v2  ;;  %v10651_v40 = vmax.f32 %v3435_v34, 1e-24  ;;  %v3766_v22 = vmul.f32 %v10620_v0, %v3765_v41  ;;  %vm3782_vm13 = vmor %vm3780_vm10, %vm3781_vm11 }
 0x528   :  { %3238 = vmatpush.bf16.msrb.mxu2 %v3223_v60  ;;  %v3151_v43 = vpop.f32.mrf.mxu2  ;;  %v3776_v60 = vmul.f32 %v10628_v38, %v3775_v12  ;;  %7744 = vrsqrt.f32 %v10651_v40  ;;  %vm3800_vm0 = vweird.f32 %v10651_v40 }
 0x529   :  { %v10616_v14 = vmax.f32 %v3151_v43, 0.0  ;;  %v4294_v43 = vmul.f32 %v3753_v63, %v9948_v24  ;;  %v8000_v24 = vld [vmem:[%s13208_s0 + $0xe8] sm:$0xff] }
 0x52a   :  { %v3187_v19 = vpop.f32.mrf.mxu1  ;;  %v3777_v21 = vmul.f32 0.5, %v3776_v60 }
 0x52b   :  { %v10618_v36 = vmax.f32 %v3187_v19, 0.0  ;;  %7219 = vmatmul.msk.bf16.vlgmr.msrb.gmra.mxu2 %vm733_vm2, %v7999_v57  ;;  %v3371_v17 = vmul.f32 %v10616_v14, %v10616_v14  ;;  %v4295_v19 = vmul.f32 %v3763_v37, %v9956_v59 }
 0x52d   :  { %7235 = vmatmul.msk.bf16.gmra.mxu1 %vm1498_vm3, %v4352_v35  ;;  %v3372_v31 = vmul.f32 %v10618_v36, %v10618_v36  ;;  %v3529_v4 = vsel %vm1498_vm3, %v3371_v17, 0.0  ;;  %v3767_v35 = vmul.f32 0.5, %v3766_v22  ;;  %v4353_v57 = vpack.c.bf16 %v4295_v19, %v4294_v43  ;;  %v10670_v17 = vpop.eup %7742 }
 0x52e   :  { %3530 = vadd.xlane.f32.xlu0 %v3529_v4  ;;  %v10676_v59 = vpop.eup %7744  ;;  %v3785_v42 = vmul.f32 %v10670_v17, %v10649_v3  ;;  %v10706_v43 = vmax.f32 %v3438_v8, 1e-24  ;;  %vm3791_vm15 = vweird.f32 %v10670_v17 }
 0x52f   :  { %v3532_v25 = vsel %vm1498_vm3, %v3372_v31, 0.0  ;;  %v3778_v31 = vsub.f32 1.5, %v3777_v21  ;;  %v3768_v9 = vsub.f32 1.5, %v3767_v35  ;;  %v3795_v54 = vmul.f32 %v10676_v59, %v10651_v40  ;;  %vm10734_vm4 = vmor %vm3790_vm14, %vm3791_vm15 }
 0x530   :  { %3533 = vadd.xlane.f32.xlu1 %v3532_v25  ;;  %v3441_v25 = vpop.xlane.xlu0 %3440  ;;  %v3786_v22 = vmul.f32 %v10670_v17, %v3785_v42  ;;  %vm3801_vm1 = vweird.f32 %v10676_v59  ;;  %vm3810_vm8 = vweird.f32 %v10706_v43 }
 0x531   :  { %v3779_v28 = vmul.f32 %v10628_v38, %v3778_v31  ;;  %v3769_v12 = vmul.f32 %v10620_v0, %v3768_v9  ;;  %vm3802_vm5 = vmor %vm3800_vm0, %vm3801_vm1 }
 0x532   :  { %v3189_v39 = vpop.f32.mrf.mxu1  ;;  %v3787_v35 = vmul.f32 0.5, %v3786_v22 }
 0x533   :  { %v10653_v2 = vmax.f32 %v3189_v39, 0.0  ;;  %v10696_v39 = vmax.f32 %v3441_v25, 1e-24  ;;  %v3783_v37 = vsel %vm3782_vm13, %v10628_v38, %v3779_v28  ;;  %v3773_v60 = vsel %vm10688_vm12, %v10620_v0, %v3769_v12  ;;  %v3447_v25 = vpop.xlane.xlu2 %3446 }
 0x534   :  { %v4296_v21 = vmul.f32 %v3773_v60, %v9966_v5  ;;  %v3788_v9 = vsub.f32 1.5, %v3787_v35 }
 0x535   :  { %v3373_v55 = vmul.f32 %v10653_v2, %v10653_v2  ;;  %7746 = vrsqrt.f32 %v10696_v39  ;;  %vm3820_vm6 = vweird.f32 %v10696_v39 }
 0x536   :  { %7748 = vrsqrt.f32 %v10706_v43  ;;  %v3789_v12 = vmul.f32 %v10670_v17, %v3788_v9 }
 0x537   :  { %v3535_v6 = vsel %vm1498_vm3, %v3373_v55, 0.0  ;;  %v3796_v55 = vmul.f32 %v10676_v59, %v3795_v54  ;;  %v3444_v54 = vpop.xlane.xlu1 %3443 }
 0x538   :  { %3536 = vadd.xlane.f32.xlu2 %v3535_v6  ;;  %v4297_v6 = vmul.f32 %v3783_v37, %v9971_v27  ;;  %v8001_v27 = vld [vmem:[%s13208_s0 + $0xf0] sm:$0xff]  ;;  %v3793_v60 = vsel %vm10734_vm4, %v10670_v17, %v3789_v12 }
 0x53a   :  { %v3192_v45 = vpop.f32.mrf.mxu1  ;;  %v4354_v31 = vpack.c.bf16 %v4297_v6, %v4296_v21 }
 0x53b   :  { %v10668_v26 = vmax.f32 %v3192_v45, 0.0  ;;  %7220 = vmatmul.msk.bf16.gmra.mxu2 %vm733_vm2, %v8000_v24  ;;  %v3797_v45 = vmul.f32 0.5, %v3796_v55  ;;  %v10721_v5 = vpop.eup %7746 }
 0x53c   :  { %v3815_v3 = vmul.f32 %v10721_v5, %v10696_v39  ;;  %vm3821_vm7 = vweird.f32 %v10721_v5 }
 0x53d   :  { %7236 = vmatmul.msk.bf16.gmra.mxu1 %vm1498_vm3, %v4353_v57  ;;  %v3374_v4 = vmul.f32 %v10668_v26, %v10668_v26  ;;  %v3798_v24 = vsub.f32 1.5, %v3797_v45  ;;  %vm3822_vm10 = vmor %vm3820_vm6, %vm3821_vm7 }
 0x53e   :  { %v3816_v22 = vmul.f32 %v10721_v5, %v3815_v3 }
 0x53f   :  { %v3538_v18 = vsel %vm1498_vm3, %v3374_v4, 0.0  ;;  %v3799_v42 = vmul.f32 %v10676_v59, %v3798_v24  ;;  %v3453_v3 = vpop.xlane.xlu1 %3452 }
 0x540   :  { %3539 = vadd.xlane.f32.xlu0 %v3538_v18  ;;  %v10730_v18 = vpop.eup %7748  ;;  %v3817_v17 = vmul.f32 0.5, %v3816_v22 }
 0x541   :  { %v3805_v40 = vmul.f32 %v10730_v18, %v10706_v43  ;;  %v3803_v55 = vsel %vm3802_vm5, %v10676_v59, %v3799_v42  ;;  %vm3811_vm9 = vweird.f32 %v10730_v18  ;;  %v10783_v43 = vmax.f32 %v3453_v3, 1e-24  ;;  %v3456_v3 = vpop.xlane.xlu2 %3455 }
 0x542   :  { %v3194_v34 = vpop.f32.mrf.mxu1  ;;  %v4299_v35 = vmul.f32 %v3803_v55, %v9997_v44  ;;  %v3818_v24 = vsub.f32 1.5, %v3817_v17  ;;  %vm3812_vm11 = vmor %vm3810_vm8, %vm3811_vm9 }
 0x543   :  { %v10698_v63 = vmax.f32 %v3194_v34, 0.0  ;;  %v10743_v34 = vmax.f32 %v3447_v25, 1e-24  ;;  %v3806_v21 = vmul.f32 %v10730_v18, %v3805_v40  ;;  %v3450_v40 = vpop.xlane.xlu0 %3449  ;;  %vm3860_vm4 = vweird.f32 %v10783_v43 }
 0x544   :  { %v3819_v12 = vmul.f32 %v10721_v5, %v3818_v24  ;;  %v10789_v55 = vmax.f32 %v3450_v40, 1e-24  ;;  %v3602_v40 = vmax.f32 %v3456_v3, 1e-24 }
 0x545   :  { %v3375_v19 = vmul.f32 %v10698_v63, %v10698_v63  ;;  %7750 = vrsqrt.f32 %v10743_v34  ;;  %v3807_v59 = vmul.f32 0.5, %v3806_v21  ;;  %vm3840_vm12 = vweird.f32 %v10743_v34 }
 0x546   :  { %vm3850_vm6 = vweird.f32 %v10789_v55 }
 0x547   :  { %v3541_v38 = vsel %vm1498_vm3, %v3375_v19, 0.0  ;;  %v10752_v19 = vmax.f32 %v3444_v54, 1e-24 }
 0x548   :  { %3542 = vadd.xlane.f32.xlu1 %v3541_v38  ;;  %v4298_v38 = vmul.f32 %v3793_v60, %v9988_v23  ;;  %v8002_v23 = vld [vmem:[%s13208_s0 + $0xf8] sm:$0xff]  ;;  %v3823_v60 = vsel %vm3822_vm10, %v10721_v5, %v3819_v12 }
 0x549   :  { %7752 = vrsqrt.f32 %v10752_v19  ;;  %vm3830_vm14 = vweird.f32 %v10752_v19 }
 0x54a   :  { %v3197_v0 = vpop.f32.mrf.mxu1  ;;  %v4355_v9 = vpack.c.bf16 %v4299_v35, %v4298_v38  ;;  %v4301_v35 = vmul.f32 %v3823_v60, %v10013_v1  ;;  %7754 = vrsqrt.f32 %v10783_v43 }
 0x54b   :  { %v10715_v57 = vmax.f32 %v3197_v0, 0.0  ;;  %7221 = vmatmul.msk.bf16.gmra.mxu2 %vm733_vm2, %v8001_v27  ;;  %v10768_v44 = vpop.eup %7750  ;;  %v3808_v27 = vsub.f32 1.5, %v3807_v59  ;;  %7756 = vrsqrt.f32 %v10789_v55 }
 0x54c   :  { %v3835_v41 = vmul.f32 %v10768_v44, %v10743_v34  ;;  %vm3841_vm13 = vweird.f32 %v10768_v44 }
 0x54d   :  { %7237 = vmatmul.msk.bf16.gmra.mxu1 %vm1498_vm3, %v4354_v31  ;;  %v3376_v4 = vmul.f32 %v10715_v57, %v10715_v57  ;;  %v3809_v39 = vmul.f32 %v10730_v18, %v3808_v27  ;;  %vm3842_vm0 = vmor %vm3840_vm12, %vm3841_vm13  ;;  %vm3870_vm12 = vweird.f32 %v3602_v40 }
 0x54e   :  { %v3836_v22 = vmul.f32 %v10768_v44, %v3835_v41 }
 0x54f   :  { %v3544_v28 = vsel %vm1498_vm3, %v3376_v4, 0.0  ;;  %v3813_v21 = vsel %vm3812_vm11, %v10730_v18, %v3809_v39 }
 0x550   :  { %3545 = vadd.xlane.f32.xlu2 %v3544_v28  ;;  %v7753_v28 = vpop.eup %7752  ;;  %v3837_v17 = vmul.f32 0.5, %v3836_v22  ;;  %v4300_v5 = vmul.f32 %v3813_v21, %v9999_v15 }
 0x551   :  { %v3825_v25 = vmul.f32 %v7753_v28, %v10752_v19  ;;  %vm3831_vm15 = vweird.f32 %v7753_v28 }
 0x552   :  { %v3199_v8 = vpop.f32.mrf.mxu1  ;;  %v3838_v24 = vsub.f32 1.5, %v3837_v17  ;;  %vm3832_vm1 = vmor %vm3830_vm14, %vm3831_vm15 }
 0x553   :  { %v10745_v37 = vmax.f32 %v3199_v8, 0.0  ;;  %v3826_v38 = vmul.f32 %v7753_v28, %v3825_v25 }
 0x554   :  { %v3839_v15 = vmul.f32 %v10768_v44, %v3838_v24 }
 0x555   :  { %v3377_v6 = vmul.f32 %v10745_v37, %v10745_v37  ;;  %v3827_v59 = vmul.f32 0.5, %v3826_v38 }
 0x556   :  { %v3843_v39 = vsel %vm3842_vm0, %v10768_v44, %v3839_v15 }
 0x557   :  { %v3547_v45 = vsel %vm1498_vm3, %v3377_v6, 0.0  ;;  %v3828_v18 = vsub.f32 1.5, %v3827_v59  ;;  %v4303_v60 = vmul.f32 %v3843_v39, %v10073_v30  ;;  %v3465_v30 = vpop.xlane.xlu2 %3464 }
 0x558   :  { %3548 = vadd.xlane.f32.xlu0 %v3547_v45  ;;  %v3605_v15 = vmax.f32 %v3465_v30, 1e-24 }
 0x559   :  { %v3829_v12 = vmul.f32 %v7753_v28, %v3828_v18 }
 0x55a   :  { %v3202_v0 = vpop.f32.mrf.mxu1 }
 0x55b   :  { %v10762_v31 = vmax.f32 %v3202_v0, 0.0  ;;  %7222 = vmatmul.msk.bf16.gmra.mxu2 %vm733_vm2, %v8002_v23  ;;  %v7755_v23 = vpop.eup %7754  ;;  %v3833_v19 = vsel %vm3832_vm1, %v7753_v28, %v3829_v12  ;;  %v3462_v28 = vpop.xlane.xlu1 %3461 }
 0x55c   :  { %v7757_v1 = vpop.eup %7756  ;;  %v3855_v27 = vmul.f32 %v7755_v23, %v10783_v43  ;;  %vm3861_vm5 = vweird.f32 %v7755_v23 }
 0x55d   :  { %7238 = vmatmul.msk.bf16.gmra.mxu1 %vm1498_vm3, %v4355_v9  ;;  %v3378_v4 = vmul.f32 %v10762_v31, %v10762_v31  ;;  %v4356_v9 = vpack.c.bf16 %v4301_v35, %v4300_v5  ;;  %v3845_v41 = vmul.f32 %v7757_v1, %v10789_v55  ;;  %vm3851_vm7 = vweird.f32 %v7757_v1  ;;  %vm3862_vm8 = vmor %vm3860_vm4, %vm3861_vm5 }
 0x55e   :  { %v3856_v25 = vmul.f32 %v7755_v23, %v3855_v27  ;;  %vm3852_vm9 = vmor %vm3850_vm6, %vm3851_vm7  ;;  %vm3900_vm4 = vweird.f32 %v3605_v15 }
 0x55f   :  { %v3550_v42 = vsel %vm1498_vm3, %v3378_v4, 0.0  ;;  %v3459_v4 = vpop.xlane.xlu0 %3458 }
 0x560   :  { %3551 = vadd.xlane.f32.xlu1 %v3550_v42  ;;  %v3603_v34 = vmax.f32 %v3459_v4, 1e-24  ;;  %v3857_v22 = vmul.f32 0.5, %v3856_v25 }
 0x562   :  { %v3204_v54 = vpop.f32.mrf.mxu1  ;;  %7758 = vrsqrt.f32 %v3603_v34  ;;  %vm3880_vm10 = vweird.f32 %v3603_v34 }
 0x563   :  { %v10785_v8 = vmax.f32 %v3204_v54, 0.0  ;;  %v3846_v54 = vmul.f32 %v7757_v1, %v3845_v41  ;;  %7760 = vrsqrt.f32 %v3602_v40 }
 0x565   :  { %v3379_v6 = vmul.f32 %v10785_v8, %v10785_v8  ;;  %v3847_v21 = vmul.f32 0.5, %v3846_v54 }
 0x567   :  { %v3553_v45 = vsel %vm1498_vm3, %v3379_v6, 0.0  ;;  %v4302_v6 = vmul.f32 %v3833_v19, %v10030_v51  ;;  %v3848_v44 = vsub.f32 1.5, %v3847_v21 }
 0x568   :  { %3554 = vadd.xlane.f32.xlu2 %v3553_v45  ;;  %v3858_v45 = vsub.f32 1.5, %v3857_v22  ;;  %v7759_v17 = vpop.eup %7758 }
 0x569   :  { %v4357_v35 = vpack.c.bf16 %v4303_v60, %v4302_v6  ;;  %v7761_v5 = vpop.eup %7760  ;;  %v3875_v59 = vmul.f32 %v7759_v17, %v3603_v34  ;;  %v3849_v24 = vmul.f32 %v7757_v1, %v3848_v44  ;;  %vm3881_vm11 = vweird.f32 %v7759_v17 }
 0x56a   :  { %v10799_v0 = vpop.f32.mrf.mxu1  ;;  %v3859_v51 = vmul.f32 %v7755_v23, %v3858_v45  ;;  %v3865_v18 = vmul.f32 %v7761_v5, %v3602_v40  ;;  %vm3871_vm13 = vweird.f32 %v7761_v5  ;;  %vm3882_vm14 = vmor %vm3880_vm10, %vm3881_vm11 }
 0x56b   :  { %v3876_v12 = vmul.f32 %v7759_v17, %v3875_v59  ;;  %v3853_v43 = vsel %vm3852_vm9, %v7757_v1, %v3849_v24  ;;  %vm3872_vm15 = vmor %vm3870_vm12, %vm3871_vm13 }
 0x56c   :  { %v3863_v4 = vsel %vm3862_vm8, %v7755_v23, %v3859_v51  ;;  %v3866_v41 = vmul.f32 %v7761_v5, %v3865_v18  ;;  %v4304_v39 = vmul.f32 %v3853_v43, %v10106_v33 }
 0x56d   :  { %7239 = vmatmul.msk.bf16.gmra.mxu1 %vm1498_vm3, %v4356_v9  ;;  %v3604_v9 = vmax.f32 %v3462_v28, 1e-24  ;;  %v4305_v3 = vmul.f32 %v3863_v4, %v10173_v49  ;;  %v3877_v55 = vmul.f32 0.5, %v3876_v12  ;;  %v3468_v49 = vpop.xlane.xlu0 %3467 }
 0x56e   :  { %v3867_v25 = vmul.f32 0.5, %v3866_v41  ;;  %v10829_v28 = vmax.f32 %v3468_v49, 1e-24 }
 0x56f   :  { %7762 = vrsqrt.f32 %v3604_v9  ;;  %v4358_v60 = vpack.c.bf16 %v4305_v3, %v4304_v39  ;;  %v3878_v6 = vsub.f32 1.5, %v3877_v55  ;;  %vm3890_vm0 = vweird.f32 %v3604_v9 }
 0x570   :  { %7764 = vrsqrt.f32 %v3605_v15  ;;  %v3868_v23 = vsub.f32 1.5, %v3867_v25  ;;  %v3474_v25 = vpop.xlane.xlu2 %3473  ;;  %vm3910_vm8 = vweird.f32 %v10829_v28 }
 0x571   :  { %v3879_v33 = vmul.f32 %v7759_v17, %v3878_v6  ;;  %7766 = vrsqrt.f32 %v10829_v28 }
 0x572   :  { %v10808_v42 = vpop.f32.mrf.mxu1  ;;  %v3869_v45 = vmul.f32 %v7761_v5, %v3868_v23 }
 0x573   :  { %v3883_v34 = vsel %vm3882_vm14, %v7759_v17, %v3879_v33 }
 0x574   :  { %v3873_v24 = vsel %vm3872_vm15, %v7761_v5, %v3869_v45  ;;  %v4307_v40 = vmul.f32 %v3883_v34, %v10295_v7 }
 0x575   :  { %v10824_v54 = vpop.eup %7762  ;;  %v4306_v12 = vmul.f32 %v3873_v24, %v10253_v29 }
 0x576   :  { %v7765_v22 = vpop.eup %7764  ;;  %v3885_v1 = vmul.f32 %v10824_v54, %v3604_v9  ;;  %vm3891_vm1 = vweird.f32 %v10824_v54 }
 0x577   :  { %v3895_v21 = vmul.f32 %v7765_v22, %v3605_v15  ;;  %v4359_v55 = vpack.c.bf16 %v4307_v40, %v4306_v12  ;;  %v10837_v39 = vpop.eup %7766  ;;  %vm3901_vm5 = vweird.f32 %v7765_v22  ;;  %vm10844_vm6 = vmor %vm3890_vm0, %vm3891_vm1 }
 0x578   :  { %v3886_v44 = vmul.f32 %v10824_v54, %v3885_v1  ;;  %vm10848_vm7 = vmor %vm3900_vm4, %vm3901_vm5  ;;  %v3905_v9 = vmul.f32 %v10837_v39, %v10829_v28  ;;  %v3477_v1 = vpop.xlane.xlu0 %3476  ;;  %vm3911_vm9 = vweird.f32 %v10837_v39 }
 0x579   :  { %v3896_v51 = vmul.f32 %v7765_v22, %v3895_v21  ;;  %v10859_v21 = vmax.f32 %v3474_v25, 1e-24  ;;  %vm10895_vm12 = vmor %vm3910_vm8, %vm3911_vm9 }
 0x57a   :  { %v10813_v38 = vpop.f32.mrf.mxu1  ;;  %v3887_v18 = vmul.f32 0.5, %v3886_v44 }
 0x57b   :  { %v3897_v4 = vmul.f32 0.5, %v3896_v51  ;;  %v3906_v51 = vmul.f32 %v10837_v39, %v3905_v9  ;;  %vm3930_vm14 = vweird.f32 %v10859_v21 }
 0x57c   :  { %v3888_v43 = vsub.f32 1.5, %v3887_v18 }
 0x57d   :  { %7240 = vmatmul.msk.bf16.gmra.mxu1 %vm1498_vm3, %v4357_v35  ;;  %v3471_v35 = vpop.xlane.xlu1 %3470  ;;  %v3898_v3 = vsub.f32 1.5, %v3897_v4 }
 0x57e   :  { %v10831_v59 = vmax.f32 %v3471_v35, 1e-24  ;;  %v3889_v7 = vmul.f32 %v10824_v54, %v3888_v43  ;;  %v10863_v35 = vmax.f32 %v3477_v1, 1e-24  ;;  %v3907_v43 = vmul.f32 0.5, %v3906_v51 }
 0x57f   :  { %v3899_v5 = vmul.f32 %v7765_v22, %v3898_v3 }
 0x580   :  { %7768 = vrsqrt.f32 %v10831_v59  ;;  %v3893_v23 = vsel %vm10844_vm6, %v10824_v54, %v3889_v7  ;;  %vm3920_vm10 = vweird.f32 %v10831_v59  ;;  %vm3940_vm0 = vweird.f32 %v10863_v35 }
 0x581   :  { %v3903_v33 = vsel %vm10848_vm7, %v7765_v22, %v3899_v5  ;;  %v4308_v4 = vmul.f32 %v3893_v23, %v10357_v52  ;;  %7770 = vrsqrt.f32 %v10859_v21  ;;  %v4662_v52 = vpack.c.bf16 %v10808_v42, %v10808_v42 }
 0x582   :  { %v10818_v27 = vpop.f32.mrf.mxu1  ;;  %v4309_v40 = vmul.f32 %v3903_v33, %v10367_v58  ;;  %7772 = vrsqrt.f32 %v10863_v35 }
 0x583   :  { %v4664_v22 = vpack.c.bf16 %v10818_v27, %v10818_v27  ;;  %v3908_v27 = vsub.f32 1.5, %v3907_v43 }
 0x584   :  { %v4360_v7 = vpack.c.bf16 %v4309_v40, %v4308_v4 }
 0x585   :  { %v4736_v58 = vunpack.c.l.b16 %v4664_v22  ;;  %v3909_v28 = vmul.f32 %v10837_v39, %v3908_v27 }
 0x586   :  { %v10840_v17 = vpop.eup %7768 }
 0x587   :  { %v3915_v15 = vmul.f32 %v10840_v17, %v10831_v59  ;;  %v10881_v29 = vpop.eup %7770  ;;  %vm3921_vm11 = vweird.f32 %v10840_v17  ;;  %v3913_v22 = vsel %vm10895_vm12, %v10837_v39, %v3909_v28 }
 0x588   :  { %v3925_v42 = vmul.f32 %v10881_v29, %v10859_v21  ;;  %vm10904_vm13 = vmor %vm3920_vm10, %vm3921_vm11  ;;  %vm3931_vm15 = vweird.f32 %v10881_v29 }
 0x589   :  { %v3916_v34 = vmul.f32 %v10840_v17, %v3915_v15  ;;  %v4734_v15 = vunpack.c.l.b16 %v4662_v52  ;;  %vm10951_vm4 = vmor %vm3930_vm14, %vm3931_vm15 }
 0x58a   :  { %v10822_v19 = vpop.f32.mrf.mxu1 }
 0x58b   :  { %v4665_v24 = vpack.c.bf16 %v10822_v19, %v10822_v19  ;;  %v4663_v19 = vpack.c.bf16 %v10813_v38, %v10813_v38  ;;  %v4661_v38 = vpack.c.bf16 %v10799_v0, %v10799_v0 }
 0x58d   :  { %7241 = vmatmul.msk.bf16.gmra.mxu1 %vm1498_vm3, %v4358_v60  ;;  %v4737_v3 = vunpack.c.l.b16 %v4665_v24  ;;  %v10883_v60 = vpop.eup %7772  ;;  %v4735_v9 = vunpack.c.l.b16 %v4663_v19 }
 0x58e   :  { %vm3941_vm1 = vweird.f32 %v10883_v60 }
 0x58f   :  { %v4742_v23 = vpack.c.b16 %v4736_v58, %v4735_v9  ;;  %vm3942_vm5 = vmor %vm3940_vm0, %vm3941_vm1 }
 0x592   :  { %v4513_v30 = vpop.f32.mrf.mxu1 }
 0x593   :  { %v4666_v45 = vpack.c.bf16 %v4513_v30, %v4513_v30 }
 0x595   :  { %v4738_v30 = vunpack.c.l.b16 %v4666_v45  ;;  %v3480_v45 = vpop.xlane.xlu1 %3479 }
 0x596   :  { %v10908_v51 = vmax.f32 %v3480_v45, 1e-24 }
 0x597   :  { %v4743_v5 = vpack.c.b16 %v4738_v30, %v4737_v3 }
 0x598   :  { %7774 = vrsqrt.f32 %v10908_v51  ;;  %vm3950_vm6 = vweird.f32 %v10908_v51 }
 0x59a   :  { %v4516_v41 = vpop.f32.mrf.mxu1 }
 0x59b   :  { %v4667_v6 = vpack.c.bf16 %v4516_v41, %v4516_v41  ;;  %v3917_v41 = vmul.f32 0.5, %v3916_v34  ;;  %v3483_v34 = vpop.xlane.xlu2 %3482 }
 0x59c   :  { %v10915_v40 = vmax.f32 %v3483_v34, 1e-24 }
 0x59d   :  { %7242 = vmatmul.msk.bf16.gmra.mxu1 %vm1498_vm3, %v4359_v55  ;;  %v4739_v18 = vunpack.c.l.b16 %v4667_v6  ;;  %v3918_v25 = vsub.f32 1.5, %v3917_v41  ;;  %v4310_v41 = vmul.f32 %v3913_v22, %v10377_v56  ;;  %v3489_v1 = vpop.xlane.xlu1 %3488 }
 0x59e   :  { %7776 = vrsqrt.f32 %v10915_v40  ;;  %v10939_v27 = vpop.eup %7774  ;;  %vm3960_vm8 = vweird.f32 %v10915_v40 }
 0x59f   :  { %v3919_v0 = vmul.f32 %v10840_v17, %v3918_v25  ;;  %v3945_v21 = vmul.f32 %v10939_v27, %v10908_v51  ;;  %vm3951_vm7 = vweird.f32 %v10939_v27 }
 0x5a0   :  { %vm11001_vm10 = vmor %vm3950_vm6, %vm3951_vm7 }
 0x5a1   :  { %v3923_v30 = vsel %vm10904_vm13, %v10840_v17, %v3919_v0  ;;  %v8003_v17 = vld [vmem:[%s13208_s0] sm:$0xff] }
 0x5a2   :  { %v4518_v49 = vpop.f32.mrf.mxu1  ;;  %v4311_v19 = vmul.f32 %v3923_v30, %v10384_v32 }
 0x5a3   :  { %v4668_v44 = vpack.c.bf16 %v4518_v49, %v4518_v49  ;;  %v3935_v49 = vmul.f32 %v10883_v60, %v10863_v35  ;;  %v3486_v35 = vpop.xlane.xlu0 %3485 }
 0x5a4   :  { %v4361_v32 = vpack.c.bf16 %v4311_v19, %v4310_v41  ;;  %v10942_v9 = vpop.eup %7776  ;;  %v10974_v22 = vmax.f32 %v3486_v35, 1e-24 }
 0x5a5   :  { %v4740_v54 = vunpack.c.l.b16 %v4668_v44  ;;  %v4733_v44 = vunpack.c.l.b16 %v4661_v38  ;;  %v3955_v28 = vmul.f32 %v10942_v9, %v10915_v40  ;;  %vm3961_vm9 = vweird.f32 %v10942_v9 }
 0x5a6   :  { %vm3962_vm11 = vmor %vm3960_vm8, %vm3961_vm9  ;;  %vm3970_vm14 = vweird.f32 %v10974_v22 }
 0x5a7   :  { %v4744_v12 = vpack.c.b16 %v4740_v54, %v4739_v18  ;;  %v3926_v54 = vmul.f32 %v10881_v29, %v3925_v42  ;;  %v4741_v4 = vpack.c.b16 %v4734_v15, %v4733_v44  ;;  %v10968_v44 = vmax.f32 %v3489_v1, 1e-24 }
 0x5a9   :  { %4753 = vmatpush.bf16.msra.mxu2 %v4744_v12  ;;  %v3936_v12 = vmul.f32 %v10883_v60, %v3935_v49  ;;  %v3927_v3 = vmul.f32 0.5, %v3926_v54  ;;  %v3956_v54 = vmul.f32 %v10942_v9, %v3955_v28  ;;  %7778 = vrsqrt.f32 %v10968_v44 }
 0x5aa   :  { %v10877_v55 = vpop.f32.mrf.mxu1  ;;  %7780 = vrsqrt.f32 %v10974_v22  ;;  %vm3980_vm12 = vweird.f32 %v10968_v44 }
 0x5ab   :  { %v3937_v52 = vmul.f32 0.5, %v3936_v12  ;;  %v3957_v41 = vmul.f32 0.5, %v3956_v54 }
 0x5ad   :  { %7243 = vmatmul.msk.bf16.gmra.mxu1 %vm1498_vm3, %v4360_v7  ;;  %4754 = vmatpush.bf16.msra.mxu2 %v4743_v5  ;;  %v3928_v5 = vsub.f32 1.5, %v3927_v3  ;;  %v3938_v25 = vsub.f32 1.5, %v3937_v52  ;;  %v3958_v52 = vsub.f32 1.5, %v3957_v41 }
 0x5ae   :  { %v3240_v6 = vpop.f32.mrf.mxu2 }
 0x5af   :  { %v10902_v59 = vmax.f32 %v3240_v6, 0.0  ;;  %v3929_v42 = vmul.f32 %v10881_v29, %v3928_v5  ;;  %v3939_v6 = vmul.f32 %v10883_v60, %v3938_v25  ;;  %v3959_v51 = vmul.f32 %v10942_v9, %v3958_v52 }
 0x5b1   :  { %4755 = vmatpush.bf16.msra.mxu2 %v4742_v23  ;;  %v3380_v18 = vmul.f32 %v10902_v59, %v10902_v59  ;;  %v3933_v45 = vsel %vm10951_vm4, %v10881_v29, %v3929_v42  ;;  %v3943_v34 = vsel %vm3942_vm5, %v10883_v60, %v3939_v6  ;;  %v8004_v60 = vld [vmem:[%s13208_s0 + $0x8] sm:$0xff]  ;;  %v3492_v23 = vpop.xlane.xlu2 %3491 }
 0x5b2   :  { %v10910_v24 = vpop.f32.mrf.mxu1  ;;  %v4313_v30 = vmul.f32 %v3943_v34, %v10399_v61  ;;  %v4312_v12 = vmul.f32 %v3933_v45, %v10394_v47 }
 0x5b3   :  { %v3556_v43 = vsel %vm1498_vm3, %v3380_v18, 0.0  ;;  %v3946_v18 = vmul.f32 %v10939_v27, %v3945_v21 }
 0x5b4   :  { %3557 = vadd.xlane.f32.xlu0 %v3556_v43  ;;  %v4362_v61 = vpack.c.bf16 %v4313_v30, %v4312_v12 }
 0x5b5   :  { %4756 = vmatpush.bf16.msra.mxu2 %v4741_v4  ;;  %v3947_v43 = vmul.f32 0.5, %v3946_v18  ;;  %v11024_v18 = vmax.f32 %v3492_v23, 1e-24  ;;  %v3498_v23 = vpop.xlane.xlu1 %3497 }
 0x5b6   :  { %v3242_v39 = vpop.f32.mrf.mxu2 }
 0x5b7   :  { %v10929_v58 = vmax.f32 %v3242_v39, 0.0  ;;  %v3948_v39 = vsub.f32 1.5, %v3947_v43  ;;  %vm3990_vm6 = vweird.f32 %v11024_v18 }
 0x5b8   :  { %7263 = vmatmul.msk.bf16.vlgmr.msra.gmra.mxu2 %vm733_vm2, %v8003_v17 }
 0x5b9   :  { %v3381_v56 = vmul.f32 %v10929_v58, %v10929_v58 }
 0x5ba   :  { %v10935_v7 = vpop.f32.mrf.mxu1 }
 0x5bb   :  { %v3559_v38 = vsel %vm1498_vm3, %v3381_v56, 0.0  ;;  %v10991_v56 = vpop.eup %7778 }
 0x5bc   :  { %3560 = vadd.xlane.f32.xlu1 %v3559_v38  ;;  %v10998_v5 = vpop.eup %7780  ;;  %v3949_v38 = vmul.f32 %v10939_v27, %v3948_v39  ;;  %vm3981_vm13 = vweird.f32 %v10991_v56 }
 0x5bd   :  { %7244 = vmatmul.msk.bf16.gmra.mxu1 %vm1498_vm3, %v4361_v32  ;;  %v3495_v32 = vpop.xlane.xlu0 %3494  ;;  %v3965_v40 = vmul.f32 %v10998_v5, %v10974_v22  ;;  %vm3971_vm15 = vweird.f32 %v10998_v5  ;;  %vm11054_vm0 = vmor %vm3980_vm12, %vm3981_vm13 }
 0x5be   :  { %v3245_v15 = vpop.f32.mrf.mxu2  ;;  %v11012_v21 = vmax.f32 %v3495_v32, 1e-24  ;;  %v3953_v35 = vsel %vm11001_vm10, %v10939_v27, %v3949_v38  ;;  %v3501_v38 = vpop.xlane.xlu2 %3500  ;;  %vm11063_vm1 = vmor %vm3970_vm14, %vm3971_vm15 }
 0x5bf   :  { %v10959_v0 = vmax.f32 %v3245_v15, 0.0  ;;  %v3975_v15 = vmul.f32 %v10991_v56, %v10968_v44  ;;  %v3966_v54 = vmul.f32 %v10998_v5, %v3965_v40 }
 0x5c0   :  { %7782 = vrsqrt.f32 %v11012_v21  ;;  %vm4000_vm4 = vweird.f32 %v11012_v21 }
 0x5c1   :  { %v3382_v33 = vmul.f32 %v10959_v0, %v10959_v0  ;;  %v3976_v45 = vmul.f32 %v10991_v56, %v3975_v15  ;;  %7784 = vrsqrt.f32 %v11024_v18  ;;  %v3967_v43 = vmul.f32 0.5, %v3966_v54 }
 0x5c2   :  { %v10961_v49 = vpop.f32.mrf.mxu1 }
 0x5c3   :  { %v3562_v4 = vsel %vm1498_vm3, %v3382_v33, 0.0  ;;  %v3963_v33 = vsel %vm3962_vm11, %v10942_v9, %v3959_v51  ;;  %v8005_v9 = vld [vmem:[%s13208_s0 + $0x10] sm:$0xff]  ;;  %v3968_v39 = vsub.f32 1.5, %v3967_v43 }
 0x5c4   :  { %3563 = vadd.xlane.f32.xlu2 %v3562_v4  ;;  %v4314_v4 = vmul.f32 %v3953_v35, %v10414_v50  ;;  %v4315_v30 = vmul.f32 %v3963_v33, %v10421_v46 }
 0x5c5   :  { %v3969_v15 = vmul.f32 %v10998_v5, %v3968_v39 }
 0x5c6   :  { %v3247_v29 = vpop.f32.mrf.mxu2  ;;  %v4363_v50 = vpack.c.bf16 %v4315_v30, %v4314_v4 }
 0x5c7   :  { %v10979_v19 = vmax.f32 %v3247_v29, 0.0  ;;  %v3977_v29 = vmul.f32 0.5, %v3976_v45  ;;  %v11068_v45 = vmax.f32 %v3501_v38, 1e-24  ;;  %v3973_v43 = vsel %vm11063_vm1, %v10998_v5, %v3969_v15  ;;  %v8006_v5 = vld [vmem:[%s13208_s0 + $0x18] sm:$0xff] }
 0x5c8   :  { %7264 = vmatmul.msk.bf16.gmra.mxu2 %vm733_vm2, %v8004_v60  ;;  %v4670_v15 = vpack.c.bf16 %v10910_v24, %v10910_v24 }
 0x5c9   :  { %v3383_v47 = vmul.f32 %v10979_v19, %v10979_v19  ;;  %v3978_v46 = vsub.f32 1.5, %v3977_v29  ;;  %7786 = vrsqrt.f32 %v11068_v45  ;;  %vm4020_vm10 = vweird.f32 %v11068_v45 }
 0x5ca   :  { %v10986_v3 = vpop.f32.mrf.mxu1 }
 0x5cb   :  { %v3565_v17 = vsel %vm1498_vm3, %v3383_v47, 0.0  ;;  %v11039_v47 = vpop.eup %7782 }
 0x5cc   :  { %3566 = vadd.xlane.f32.xlu0 %v3565_v17  ;;  %v11045_v52 = vpop.eup %7784  ;;  %v3995_v17 = vmul.f32 %v11039_v47, %v11012_v21  ;;  %vm4001_vm5 = vweird.f32 %v11039_v47 }
 0x5cd   :  { %7245 = vmatmul.msk.bf16.gmra.mxu1 %vm1498_vm3, %v4362_v61  ;;  %v3985_v40 = vmul.f32 %v11045_v52, %v11024_v18  ;;  %vm3991_vm7 = vweird.f32 %v11045_v52  ;;  %vm11121_vm8 = vmor %vm4000_vm4, %vm4001_vm5 }
 0x5ce   :  { %v3250_v25 = vpop.f32.mrf.mxu2  ;;  %v3996_v33 = vmul.f32 %v11039_v47, %v3995_v17  ;;  %vm3992_vm9 = vmor %vm3990_vm6, %vm3991_vm7 }
 0x5cf   :  { %v11008_v6 = vmax.f32 %v3250_v25, 0.0  ;;  %v3979_v25 = vmul.f32 %v10991_v56, %v3978_v46 }
 0x5d1   :  { %v3384_v1 = vmul.f32 %v11008_v6, %v11008_v6  ;;  %v3983_v54 = vsel %vm11054_vm0, %v10991_v56, %v3979_v25 }
 0x5d2   :  { %v11014_v28 = vpop.f32.mrf.mxu1  ;;  %v4317_v56 = vmul.f32 %v3983_v54, %v10435_v13  ;;  %v3507_v54 = vpop.xlane.xlu1 %3506 }
 0x5d3   :  { %v3568_v34 = vsel %vm1498_vm3, %v3384_v1, 0.0  ;;  %v4674_v4 = vpack.c.bf16 %v11014_v28, %v11014_v28 }
 0x5d4   :  { %3569 = vadd.xlane.f32.xlu1 %v3568_v34 }
 0x5d5   :  { %v4791_v39 = vunpack.c.l.b16 %v4674_v4  ;;  %v4787_v4 = vunpack.c.l.b16 %v4670_v15 }
 0x5d6   :  { %v3252_v12 = vpop.f32.mrf.mxu2 }
 0x5d7   :  { %v11030_v27 = vmax.f32 %v3252_v12, 0.0  ;;  %v11076_v12 = vmax.f32 %v3498_v23, 1e-24 }
 0x5d8   :  { %7265 = vmatmul.msk.bf16.gmra.mxu2 %vm733_vm2, %v8005_v9 }
 0x5d9   :  { %v3385_v60 = vmul.f32 %v11030_v27, %v11030_v27  ;;  %7788 = vrsqrt.f32 %v11076_v12  ;;  %vm4010_vm12 = vweird.f32 %v11076_v12 }
 0x5da   :  { %v4536_v41 = vpop.f32.mrf.mxu1 }
 0x5db   :  { %v3571_v61 = vsel %vm1498_vm3, %v3385_v60, 0.0  ;;  %v4675_v44 = vpack.c.bf16 %v4536_v41, %v4536_v41  ;;  %v3986_v41 = vmul.f32 %v11045_v52, %v3985_v40  ;;  %v4673_v60 = vpack.c.bf16 %v10986_v3, %v10986_v3 }
 0x5dc   :  { %3572 = vadd.xlane.f32.xlu2 %v3571_v61  ;;  %v4672_v61 = vpack.c.bf16 %v10961_v49, %v10961_v49  ;;  %v4316_v3 = vmul.f32 %v3973_v43, %v10423_v20 }
 0x5dd   :  { %7246 = vmatmul.msk.bf16.gmra.mxu1 %vm1498_vm3, %v4363_v50  ;;  %v4792_v29 = vunpack.c.l.b16 %v4675_v44  ;;  %v3997_v50 = vmul.f32 0.5, %v3996_v33  ;;  %v3987_v13 = vmul.f32 0.5, %v3986_v41  ;;  %v4790_v25 = vunpack.c.l.b16 %v4673_v60 }
 0x5de   :  { %v3255_v32 = vpop.f32.mrf.mxu2  ;;  %v4364_v44 = vpack.c.bf16 %v4317_v56, %v4316_v3  ;;  %v4789_v40 = vunpack.c.l.b16 %v4672_v61  ;;  %v11130_v60 = vmax.f32 %v3507_v54, 1e-24 }
 0x5df   :  { %v11052_v42 = vmax.f32 %v3255_v32, 0.0  ;;  %v4671_v32 = vpack.c.bf16 %v10935_v7, %v10935_v7  ;;  %v3998_v51 = vsub.f32 1.5, %v3997_v50  ;;  %v4796_v23 = vpack.c.b16 %v4791_v39, %v4790_v25 }
 0x5e0   :  { %v3988_v7 = vsub.f32 1.5, %v3987_v13  ;;  %7790 = vrsqrt.f32 %v11130_v60  ;;  %vm4040_vm0 = vweird.f32 %v11130_v60 }
 0x5e1   :  { %v3386_v22 = vmul.f32 %v11052_v42, %v11052_v42  ;;  %v4788_v35 = vunpack.c.l.b16 %v4671_v32  ;;  %v3999_v33 = vmul.f32 %v11039_v47, %v3998_v51 }
 0x5e2   :  { %v4538_v1 = vpop.f32.mrf.mxu1 }
 0x5e3   :  { %v4676_v34 = vpack.c.bf16 %v4538_v1, %v4538_v1  ;;  %v3574_v30 = vsel %vm1498_vm3, %v3386_v22, 0.0  ;;  %v11105_v1 = vpop.eup %7786  ;;  %v4669_v22 = vpack.c.bf16 %v10877_v55, %v10877_v55  ;;  %v4003_v21 = vsel %vm11121_vm8, %v11039_v47, %v3999_v33  ;;  %v8007_v47 = vld [vmem:[%s13208_s0 + $0x20] sm:$0xff]  ;;  %v8008_v55 = vld [vmem:[%s13208_s0 + $0x28] sm:$0xff] }
 0x5e4   :  { %3575 = vadd.xlane.f32.xlu0 %v3574_v30  ;;  %v11112_v24 = vpop.eup %7788  ;;  %v4795_v30 = vpack.c.b16 %v4789_v40, %v4788_v35  ;;  %v4319_v39 = vmul.f32 %v4003_v21, %v10449_v53  ;;  %vm4021_vm11 = vweird.f32 %v11105_v1 }
 0x5e5   :  { %v4793_v9 = vunpack.c.l.b16 %v4676_v34  ;;  %v4015_v34 = vmul.f32 %v11105_v1, %v11068_v45  ;;  %v4005_v18 = vmul.f32 %v11112_v24, %v11076_v12  ;;  %v4786_v43 = vunpack.c.l.b16 %v4669_v22  ;;  %vm4022_vm14 = vmor %vm4020_vm10, %vm4021_vm11 }
 0x5e6   :  { %v3257_v46 = vpop.f32.mrf.mxu2  ;;  %vm4011_vm13 = vweird.f32 %v11112_v24 }
 0x5e7   :  { %v4797_v28 = vpack.c.b16 %v4793_v9, %v4792_v29  ;;  %v11088_v17 = vmax.f32 %v3257_v46, 0.0  ;;  %v3989_v29 = vmul.f32 %v11045_v52, %v3988_v7  ;;  %v3504_v9 = vpop.xlane.xlu0 %3503  ;;  %v4016_v56 = vmul.f32 %v11105_v1, %v4015_v34  ;;  %vm4012_vm15 = vmor %vm4010_vm12, %vm4011_vm13 }
 0x5e8   :  { %7266 = vmatmul.msk.bf16.gmra.mxu2 %vm733_vm2, %v8006_v5  ;;  %v4794_v50 = vpack.c.b16 %v4787_v4, %v4786_v43  ;;  %v4006_v61 = vmul.f32 %v11112_v24, %v4005_v18 }
 0x5e9   :  { %4806 = vmatpush.bf16.msra.mxu0 %v4797_v28  ;;  %v3387_v38 = vmul.f32 %v11088_v17, %v11088_v17  ;;  %v11136_v28 = vmax.f32 %v3504_v9, 1e-24  ;;  %v3993_v46 = vsel %vm3992_vm9, %v11045_v52, %v3989_v29  ;;  %v4017_v5 = vmul.f32 0.5, %v4016_v56  ;;  %v3516_v56 = vpop.xlane.xlu1 %3515 }
 0x5ea   :  { %v11098_v49 = vpop.f32.mrf.mxu1  ;;  %v4318_v3 = vmul.f32 %v3993_v46, %v10440_v62  ;;  %v4007_v13 = vmul.f32 0.5, %v4006_v61  ;;  %v3510_v62 = vpop.xlane.xlu2 %3509 }
 0x5eb   :  { %v3577_v20 = vsel %vm1498_vm3, %v3387_v38, 0.0  ;;  %7792 = vrsqrt.f32 %v11136_v28  ;;  %v4018_v25 = vsub.f32 1.5, %v4017_v5  ;;  %v7791_v38 = vpop.eup %7790  ;;  %vm4030_vm4 = vweird.f32 %v11136_v28 }
 0x5ec   :  { %3578 = vadd.xlane.f32.xlu1 %v3577_v20  ;;  %v4365_v32 = vpack.c.bf16 %v4319_v39, %v4318_v3  ;;  %v4008_v53 = vsub.f32 1.5, %v4007_v13  ;;  %v4035_v40 = vmul.f32 %v7791_v38, %v11130_v60  ;;  %v11157_v20 = vmax.f32 %v3510_v62, 1e-24 }
 0x5ed   :  { %7247 = vmatmul.msk.bf16.gmra.mxu1 %vm1498_vm3, %v4364_v44  ;;  %4807 = vmatpush.bf16.msra.mxu0 %v4796_v23  ;;  %v4019_v15 = vmul.f32 %v11105_v1, %v4018_v25  ;;  %vm4041_vm1 = vweird.f32 %v7791_v38  ;;  %v11189_v5 = vmax.f32 %v3516_v56, 1e-24 }
 0x5ee   :  { %v4009_v23 = vmul.f32 %v11112_v24, %v4008_v53  ;;  %v4036_v35 = vmul.f32 %v7791_v38, %v4035_v40  ;;  %7794 = vrsqrt.f32 %v11157_v20  ;;  %vm4042_vm6 = vmor %vm4040_vm0, %vm4041_vm1  ;;  %v8009_v40 = vld [vmem:[%s13208_s0 + $0x30] sm:$0xff]  ;;  %vm4050_vm8 = vweird.f32 %v11157_v20 }
 0x5ef   :  { %v3513_v44 = vpop.xlane.xlu0 %3512  ;;  %v4023_v12 = vsel %vm4022_vm14, %v11105_v1, %v4019_v15  ;;  %vm4070_vm14 = vweird.f32 %v11189_v5 }
 0x5f0   :  { %v11161_v7 = vmax.f32 %v3513_v44, 1e-24  ;;  %v4013_v33 = vsel %vm4012_vm15, %v11112_v24, %v4009_v23  ;;  %v4321_v54 = vmul.f32 %v4023_v12, %v10469_v48  ;;  %v4037_v4 = vmul.f32 0.5, %v4036_v35  ;;  %v13358_v44 = vld [vmem:[#allocation3_spill] sm:$0xff] }
 0x5f1   :  { %4808 = vmatpush.bf16.msra.mxu0 %v4795_v30  ;;  %v7793_v51 = vpop.eup %7792  ;;  %v4320_v30 = vmul.f32 %v4013_v33, %v10457_v11 }
 0x5f2   :  { %v11128_v41 = vpop.f32.mrf.mxu1  ;;  %v4025_v45 = vmul.f32 %v7793_v51, %v11136_v28  ;;  %7796 = vrsqrt.f32 %v11161_v7  ;;  %v4038_v43 = vsub.f32 1.5, %v4037_v4  ;;  %vm4031_vm5 = vweird.f32 %v7793_v51  ;;  %v3519_v46 = vpop.xlane.xlu2 %3518  ;;  %v13357_v28 = vld [vmem:[#allocation4_spill] sm:$0xff] }
 0x5f3   :  { %v4366_v24 = vpack.c.bf16 %v4321_v54, %v4320_v30  ;;  %vm4032_vm7 = vmor %vm4030_vm4, %vm4031_vm5  ;;  %7798 = vrsqrt.f32 %v11189_v5  ;;  %vm4060_vm10 = vweird.f32 %v11161_v7 }
 0x5f4   :  { %v4026_v34 = vmul.f32 %v7793_v51, %v4025_v45  ;;  %v11177_v18 = vpop.eup %7794 }
 0x5f5   :  { %4809 = vmatpush.bf16.msra.mxu0 %v4794_v50  ;;  %v4045_v11 = vmul.f32 %v11177_v18, %v11157_v20  ;;  %v4039_v50 = vmul.f32 %v7791_v38, %v4038_v43  ;;  %vm4051_vm9 = vweird.f32 %v11177_v18 }
 0x5f6   :  { %v4027_v1 = vmul.f32 0.5, %v4026_v34  ;;  %vm11212_vm12 = vmor %vm4050_vm8, %vm4051_vm9 }
 0x5f7   :  { %v4046_v39 = vmul.f32 %v11177_v18, %v4045_v11  ;;  %v4043_v13 = vsel %vm4042_vm6, %v7791_v38, %v4039_v50  ;;  %v3522_v4 = vpop.xlane.xlu0 %3521 }
 0x5f8   :  { %7267 = vmatmul.msk.bf16.vlgmr.msra.gmra.mxu0 %vm733_vm2, %v8007_v47  ;;  %v11179_v9 = vpop.eup %7796  ;;  %v4028_v48 = vsub.f32 1.5, %v4027_v1  ;;  %v11192_v47 = vmax.f32 %v3519_v46, 1e-24  ;;  %v4323_v53 = vmul.f32 %v4043_v13, %v13357_v28  ;;  %v11228_v43 = vmax.f32 %v3522_v4, 1e-24  ;;  %v13363_v13 = vld [vmem:[#allocation5_spill] sm:$0xff] }
 0x5f9   :  { %v4055_v21 = vmul.f32 %v11179_v9, %v11161_v7  ;;  %v4047_v25 = vmul.f32 0.5, %v4046_v39  ;;  %v11202_v12 = vpop.eup %7798  ;;  %vm4061_vm11 = vweird.f32 %v11179_v9  ;;  %v4677_v4 = vpack.c.bf16 %v11098_v49, %v11098_v49 }
 0x5fa   :  { %v11148_v52 = vpop.f32.mrf.mxu1  ;;  %v4029_v61 = vmul.f32 %v7793_v51, %v4028_v48  ;;  %7800 = vrsqrt.f32 %v11192_v47  ;;  %vm11217_vm13 = vmor %vm4060_vm10, %vm4061_vm11  ;;  %v4065_v30 = vmul.f32 %v11202_v12, %v11189_v5  ;;  %vm4071_vm15 = vweird.f32 %v11202_v12 }
 0x5fb   :  { %v4056_v3 = vmul.f32 %v11179_v9, %v4055_v21  ;;  %v4048_v23 = vsub.f32 1.5, %v4047_v25  ;;  %v13364_v25 = vld [vmem:[#allocation6_spill] sm:$0xff]  ;;  %7802 = vrsqrt.f32 %v11228_v43  ;;  %vm4080_vm0 = vweird.f32 %v11192_v47  ;;  %vm11268_vm4 = vmor %vm4070_vm14, %vm4071_vm15 }
 0x5fc   :  { %vm4090_vm6 = vweird.f32 %v11228_v43 }
 0x5fd   :  { %7248 = vmatmul.msk.bf16.gmra.mxu1 %vm1498_vm3, %v4365_v32  ;;  %v4033_v32 = vsel %vm4032_vm7, %v7793_v51, %v4029_v61  ;;  %v4057_v62 = vmul.f32 0.5, %v4056_v3  ;;  %v4049_v33 = vmul.f32 %v11177_v18, %v4048_v23  ;;  %v4066_v61 = vmul.f32 %v11202_v12, %v4065_v30 }
 0x5fe   :  { %v4322_v15 = vmul.f32 %v4033_v32, %v13358_v44 }
 0x5ff   :  { %v4058_v38 = vsub.f32 1.5, %v4057_v62  ;;  %v4053_v1 = vsel %vm11212_vm12, %v11177_v18, %v4049_v33  ;;  %v4067_v44 = vmul.f32 0.5, %v4066_v61 }
 0x600   :  { %v4367_v51 = vpack.c.bf16 %v4323_v53, %v4322_v15  ;;  %v11206_v35 = vpop.eup %7800  ;;  %v4324_v32 = vmul.f32 %v4053_v1, %v13363_v13  ;;  %v13367_v13 = vld [vmem:[#allocation8_spill] sm:$0xff] }
 0x601   :  { %v4059_v54 = vmul.f32 %v11179_v9, %v4058_v38  ;;  %v4075_v7 = vmul.f32 %v11206_v35, %v11192_v47  ;;  %v11255_v33 = vpop.eup %7802  ;;  %vm4081_vm1 = vweird.f32 %v11206_v35  ;;  %v3528_v47 = vpop.xlane.xlu2 %3527 }
 0x602   :  { %v11163_v22 = vpop.f32.mrf.mxu1  ;;  %v4085_v1 = vmul.f32 %v11255_v33, %v11228_v43  ;;  %vm4082_vm5 = vmor %vm4080_vm0, %vm4081_vm1  ;;  %vm4091_vm7 = vweird.f32 %v11255_v33 }
 0x603   :  { %v4063_v11 = vsel %vm11217_vm13, %v11179_v9, %v4059_v54  ;;  %v4076_v46 = vmul.f32 %v11206_v35, %v4075_v7  ;;  %v4680_v9 = vpack.c.bf16 %v11163_v22, %v11163_v22  ;;  %v4678_v22 = vpack.c.bf16 %v11128_v41, %v11128_v41  ;;  %vm4092_vm10 = vmor %vm4090_vm6, %vm4091_vm7 }
 0x604   :  { %v4325_v28 = vmul.f32 %v4063_v11, %v13364_v25  ;;  %v3531_v11 = vpop.xlane.xlu0 %3530  ;;  %v13368_v25 = vld [vmem:[#allocation7_spill] sm:$0xff] }
 0x605   :  { %v4077_v62 = vmul.f32 0.5, %v4076_v46  ;;  %v4840_v41 = vunpack.c.l.b16 %v4678_v22 }
 0x606   :  { %v4368_v38 = vpack.c.bf16 %v4325_v28, %v4324_v32 }
 0x607   :  { %v4078_v34 = vsub.f32 1.5, %v4077_v62 }
 0x608   :  { %7268 = vmatmul.msk.bf16.gmra.mxu0 %vm733_vm2, %v8008_v55 }
 0x609   :  { %v4079_v30 = vmul.f32 %v11206_v35, %v4078_v34  ;;  %v3537_v22 = vpop.xlane.xlu2 %3536 }
 0x60a   :  { %v11175_v29 = vpop.f32.mrf.mxu1  ;;  %v11309_v43 = vmax.f32 %v3537_v22, 1e-24 }
 0x60b   :  { %v4681_v39 = vpack.c.bf16 %v11175_v29, %v11175_v29  ;;  %v4679_v29 = vpack.c.bf16 %v11148_v52, %v11148_v52  ;;  %v4068_v52 = vsub.f32 1.5, %v4067_v44  ;;  %v4083_v61 = vsel %vm4082_vm5, %v11206_v35, %v4079_v30  ;;  %v8011_v35 = vld [vmem:[%s13208_s0 + $0x40] sm:$0xff] }
 0x60c   :  { %v4327_v32 = vmul.f32 %v4083_v61, %v13367_v13  ;;  %vm4140_vm6 = vweird.f32 %v11309_v43 }
 0x60d   :  { %7249 = vmatmul.msk.bf16.gmra.mxu1 %vm1498_vm3, %v4366_v24  ;;  %v3525_v24 = vpop.xlane.xlu1 %3524  ;;  %v4843_v15 = vunpack.c.l.b16 %v4681_v39  ;;  %v4841_v20 = vunpack.c.l.b16 %v4679_v29 }
 0x60e   :  { %v11233_v21 = vmax.f32 %v3525_v24, 1e-24  ;;  %v4839_v24 = vunpack.c.l.b16 %v4677_v4 }
 0x610   :  { %7804 = vrsqrt.f32 %v11233_v21  ;;  %v4847_v46 = vpack.c.b16 %v4840_v41, %v4839_v24  ;;  %vm4100_vm8 = vweird.f32 %v11233_v21 }
 0x612   :  { %v4553_v60 = vpop.f32.mrf.mxu1 }
 0x613   :  { %v4682_v56 = vpack.c.bf16 %v4553_v60, %v4553_v60 }
 0x615   :  { %v4844_v60 = vunpack.c.l.b16 %v4682_v56  ;;  %v3534_v34 = vpop.xlane.xlu1 %3533 }
 0x616   :  { %v11257_v54 = vpop.eup %7804 }
 0x617   :  { %v4095_v49 = vmul.f32 %v11257_v54, %v11233_v21  ;;  %vm4101_vm9 = vweird.f32 %v11257_v54 }
 0x618   :  { %7269 = vmatmul.msk.bf16.gmra.mxu0 %vm733_vm2, %v8009_v40  ;;  %v8010_v40 = vld [vmem:[%s13208_s0 + $0x38] sm:$0xff]  ;;  %vm4102_vm11 = vmor %vm4100_vm8, %vm4101_vm9 }
 0x61a   :  { %v4556_v45 = vpop.f32.mrf.mxu1 }
 0x61b   :  { %v4683_v55 = vpack.c.bf16 %v4556_v45, %v4556_v45  ;;  %v4842_v45 = vunpack.c.l.b16 %v4680_v9 }
 0x61d   :  { %7250 = vmatmul.msk.bf16.gmra.mxu1 %vm1498_vm3, %v4367_v51  ;;  %v4845_v18 = vunpack.c.l.b16 %v4683_v55  ;;  %v4849_v51 = vpack.c.b16 %v4844_v60, %v4843_v15  ;;  %v4848_v7 = vpack.c.b16 %v4842_v45, %v4841_v20  ;;  %v4069_v55 = vmul.f32 %v11202_v12, %v4068_v52 }
 0x61e   :  { %v11313_v20 = vmax.f32 %v3534_v34, 1e-24 }
 0x61f   :  { %v4073_v39 = vsel %vm11268_vm4, %v11202_v12, %v4069_v55 }
 0x620   :  { %v4326_v28 = vmul.f32 %v4073_v39, %v13368_v25  ;;  %vm4130_vm7 = vweird.f32 %v11313_v20 }
 0x622   :  { %v4558_v48 = vpop.f32.mrf.mxu1 }
 0x623   :  { %v4684_v50 = vpack.c.bf16 %v4558_v48, %v4558_v48  ;;  %v11276_v48 = vmax.f32 %v3528_v47, 1e-24 }
 0x625   :  { %v4846_v3 = vunpack.c.l.b16 %v4684_v50  ;;  %v11280_v50 = vmax.f32 %v3531_v11, 1e-24  ;;  %7806 = vrsqrt.f32 %v11276_v48  ;;  %v8012_v11 = vld [vmem:[%s13208_s0 + $0x48] sm:$0xff]  ;;  %vm4110_vm12 = vweird.f32 %v11276_v48 }
 0x627   :  { %v4850_v53 = vpack.c.b16 %v4846_v3, %v4845_v18  ;;  %v4096_v18 = vmul.f32 %v11257_v54, %v4095_v49  ;;  %v4086_v3 = vmul.f32 %v11255_v33, %v4085_v1  ;;  %7808 = vrsqrt.f32 %v11280_v50  ;;  %v13369_v49 = vld [vmem:[#allocation9_spill] sm:$0xff] }
 0x628   :  { %7270 = vmatmul.msk.bf16.gmra.mxu0 %vm733_vm2, %v8010_v40  ;;  %7810 = vrsqrt.f32 %v11309_v43  ;;  %vm4120_vm14 = vweird.f32 %v11280_v50 }
 0x629   :  { %4859 = vmatpush.bf16.msrb.mxu2 %v4850_v53  ;;  %v4097_v9 = vmul.f32 0.5, %v4096_v18  ;;  %v4087_v60 = vmul.f32 0.5, %v4086_v3  ;;  %v4369_v53 = vpack.c.bf16 %v4327_v32, %v4326_v28  ;;  %7812 = vrsqrt.f32 %v11313_v20  ;;  %v3543_v28 = vpop.xlane.xlu1 %3542 }
 0x62a   :  { %v11251_v23 = vpop.f32.mrf.mxu1 }
 0x62b   :  { %v7807_v44 = vpop.eup %7806  ;;  %v4098_v29 = vsub.f32 1.5, %v4097_v9  ;;  %v4088_v15 = vsub.f32 1.5, %v4087_v60  ;;  %v3540_v9 = vpop.xlane.xlu0 %3539 }
 0x62c   :  { %vm4111_vm13 = vweird.f32 %v7807_v44  ;;  %v11348_v22 = vmax.f32 %v3540_v9, 1e-24 }
 0x62d   :  { %7251 = vmatmul.msk.bf16.gmra.mxu1 %vm1498_vm3, %v4368_v38  ;;  %4860 = vmatpush.bf16.msrb.mxu2 %v4849_v51  ;;  %v7809_v40 = vpop.eup %7808  ;;  %v4099_v45 = vmul.f32 %v11257_v54, %v4098_v29  ;;  %v4089_v38 = vmul.f32 %v11255_v33, %v4088_v15  ;;  %v4105_v51 = vmul.f32 %v7807_v44, %v11276_v48  ;;  %vm4112_vm0 = vmor %vm4110_vm12, %vm4111_vm13 }
 0x62e   :  { %v4115_v52 = vmul.f32 %v7809_v40, %v11280_v50  ;;  %v11331_v61 = vpop.eup %7810  ;;  %vm4121_vm15 = vweird.f32 %v7809_v40 }
 0x62f   :  { %v4103_v41 = vsel %vm4102_vm11, %v11257_v54, %v4099_v45  ;;  %v4106_v30 = vmul.f32 %v7807_v44, %v4105_v51  ;;  %v11333_v18 = vpop.eup %7812  ;;  %v4135_v3 = vmul.f32 %v11331_v61, %v11309_v43  ;;  %vm4122_vm1 = vmor %vm4120_vm14, %vm4121_vm15  ;;  %vm4141_vm4 = vweird.f32 %v11331_v61 }
 0x630   :  { %v4116_v55 = vmul.f32 %v7809_v40, %v4115_v52  ;;  %v4329_v5 = vmul.f32 %v4103_v41, %v10556_v10  ;;  %v4125_v32 = vmul.f32 %v11333_v18, %v11313_v20  ;;  %v8013_v52 = vld [vmem:[%s13208_s0 + $0x50] sm:$0xff]  ;;  %vm4131_vm5 = vweird.f32 %v11333_v18  ;;  %vm11373_vm8 = vmor %vm4140_vm6, %vm4141_vm4 }
 0x631   :  { %4861 = vmatpush.bf16.msrb.mxu2 %v4848_v7  ;;  %v4093_v7 = vsel %vm4092_vm10, %v11255_v33, %v4089_v38  ;;  %v4107_v47 = vmul.f32 0.5, %v4106_v30  ;;  %v4136_v48 = vmul.f32 %v11331_v61, %v4135_v3  ;;  %vm11379_vm9 = vmor %vm4130_vm7, %vm4131_vm5  ;;  %vm4150_vm14 = vweird.f32 %v11348_v22 }
 0x632   :  { %v11278_v56 = vpop.f32.mrf.mxu1  ;;  %v4328_v1 = vmul.f32 %v4093_v7, %v13369_v49  ;;  %v4117_v24 = vmul.f32 0.5, %v4116_v55  ;;  %v4126_v29 = vmul.f32 %v11333_v18, %v4125_v32 }
 0x633   :  { %v4108_v10 = vsub.f32 1.5, %v4107_v47  ;;  %v4137_v38 = vmul.f32 0.5, %v4136_v48 }
 0x634   :  { %v4370_v33 = vpack.c.bf16 %v4329_v5, %v4328_v1  ;;  %v4118_v39 = vsub.f32 1.5, %v4117_v24  ;;  %v4127_v34 = vmul.f32 0.5, %v4126_v29  ;;  %v3549_v1 = vpop.xlane.xlu0 %3548 }
 0x635   :  { %4862 = vmatpush.bf16.msrb.mxu2 %v4847_v46  ;;  %v4109_v13 = vmul.f32 %v7807_v44, %v4108_v10  ;;  %v11386_v3 = vmax.f32 %v3549_v1, 1e-24  ;;  %v4685_v1 = vpack.c.bf16 %v11251_v23, %v11251_v23 }
 0x636   :  { %v4119_v25 = vmul.f32 %v7809_v40, %v4118_v39 }
 0x637   :  { %v4113_v50 = vsel %vm4112_vm0, %v7807_v44, %v4109_v13  ;;  %vm4180_vm4 = vweird.f32 %v11386_v3 }
 0x638   :  { %7271 = vmatmul.msk.bf16.vlgmr.msrb.gmra.mxu2 %vm733_vm2, %v8011_v35  ;;  %v11343_v35 = vmax.f32 %v3543_v28, 1e-24  ;;  %v4123_v15 = vsel %vm4122_vm1, %v7809_v40, %v4119_v25  ;;  %v4330_v45 = vmul.f32 %v4113_v50, %v10593_v16  ;;  %v4138_v40 = vsub.f32 1.5, %v4137_v38 }
 0x639   :  { %v4331_v51 = vmul.f32 %v4123_v15, %v10616_v14  ;;  %v4128_v16 = vsub.f32 1.5, %v4127_v34 }
 0x63a   :  { %v11296_v12 = vpop.f32.mrf.mxu1  ;;  %7814 = vrsqrt.f32 %v11343_v35  ;;  %v4139_v55 = vmul.f32 %v11331_v61, %v4138_v40  ;;  %v4686_v40 = vpack.c.bf16 %v11278_v56, %v11278_v56  ;;  %vm4160_vm12 = vweird.f32 %v11343_v35 }
 0x63b   :  { %v11298_v62 = vpop.f32.mrf.mxu2  ;;  %7816 = vrsqrt.f32 %v11348_v22  ;;  %v4371_v41 = vpack.c.bf16 %v4331_v51, %v4330_v45  ;;  %v4129_v5 = vmul.f32 %v11333_v18, %v4128_v16 }
 0x63c   :  { %v4143_v43 = vsel %vm11373_vm8, %v11331_v61, %v4139_v55  ;;  %7818 = vrsqrt.f32 %v11386_v3  ;;  %v4893_v56 = vunpack.c.l.b16 %v4686_v40  ;;  %v5149_v23 = vmul.f32 %v11298_v62, %v11298_v62 }
 0x63d   :  { %7252 = vmatmul.msk.bf16.gmra.mxu1 %vm1498_vm3, %v4369_v53  ;;  %v4133_v25 = vsel %vm11379_vm9, %v11333_v18, %v4129_v5  ;;  %v4333_v61 = vmul.f32 %v4143_v43, %v10653_v2  ;;  %v4687_v2 = vpack.c.bf16 %v11296_v12, %v11296_v12 }
 0x63e   :  { %v4332_v38 = vmul.f32 %v4133_v25, %v10618_v36 }
 0x640   :  { %v11360_v30 = vpop.eup %7814  ;;  %v4372_v36 = vpack.c.bf16 %v4333_v61, %v4332_v38 }
 0x641   :  { %v11363_v14 = vpop.eup %7816  ;;  %v4155_v49 = vmul.f32 %v11360_v30, %v11343_v35  ;;  %vm4161_vm10 = vweird.f32 %v11360_v30 }
 0x642   :  { %v11311_v4 = vpop.f32.mrf.mxu1  ;;  %v11420_v12 = vpop.eup %7818  ;;  %vm4151_vm11 = vweird.f32 %v11363_v14  ;;  %vm11443_vm13 = vmor %vm4160_vm12, %vm4161_vm10 }
 0x643   :  { %v11315_v21 = vpop.f32.mrf.mxu2  ;;  %v4156_v28 = vmul.f32 %v11360_v30, %v4155_v49  ;;  %v4688_v15 = vpack.c.bf16 %v11311_v4, %v11311_v4  ;;  %v4175_v39 = vmul.f32 %v11420_v12, %v11386_v3  ;;  %vm4152_vm15 = vmor %vm4150_vm14, %vm4151_vm11  ;;  %vm4181_vm0 = vweird.f32 %v11420_v12 }
 0x644   :  { %v5150_v4 = vmul.f32 %v11315_v21, %v11315_v21  ;;  %vm4182_vm5 = vmor %vm4180_vm4, %vm4181_vm0 }
 0x645   :  { %v4157_v51 = vmul.f32 0.5, %v4156_v28  ;;  %v4176_v38 = vmul.f32 %v11420_v12, %v4175_v39 }
 0x646   :  { %v5216_v5 = vsel %vm1498_vm3, %v5150_v4, 0.0 }
 0x647   :  { %v4158_v49 = vsub.f32 1.5, %v4157_v51  ;;  %5217 = vadd.xlane.f32.xlu0 %v5216_v5 }
 0x648   :  { %7272 = vmatmul.msk.bf16.gmra.mxu2 %vm733_vm2, %v8012_v11  ;;  %v4145_v11 = vmul.f32 %v11363_v14, %v11348_v22 }
 0x64a   :  { %v11327_v54 = vpop.f32.mrf.mxu1 }
 0x64b   :  { %v11329_v46 = vpop.f32.mrf.mxu2  ;;  %v4689_v48 = vpack.c.bf16 %v11327_v54, %v11327_v54  ;;  %v8014_v54 = vld [vmem:[%s13208_s0 + $0x58] sm:$0xff] }
 0x64d   :  { %7253 = vmatmul.msk.bf16.gmra.mxu1 %vm1498_vm3, %v4370_v33  ;;  %v3546_v33 = vpop.xlane.xlu2 %3545  ;;  %v4896_v34 = vunpack.c.l.b16 %v4689_v48  ;;  %v3552_v48 = vpop.xlane.xlu1 %3551 }
 0x64e   :  { %v11394_v9 = vmax.f32 %v3546_v33, 1e-24 }
 0x650   :  { %7820 = vrsqrt.f32 %v11394_v9  ;;  %vm4170_vm6 = vweird.f32 %v11394_v9 }
 0x652   :  { %v4573_v60 = vpop.f32.mrf.mxu1 }
 0x653   :  { %v11345_v53 = vpop.f32.mrf.mxu2  ;;  %v4690_v20 = vpack.c.bf16 %v4573_v60, %v4573_v60  ;;  %v4146_v60 = vmul.f32 %v11363_v14, %v4145_v11 }
 0x655   :  { %v4897_v45 = vunpack.c.l.b16 %v4690_v20  ;;  %v3555_v43 = vpop.xlane.xlu2 %3554  ;;  %v4892_v20 = vunpack.c.l.b16 %v4685_v1 }
 0x656   :  { %v11425_v11 = vpop.eup %7820 }
 0x657   :  { %v4902_v16 = vpack.c.b16 %v4897_v45, %v4896_v34  ;;  %v4165_v28 = vmul.f32 %v11425_v11, %v11394_v9  ;;  %vm4171_vm1 = vweird.f32 %v11425_v11 }
 0x658   :  { %7273 = vmatmul.msk.bf16.gmra.mxu2 %vm733_vm2, %v8013_v52  ;;  %v4147_v52 = vmul.f32 0.5, %v4146_v60  ;;  %v11447_v60 = vmax.f32 %v3555_v43, 1e-24  ;;  %v3561_v43 = vpop.xlane.xlu1 %3560  ;;  %vm4172_vm7 = vmor %vm4170_vm6, %vm4171_vm1 }
 0x659   :  { %v4166_v22 = vmul.f32 %v11425_v11, %v4165_v28  ;;  %v11507_v61 = vmax.f32 %v3561_v43, 1e-24 }
 0x65a   :  { %v4576_v44 = vpop.f32.mrf.mxu1  ;;  %v4148_v24 = vsub.f32 1.5, %v4147_v52  ;;  %7822 = vrsqrt.f32 %v11447_v60  ;;  %v4177_v52 = vmul.f32 0.5, %v4176_v38  ;;  %vm4200_vm10 = vweird.f32 %v11447_v60 }
 0x65b   :  { %v11358_v7 = vpop.f32.mrf.mxu2  ;;  %v4691_v47 = vpack.c.bf16 %v4576_v44, %v4576_v44  ;;  %vm4220_vm14 = vweird.f32 %v11507_v61 }
 0x65c   :  { %v4149_v25 = vmul.f32 %v11363_v14, %v4148_v24  ;;  %v4178_v24 = vsub.f32 1.5, %v4177_v52 }
 0x65d   :  { %7254 = vmatmul.msk.bf16.gmra.mxu1 %vm1498_vm3, %v4371_v41  ;;  %v4898_v50 = vunpack.c.l.b16 %v4691_v47  ;;  %v4895_v41 = vunpack.c.l.b16 %v4688_v15  ;;  %v4894_v47 = vunpack.c.l.b16 %v4687_v2  ;;  %v4900_v15 = vpack.c.b16 %v4893_v56, %v4892_v20 }
 0x65e   :  { %v4153_v2 = vsel %vm4152_vm15, %v11363_v14, %v4149_v25  ;;  %v5151_v14 = vmul.f32 %v11329_v46, %v11329_v46 }
 0x65f   :  { %v4901_v33 = vpack.c.b16 %v4895_v41, %v4894_v47  ;;  %v4334_v41 = vmul.f32 %v4153_v2, %v10668_v26 }
 0x662   :  { %v4578_v10 = vpop.f32.mrf.mxu1 }
 0x663   :  { %v4692_v13 = vpack.c.bf16 %v4578_v10, %v4578_v10  ;;  %v11388_v32 = vpop.f32.mrf.mxu2  ;;  %v4159_v10 = vmul.f32 %v11360_v30, %v4158_v49  ;;  %v5219_v49 = vsel %vm1498_vm3, %v5151_v14, 0.0 }
 0x664   :  { %v5154_v28 = vmul.f32 %v11388_v32, %v11388_v32 }
 0x665   :  { %v4899_v29 = vunpack.c.l.b16 %v4692_v13  ;;  %v5152_v13 = vmul.f32 %v11345_v53, %v11345_v53 }
 0x666   :  { %v5228_v3 = vsel %vm1498_vm3, %v5154_v28, 0.0 }
 0x667   :  { %v4903_v18 = vpack.c.b16 %v4899_v29, %v4898_v50  ;;  %v5213_v29 = vsel %vm1498_vm3, %v5149_v23, 0.0  ;;  %v5222_v35 = vsel %vm1498_vm3, %v5152_v13, 0.0  ;;  %v4179_v23 = vmul.f32 %v11420_v12, %v4178_v24  ;;  %v3558_v13 = vpop.xlane.xlu0 %3557 }
 0x668   :  { %7274 = vmatmul.msk.bf16.gmra.mxu2 %vm733_vm2, %v8014_v54  ;;  %5214 = vadd.xlane.f32.xlu2 %v5213_v29  ;;  %v11461_v54 = vmax.f32 %v3552_v48, 1e-24 }
 0x669   :  { %4912 = vmatpush.bf16.msrb.mxu0 %v4903_v18  ;;  %v4163_v18 = vsel %vm11443_vm13, %v11360_v30, %v4159_v10  ;;  %5223 = vadd.xlane.f32.xlu0 %v5222_v35  ;;  %v4183_v38 = vsel %vm4182_vm5, %v11420_v12, %v4179_v23  ;;  %v8016_v12 = vld [vmem:[%s13208_s0 + $0x68] sm:$0xff] }
 0x66a   :  { %v11413_v44 = vpop.f32.mrf.mxu1  ;;  %v4335_v4 = vmul.f32 %v4163_v18, %v10698_v63  ;;  %7824 = vrsqrt.f32 %v11461_v54  ;;  %v5153_v63 = vmul.f32 %v11358_v7, %v11358_v7  ;;  %v11512_v18 = vmax.f32 %v3558_v13, 1e-24 }
 0x66b   :  { %v11417_v55 = vpop.f32.mrf.mxu2  ;;  %7826 = vrsqrt.f32 %v11507_v61  ;;  %vm4190_vm12 = vweird.f32 %v11461_v54 }
 0x66c   :  { %v4373_v1 = vpack.c.bf16 %v4335_v4, %v4334_v41  ;;  %v5225_v47 = vsel %vm1498_vm3, %v5153_v63, 0.0  ;;  %v5155_v25 = vmul.f32 %v11417_v55, %v11417_v55  ;;  %v4337_v4 = vmul.f32 %v4183_v38, %v10745_v37 }
 0x66d   :  { %7255 = vmatmul.msk.bf16.gmra.mxu1 %vm1498_vm3, %v4372_v36  ;;  %4913 = vmatpush.bf16.msrb.mxu0 %v4902_v16  ;;  %v8015_v36 = vld [vmem:[%s13208_s0 + $0x60] sm:$0xff]  ;;  %v4167_v16 = vmul.f32 0.5, %v4166_v22  ;;  %7828 = vrsqrt.f32 %v11512_v18  ;;  %vm4210_vm0 = vweird.f32 %v11512_v18 }
 0x66e   :  { %v5231_v35 = vsel %vm1498_vm3, %v5155_v25, 0.0  ;;  %v3564_v25 = vpop.xlane.xlu2 %3563 }
 0x66f   :  { %v4168_v26 = vsub.f32 1.5, %v4167_v16  ;;  %v3567_v23 = vpop.xlane.xlu0 %3566  ;;  %v11567_v38 = vmax.f32 %v3564_v25, 1e-24 }
 0x670   :  { %5220 = vadd.xlane.f32.xlu2 %v5219_v49 }
 0x671   :  { %4914 = vmatpush.bf16.msrb.mxu0 %v4901_v33  ;;  %5226 = vadd.xlane.f32.xlu0 %v5225_v47  ;;  %v11487_v33 = vpop.eup %7822  ;;  %v4169_v48 = vmul.f32 %v11425_v11, %v4168_v26 }
 0x672   :  { %v11440_v50 = vpop.f32.mrf.mxu1  ;;  %v11492_v39 = vpop.eup %7824  ;;  %v4195_v20 = vmul.f32 %v11487_v33, %v11447_v60  ;;  %vm4201_vm8 = vweird.f32 %v11487_v33 }
 0x673   :  { %v11449_v45 = vpop.f32.mrf.mxu2  ;;  %v4185_v29 = vmul.f32 %v11492_v39, %v11461_v54  ;;  %v4173_v2 = vsel %vm4172_vm7, %v11425_v11, %v4169_v48  ;;  %v11539_v63 = vpop.eup %7826  ;;  %vm4191_vm9 = vweird.f32 %v11492_v39  ;;  %vm4202_vm11 = vmor %vm4200_vm10, %vm4201_vm8  ;;  %vm4230_vm8 = vweird.f32 %v11567_v38 }
 0x674   :  { %v5156_v51 = vmul.f32 %v11449_v45, %v11449_v45  ;;  %v4336_v52 = vmul.f32 %v4173_v2, %v10715_v57  ;;  %v4215_v24 = vmul.f32 %v11539_v63, %v11507_v61  ;;  %vm4192_vm13 = vmor %vm4190_vm12, %vm4191_vm9  ;;  %vm4221_vm15 = vweird.f32 %v11539_v63 }
 0x675   :  { %4915 = vmatpush.bf16.msrb.mxu0 %v4900_v15  ;;  %v11465_v34 = vpop.f32.mrf.mxu0  ;;  %v4186_v22 = vmul.f32 %v11492_v39, %v4185_v29  ;;  %v11562_v29 = vmax.f32 %v3567_v23, 1e-24  ;;  %vm11598_vm4 = vmor %vm4220_vm14, %vm4221_vm15 }
 0x676   :  { %v5234_v30 = vsel %vm1498_vm3, %v5156_v51, 0.0  ;;  %v5157_v40 = vmul.f32 %v11465_v34, %v11465_v34  ;;  %v4196_v51 = vmul.f32 %v11487_v33, %v4195_v20  ;;  %v4374_v41 = vpack.c.bf16 %v4337_v4, %v4336_v52 }
 0x677   :  { %5235 = vadd.xlane.f32.xlu1 %v5234_v30  ;;  %v4216_v48 = vmul.f32 %v11539_v63, %v4215_v24  ;;  %7830 = vrsqrt.f32 %v11562_v29  ;;  %vm4240_vm6 = vweird.f32 %v11562_v29 }
 0x678   :  { %7275 = vmatmul.msk.bf16.vlgmr.msrb.gmra.mxu0 %vm733_vm2, %v8015_v36  ;;  %v5237_v56 = vsel %vm1498_vm3, %v5157_v40, 0.0  ;;  %5232 = vadd.xlane.f32.xlu2 %v5231_v35  ;;  %v4197_v9 = vmul.f32 0.5, %v4196_v51  ;;  %v4187_v36 = vmul.f32 0.5, %v4186_v22  ;;  %7832 = vrsqrt.f32 %v11567_v38 }
 0x679   :  { %5229 = vadd.xlane.f32.xlu0 %v5228_v3  ;;  %v4217_v22 = vmul.f32 0.5, %v4216_v48 }
 0x67a   :  { %v11482_v5 = vpop.f32.mrf.mxu1  ;;  %v4198_v16 = vsub.f32 1.5, %v4197_v9  ;;  %v4188_v57 = vsub.f32 1.5, %v4187_v36 }
 0x67c   :  { %v4199_v26 = vmul.f32 %v11487_v33, %v4198_v16  ;;  %v4189_v13 = vmul.f32 %v11492_v39, %v4188_v57 }
 0x67d   :  { %7256 = vmatmul.msk.bf16.gmra.mxu1 %vm1498_vm3, %v4373_v1  ;;  %v11490_v10 = vpop.f32.mrf.mxu0  ;;  %v11542_v1 = vpop.eup %7828 }
 0x67e   :  { %v5158_v11 = vmul.f32 %v11490_v10, %v11490_v10  ;;  %v4205_v43 = vmul.f32 %v11542_v1, %v11512_v18  ;;  %v4203_v35 = vsel %vm4202_vm11, %v11487_v33, %v4199_v26  ;;  %v4193_v60 = vsel %vm4192_vm13, %v11492_v39, %v4189_v13  ;;  %v8017_v33 = vld [vmem:[%s13208_s0 + $0x70] sm:$0xff]  ;;  %v11583_v36 = vpop.eup %7830 }
 0x67f   :  { %5238 = vadd.xlane.f32.xlu1 %v5237_v56  ;;  %v4339_v2 = vmul.f32 %v4203_v35, %v10785_v8  ;;  %v4338_v9 = vmul.f32 %v4193_v60, %v10762_v31  ;;  %vm4211_vm1 = vweird.f32 %v11542_v1  ;;  %v4235_v18 = vmul.f32 %v11583_v36, %v11562_v29 }
 0x680   :  { %v5240_v40 = vsel %vm1498_vm3, %v5158_v11, 0.0  ;;  %v4206_v3 = vmul.f32 %v11542_v1, %v4205_v43  ;;  %vm11604_vm5 = vmor %vm4210_vm0, %vm4211_vm1  ;;  %v3570_v43 = vpop.xlane.xlu1 %3569  ;;  %vm4241_vm7 = vweird.f32 %v11583_v36 }
 0x681   :  { %5241 = vadd.xlane.f32.xlu2 %v5240_v40  ;;  %v4375_v11 = vpack.c.bf16 %v4339_v2, %v4338_v9  ;;  %v11622_v60 = vmax.f32 %v3570_v43, 1e-24  ;;  %vm11666_vm10 = vmor %vm4240_vm6, %vm4241_vm7 }
 0x682   :  { %v11509_v15 = vpop.f32.mrf.mxu1  ;;  %v4207_v54 = vmul.f32 0.5, %v4206_v3  ;;  %v4236_v3 = vmul.f32 %v11583_v36, %v4235_v18 }
 0x683   :  { %vm4250_vm14 = vweird.f32 %v11622_v60 }
 0x684   :  { %v4208_v52 = vsub.f32 1.5, %v4207_v54 }
 0x685   :  { %v11523_v30 = vpop.f32.mrf.mxu0 }
 0x686   :  { %v5159_v37 = vmul.f32 %v11523_v30, %v11523_v30  ;;  %v4209_v61 = vmul.f32 %v11542_v1, %v4208_v52 }
 0x688   :  { %7276 = vmatmul.msk.bf16.gmra.mxu0 %vm733_vm2, %v8016_v12  ;;  %v5243_v49 = vsel %vm1498_vm3, %v5159_v37, 0.0  ;;  %v4218_v12 = vsub.f32 1.5, %v4217_v22  ;;  %v11592_v37 = vpop.eup %7832  ;;  %v4213_v35 = vsel %vm11604_vm5, %v11542_v1, %v4209_v61  ;;  %v4696_v1 = vpack.c.bf16 %v11509_v15, %v11509_v15 }
 0x689   :  { %5244 = vadd.xlane.f32.xlu0 %v5243_v49  ;;  %v4225_v26 = vmul.f32 %v11592_v37, %v11567_v38  ;;  %vm4231_vm9 = vweird.f32 %v11592_v37 }
 0x68a   :  { %v11534_v14 = vpop.f32.mrf.mxu1  ;;  %v4219_v40 = vmul.f32 %v11539_v63, %v4218_v12  ;;  %v4695_v12 = vpack.c.bf16 %v11482_v5, %v11482_v5  ;;  %v4693_v5 = vpack.c.bf16 %v11413_v44, %v11413_v44  ;;  %vm4232_vm11 = vmor %vm4230_vm8, %vm4231_vm9 }
 0x68b   :  { %v4697_v2 = vpack.c.bf16 %v11534_v14, %v11534_v14  ;;  %v4340_v14 = vmul.f32 %v4213_v35, %v10902_v59  ;;  %v4694_v59 = vpack.c.bf16 %v11440_v50, %v11440_v50 }
 0x68c   :  { %v4223_v13 = vsel %vm11598_vm4, %v11539_v63, %v4219_v40  ;;  %v4226_v63 = vmul.f32 %v11592_v37, %v4225_v26  ;;  %v4947_v57 = vunpack.c.l.b16 %v4695_v12 }
 0x68d   :  { %7257 = vmatmul.msk.bf16.gmra.mxu1 %vm1498_vm3, %v4374_v41  ;;  %v11545_v47 = vpop.f32.mrf.mxu0  ;;  %v3573_v41 = vpop.xlane.xlu2 %3572  ;;  %v4341_v54 = vmul.f32 %v4223_v13, %v10929_v58  ;;  %v8018_v58 = vld [vmem:[%s13208_s0 + $0x78] sm:$0xff]  ;;  %v4949_v15 = vunpack.c.l.b16 %v4697_v2  ;;  %v4946_v26 = vunpack.c.l.b16 %v4694_v59 }
 0x68e   :  { %v5160_v56 = vmul.f32 %v11545_v47, %v11545_v47  ;;  %v11611_v23 = vmax.f32 %v3573_v41, 1e-24  ;;  %v4227_v52 = vmul.f32 0.5, %v4226_v63  ;;  %v4948_v41 = vunpack.c.l.b16 %v4696_v1  ;;  %v3579_v13 = vpop.xlane.xlu1 %3578  ;;  %v3576_v2 = vpop.xlane.xlu0 %3575 }
 0x690   :  { %v5246_v20 = vsel %vm1498_vm3, %v5160_v56, 0.0  ;;  %7834 = vrsqrt.f32 %v11611_v23  ;;  %v4954_v43 = vpack.c.b16 %v4948_v41, %v4947_v57  ;;  %vm4260_vm12 = vweird.f32 %v11611_v23 }
 0x691   :  { %5247 = vadd.xlane.f32.xlu1 %v5246_v20  ;;  %7836 = vrsqrt.f32 %v11622_v60 }
 0x692   :  { %v11559_v28 = vpop.f32.mrf.mxu1 }
 0x693   :  { %v4698_v25 = vpack.c.bf16 %v11559_v28, %v11559_v28 }
 0x695   :  { %v11570_v51 = vpop.f32.mrf.mxu0 }
 0x696   :  { %v5161_v4 = vmul.f32 %v11570_v51, %v11570_v51  ;;  %v11648_v49 = vpop.eup %7834 }
 0x697   :  { %v11657_v50 = vpop.eup %7836  ;;  %v4255_v29 = vmul.f32 %v11648_v49, %v11611_v23  ;;  %vm4261_vm13 = vweird.f32 %v11648_v49 }
 0x698   :  { %7277 = vmatmul.msk.bf16.gmra.mxu0 %vm733_vm2, %v8017_v33  ;;  %v5249_v39 = vsel %vm1498_vm3, %v5161_v4, 0.0  ;;  %v4950_v33 = vunpack.c.l.b16 %v4698_v25  ;;  %v4245_v38 = vmul.f32 %v11657_v50, %v11622_v60  ;;  %vm4251_vm15 = vweird.f32 %v11657_v50  ;;  %vm4262_vm0 = vmor %vm4260_vm12, %vm4261_vm13 }
 0x699   :  { %5250 = vadd.xlane.f32.xlu1 %v5249_v39  ;;  %v4256_v1 = vmul.f32 %v11648_v49, %v4255_v29  ;;  %vm4252_vm1 = vmor %vm4250_vm14, %vm4251_vm15 }
 0x69a   :  { %v4596_v8 = vpop.f32.mrf.mxu1  ;;  %v4955_v61 = vpack.c.b16 %v4950_v33, %v4949_v15  ;;  %v11682_v33 = vmax.f32 %v3576_v2, 1e-24 }
 0x69b   :  { %v4699_v24 = vpack.c.bf16 %v4596_v8, %v4596_v8  ;;  %v4237_v8 = vmul.f32 0.5, %v4236_v3 }
 0x69c   :  { %vm4270_vm6 = vweird.f32 %v11682_v33 }
 0x69d   :  { %7258 = vmatmul.msk.bf16.gmra.mxu1 %vm1498_vm3, %v4375_v11  ;;  %v11590_v31 = vpop.f32.mrf.mxu0  ;;  %v4951_v22 = vunpack.c.l.b16 %v4699_v24  ;;  %v4238_v18 = vsub.f32 1.5, %v4237_v8  ;;  %v4228_v24 = vsub.f32 1.5, %v4227_v52  ;;  %v4257_v8 = vmul.f32 0.5, %v4256_v1 }
 0x69e   :  { %v5162_v16 = vmul.f32 %v11590_v31, %v11590_v31 }
 0x69f   :  { %v4239_v44 = vmul.f32 %v11583_v36, %v4238_v18  ;;  %v4229_v3 = vmul.f32 %v11592_v37, %v4228_v24 }
 0x6a0   :  { %v5252_v56 = vsel %vm1498_vm3, %v5162_v16, 0.0  ;;  %v4376_v16 = vpack.c.bf16 %v4341_v54, %v4340_v14 }
 0x6a1   :  { %5253 = vadd.xlane.f32.xlu1 %v5252_v56  ;;  %v4243_v63 = vsel %vm11666_vm10, %v11583_v36, %v4239_v44 }
 0x6a2   :  { %v4598_v20 = vpop.f32.mrf.mxu1  ;;  %v4343_v14 = vmul.f32 %v4243_v63, %v10979_v19  ;;  %v4258_v19 = vsub.f32 1.5, %v4257_v8 }
 0x6a3   :  { %v4700_v48 = vpack.c.bf16 %v4598_v20, %v4598_v20 }
 0x6a5   :  { %v4952_v4 = vunpack.c.l.b16 %v4700_v48  ;;  %v11629_v28 = vpop.f32.mrf.mxu0  ;;  %v4945_v48 = vunpack.c.l.b16 %v4693_v5 }
 0x6a6   :  { %v5163_v39 = vmul.f32 %v11629_v28, %v11629_v28 }
 0x6a7   :  { %v4956_v9 = vpack.c.b16 %v4952_v4, %v4951_v22  ;;  %v11676_v4 = vmax.f32 %v3579_v13, 1e-24  ;;  %v4953_v54 = vpack.c.b16 %v4946_v26, %v4945_v48  ;;  %v8020_v48 = vld [vmem:[%s13208_s0 + $0x88] sm:$0xff] }
 0x6a8   :  { %7278 = vmatmul.msk.bf16.gmra.mxu0 %vm733_vm2, %v8018_v58  ;;  %v5255_v11 = vsel %vm1498_vm3, %v5163_v39, 0.0  ;;  %v4246_v39 = vmul.f32 %v11657_v50, %v4245_v38  ;;  %v8019_v58 = vld [vmem:[%s13208_s0 + $0x80] sm:$0xff] }
 0x6a9   :  { %4965 = vmatpush.bf16.msra.mxu2 %v4956_v9  ;;  %5256 = vadd.xlane.f32.xlu0 %v5255_v11  ;;  %v4233_v9 = vsel %vm4232_vm11, %v11592_v37, %v4229_v3  ;;  %7838 = vrsqrt.f32 %v11676_v4  ;;  %vm4280_vm4 = vweird.f32 %v11676_v4 }
 0x6aa   :  { %v11644_v40 = vpop.f32.mrf.mxu1  ;;  %v4342_v36 = vmul.f32 %v4233_v9, %v10959_v0  ;;  %7840 = vrsqrt.f32 %v11682_v33  ;;  %v4247_v12 = vmul.f32 0.5, %v4246_v39 }
 0x6ac   :  { %v4377_v37 = vpack.c.bf16 %v4343_v14, %v4342_v36  ;;  %v4248_v41 = vsub.f32 1.5, %v4247_v12 }
 0x6ad   :  { %7259 = vmatmul.msk.bf16.gmra.mxu1 %vm1498_vm3, %v4376_v16  ;;  %4966 = vmatpush.bf16.msra.mxu2 %v4955_v61  ;;  %v11655_v56 = vpop.f32.mrf.mxu0  ;;  %v4259_v61 = vmul.f32 %v11648_v49, %v4258_v19 }
 0x6ae   :  { %v5164_v20 = vmul.f32 %v11655_v56, %v11655_v56  ;;  %v4249_v5 = vmul.f32 %v11657_v50, %v4248_v41 }
 0x6af   :  { %v7839_v59 = vpop.eup %7838  ;;  %v4263_v26 = vsel %vm4262_vm0, %v11648_v49, %v4259_v61 }
 0x6b0   :  { %v5258_v35 = vsel %vm1498_vm3, %v5164_v20, 0.0  ;;  %v7841_v16 = vpop.eup %7840  ;;  %v4275_v18 = vmul.f32 %v7839_v59, %v11676_v4  ;;  %v4253_v20 = vsel %vm4252_vm1, %v11657_v50, %v4249_v5  ;;  %v4345_v13 = vmul.f32 %v4263_v26, %v11030_v27 }
 0x6b1   :  { %4967 = vmatpush.bf16.msra.mxu2 %v4954_v43  ;;  %5259 = vadd.xlane.f32.xlu2 %v5258_v35  ;;  %v4265_v57 = vmul.f32 %v7841_v16, %v11682_v33  ;;  %v4344_v49 = vmul.f32 %v4253_v20, %v11008_v6  ;;  %vm4281_vm5 = vweird.f32 %v7839_v59  ;;  %vm4271_vm7 = vweird.f32 %v7841_v16  ;;  %v8021_v33 = vld [vmem:[%s13208_s0 + $0x90] sm:$0xff] }
 0x6b2   :  { %v11674_v22 = vpop.f32.mrf.mxu1  ;;  %v4276_v43 = vmul.f32 %v7839_v59, %v4275_v18  ;;  %vm4282_vm8 = vmor %vm4280_vm4, %vm4281_vm5 }
 0x6b3   :  { %v4266_v44 = vmul.f32 %v7841_v16, %v4265_v57  ;;  %v4378_v38 = vpack.c.bf16 %v4345_v13, %v4344_v49  ;;  %vm4272_vm9 = vmor %vm4270_vm6, %vm4271_vm7 }
 0x6b4   :  { %v4277_v25 = vmul.f32 0.5, %v4276_v43 }
 0x6b5   :  { %4968 = vmatpush.bf16.msra.mxu2 %v4953_v54  ;;  %v4267_v35 = vmul.f32 0.5, %v4266_v44 }
 0x6b6   :  { %v4278_v50 = vsub.f32 1.5, %v4277_v25  ;;  %v8022_v25 = vld [vmem:[%s13208_s0 + $0x98] sm:$0xff] }
 0x6b7   :  { %v4268_v27 = vsub.f32 1.5, %v4267_v35 }
 0x6b8   :  { %7279 = vmatmul.msk.bf16.vlgmr.msra.gmra.mxu2 %vm733_vm2, %v8019_v58  ;;  %v4279_v6 = vmul.f32 %v7839_v59, %v4278_v50 }
 0x6b9   :  { %v4269_v1 = vmul.f32 %v7841_v16, %v4268_v27 }
 0x6ba   :  { %v11694_v15 = vpop.f32.mrf.mxu1  ;;  %v4283_v14 = vsel %vm4282_vm8, %v7839_v59, %v4279_v6  ;;  %v5218_v41 = vpop.xlane.xlu0 %5217 }
 0x6bb   :  { %v11696_v11 = vpop.f32.mrf.mxu2  ;;  %v4273_v58 = vsel %vm4272_vm9, %v7841_v16, %v4269_v1  ;;  %v4347_v36 = vmul.f32 %v4283_v14, %v11088_v17 }
 0x6bc   :  { %v5165_v52 = vmul.f32 %v11696_v11, %v11696_v11  ;;  %v4346_v12 = vmul.f32 %v4273_v58, %v11052_v42 }
 0x6bd   :  { %7260 = vmatmul.msk.bf16.gmra.mxu1 %vm1498_vm3, %v4377_v37 }
 0x6be   :  { %v5261_v0 = vsel %vm1498_vm3, %v5165_v52, 0.0  ;;  %v4379_v19 = vpack.c.bf16 %v4347_v36, %v4346_v12 }
 0x6bf   :  { %5262 = vadd.xlane.f32.xlu0 %v5261_v0 }
 0x6c2   :  { %v11710_v23 = vpop.f32.mrf.mxu1 }
 0x6c3   :  { %v11712_v24 = vpop.f32.mrf.mxu2  ;;  %v4704_v20 = vpack.c.bf16 %v11710_v23, %v11710_v23  ;;  %v4702_v23 = vpack.c.bf16 %v11674_v22, %v11674_v22  ;;  %v11776_v22 = vmax.f32 %v5218_v41, 1e-24 }
 0x6c4   :  { %v5166_v60 = vmul.f32 %v11712_v24, %v11712_v24 }
 0x6c5   :  { %v4999_v1 = vunpack.c.l.b16 %v4702_v23  ;;  %vm5485_vm12 = vweird.f32 %v11776_v22 }
 0x6c6   :  { %v5264_v29 = vsel %vm1498_vm3, %v5166_v60, 0.0 }
 0x6c7   :  { %5265 = vadd.xlane.f32.xlu1 %v5264_v29 }
 0x6c8   :  { %7280 = vmatmul.msk.bf16.gmra.mxu2 %vm733_vm2, %v8020_v48  ;;  %v4703_v48 = vpack.c.bf16 %v11694_v15, %v11694_v15 }
 0x6ca   :  { %v4611_v3 = vpop.f32.mrf.mxu1  ;;  %v5000_v6 = vunpack.c.l.b16 %v4703_v48 }
 0x6cb   :  { %v11725_v2 = vpop.f32.mrf.mxu2  ;;  %v4705_v57 = vpack.c.bf16 %v4611_v3, %v4611_v3 }
 0x6cc   :  { %v5167_v54 = vmul.f32 %v11725_v2, %v11725_v2 }
 0x6cd   :  { %7261 = vmatmul.msk.bf16.gmra.mxu1 %vm1498_vm3, %v4378_v38  ;;  %v5002_v49 = vunpack.c.l.b16 %v4705_v57  ;;  %v5001_v38 = vunpack.c.l.b16 %v4704_v20 }
 0x6ce   :  { %v5267_v63 = vsel %vm1498_vm3, %v5167_v54, 0.0 }
 0x6cf   :  { %5268 = vadd.xlane.f32.xlu0 %v5267_v63  ;;  %v4701_v63 = vpack.c.bf16 %v11644_v40, %v11644_v40 }
 0x6d2   :  { %v4613_v9 = vpop.f32.mrf.mxu1 }
 0x6d3   :  { %v11733_v39 = vpop.f32.mrf.mxu2  ;;  %v4706_v61 = vpack.c.bf16 %v4613_v9, %v4613_v9  ;;  %v5007_v9 = vpack.c.b16 %v5001_v38, %v5000_v6 }
 0x6d4   :  { %v5168_v8 = vmul.f32 %v11733_v39, %v11733_v39 }
 0x6d5   :  { %v5003_v44 = vunpack.c.l.b16 %v4706_v61  ;;  %v8023_v61 = vld [vmem:[%s13208_s0 + $0xa0] sm:$0xff] }
 0x6d6   :  { %v5270_v4 = vsel %vm1498_vm3, %v5168_v8, 0.0  ;;  %v4998_v8 = vunpack.c.l.b16 %v4701_v63 }
 0x6d7   :  { %5271 = vadd.xlane.f32.xlu2 %v5270_v4  ;;  %v5008_v50 = vpack.c.b16 %v5003_v44, %v5002_v49 }
 0x6d8   :  { %7281 = vmatmul.msk.bf16.gmra.mxu2 %vm733_vm2, %v8021_v33  ;;  %v5006_v33 = vpack.c.b16 %v4999_v1, %v4998_v8 }
 0x6da   :  { %v4616_v37 = vpop.f32.mrf.mxu1 }
 0x6db   :  { %v11744_v52 = vpop.f32.mrf.mxu2  ;;  %v4707_v0 = vpack.c.bf16 %v4616_v37, %v4616_v37  ;;  %v5215_v13 = vpop.xlane.xlu2 %5214 }
 0x6dc   :  { %v5169_v59 = vmul.f32 %v11744_v52, %v11744_v52  ;;  %v5224_v35 = vpop.xlane.xlu0 %5223  ;;  %v11774_v14 = vmax.f32 %v5215_v13, 1e-24 }
 0x6dd   :  { %7262 = vmatmul.msk.bf16.gmra.mxu1 %vm1498_vm3, %v4379_v19  ;;  %v5004_v26 = vunpack.c.l.b16 %v4707_v0 }
 0x6de   :  { %v5273_v17 = vsel %vm1498_vm3, %v5169_v59, 0.0  ;;  %7842 = vrsqrt.f32 %v11774_v14  ;;  %v11789_v59 = vmax.f32 %v5224_v35, 1e-24  ;;  %vm5475_vm10 = vweird.f32 %v11774_v14 }
 0x6df   :  { %5274 = vadd.xlane.f32.xlu0 %v5273_v17  ;;  %7844 = vrsqrt.f32 %v11776_v22 }
 0x6e0   :  { %vm5505_vm5 = vweird.f32 %v11789_v59 }
 0x6e2   :  { %v4618_v16 = vpop.f32.mrf.mxu1 }
 0x6e3   :  { %v4708_v18 = vpack.c.bf16 %v4618_v16, %v4618_v16  ;;  %v11750_v5 = vpop.f32.mrf.mxu2  ;;  %v5221_v4 = vpop.xlane.xlu2 %5220 }
 0x6e4   :  { %v5170_v42 = vmul.f32 %v11750_v5, %v11750_v5  ;;  %v11781_v40 = vmax.f32 %v5221_v4, 1e-24  ;;  %v5227_v37 = vpop.xlane.xlu0 %5226  ;;  %v7843_v16 = vpop.eup %7842 }
 0x6e5   :  { %v5005_v43 = vunpack.c.l.b16 %v4708_v18  ;;  %v7845_v57 = vpop.eup %7844  ;;  %vm5476_vm11 = vweird.f32 %v7843_v16 }
 0x6e6   :  { %v5276_v60 = vsel %vm1498_vm3, %v5170_v42, 0.0  ;;  %7846 = vrsqrt.f32 %v11781_v40  ;;  %v11802_v42 = vmax.f32 %v5227_v37, 1e-24  ;;  %v5480_v20 = vmul.f32 %v7845_v57, %v11776_v22  ;;  %vm5477_vm13 = vmor %vm5475_vm10, %vm5476_vm11 }
 0x6e7   :  { %v5009_v29 = vpack.c.b16 %v5005_v43, %v5004_v26  ;;  %5277 = vadd.xlane.f32.xlu2 %v5276_v60  ;;  %7848 = vrsqrt.f32 %v11789_v59  ;;  %v5470_v26 = vmul.f32 %v7843_v16, %v11774_v14  ;;  %vm5486_vm14 = vweird.f32 %v7845_v57 }
 0x6e8   :  { %7282 = vmatmul.msk.bf16.gmra.mxu2 %vm733_vm2, %v8022_v25  ;;  %v5481_v49 = vmul.f32 %v7845_v57, %v5480_v20  ;;  %7850 = vrsqrt.f32 %v11802_v42  ;;  %vm5487_vm15 = vmor %vm5485_vm12, %vm5486_vm14  ;;  %vm5495_vm0 = vweird.f32 %v11781_v40  ;;  %vm5515_vm8 = vweird.f32 %v11802_v42 }
 0x6e9   :  { %5018 = vmatpush.bf16.msra.mxu0 %v5009_v29  ;;  %v5471_v44 = vmul.f32 %v7843_v16, %v5470_v26 }
 0x6ea   :  { %v11763_v3 = vpop.f32.mrf.mxu1  ;;  %v5236_v58 = vpop.xlane.xlu1 %5235  ;;  %v5482_v1 = vmul.f32 0.5, %v5481_v49 }
 0x6eb   :  { %v11767_v54 = vpop.f32.mrf.mxu2  ;;  %v5233_v25 = vpop.xlane.xlu2 %5232  ;;  %v11814_v35 = vmax.f32 %v5236_v58, 1e-24 }
 0x6ec   :  { %v5171_v27 = vmul.f32 %v11767_v54, %v11767_v54  ;;  %v11805_v43 = vpop.eup %7846  ;;  %v11816_v23 = vmax.f32 %v5233_v25, 1e-24  ;;  %v5230_v6 = vpop.xlane.xlu0 %5229 }
 0x6ed   :  { %5019 = vmatpush.bf16.msra.mxu0 %v5008_v50  ;;  %v5490_v29 = vmul.f32 %v11805_v43, %v11781_v40  ;;  %v11812_v48 = vpop.eup %7848  ;;  %v5472_v50 = vmul.f32 0.5, %v5471_v44  ;;  %7852 = vrsqrt.f32 %v11814_v35  ;;  %v11830_v37 = vmax.f32 %v5230_v6, 1e-24 }
 0x6ee   :  { %v5279_v15 = vsel %vm1498_vm3, %v5171_v27, 0.0  ;;  %v5500_v63 = vmul.f32 %v11812_v48, %v11789_v59  ;;  %7854 = vrsqrt.f32 %v11816_v23  ;;  %vm5496_vm1 = vweird.f32 %v11805_v43 }
 0x6ef   :  { %5280 = vadd.xlane.f32.xlu1 %v5279_v15  ;;  %v5491_v27 = vmul.f32 %v11805_v43, %v5490_v29  ;;  %vm5497_vm4 = vmor %vm5495_vm0, %vm5496_vm1  ;;  %7856 = vrsqrt.f32 %v11830_v37  ;;  %vm5506_vm6 = vweird.f32 %v11812_v48  ;;  %vm5545_vm9 = vweird.f32 %v11814_v35 }
 0x6f0   :  { %v5501_v58 = vmul.f32 %v11812_v48, %v5500_v63  ;;  %vm5507_vm7 = vmor %vm5505_vm5, %vm5506_vm6  ;;  %vm5535_vm14 = vweird.f32 %v11816_v23  ;;  %vm5525_vm6 = vweird.f32 %v11830_v37 }
 0x6f1   :  { %5020 = vmatpush.bf16.msra.mxu0 %v5007_v9  ;;  %v5473_v9 = vsub.f32 1.5, %v5472_v50  ;;  %v5492_v8 = vmul.f32 0.5, %v5491_v27 }
 0x6f2   :  { %v11778_v36 = vpop.f32.mrf.mxu1  ;;  %v5239_v13 = vpop.xlane.xlu1 %5238  ;;  %v5502_v26 = vmul.f32 0.5, %v5501_v58 }
 0x6f3   :  { %v11783_v12 = vpop.f32.mrf.mxu2  ;;  %v11840_v44 = vmax.f32 %v5239_v13, 1e-24 }
 0x6f4   :  { %v5172_v19 = vmul.f32 %v11783_v12, %v11783_v12  ;;  %v5503_v49 = vsub.f32 1.5, %v5502_v26 }
 0x6f5   :  { %5021 = vmatpush.bf16.msra.mxu0 %v5006_v33  ;;  %v11791_v17 = vpop.f32.mrf.mxu0  ;;  %v5483_v33 = vsub.f32 1.5, %v5482_v1  ;;  %7858 = vrsqrt.f32 %v11840_v44 }
 0x6f6   :  { %v5173_v41 = vmul.f32 %v11791_v17, %v11791_v17  ;;  %v5282_v0 = vsel %vm1498_vm3, %v5172_v19, 0.0  ;;  %v5474_v19 = vmul.f32 %v7843_v16, %v5473_v9 }
 0x6f7   :  { %5283 = vadd.xlane.f32.xlu0 %v5282_v0 }
 0x6f8   :  { %7283 = vmatmul.msk.bf16.vlgmr.msra.gmra.mxu0 %vm733_vm2, %v8023_v61  ;;  %v5285_v18 = vsel %vm1498_vm3, %v5173_v41, 0.0  ;;  %v11834_v41 = vpop.eup %7850  ;;  %v5484_v61 = vmul.f32 %v7845_v57, %v5483_v33  ;;  %v5478_v20 = vsel %vm5477_vm13, %v7843_v16, %v5474_v19 }
 0x6f9   :  { %5286 = vadd.xlane.f32.xlu1 %v5285_v18  ;;  %v5493_v18 = vsub.f32 1.5, %v5492_v8  ;;  %v11842_v14 = vpop.eup %7852  ;;  %v6109_v22 = vmul.f32 %v5478_v20, %v11298_v62  ;;  %v5510_v13 = vmul.f32 %v11834_v41, %v11802_v42  ;;  %v8024_v8 = vld [vmem:[%s13208_s0 + $0xa8] sm:$0xff]  ;;  %vm5516_vm11 = vweird.f32 %v11834_v41 }
 0x6fa   :  { %v11807_v60 = vpop.f32.mrf.mxu1  ;;  %v5488_v29 = vsel %vm5487_vm15, %v7845_v57, %v5484_v61  ;;  %v5540_v40 = vmul.f32 %v11842_v14, %v11814_v35  ;;  %v11854_v63 = vpop.eup %7854  ;;  %vm5546_vm10 = vweird.f32 %v11842_v14  ;;  %vm11911_vm13 = vmor %vm5515_vm8, %vm5516_vm11  ;;  %v4710_v42 = vpack.c.bf16 %v11778_v36, %v11778_v36 }
 0x6fb   :  { %v5494_v25 = vmul.f32 %v11805_v43, %v5493_v18  ;;  %v6110_v16 = vmul.f32 %v5488_v29, %v11315_v21  ;;  %v6173_v57 = vsel %vm1498_vm3, %v6109_v22, 0.0  ;;  %v5504_v21 = vmul.f32 %v11812_v48, %v5503_v49  ;;  %v5242_v61 = vpop.xlane.xlu2 %5241  ;;  %vm11900_vm12 = vmor %vm5545_vm9, %vm5546_vm10 }
 0x6fc   :  { %v5541_v1 = vmul.f32 %v11842_v14, %v5540_v40  ;;  %v5511_v19 = vmul.f32 %v11834_v41, %v5510_v13  ;;  %v11888_v40 = vpop.eup %7856  ;;  %vm5555_vm15 = vweird.f32 %v11840_v44  ;;  %vm5536_vm0 = vweird.f32 %v11854_v63 }
 0x6fd   :  { %v11819_v38 = vpop.f32.mrf.mxu0  ;;  %v5498_v6 = vsel %vm5497_vm4, %v11805_v43, %v5494_v25  ;;  %v5508_v20 = vsel %vm5507_vm7, %v11812_v48, %v5504_v21  ;;  %vm11964_vm4 = vmor %vm5535_vm14, %vm5536_vm0  ;;  %vm5526_vm7 = vweird.f32 %v11888_v40 }
 0x6fe   :  { %v5174_v15 = vmul.f32 %v11819_v38, %v11819_v38  ;;  %v6111_v9 = vmul.f32 %v5498_v6, %v11329_v46  ;;  %v5542_v43 = vmul.f32 0.5, %v5541_v1  ;;  %v5530_v46 = vmul.f32 %v11854_v63, %v11816_v23  ;;  %vm12011_vm10 = vmor %vm5525_vm6, %vm5526_vm7 }
 0x6ff   :  { %v6112_v29 = vmul.f32 %v5508_v20, %v11345_v53  ;;  %v5512_v49 = vmul.f32 0.5, %v5511_v19  ;;  %v11896_v53 = vpop.eup %7858 }
 0x700   :  { %v5288_v4 = vsel %vm1498_vm3, %v5174_v15, 0.0  ;;  %v6174_v15 = vsel %vm1498_vm3, %v6110_v16, 0.0  ;;  %v6176_v33 = vsel %vm1498_vm3, %v6111_v9, 0.0  ;;  %v5543_v22 = vsub.f32 1.5, %v5542_v43 }
 0x701   :  { %5289 = vadd.xlane.f32.xlu2 %v5288_v4  ;;  %v6175_v4 = vadd.f32 %v6174_v15, %v6173_v57  ;;  %v5531_v25 = vmul.f32 %v11854_v63, %v5530_v46  ;;  %v11886_v16 = vmax.f32 %v5242_v61, 1e-24  ;;  %v6178_v57 = vsel %vm1498_vm3, %v6112_v29, 0.0 }
 0x702   :  { %v11836_v0 = vpop.f32.mrf.mxu1  ;;  %v5513_v21 = vsub.f32 1.5, %v5512_v49  ;;  %v5550_v35 = vmul.f32 %v11896_v53, %v11840_v44  ;;  %v5520_v61 = vmul.f32 %v11888_v40, %v11830_v37  ;;  %vm5556_vm1 = vweird.f32 %v11896_v53 }
 0x703   :  { %v6177_v26 = vadd.f32 %v6176_v33, %v6175_v4  ;;  %v5532_v6 = vmul.f32 0.5, %v5531_v25  ;;  %v4709_v33 = vpack.c.bf16 %v11763_v3, %v11763_v3  ;;  %vm11979_vm5 = vmor %vm5555_vm15, %vm5556_vm1  ;;  %vm5565_vm8 = vweird.f32 %v11886_v16 }
 0x704   :  { %v5248_v27 = vpop.xlane.xlu1 %5247  ;;  %v5551_v4 = vmul.f32 %v11896_v53, %v5550_v35  ;;  %v5514_v43 = vmul.f32 %v11834_v41, %v5513_v21  ;;  %v4711_v21 = vpack.c.bf16 %v11807_v60, %v11807_v60  ;;  %v4712_v35 = vpack.c.bf16 %v11836_v0, %v11836_v0 }
 0x705   :  { %v11846_v50 = vpop.f32.mrf.mxu0  ;;  %v11884_v59 = vmax.f32 %v5248_v27, 1e-24  ;;  %v6179_v1 = vadd.f32 %v6178_v57, %v6177_v26  ;;  %v5533_v19 = vsub.f32 1.5, %v5532_v6 }
 0x706   :  { %v5175_v62 = vmul.f32 %v11846_v50, %v11846_v50  ;;  %v5552_v26 = vmul.f32 0.5, %v5551_v4  ;;  %v5518_v20 = vsel %vm11911_vm13, %v11834_v41, %v5514_v43  ;;  %v8025_v4 = vld [vmem:[%s13208_s0 + $0xb0] sm:$0xff]  ;;  %v5053_v0 = vunpack.c.l.b16 %v4711_v21 }
 0x707   :  { %7860 = vrsqrt.f32 %v11884_v59  ;;  %v6113_v25 = vmul.f32 %v5518_v20, %v11358_v7  ;;  %v5534_v41 = vmul.f32 %v11854_v63, %v5533_v19  ;;  %vm5585_vm11 = vweird.f32 %v11884_v59 }
 0x708   :  { %7284 = vmatmul.msk.bf16.gmra.mxu0 %vm733_vm2, %v8024_v8  ;;  %v5291_v58 = vsel %vm1498_vm3, %v5175_v62, 0.0  ;;  %v5544_v62 = vmul.f32 %v11842_v14, %v5543_v22  ;;  %7862 = vrsqrt.f32 %v11886_v16  ;;  %v5245_v22 = vpop.xlane.xlu0 %5244 }
 0x709   :  { %5292 = vadd.xlane.f32.xlu2 %v5291_v58  ;;  %v6180_v57 = vsel %vm1498_vm3, %v6113_v25, 0.0  ;;  %v5538_v25 = vsel %vm11964_vm4, %v11854_v63, %v5534_v41 }
 0x70a   :  { %v11878_v18 = vpop.f32.mrf.mxu1  ;;  %v5548_v58 = vsel %vm11900_vm12, %v11842_v14, %v5544_v62  ;;  %v6181_v8 = vadd.f32 %v6180_v57, %v6179_v1  ;;  %v12001_v57 = vmax.f32 %v5245_v22, 1e-24  ;;  %v6115_v22 = vmul.f32 %v5538_v25, %v11417_v55 }
 0x70b   :  { %v4713_v14 = vpack.c.bf16 %v11878_v18, %v11878_v18  ;;  %v6116_v29 = vmul.f32 %v5548_v58, %v11449_v45  ;;  %v5553_v18 = vsub.f32 1.5, %v5552_v26 }
 0x70c   :  { %v5251_v15 = vpop.xlane.xlu1 %5250  ;;  %vm5575_vm15 = vweird.f32 %v12001_v57 }
 0x70d   :  { %v11890_v13 = vpop.f32.mrf.mxu0  ;;  %v11939_v49 = vpop.eup %7860  ;;  %v11945_v27 = vmax.f32 %v5251_v15, 1e-24  ;;  %v5554_v15 = vmul.f32 %v11896_v53, %v5553_v18  ;;  %v11968_v58 = vunpack.c.l.b16 %v4713_v14  ;;  %v11992_v20 = vsel %vm1498_vm3, %v6116_v29, 0.0 }
 0x70e   :  { %v5176_v48 = vmul.f32 %v11890_v13, %v11890_v13  ;;  %v5580_v7 = vmul.f32 %v11939_v49, %v11884_v59  ;;  %v11953_v6 = vpop.eup %7862  ;;  %vm5586_vm13 = vweird.f32 %v11939_v49 }
 0x70f   :  { %v5560_v19 = vmul.f32 %v11953_v6, %v11886_v16  ;;  %7864 = vrsqrt.f32 %v11945_v27  ;;  %vm5566_vm9 = vweird.f32 %v11953_v6  ;;  %v6184_v16 = vsel %vm1498_vm3, %v6115_v22, 0.0  ;;  %vm12083_vm0 = vmor %vm5585_vm11, %vm5586_vm13 }
 0x710   :  { %v5294_v9 = vsel %vm1498_vm3, %v5176_v48, 0.0  ;;  %v5521_v48 = vmul.f32 %v11888_v40, %v5520_v61  ;;  %v5581_v1 = vmul.f32 %v11939_v49, %v5580_v7  ;;  %7866 = vrsqrt.f32 %v12001_v57  ;;  %vm12033_vm12 = vmor %vm5565_vm8, %vm5566_vm9 }
 0x711   :  { %5295 = vadd.xlane.f32.xlu2 %v5294_v9  ;;  %v5561_v18 = vmul.f32 %v11953_v6, %v5560_v19  ;;  %vm5595_vm14 = vweird.f32 %v11945_v27 }
 0x712   :  { %v11925_v46 = vpop.f32.mrf.mxu1  ;;  %v5522_v14 = vmul.f32 0.5, %v5521_v48  ;;  %v5558_v48 = vsel %vm11979_vm5, %v11896_v53, %v5554_v15 }
 0x713   :  { %v4714_v44 = vpack.c.bf16 %v11925_v46, %v11925_v46  ;;  %v5582_v46 = vmul.f32 0.5, %v5581_v1  ;;  %v6117_v37 = vmul.f32 %v5558_v48, %v11465_v34 }
 0x714   :  { %v5254_v61 = vpop.xlane.xlu1 %5253 }
 0x715   :  { %v11941_v62 = vpop.f32.mrf.mxu0  ;;  %v12003_v7 = vmax.f32 %v5254_v61, 1e-24  ;;  %v12027_v23 = vunpack.c.l.b16 %v4714_v44 }
 0x716   :  { %v5177_v45 = vmul.f32 %v11941_v62, %v11941_v62 }
 0x717   :  { %7868 = vrsqrt.f32 %v12003_v7  ;;  %vm5605_vm5 = vweird.f32 %v12003_v7 }
 0x718   :  { %7285 = vmatmul.msk.bf16.gmra.mxu0 %vm733_vm2, %v8025_v4  ;;  %v5297_v43 = vsel %vm1498_vm3, %v5177_v45, 0.0  ;;  %v5523_v45 = vsub.f32 1.5, %v5522_v14  ;;  %v5562_v4 = vmul.f32 0.5, %v5561_v18  ;;  %v5583_v14 = vsub.f32 1.5, %v5582_v46 }
 0x719   :  { %5298 = vadd.xlane.f32.xlu2 %v5297_v43  ;;  %v12025_v43 = vpop.eup %7864  ;;  %v6194_v18 = vsel %vm1498_vm3, %v6117_v37, 0.0 }
 0x71a   :  { %v4636_v26 = vpop.f32.mrf.mxu1  ;;  %v5524_v29 = vmul.f32 %v11888_v40, %v5523_v45  ;;  %v5563_v9 = vsub.f32 1.5, %v5562_v4  ;;  %v5590_v25 = vmul.f32 %v12025_v43, %v11945_v27  ;;  %vm5596_vm1 = vweird.f32 %v12025_v43 }
 0x71b   :  { %v4715_v55 = vpack.c.bf16 %v4636_v26, %v4636_v26  ;;  %vm12119_vm7 = vmor %vm5595_vm14, %vm5596_vm1 }
 0x71c   :  { %v5257_v41 = vpop.xlane.xlu0 %5256  ;;  %v5528_v34 = vsel %vm12011_vm10, %v11888_v40, %v5524_v29  ;;  %v5564_v44 = vmul.f32 %v11953_v6, %v5563_v9 }
 0x71d   :  { %v12015_v53 = vpop.f32.mrf.mxu0  ;;  %v12040_v19 = vmax.f32 %v5257_v41, 1e-24  ;;  %v6114_v26 = vmul.f32 %v5528_v34, %v11388_v32  ;;  %v12056_v32 = vpop.eup %7866  ;;  %v5057_v46 = vunpack.c.l.b16 %v4715_v55  ;;  %v5584_v41 = vmul.f32 %v11939_v49, %v5583_v14 }
 0x71e   :  { %v5178_v15 = vmul.f32 %v12015_v53, %v12015_v53  ;;  %v5568_v48 = vsel %vm12033_vm12, %v11953_v6, %v5564_v44  ;;  %v12059_v29 = vpop.eup %7868  ;;  %v5570_v6 = vmul.f32 %v12056_v32, %v12001_v57  ;;  %vm5576_vm4 = vweird.f32 %v12056_v32 }
 0x71f   :  { %7870 = vrsqrt.f32 %v12040_v19  ;;  %v6182_v45 = vsel %vm1498_vm3, %v6114_v26, 0.0  ;;  %v6118_v63 = vmul.f32 %v5568_v48, %v11490_v10  ;;  %v5600_v10 = vmul.f32 %v12059_v29, %v12003_v7  ;;  %vm12133_vm8 = vmor %vm5575_vm15, %vm5576_vm4 }
 0x720   :  { %v5300_v61 = vsel %vm1498_vm3, %v5178_v15, 0.0  ;;  %v6183_v22 = vadd.f32 %v6182_v45, %v6181_v8  ;;  %v5591_v15 = vmul.f32 %v12025_v43, %v5590_v25  ;;  %v8026_v45 = vld [vmem:[%s13208_s0 + $0xb8] sm:$0xff]  ;;  %vm5606_vm6 = vweird.f32 %v12059_v29 }
 0x721   :  { %5301 = vadd.xlane.f32.xlu1 %v5300_v61  ;;  %v6195_v55 = vsel %vm1498_vm3, %v6118_v63, 0.0  ;;  %v5601_v48 = vmul.f32 %v12059_v29, %v5600_v10  ;;  %vm12146_vm9 = vmor %vm5605_vm5, %vm5606_vm6  ;;  %vm5615_vm10 = vweird.f32 %v12040_v19  ;;  %v5051_v7 = vunpack.c.l.b16 %v4709_v33 }
 0x722   :  { %v4638_v40 = vpop.f32.mrf.mxu1  ;;  %v6185_v1 = vadd.f32 %v6184_v16, %v6183_v22  ;;  %v12073_v61 = vadd.f32 %v6195_v55, %v6194_v18  ;;  %v5592_v14 = vmul.f32 0.5, %v5591_v15  ;;  %v5571_v18 = vmul.f32 %v12056_v32, %v5570_v6 }
 0x723   :  { %v4716_v4 = vpack.c.bf16 %v4638_v40, %v4638_v40  ;;  %v5588_v22 = vsel %vm12083_vm0, %v11939_v49, %v5584_v41  ;;  %v5061_v55 = vpack.c.b16 %v12027_v23, %v11968_v58 }
 0x724   :  { %v5260_v34 = vpop.xlane.xlu2 %5259  ;;  %v12088_v40 = vadd.f32 %v11992_v20, %v6185_v1  ;;  %v5593_v59 = vsub.f32 1.5, %v5592_v14  ;;  %v5572_v20 = vmul.f32 0.5, %v5571_v18  ;;  %v6120_v36 = vmul.f32 %v5588_v22, %v11545_v47 }
 0x725   :  { %v5058_v37 = vunpack.c.l.b16 %v4716_v4  ;;  %v12066_v9 = vpop.f32.mrf.mxu0  ;;  %v12075_v44 = vmax.f32 %v5260_v34, 1e-24  ;;  %v12077_v26 = vpop.eup %7870  ;;  %v5602_v4 = vmul.f32 0.5, %v5601_v48  ;;  %v5052_v34 = vunpack.c.l.b16 %v4710_v42 }
 0x726   :  { %v5179_v8 = vmul.f32 %v12066_v9, %v12066_v9  ;;  %v5594_v15 = vmul.f32 %v12025_v43, %v5593_v59  ;;  %v5610_v6 = vmul.f32 %v12077_v26, %v12040_v19  ;;  %v5573_v41 = vsub.f32 1.5, %v5572_v20 }
 0x727   :  { %v5062_v25 = vpack.c.b16 %v5058_v37, %v5057_v46  ;;  %7872 = vrsqrt.f32 %v12075_v44  ;;  %v5054_v37 = vunpack.c.l.b16 %v4712_v35  ;;  %v5603_v1 = vsub.f32 1.5, %v5602_v4 }
 0x728   :  { %7286 = vmatmul.msk.bf16.gmra.mxu0 %vm733_vm2, %v8026_v45  ;;  %v5303_v46 = vsel %vm1498_vm3, %v5179_v8, 0.0  ;;  %v5611_v35 = vmul.f32 %v12077_v26, %v5610_v6  ;;  %v5574_v42 = vmul.f32 %v12056_v32, %v5573_v41  ;;  %vm5616_vm11 = vweird.f32 %v12077_v26 }
 0x729   :  { %5071 = vmatpush.bf16.msrb.mxu2 %v5062_v25  ;;  %5304 = vadd.xlane.f32.xlu0 %v5303_v46  ;;  %v5598_v47 = vsel %vm12119_vm7, %v12025_v43, %v5594_v15  ;;  %v5604_v23 = vmul.f32 %v12059_v29, %v5603_v1  ;;  %v5060_v8 = vpack.c.b16 %v5054_v37, %v5053_v0  ;;  %v6188_v48 = vrot.slane %v12088_v40, 4  ;;  %vm12176_vm12 = vmor %vm5615_vm10, %vm5616_vm11 }
 0x72a   :  { %v12101_v63 = vpop.f32.mrf.mxu1  ;;  %v5612_v10 = vmul.f32 0.5, %v5611_v35  ;;  %v5578_v16 = vsel %vm12133_vm8, %v12056_v32, %v5574_v42  ;;  %v6121_v3 = vmul.f32 %v5598_v47, %v11570_v51  ;;  %v5059_v46 = vpack.c.b16 %v5052_v34, %v5051_v7 }
 0x72b   :  { %v5608_v43 = vsel %vm12146_vm9, %v12059_v29, %v5604_v23  ;;  %v6119_v45 = vmul.f32 %v5578_v16, %v11523_v30  ;;  %v6199_v59 = vsel %vm1498_vm3, %v6120_v36, 0.0  ;;  %vm5625_vm13 = vweird.f32 %v12075_v44 }
 0x72c   :  { %v5613_v18 = vsub.f32 1.5, %v5612_v10  ;;  %v6122_v4 = vmul.f32 %v5608_v43, %v11590_v31  ;;  %v6189_v15 = vadd.f32 %v6188_v48, %v12088_v40  ;;  %v6201_v6 = vsel %vm1498_vm3, %v6121_v3, 0.0 }
 0x72d   :  { %5072 = vmatpush.bf16.msrb.mxu2 %v5061_v55  ;;  %v12138_v58 = vpop.f32.mrf.mxu0  ;;  %v7873_v21 = vpop.eup %7872  ;;  %v6197_v30 = vsel %vm1498_vm3, %v6119_v45, 0.0  ;;  %vm6373_vm8 = vcmask 1041409  }
 0x72e   :  { %v5180_v57 = vmul.f32 %v12138_v58, %v12138_v58  ;;  %v5620_v14 = vmul.f32 %v7873_v21, %v12075_v44  ;;  %v5614_v51 = vmul.f32 %v12077_v26, %v5613_v18  ;;  %vm5626_vm14 = vweird.f32 %v7873_v21 }
 0x72f   :  { %v6198_v19 = vadd.f32 %v6197_v30, %v12073_v61  ;;  %vm5627_vm15 = vmor %vm5625_vm13, %vm5626_vm14  ;;  %v6203_v31 = vsel %vm1498_vm3, %v6122_v4, 0.0  ;;  %v8027_v61 = vld [vmem:[%s13208_s0 + $0xc0] sm:$0xff]  ;;  %v6190_v40 = vrot.slane %v6189_v15, 2 }
 0x730   :  { %v5306_v25 = vsel %vm1498_vm3, %v5180_v57, 0.0  ;;  %v5621_v33 = vmul.f32 %v7873_v21, %v5620_v14  ;;  %v5618_v22 = vsel %vm12176_vm12, %v12077_v26, %v5614_v51 }
 0x731   :  { %5073 = vmatpush.bf16.msrb.mxu2 %v5060_v8  ;;  %5307 = vadd.xlane.f32.xlu0 %v5306_v25  ;;  %v6123_v37 = vmul.f32 %v5618_v22, %v11629_v28  ;;  %v6200_v49 = vadd.f32 %v6199_v59, %v6198_v19  ;;  %v6191_v10 = vadd.f32 %v6190_v40, %v6189_v15 }
 0x732   :  { %v12180_v29 = vpop.f32.mrf.mxu1  ;;  %v5622_v20 = vmul.f32 0.5, %v5621_v33  ;;  %v5263_v55 = vpop.xlane.xlu0 %5262 }
 0x733   :  { %v5421_v41 = vmax.f32 %v5263_v55, 1e-24  ;;  %v6202_v26 = vadd.f32 %v6201_v6, %v6200_v49  ;;  %v6205_v0 = vsel %vm1498_vm3, %v6123_v37, 0.0  ;;  %v6192_v25 = vrot.slane %v6191_v10, 1  ;;  %v8028_v6 = vld [vmem:[%s13208_s0 + $0xc8] sm:$0xff] }
 0x734   :  { %v5623_v44 = vsub.f32 1.5, %v5622_v20 }
 0x735   :  { %5074 = vmatpush.bf16.msrb.mxu2 %v5059_v46  ;;  %7874 = vrsqrt.f32 %v5421_v41  ;;  %v6204_v35 = vadd.f32 %v6203_v31, %v6202_v26  ;;  %v6193_v20 = vadd.f32 %v6192_v25, %v6191_v10  ;;  %vm5635_vm4 = vweird.f32 %v5421_v41 }
 0x736   :  { %v5624_v1 = vmul.f32 %v7873_v21, %v5623_v44 }
 0x737   :  { %v6206_v23 = vadd.f32 %v6205_v0, %v6204_v35  ;;  %v6341_v55 = vpack.c.bf16 %v6193_v20, %v6193_v20 }
 0x738   :  { %7287 = vmatmul.msk.bf16.vlgmr.msrb.gmra.mxu2 %vm733_vm2, %v8027_v61  ;;  %v5628_v34 = vsel %vm5627_vm15, %v7873_v21, %v5624_v1 }
 0x739   :  { %v6124_v27 = vmul.f32 %v5628_v34, %v11655_v56 }
 0x73a   :  { %v12200_v28 = vpop.f32.mrf.mxu1  ;;  %v5266_v36 = vpop.xlane.xlu1 %5265 }
 0x73b   :  { %v12203_v42 = vpop.f32.mrf.mxu2  ;;  %v5422_v60 = vmax.f32 %v5266_v36, 1e-24  ;;  %v6207_v47 = vsel %vm1498_vm3, %v6124_v27, 0.0  ;;  %v7875_v21 = vpop.eup %7874 }
 0x73c   :  { %v5181_v57 = vmul.f32 %v12203_v42, %v12203_v42  ;;  %v6208_v8 = vadd.f32 %v6207_v47, %v6206_v23  ;;  %v5630_v14 = vmul.f32 %v7875_v21, %v5421_v41  ;;  %vm5636_vm5 = vweird.f32 %v7875_v21 }
 0x73d   :  { %7876 = vrsqrt.f32 %v5422_v60  ;;  %vm5645_vm0 = vweird.f32 %v5422_v60  ;;  %vm5637_vm6 = vmor %vm5635_vm4, %vm5636_vm5  ;;  %v6365_v47 = vunpack.c.l.b16 %v6341_v55 }
 0x73e   :  { %v5309_v7 = vsel %vm1498_vm3, %v5181_v57, 0.0  ;;  %v6209_v56 = vrot.slane %v6208_v8, 4  ;;  %v5631_v16 = vmul.f32 %v7875_v21, %v5630_v14 }
 0x73f   :  { %5310 = vadd.xlane.f32.xlu1 %v5309_v7 }
 0x740   :  { %v6210_v18 = vadd.f32 %v6209_v56, %v6208_v8  ;;  %v5632_v45 = vmul.f32 0.5, %v5631_v16 }
 0x742   :  { %v12209_v43 = vpop.f32.mrf.mxu1  ;;  %v5269_v48 = vpop.xlane.xlu0 %5268  ;;  %v6211_v59 = vrot.slane %v6210_v18, 2  ;;  %v5633_v30 = vsub.f32 1.5, %v5632_v45 }
 0x743   :  { %v7877_v3 = vpop.eup %7876  ;;  %v12211_v33 = vpop.f32.mrf.mxu2  ;;  %v5423_v32 = vmax.f32 %v5269_v48, 1e-24 }
 0x744   :  { %v5182_v46 = vmul.f32 %v12211_v33, %v12211_v33  ;;  %v5640_v51 = vmul.f32 %v7877_v3, %v5422_v60  ;;  %v6212_v19 = vadd.f32 %v6211_v59, %v6210_v18  ;;  %vm5646_vm1 = vweird.f32 %v7877_v3 }
 0x745   :  { %7878 = vrsqrt.f32 %v5423_v32  ;;  %v5634_v15 = vmul.f32 %v7875_v21, %v5633_v30  ;;  %vm5647_vm7 = vmor %vm5645_vm0, %vm5646_vm1  ;;  %vm5655_vm9 = vweird.f32 %v5423_v32 }
 0x746   :  { %v5312_v4 = vsel %vm1498_vm3, %v5182_v46, 0.0  ;;  %v5641_v22 = vmul.f32 %v7877_v3, %v5640_v51  ;;  %v6213_v44 = vrot.slane %v6212_v19, 1 }
 0x747   :  { %5313 = vadd.xlane.f32.xlu2 %v5312_v4  ;;  %v5638_v26 = vsel %vm5637_vm6, %v7875_v21, %v5634_v15 }
 0x748   :  { %7288 = vmatmul.msk.bf16.gmra.mxu2 %vm733_vm2, %v8028_v6  ;;  %v5642_v37 = vmul.f32 0.5, %v5641_v22  ;;  %v6214_v31 = vadd.f32 %v6213_v44, %v6212_v19  ;;  %v6125_v27 = vmul.f32 %v5638_v26, %v11696_v11  ;;  %v8029_v19 = vld [vmem:[%s13208_s0 + $0xd0] sm:$0xff] }
 0x74a   :  { %v12220_v49 = vpop.f32.mrf.mxu1  ;;  %v5272_v1 = vpop.xlane.xlu2 %5271  ;;  %v5643_v61 = vsub.f32 1.5, %v5642_v37  ;;  %v6342_v35 = vpack.c.bf16 %v6214_v31, %v6214_v31  ;;  %v6215_v8 = vsel %vm1498_vm3, %v6125_v27, 0.0 }
 0x74b   :  { %v7879_v40 = vpop.eup %7878  ;;  %v12222_v34 = vpop.f32.mrf.mxu2  ;;  %v5424_v0 = vmax.f32 %v5272_v1, 1e-24 }
 0x74c   :  { %v5183_v41 = vmul.f32 %v12222_v34, %v12222_v34  ;;  %v5644_v36 = vmul.f32 %v7877_v3, %v5643_v61  ;;  %v5650_v57 = vmul.f32 %v7879_v40, %v5423_v32  ;;  %v6366_v10 = vunpack.c.l.b16 %v6342_v35 }
 0x74d   :  { %7880 = vrsqrt.f32 %v5424_v0  ;;  %vm5656_vm10 = vweird.f32 %v7879_v40  ;;  %vm5665_vm12 = vweird.f32 %v5424_v0 }
 0x74e   :  { %v5315_v23 = vsel %vm1498_vm3, %v5183_v41, 0.0  ;;  %v5648_v21 = vsel %vm5647_vm7, %v7877_v3, %v5644_v36  ;;  %v5651_v7 = vmul.f32 %v7879_v40, %v5650_v57  ;;  %v12232_v11 = vsel %vm6373_vm8, %v6366_v10, %v6365_v47  ;;  %vm5657_vm11 = vmor %vm5655_vm9, %vm5656_vm10 }
 0x74f   :  { %5316 = vadd.xlane.f32.xlu0 %v5315_v23  ;;  %v6126_v60 = vmul.f32 %v5648_v21, %v11712_v24 }
 0x750   :  { %v5652_v14 = vmul.f32 0.5, %v5651_v7 }
 0x751   :  { %v6216_v56 = vsel %vm1498_vm3, %v6126_v60, 0.0 }
 0x752   :  { %v12235_v25 = vpop.f32.mrf.mxu1  ;;  %v6217_v16 = vadd.f32 %v6216_v56, %v6215_v8  ;;  %v5653_v18 = vsub.f32 1.5, %v5652_v14  ;;  %v5275_v48 = vpop.xlane.xlu0 %5274 }
 0x753   :  { %v7881_v45 = vpop.eup %7880  ;;  %v12237_v3 = vpop.f32.mrf.mxu2  ;;  %v5425_v46 = vmax.f32 %v5275_v48, 1e-24  ;;  %v4722_v8 = vpack.c.bf16 %v12235_v25, %v12235_v25 }
 0x754   :  { %v5184_v24 = vmul.f32 %v12237_v3, %v12237_v3  ;;  %v5660_v59 = vmul.f32 %v7881_v45, %v5424_v0  ;;  %v5654_v51 = vmul.f32 %v7879_v40, %v5653_v18  ;;  %vm5666_vm13 = vweird.f32 %v7881_v45 }
 0x755   :  { %7882 = vrsqrt.f32 %v5425_v46  ;;  %vm5667_vm14 = vmor %vm5665_vm12, %vm5666_vm13  ;;  %vm5675_vm15 = vweird.f32 %v5425_v46 }
 0x756   :  { %v5318_v32 = vsel %vm1498_vm3, %v5184_v24, 0.0  ;;  %v5661_v20 = vmul.f32 %v7881_v45, %v5660_v59  ;;  %v5658_v30 = vsel %vm5657_vm11, %v7879_v40, %v5654_v51 }
 0x757   :  { %5319 = vadd.xlane.f32.xlu1 %v5318_v32  ;;  %v6127_v4 = vmul.f32 %v5658_v30, %v11725_v2  ;;  %v4720_v32 = vpack.c.bf16 %v12209_v43, %v12209_v43 }
 0x758   :  { %7289 = vmatmul.msk.bf16.gmra.mxu2 %vm733_vm2, %v8029_v19  ;;  %v5662_v22 = vmul.f32 0.5, %v5661_v20  ;;  %v5109_v20 = vunpack.c.l.b16 %v4722_v8 }
 0x759   :  { %v6218_v15 = vsel %vm1498_vm3, %v6127_v4, 0.0 }
 0x75a   :  { %v4656_v6 = vpop.f32.mrf.mxu1  ;;  %v5663_v44 = vsub.f32 1.5, %v5662_v22  ;;  %v5278_v37 = vpop.xlane.xlu2 %5277  ;;  %v6219_v55 = vadd.f32 %v6218_v15, %v6217_v16  ;;  %v4719_v22 = vpack.c.bf16 %v12200_v28, %v12200_v28 }
 0x75b   :  { %v7883_v1 = vpop.eup %7882  ;;  %v12248_v31 = vpop.f32.mrf.mxu2  ;;  %v5426_v2 = vmax.f32 %v5278_v37, 1e-24  ;;  %v4723_v57 = vpack.c.bf16 %v4656_v6, %v4656_v6 }
 0x75c   :  { %v5185_v61 = vmul.f32 %v12248_v31, %v12248_v31  ;;  %v5664_v26 = vmul.f32 %v7881_v45, %v5663_v44  ;;  %v5670_v40 = vmul.f32 %v7883_v1, %v5425_v46  ;;  %vm5676_vm0 = vweird.f32 %v7883_v1 }
 0x75d   :  { %7884 = vrsqrt.f32 %v5426_v2  ;;  %vm5677_vm1 = vmor %vm5675_vm15, %vm5676_vm0  ;;  %v5110_v46 = vunpack.c.l.b16 %v4723_v57  ;;  %vm5685_vm4 = vweird.f32 %v5426_v2 }
 0x75e   :  { %v5321_v0 = vsel %vm1498_vm3, %v5185_v61, 0.0  ;;  %v5668_v27 = vsel %vm5667_vm14, %v7881_v45, %v5664_v26  ;;  %v5671_v41 = vmul.f32 %v7883_v1, %v5670_v40  ;;  %v4721_v45 = vpack.c.bf16 %v12220_v49, %v12220_v49  ;;  %v8030_v49 = vld [vmem:[%s13208_s0 + $0xd8] sm:$0xff] }
 0x75f   :  { %5322 = vadd.xlane.f32.xlu0 %v5321_v0  ;;  %v6128_v35 = vmul.f32 %v5668_v27, %v11733_v39 }
 0x760   :  { %v5672_v36 = vmul.f32 0.5, %v5671_v41  ;;  %v5108_v15 = vunpack.c.l.b16 %v4721_v45 }
 0x761   :  { %v6220_v47 = vsel %vm1498_vm3, %v6128_v35, 0.0  ;;  %v5106_v35 = vunpack.c.l.b16 %v4719_v22 }
 0x762   :  { %v4658_v23 = vpop.f32.mrf.mxu1  ;;  %v5281_v10 = vpop.xlane.xlu1 %5280  ;;  %v5673_v21 = vsub.f32 1.5, %v5672_v36  ;;  %v6221_v7 = vadd.f32 %v6220_v47, %v6219_v55  ;;  %v4718_v55 = vpack.c.bf16 %v12180_v29, %v12180_v29  ;;  %v5114_v61 = vpack.c.b16 %v5109_v20, %v5108_v15 }
 0x763   :  { %v7885_v60 = vpop.eup %7884  ;;  %v4724_v14 = vpack.c.bf16 %v4658_v23, %v4658_v23  ;;  %v12257_v56 = vpop.f32.mrf.mxu2  ;;  %v12259_v16 = vmax.f32 %v5281_v10, 1e-24  ;;  %v4717_v29 = vpack.c.bf16 %v12101_v63, %v12101_v63 }
 0x764   :  { %v5186_v39 = vmul.f32 %v12257_v56, %v12257_v56  ;;  %v5680_v18 = vmul.f32 %v7885_v60, %v5426_v2  ;;  %v5674_v48 = vmul.f32 %v7883_v1, %v5673_v21  ;;  %vm5686_vm5 = vweird.f32 %v7885_v60 }
 0x765   :  { %v5111_v24 = vunpack.c.l.b16 %v4724_v14  ;;  %7886 = vrsqrt.f32 %v12259_v16  ;;  %vm12281_vm6 = vmor %vm5685_vm4, %vm5686_vm5  ;;  %v5105_v10 = vunpack.c.l.b16 %v4718_v55  ;;  %vm5695_vm7 = vweird.f32 %v12259_v16 }
 0x766   :  { %v5324_v25 = vsel %vm1498_vm3, %v5186_v39, 0.0  ;;  %v5681_v59 = vmul.f32 %v7885_v60, %v5680_v18  ;;  %v5678_v51 = vsel %vm5677_vm1, %v7883_v1, %v5674_v48  ;;  %v5107_v1 = vunpack.c.l.b16 %v4720_v32 }
 0x767   :  { %v5115_v30 = vpack.c.b16 %v5111_v24, %v5110_v46  ;;  %5325 = vadd.xlane.f32.xlu2 %v5324_v25  ;;  %v6129_v4 = vmul.f32 %v5678_v51, %v11744_v52  ;;  %v5104_v63 = vunpack.c.l.b16 %v4717_v29 }
 0x768   :  { %7290 = vmatmul.msk.bf16.gmra.mxu2 %vm733_vm2, %v8030_v49  ;;  %v5682_v19 = vmul.f32 0.5, %v5681_v59  ;;  %v5113_v21 = vpack.c.b16 %v5107_v1, %v5106_v35  ;;  %v8031_v49 = vld [vmem:[%s13208_s0 + $0xe0] sm:$0xff] }
 0x769   :  { %5124 = vmatpush.bf16.msra.mxu3 %v5115_v30  ;;  %v6222_v43 = vsel %vm1498_vm3, %v6129_v4, 0.0  ;;  %v5112_v45 = vpack.c.b16 %v5105_v10, %v5104_v63 }
 0x76a   :  { %v5683_v6 = vsub.f32 1.5, %v5682_v19  ;;  %v6223_v44 = vadd.f32 %v6222_v43, %v6221_v7  ;;  %v5284_v37 = vpop.xlane.xlu0 %5283 }
 0x76b   :  { %v7887_v52 = vpop.eup %7886  ;;  %v12279_v26 = vpop.f32.mrf.mxu2  ;;  %v12285_v28 = vmax.f32 %v5284_v37, 1e-24 }
 0x76c   :  { %v5187_v40 = vmul.f32 %v12279_v26, %v12279_v26  ;;  %v5684_v0 = vmul.f32 %v7885_v60, %v5683_v6  ;;  %v5690_v27 = vmul.f32 %v7887_v52, %v12259_v16  ;;  %v5287_v41 = vpop.xlane.xlu1 %5286  ;;  %vm5696_vm8 = vweird.f32 %v7887_v52 }
 0x76d   :  { %5125 = vmatpush.bf16.msra.mxu3 %v5114_v61  ;;  %v5429_v36 = vmax.f32 %v5287_v41, 1e-24  ;;  %7888 = vrsqrt.f32 %v12285_v28  ;;  %vm5697_vm9 = vmor %vm5695_vm7, %vm5696_vm8  ;;  %vm5705_vm11 = vweird.f32 %v12285_v28 }
 0x76e   :  { %v5327_v57 = vsel %vm1498_vm3, %v5187_v40, 0.0  ;;  %v5688_v47 = vsel %vm12281_vm6, %v7885_v60, %v5684_v0  ;;  %v5691_v23 = vmul.f32 %v7887_v52, %v5690_v27 }
 0x76f   :  { %5328 = vadd.xlane.f32.xlu1 %v5327_v57  ;;  %v6130_v7 = vmul.f32 %v5688_v47, %v11750_v5  ;;  %7890 = vrsqrt.f32 %v5429_v36  ;;  %vm5715_vm10 = vweird.f32 %v5429_v36 }
 0x770   :  { %v5692_v8 = vmul.f32 0.5, %v5691_v23 }
 0x771   :  { %5126 = vmatpush.bf16.msra.mxu3 %v5113_v21  ;;  %v6224_v14 = vsel %vm1498_vm3, %v6130_v7, 0.0 }
 0x772   :  { %v5693_v39 = vsub.f32 1.5, %v5692_v8  ;;  %v6225_v18 = vadd.f32 %v6224_v14, %v6223_v44 }
 0x773   :  { %v7889_v48 = vpop.eup %7888  ;;  %v12299_v60 = vpop.f32.mrf.mxu2 }
 0x774   :  { %v5188_v46 = vmul.f32 %v12299_v60, %v12299_v60  ;;  %v5694_v5 = vmul.f32 %v7887_v52, %v5693_v39  ;;  %v5290_v24 = vpop.xlane.xlu2 %5289  ;;  %v5700_v25 = vmul.f32 %v7889_v48, %v12285_v28  ;;  %vm5706_vm12 = vweird.f32 %v7889_v48 }
 0x775   :  { %v7891_v16 = vpop.eup %7890  ;;  %5127 = vmatpush.bf16.msra.mxu3 %v5112_v45  ;;  %v12304_v59 = vpop.f32.mrf.mxu0  ;;  %v5430_v51 = vmax.f32 %v5290_v24, 1e-24  ;;  %vm5707_vm14 = vmor %vm5705_vm11, %vm5706_vm12 }
 0x776   :  { %v5330_v32 = vsel %vm1498_vm3, %v5188_v46, 0.0  ;;  %v5698_v20 = vsel %vm5697_vm9, %v7887_v52, %v5694_v5  ;;  %v5710_v30 = vmul.f32 %v7891_v16, %v5429_v36  ;;  %v5189_v19 = vmul.f32 %v12304_v59, %v12304_v59 }
 0x777   :  { %5331 = vadd.xlane.f32.xlu0 %v5330_v32  ;;  %v6131_v4 = vmul.f32 %v5698_v20, %v11767_v54  ;;  %7892 = vrsqrt.f32 %v5430_v51  ;;  %v5701_v15 = vmul.f32 %v7889_v48, %v5700_v25  ;;  %vm5716_vm13 = vweird.f32 %v7891_v16 }
 0x778   :  { %7291 = vmatmul.msk.bf16.vlgmr.msra.gmra.mxu3 %vm733_vm2, %v8031_v49  ;;  %v5711_v22 = vmul.f32 %v7891_v16, %v5710_v30  ;;  %v5333_v54 = vsel %vm1498_vm3, %v5189_v19, 0.0  ;;  %vm12322_vm15 = vmor %vm5715_vm10, %vm5716_vm13  ;;  %vm5725_vm0 = vweird.f32 %v5430_v51  ;;  %vm6375_vm10 = vcmask 1042434  }
 0x779   :  { %v6226_v43 = vsel %vm1498_vm3, %v6131_v4, 0.0  ;;  %v5702_v44 = vmul.f32 0.5, %v5701_v15 }
 0x77a   :  { %v5712_v6 = vmul.f32 0.5, %v5711_v22  ;;  %v6227_v37 = vadd.f32 %v6226_v43, %v6225_v18 }
 0x77b   :  { %v5703_v1 = vsub.f32 1.5, %v5702_v44 }
 0x77c   :  { %v5713_v52 = vsub.f32 1.5, %v5712_v6  ;;  %v5293_v55 = vpop.xlane.xlu2 %5292 }
 0x77d   :  { %v7893_v61 = vpop.eup %7892  ;;  %v12317_v2 = vpop.f32.mrf.mxu0  ;;  %v5431_v40 = vmax.f32 %v5293_v55, 1e-24  ;;  %v5704_v29 = vmul.f32 %v7889_v48, %v5703_v1 }
 0x77e   :  { %v5190_v0 = vmul.f32 %v12317_v2, %v12317_v2  ;;  %v5720_v27 = vmul.f32 %v7893_v61, %v5430_v51  ;;  %v5714_v41 = vmul.f32 %v7891_v16, %v5713_v52  ;;  %vm5726_vm1 = vweird.f32 %v7893_v61 }
 0x77f   :  { %5334 = vadd.xlane.f32.xlu0 %v5333_v54  ;;  %7894 = vrsqrt.f32 %v5431_v40  ;;  %v5708_v47 = vsel %vm5707_vm14, %v7889_v48, %v5704_v29  ;;  %vm5727_vm4 = vmor %vm5725_vm0, %vm5726_vm1  ;;  %vm5735_vm5 = vweird.f32 %v5431_v40 }
 0x780   :  { %v5336_v35 = vsel %vm1498_vm3, %v5190_v0, 0.0  ;;  %v5721_v57 = vmul.f32 %v7893_v61, %v5720_v27  ;;  %v5718_v10 = vsel %vm12322_vm15, %v7891_v16, %v5714_v41  ;;  %v6132_v21 = vmul.f32 %v5708_v47, %v11783_v12  ;;  %v8032_v12 = vld [vmem:[%s13208_s0 + $0xe8] sm:$0xff] }
 0x781   :  { %5337 = vadd.xlane.f32.xlu1 %v5336_v35  ;;  %v6133_v39 = vmul.f32 %v5718_v10, %v11791_v17 }
 0x782   :  { %v5722_v23 = vmul.f32 0.5, %v5721_v57  ;;  %v6228_v8 = vsel %vm1498_vm3, %v6132_v21, 0.0 }
 0x783   :  { %v6229_v45 = vadd.f32 %v6228_v8, %v6227_v37  ;;  %v6236_v32 = vsel %vm1498_vm3, %v6133_v39, 0.0  ;;  %v8033_v39 = vld [vmem:[%s13208_s0 + $0xf0] sm:$0xff] }
 0x784   :  { %v5723_v36 = vsub.f32 1.5, %v5722_v23  ;;  %v5296_v7 = vpop.xlane.xlu2 %5295 }
 0x785   :  { %v7895_v63 = vpop.eup %7894  ;;  %v12331_v14 = vpop.f32.mrf.mxu0  ;;  %v5432_v18 = vmax.f32 %v5296_v7, 1e-24  ;;  %v6230_v24 = vrot.slane %v6229_v45, 4 }
 0x786   :  { %v5191_v48 = vmul.f32 %v12331_v14, %v12331_v14  ;;  %v5724_v46 = vmul.f32 %v7893_v61, %v5723_v36  ;;  %v5730_v5 = vmul.f32 %v7895_v63, %v5431_v40  ;;  %vm5736_vm6 = vweird.f32 %v7895_v63 }
 0x787   :  { %7896 = vrsqrt.f32 %v5432_v18  ;;  %v6231_v20 = vadd.f32 %v6230_v24, %v6229_v45  ;;  %vm5737_vm7 = vmor %vm5735_vm5, %vm5736_vm6  ;;  %vm5745_vm8 = vweird.f32 %v5432_v18 }
 0x788   :  { %7292 = vmatmul.msk.bf16.gmra.mxu3 %vm733_vm2, %v8032_v12  ;;  %v5339_v25 = vsel %vm1498_vm3, %v5191_v48, 0.0  ;;  %v5728_v16 = vsel %vm5727_vm4, %v7893_v61, %v5724_v46  ;;  %v5731_v51 = vmul.f32 %v7895_v63, %v5730_v5 }
 0x789   :  { %5340 = vadd.xlane.f32.xlu0 %v5339_v25  ;;  %v6134_v17 = vmul.f32 %v5728_v16, %v11819_v38  ;;  %v6232_v49 = vrot.slane %v6231_v20, 2 }
 0x78a   :  { %v5732_v30 = vmul.f32 0.5, %v5731_v51 }
 0x78b   :  { %v6237_v4 = vsel %vm1498_vm3, %v6134_v17, 0.0  ;;  %v6233_v44 = vadd.f32 %v6232_v49, %v6231_v20 }
 0x78c   :  { %v6238_v19 = vadd.f32 %v6237_v4, %v6236_v32  ;;  %v5733_v22 = vsub.f32 1.5, %v5732_v30  ;;  %v5299_v15 = vpop.xlane.xlu2 %5298 }
 0x78d   :  { %v7897_v43 = vpop.eup %7896  ;;  %v12344_v6 = vpop.f32.mrf.mxu0  ;;  %v5433_v37 = vmax.f32 %v5299_v15, 1e-24  ;;  %v6234_v55 = vrot.slane %v6233_v44, 1 }
 0x78e   :  { %v5192_v38 = vmul.f32 %v12344_v6, %v12344_v6  ;;  %v5734_v54 = vmul.f32 %v7895_v63, %v5733_v22  ;;  %v5740_v52 = vmul.f32 %v7897_v43, %v5432_v18  ;;  %vm5746_vm9 = vweird.f32 %v7897_v43 }
 0x78f   :  { %7898 = vrsqrt.f32 %v5433_v37  ;;  %v6235_v27 = vadd.f32 %v6234_v55, %v6233_v44  ;;  %vm5747_vm11 = vmor %vm5745_vm8, %vm5746_vm9  ;;  %vm5755_vm12 = vweird.f32 %v5433_v37 }
 0x790   :  { %v5342_v1 = vsel %vm1498_vm3, %v5192_v38, 0.0  ;;  %v5738_v61 = vsel %vm5737_vm7, %v7895_v63, %v5734_v54  ;;  %v5741_v40 = vmul.f32 %v7897_v43, %v5740_v52 }
 0x791   :  { %5343 = vadd.xlane.f32.xlu0 %v5342_v1  ;;  %v6135_v0 = vmul.f32 %v5738_v61, %v11846_v50  ;;  %v6343_v29 = vpack.c.bf16 %v6235_v27, %v6235_v27 }
 0x792   :  { %v5742_v41 = vmul.f32 0.5, %v5741_v40 }
 0x793   :  { %v6239_v28 = vsel %vm1498_vm3, %v6135_v0, 0.0  ;;  %v6367_v36 = vunpack.c.l.b16 %v6343_v29 }
 0x794   :  { %v6240_v35 = vadd.f32 %v6239_v28, %v6238_v19  ;;  %v5302_v57 = vpop.xlane.xlu1 %5301  ;;  %v5743_v47 = vsub.f32 1.5, %v5742_v41 }
 0x795   :  { %v7899_v23 = vpop.eup %7898  ;;  %v12351_v10 = vpop.f32.mrf.mxu0  ;;  %v5434_v21 = vmax.f32 %v5302_v57, 1e-24  ;;  %v12356_v63 = vsel %vm6375_vm10, %v6367_v36, %v12232_v11 }
 0x796   :  { %v5193_v50 = vmul.f32 %v12351_v10, %v12351_v10  ;;  %v5744_v7 = vmul.f32 %v7897_v43, %v5743_v47  ;;  %v5750_v8 = vmul.f32 %v7899_v23, %v5433_v37  ;;  %vm5756_vm13 = vweird.f32 %v7899_v23 }
 0x797   :  { %7900 = vrsqrt.f32 %v5434_v21  ;;  %vm5757_vm14 = vmor %vm5755_vm12, %vm5756_vm13  ;;  %vm5765_vm15 = vweird.f32 %v5434_v21 }
 0x798   :  { %7293 = vmatmul.msk.bf16.gmra.mxu3 %vm733_vm2, %v8033_v39  ;;  %v5345_v18 = vsel %vm1498_vm3, %v5193_v50, 0.0  ;;  %v5748_v45 = vsel %vm5747_vm11, %v7897_v43, %v5744_v7  ;;  %v5751_v48 = vmul.f32 %v7899_v23, %v5750_v8 }
 0x799   :  { %5346 = vadd.xlane.f32.xlu2 %v5345_v18  ;;  %v6136_v46 = vmul.f32 %v5748_v45, %v11890_v13 }
 0x79a   :  { %v5752_v5 = vmul.f32 0.5, %v5751_v48 }
 0x79b   :  { %v6241_v24 = vsel %vm1498_vm3, %v6136_v46, 0.0 }
 0x79c   :  { %v6242_v11 = vadd.f32 %v6241_v24, %v6240_v35  ;;  %v5753_v12 = vsub.f32 1.5, %v5752_v5  ;;  %v5305_v25 = vpop.xlane.xlu0 %5304 }
 0x79d   :  { %v7901_v16 = vpop.eup %7900  ;;  %v12365_v51 = vpop.f32.mrf.mxu0  ;;  %v5435_v17 = vmax.f32 %v5305_v25, 1e-24 }
 0x79e   :  { %v5194_v32 = vmul.f32 %v12365_v51, %v12365_v51  ;;  %v5760_v20 = vmul.f32 %v7901_v16, %v5434_v21  ;;  %v5754_v30 = vmul.f32 %v7899_v23, %v5753_v12  ;;  %vm5766_vm0 = vweird.f32 %v7901_v16 }
 0x79f   :  { %7902 = vrsqrt.f32 %v5435_v17  ;;  %vm5767_vm1 = vmor %vm5765_vm15, %vm5766_vm0  ;;  %vm5775_vm4 = vweird.f32 %v5435_v17  ;;  %vm6377_vm15 = vcmask 1043459  }
 0x7a0   :  { %v5348_v13 = vsel %vm1498_vm3, %v5194_v32, 0.0  ;;  %v5761_v4 = vmul.f32 %v7901_v16, %v5760_v20  ;;  %v5758_v49 = vsel %vm5757_vm14, %v7899_v23, %v5754_v30 }
 0x7a1   :  { %5349 = vadd.xlane.f32.xlu1 %v5348_v13  ;;  %v6137_v19 = vmul.f32 %v5758_v49, %v11941_v62  ;;  %v8034_v62 = vld [vmem:[%s13208_s0 + $0xf8] sm:$0xff] }
 0x7a2   :  { %v5762_v22 = vmul.f32 0.5, %v5761_v4 }
 0x7a3   :  { %v6243_v15 = vsel %vm1498_vm3, %v6137_v19, 0.0 }
 0x7a4   :  { %v5763_v43 = vsub.f32 1.5, %v5762_v22  ;;  %v6244_v44 = vadd.f32 %v6243_v15, %v6242_v11  ;;  %v5308_v37 = vpop.xlane.xlu0 %5307 }
 0x7a5   :  { %v7903_v38 = vpop.eup %7902  ;;  %v12372_v54 = vpop.f32.mrf.mxu0  ;;  %v5436_v52 = vmax.f32 %v5308_v37, 1e-24 }
 0x7a6   :  { %v5195_v55 = vmul.f32 %v12372_v54, %v12372_v54  ;;  %v5764_v1 = vmul.f32 %v7901_v16, %v5763_v43  ;;  %v5770_v61 = vmul.f32 %v7903_v38, %v5435_v17  ;;  %vm5776_vm5 = vweird.f32 %v7903_v38 }
 0x7a7   :  { %7904 = vrsqrt.f32 %v5436_v52  ;;  %vm5777_vm6 = vmor %vm5775_vm4, %vm5776_vm5 }
 0x7a8   :  { %7294 = vmatmul.msk.bf16.gmra.mxu3 %vm733_vm2, %v8034_v62  ;;  %v5351_v40 = vsel %vm1498_vm3, %v5195_v55, 0.0  ;;  %v5768_v0 = vsel %vm5767_vm1, %v7901_v16, %v5764_v1  ;;  %v5771_v27 = vmul.f32 %v7903_v38, %v5770_v61  ;;  %vm5785_vm2 = vweird.f32 %v5436_v52 }
 0x7a9   :  { %5352 = vadd.xlane.f32.xlu1 %v5351_v40  ;;  %v6138_v41 = vmul.f32 %v5768_v0, %v12015_v53 }
 0x7aa   :  { %v5772_v28 = vmul.f32 0.5, %v5771_v27 }
 0x7ab   :  { %v6245_v29 = vsel %vm1498_vm3, %v6138_v41, 0.0 }
 0x7ac   :  { %v5773_v35 = vsub.f32 1.5, %v5772_v28  ;;  %v6246_v57 = vadd.f32 %v6245_v29, %v6244_v44 }
 0x7ad   :  { %v7905_v47 = vpop.eup %7904 }
 0x7ae   :  { %v5774_v23 = vmul.f32 %v7903_v38, %v5773_v35  ;;  %v5780_v21 = vmul.f32 %v7905_v47, %v5436_v52  ;;  %vm5786_vm7 = vweird.f32 %v7905_v47 }
 0x7af   :  { %vm5787_vm8 = vmor %vm5785_vm2, %vm5786_vm7 }
 0x7b0   :  { %v5778_v36 = vsel %vm5777_vm6, %v7903_v38, %v5774_v23  ;;  %v5781_v50 = vmul.f32 %v7905_v47, %v5780_v21 }
 0x7b1   :  { %v6139_v7 = vmul.f32 %v5778_v36, %v12066_v9 }
 0x7b2   :  { %v5311_v8 = vpop.xlane.xlu1 %5310  ;;  %v5782_v39 = vmul.f32 0.5, %v5781_v50 }
 0x7b3   :  { %v5437_v53 = vmax.f32 %v5311_v8, 1e-24  ;;  %v6247_v18 = vsel %vm1498_vm3, %v6139_v7, 0.0 }
 0x7b4   :  { %v6248_v45 = vadd.f32 %v6247_v18, %v6246_v57  ;;  %v5783_v48 = vsub.f32 1.5, %v5782_v39 }
 0x7b5   :  { %7906 = vrsqrt.f32 %v5437_v53  ;;  %vm5795_vm9 = vweird.f32 %v5437_v53 }
 0x7b6   :  { %v5784_v46 = vmul.f32 %v7905_v47, %v5783_v48 }
 0x7b8   :  { %v5788_v5 = vsel %vm5787_vm8, %v7905_v47, %v5784_v46 }
 0x7b9   :  { %v6140_v24 = vmul.f32 %v5788_v5, %v12138_v58 }
 0x7ba   :  { %v5314_v11 = vpop.xlane.xlu2 %5313 }
 0x7bb   :  { %v7907_v12 = vpop.eup %7906  ;;  %v12386_v25 = vpop.f32.mrf.mxu2  ;;  %v5438_v9 = vmax.f32 %v5314_v11, 1e-24  ;;  %v6249_v16 = vsel %vm1498_vm3, %v6140_v24, 0.0 }
 0x7bc   :  { %v5197_v17 = vmul.f32 %v12386_v25, %v12386_v25  ;;  %v5790_v32 = vmul.f32 %v7907_v12, %v5437_v53  ;;  %v6250_v20 = vadd.f32 %v6249_v16, %v6248_v45  ;;  %vm5796_vm10 = vweird.f32 %v7907_v12 }
 0x7bd   :  { %7908 = vrsqrt.f32 %v5438_v9  ;;  %vm12397_vm11 = vmor %vm5795_vm9, %vm5796_vm10  ;;  %vm5805_vm12 = vweird.f32 %v5438_v9 }
 0x7be   :  { %v5357_v30 = vsel %vm1498_vm3, %v5197_v17, 0.0  ;;  %v5791_v13 = vmul.f32 %v7907_v12, %v5790_v32  ;;  %v6251_v4 = vrot.slane %v6250_v20, 4 }
 0x7bf   :  { %5358 = vadd.xlane.f32.xlu1 %v5357_v30 }
 0x7c0   :  { %v5792_v49 = vmul.f32 0.5, %v5791_v13  ;;  %v6252_v58 = vadd.f32 %v6251_v4, %v6250_v20 }
 0x7c2   :  { %v5793_v19 = vsub.f32 1.5, %v5792_v49  ;;  %v6253_v22 = vrot.slane %v6252_v58, 2  ;;  %v5317_v15 = vpop.xlane.xlu0 %5316 }
 0x7c3   :  { %v7909_v43 = vpop.eup %7908  ;;  %v12392_v44 = vpop.f32.mrf.mxu2  ;;  %v5439_v37 = vmax.f32 %v5317_v15, 1e-24 }
 0x7c4   :  { %v5198_v38 = vmul.f32 %v12392_v44, %v12392_v44  ;;  %v5800_v52 = vmul.f32 %v7909_v43, %v5438_v9  ;;  %v6254_v55 = vadd.f32 %v6253_v22, %v6252_v58  ;;  %v5794_v61 = vmul.f32 %v7907_v12, %v5793_v19 }
 0x7c5   :  { %7910 = vrsqrt.f32 %v5439_v37  ;;  %vm5806_vm13 = vweird.f32 %v7909_v43  ;;  %vm5815_vm0 = vweird.f32 %v5439_v37 }
 0x7c6   :  { %v5360_v1 = vsel %vm1498_vm3, %v5198_v38, 0.0  ;;  %v5801_v62 = vmul.f32 %v7909_v43, %v5800_v52  ;;  %v6255_v0 = vrot.slane %v6254_v55, 1  ;;  %v5798_v28 = vsel %vm12397_vm11, %v7907_v12, %v5794_v61  ;;  %vm5807_vm14 = vmor %vm5805_vm12, %vm5806_vm13 }
 0x7c7   :  { %5361 = vadd.xlane.f32.xlu2 %v5360_v1  ;;  %v6141_v8 = vmul.f32 %v5798_v28, %v12203_v42 }
 0x7c8   :  { %v5802_v27 = vmul.f32 0.5, %v5801_v62  ;;  %v6256_v41 = vadd.f32 %v6255_v0, %v6254_v55 }
 0x7c9   :  { %v6257_v24 = vsel %vm1498_vm3, %v6141_v8, 0.0 }
 0x7ca   :  { %v5320_v29 = vpop.xlane.xlu1 %5319  ;;  %v5803_v35 = vsub.f32 1.5, %v5802_v27  ;;  %v6344_v21 = vpack.c.bf16 %v6256_v41, %v6256_v41 }
 0x7cb   :  { %v7911_v57 = vpop.eup %7910  ;;  %v12403_v47 = vpop.f32.mrf.mxu2  ;;  %v5440_v23 = vmax.f32 %v5320_v29, 1e-24 }
 0x7cc   :  { %v5199_v36 = vmul.f32 %v12403_v47, %v12403_v47  ;;  %v5804_v50 = vmul.f32 %v7909_v43, %v5803_v35  ;;  %v5810_v7 = vmul.f32 %v7911_v57, %v5439_v37  ;;  %v6368_v39 = vunpack.c.l.b16 %v6344_v21 }
 0x7cd   :  { %7912 = vrsqrt.f32 %v5440_v23  ;;  %vm5816_vm1 = vweird.f32 %v7911_v57  ;;  %vm5825_vm5 = vweird.f32 %v5440_v23 }
 0x7ce   :  { %v5363_v53 = vsel %vm1498_vm3, %v5199_v36, 0.0  ;;  %v5808_v18 = vsel %vm5807_vm14, %v7909_v43, %v5804_v50  ;;  %v5811_v45 = vmul.f32 %v7911_v57, %v5810_v7  ;;  %v12411_v46 = vsel %vm6377_vm15, %v6368_v39, %v12356_v63  ;;  %vm5817_vm4 = vmor %vm5815_vm0, %vm5816_vm1 }
 0x7cf   :  { %5364 = vadd.xlane.f32.xlu2 %v5363_v53  ;;  %v6142_v48 = vmul.f32 %v5808_v18, %v12211_v33 }
 0x7d0   :  { %v5812_v5 = vmul.f32 0.5, %v5811_v45 }
 0x7d1   :  { %v6258_v11 = vsel %vm1498_vm3, %v6142_v48, 0.0 }
 0x7d2   :  { %v6259_v42 = vadd.f32 %v6258_v11, %v6257_v24  ;;  %v5813_v12 = vsub.f32 1.5, %v5812_v5  ;;  %v5323_v9 = vpop.xlane.xlu0 %5322 }
 0x7d3   :  { %v7913_v16 = vpop.eup %7912  ;;  %v12415_v17 = vpop.f32.mrf.mxu2  ;;  %v5441_v32 = vmax.f32 %v5323_v9, 1e-24 }
 0x7d4   :  { %v5200_v33 = vmul.f32 %v12415_v17, %v12415_v17  ;;  %v5820_v63 = vmul.f32 %v7913_v16, %v5440_v23  ;;  %v5814_v20 = vmul.f32 %v7911_v57, %v5813_v12  ;;  %vm5826_vm6 = vweird.f32 %v7913_v16 }
 0x7d5   :  { %7914 = vrsqrt.f32 %v5441_v32  ;;  %vm5827_vm2 = vmor %vm5825_vm5, %vm5826_vm6  ;;  %vm5835_vm7 = vweird.f32 %v5441_v32  ;;  %vm6379_vm5 = vcmask 1044484  }
 0x7d6   :  { %v5366_v30 = vsel %vm1498_vm3, %v5200_v33, 0.0  ;;  %v5821_v13 = vmul.f32 %v7913_v16, %v5820_v63  ;;  %v5818_v4 = vsel %vm5817_vm4, %v7911_v57, %v5814_v20 }
 0x7d7   :  { %5367 = vadd.xlane.f32.xlu1 %v5366_v30  ;;  %v6143_v58 = vmul.f32 %v5818_v4, %v12222_v34 }
 0x7d8   :  { %v5822_v49 = vmul.f32 0.5, %v5821_v13 }
 0x7d9   :  { %v6260_v1 = vsel %vm1498_vm3, %v6143_v58, 0.0 }
 0x7da   :  { %v5823_v19 = vsub.f32 1.5, %v5822_v49  ;;  %v5326_v22 = vpop.xlane.xlu2 %5325  ;;  %v6261_v0 = vadd.f32 %v6260_v1, %v6259_v42 }
 0x7db   :  { %v7915_v15 = vpop.eup %7914  ;;  %v12421_v43 = vpop.f32.mrf.mxu2  ;;  %v5442_v37 = vmax.f32 %v5326_v22, 1e-24 }
 0x7dc   :  { %v5201_v38 = vmul.f32 %v12421_v43, %v12421_v43  ;;  %v5824_v52 = vmul.f32 %v7913_v16, %v5823_v19  ;;  %v5830_v55 = vmul.f32 %v7915_v15, %v5441_v32  ;;  %vm5836_vm8 = vweird.f32 %v7915_v15 }
 0x7dd   :  { %7916 = vrsqrt.f32 %v5442_v37  ;;  %vm5837_vm9 = vmor %vm5835_vm7, %vm5836_vm8  ;;  %vm5845_vm10 = vweird.f32 %v5442_v37 }
 0x7de   :  { %v5369_v61 = vsel %vm1498_vm3, %v5201_v38, 0.0  ;;  %v5828_v62 = vsel %vm5827_vm2, %v7913_v16, %v5824_v52  ;;  %v5831_v40 = vmul.f32 %v7915_v15, %v5830_v55 }
 0x7df   :  { %5370 = vadd.xlane.f32.xlu0 %v5369_v61  ;;  %v6144_v34 = vmul.f32 %v5828_v62, %v12237_v3 }
 0x7e0   :  { %v5832_v27 = vmul.f32 0.5, %v5831_v40 }
 0x7e1   :  { %v6262_v41 = vsel %vm1498_vm3, %v6144_v34, 0.0 }
 0x7e2   :  { %v5329_v28 = vpop.xlane.xlu1 %5328  ;;  %v5833_v29 = vsub.f32 1.5, %v5832_v27  ;;  %v6263_v35 = vadd.f32 %v6262_v41, %v6261_v0 }
 0x7e3   :  { %v7917_v57 = vpop.eup %7916  ;;  %v12429_v23 = vpop.f32.mrf.mxu2  ;;  %v5443_v21 = vmax.f32 %v5329_v28, 1e-24 }
 0x7e4   :  { %v5202_v36 = vmul.f32 %v12429_v23, %v12429_v23  ;;  %v5840_v50 = vmul.f32 %v7917_v57, %v5442_v37  ;;  %v5834_v7 = vmul.f32 %v7915_v15, %v5833_v29  ;;  %vm5846_vm11 = vweird.f32 %v7917_v57 }
 0x7e5   :  { %7918 = vrsqrt.f32 %v5443_v21  ;;  %vm5847_vm12 = vmor %vm5845_vm10, %vm5846_vm11  ;;  %vm5855_vm13 = vweird.f32 %v5443_v21 }
 0x7e6   :  { %v5372_v3 = vsel %vm1498_vm3, %v5202_v36, 0.0  ;;  %v5841_v8 = vmul.f32 %v7917_v57, %v5840_v50  ;;  %v5838_v39 = vsel %vm5837_vm9, %v7915_v15, %v5834_v7 }
 0x7e7   :  { %5373 = vadd.xlane.f32.xlu2 %v5372_v3  ;;  %v6145_v18 = vmul.f32 %v5838_v39, %v12248_v31 }
 0x7e8   :  { %v5842_v53 = vmul.f32 0.5, %v5841_v8 }
 0x7e9   :  { %v6264_v12 = vsel %vm1498_vm3, %v6145_v18, 0.0 }
 0x7ea   :  { %v5843_v45 = vsub.f32 1.5, %v5842_v53  ;;  %v5332_v48 = vpop.xlane.xlu0 %5331  ;;  %v6265_v63 = vadd.f32 %v6264_v12, %v6263_v35  ;;  %v12452_v35 = vpop.f32.mrf.mxu0 }
 0x7eb   :  { %v7919_v5 = vpop.eup %7918  ;;  %v5444_v24 = vmax.f32 %v5332_v48, 1e-24  ;;  %v12458_v50 = vpop.f32.mrf.mxu2 }
 0x7ec   :  { %v5850_v11 = vmul.f32 %v7919_v5, %v5443_v21  ;;  %v5844_v42 = vmul.f32 %v7917_v57, %v5843_v45  ;;  %vm5856_vm14 = vweird.f32 %v7919_v5  ;;  %v5196_v21 = vmul.f32 %v12452_v35, %v12452_v35 }
 0x7ed   :  { %7920 = vrsqrt.f32 %v5444_v24  ;;  %vm5857_vm15 = vmor %vm5855_vm13, %vm5856_vm14  ;;  %vm5865_vm0 = vweird.f32 %v5444_v24  ;;  %v5203_v18 = vmul.f32 %v12458_v50, %v12458_v50 }
 0x7ee   :  { %v5851_v9 = vmul.f32 %v7919_v5, %v5850_v11  ;;  %v5848_v16 = vsel %vm5847_vm12, %v7917_v57, %v5844_v42  ;;  %v5354_v8 = vsel %vm1498_vm3, %v5196_v21, 0.0 }
 0x7ef   :  { %v6146_v32 = vmul.f32 %v5848_v16, %v12257_v56  ;;  %v5375_v11 = vsel %vm1498_vm3, %v5203_v18, 0.0 }
 0x7f0   :  { %v5852_v33 = vmul.f32 0.5, %v5851_v9 }
 0x7f1   :  { %v6266_v31 = vsel %vm1498_vm3, %v6146_v32, 0.0 }
 0x7f2   :  { %v5853_v20 = vsub.f32 1.5, %v5852_v33  ;;  %v6267_v30 = vadd.f32 %v6266_v31, %v6265_v63 }
 0x7f3   :  { %v7921_v13 = vpop.eup %7920  ;;  %v12474_v12 = vpop.f32.mrf.mxu2 }
 0x7f4   :  { %v5854_v4 = vmul.f32 %v7919_v5, %v5853_v20  ;;  %v5860_v49 = vmul.f32 %v7921_v13, %v5444_v24  ;;  %vm5866_vm1 = vweird.f32 %v7921_v13  ;;  %v5204_v16 = vmul.f32 %v12474_v12, %v12474_v12 }
 0x7f5   :  { %vm5867_vm4 = vmor %vm5865_vm0, %vm5866_vm1 }
 0x7f6   :  { %v5858_v58 = vsel %vm5857_vm15, %v7919_v5, %v5854_v4  ;;  %v5861_v19 = vmul.f32 %v7921_v13, %v5860_v49  ;;  %v5378_v63 = vsel %vm1498_vm3, %v5204_v16, 0.0 }
 0x7f7   :  { %v6147_v22 = vmul.f32 %v5858_v58, %v12279_v26 }
 0x7f8   :  { %v5862_v15 = vmul.f32 0.5, %v5861_v19 }
 0x7f9   :  { %v6268_v56 = vsel %vm1498_vm3, %v6147_v22, 0.0 }
 0x7fa   :  { %v5863_v37 = vsub.f32 1.5, %v5862_v15  ;;  %v6269_v38 = vadd.f32 %v6268_v56, %v6267_v30  ;;  %v5335_v15 = vpop.xlane.xlu0 %5334  ;;  %v5338_v56 = vpop.xlane.xlu1 %5337 }
 0x7fb   :  { %v12440_v52 = vpop.f32.mrf.mxu3 }
 0x7fc   :  { %v5205_v55 = vmul.f32 %v12440_v52, %v12440_v52  ;;  %v5864_v1 = vmul.f32 %v7921_v13, %v5863_v37 }
 0x7fe   :  { %v5381_v61 = vsel %vm1498_vm3, %v5205_v55, 0.0  ;;  %v5868_v62 = vsel %vm5867_vm4, %v7921_v13, %v5864_v1  ;;  %v5445_v55 = vmax.f32 %v5335_v15, 1e-24  ;;  %v5446_v1 = vmax.f32 %v5338_v56, 1e-24 }
 0x7ff   :  { %5382 = vadd.xlane.f32.xlu1 %v5381_v61  ;;  %v6148_v26 = vmul.f32 %v5868_v62, %v12299_v60 }
 0x800   :  { %7922 = vrsqrt.f32 %v5445_v55  ;;  %vm5875_vm6 = vweird.f32 %v5445_v55  ;;  %vm5885_vm7 = vweird.f32 %v5446_v1 }
 0x801   :  { %v6270_v40 = vsel %vm1498_vm3, %v6148_v26, 0.0  ;;  %7924 = vrsqrt.f32 %v5446_v1 }
 0x802   :  { %v6271_v34 = vadd.f32 %v6270_v40, %v6269_v38  ;;  %v5341_v37 = vpop.xlane.xlu0 %5340 }
 0x803   :  { %v12447_v0 = vpop.f32.mrf.mxu3  ;;  %v12500_v62 = vmax.f32 %v5341_v37, 1e-24 }
 0x804   :  { %v5206_v27 = vmul.f32 %v12447_v0, %v12447_v0  ;;  %v6272_v41 = vrot.slane %v6271_v34, 4 }
 0x805   :  { %7926 = vrsqrt.f32 %v12500_v62  ;;  %vm5895_vm11 = vweird.f32 %v12500_v62 }
 0x806   :  { %v5384_v28 = vsel %vm1498_vm3, %v5206_v27, 0.0  ;;  %v6273_v29 = vadd.f32 %v6272_v41, %v6271_v34  ;;  %v12505_v34 = vpop.eup %7922 }
 0x807   :  { %5385 = vadd.xlane.f32.xlu2 %v5384_v28  ;;  %v12507_v41 = vpop.eup %7924  ;;  %vm5876_vm2 = vweird.f32 %v12505_v34 }
 0x808   :  { %v6274_v57 = vrot.slane %v6273_v29, 2  ;;  %v5880_v21 = vmul.f32 %v12507_v41, %v5446_v1  ;;  %vm5886_vm8 = vweird.f32 %v12507_v41  ;;  %vm12551_vm9 = vmor %vm5875_vm6, %vm5876_vm2 }
 0x809   :  { %vm12557_vm10 = vmor %vm5885_vm7, %vm5886_vm8 }
 0x80a   :  { %v6275_v60 = vadd.f32 %v6274_v57, %v6273_v29  ;;  %v5344_v26 = vpop.xlane.xlu0 %5343  ;;  %v5870_v29 = vmul.f32 %v12505_v34, %v5445_v55 }
 0x80b   :  { %v12456_v36 = vpop.f32.mrf.mxu3  ;;  %v12503_v40 = vmax.f32 %v5344_v26, 1e-24  ;;  %v12511_v57 = vpop.eup %7926 }
 0x80c   :  { %v5207_v7 = vmul.f32 %v12456_v36, %v12456_v36  ;;  %v6276_v3 = vrot.slane %v6275_v60, 1  ;;  %v5347_v61 = vpop.xlane.xlu2 %5346  ;;  %vm5896_vm12 = vweird.f32 %v12511_v57 }
 0x80d   :  { %7928 = vrsqrt.f32 %v12503_v40  ;;  %vm12578_vm13 = vmor %vm5895_vm11, %vm5896_vm12  ;;  %vm5905_vm14 = vweird.f32 %v12503_v40 }
 0x80e   :  { %v5387_v39 = vsel %vm1498_vm3, %v5207_v7, 0.0  ;;  %v6277_v53 = vadd.f32 %v6276_v3, %v6275_v60  ;;  %v12514_v60 = vmax.f32 %v5347_v61, 1e-24  ;;  %v5871_v7 = vmul.f32 %v12505_v34, %v5870_v29 }
 0x80f   :  { %5355 = vadd.xlane.f32.xlu2 %v5354_v8  ;;  %5388 = vadd.xlane.f32.xlu1 %v5387_v39  ;;  %v5890_v3 = vmul.f32 %v12511_v57, %v12500_v62  ;;  %v5881_v8 = vmul.f32 %v12507_v41, %v5880_v21 }
 0x810   :  { %v6345_v45 = vpack.c.bf16 %v6277_v53, %v6277_v53  ;;  %7930 = vrsqrt.f32 %v12514_v60  ;;  %vm5915_vm1 = vweird.f32 %v12514_v60 }
 0x812   :  { %v6369_v48 = vunpack.c.l.b16 %v6345_v45  ;;  %v5872_v45 = vmul.f32 0.5, %v5871_v7 }
 0x813   :  { %v12466_v5 = vpop.f32.mrf.mxu3  ;;  %v12520_v53 = vpop.eup %7928 }
 0x814   :  { %v5208_v24 = vmul.f32 %v12466_v5, %v12466_v5  ;;  %v12472_v42 = vsel %vm6379_vm5, %v6369_v48, %v12411_v46  ;;  %v5350_v38 = vpop.xlane.xlu1 %5349  ;;  %vm5906_vm15 = vweird.f32 %v12520_v53 }
 0x815   :  { %v12522_v18 = vmax.f32 %v5350_v38, 1e-24  ;;  %vm12615_vm0 = vmor %vm5905_vm14, %vm5906_vm15 }
 0x816   :  { %v5390_v9 = vsel %vm1498_vm3, %v5208_v24, 0.0  ;;  %v5891_v24 = vmul.f32 %v12511_v57, %v5890_v3 }
 0x817   :  { %5391 = vadd.xlane.f32.xlu0 %v5390_v9  ;;  %5376 = vadd.xlane.f32.xlu1 %v5375_v11  ;;  %v5882_v11 = vmul.f32 0.5, %v5881_v8  ;;  %7932 = vrsqrt.f32 %v12522_v18  ;;  %vm5925_vm5 = vweird.f32 %v12522_v18 }
 0x81b   :  { %v12479_v32 = vpop.f32.mrf.mxu3 }
 0x81c   :  { %v5209_v33 = vmul.f32 %v12479_v32, %v12479_v32  ;;  %v5353_v27 = vpop.xlane.xlu1 %5352 }
 0x81e   :  { %v5393_v31 = vsel %vm1498_vm3, %v5209_v33, 0.0  ;;  %v5900_v33 = vmul.f32 %v12520_v53, %v12503_v40 }
 0x81f   :  { %5394 = vadd.xlane.f32.xlu2 %v5393_v31  ;;  %5379 = vadd.xlane.f32.xlu1 %v5378_v63  ;;  %v12533_v63 = vmax.f32 %v5353_v27, 1e-24  ;;  %v5873_v31 = vsub.f32 1.5, %v5872_v45 }
 0x821   :  { %vm5935_vm12 = vweird.f32 %v12533_v63 }
 0x823   :  { %v12485_v46 = vpop.f32.mrf.mxu3 }
 0x824   :  { %v5210_v20 = vmul.f32 %v12485_v46, %v12485_v46 }
 0x826   :  { %v5396_v30 = vsel %vm1498_vm3, %v5210_v20, 0.0  ;;  %v5892_v20 = vmul.f32 0.5, %v5891_v24 }
 0x827   :  { %5397 = vadd.xlane.f32.xlu2 %v5396_v30  ;;  %v5883_v30 = vsub.f32 1.5, %v5882_v11 }
 0x828   :  { %v5893_v15 = vsub.f32 1.5, %v5892_v20 }
 0x829   :  { %v5884_v38 = vmul.f32 %v12507_v41, %v5883_v30 }
 0x82a   :  { %v5894_v8 = vmul.f32 %v12511_v57, %v5893_v15 }
 0x82b   :  { %v12490_v13 = vpop.f32.mrf.mxu3 }
 0x82c   :  { %v5211_v4 = vmul.f32 %v12490_v13, %v12490_v13 }
 0x82e   :  { %v5399_v49 = vsel %vm1498_vm3, %v5211_v4, 0.0  ;;  %v5901_v4 = vmul.f32 %v12520_v53, %v5900_v33 }
 0x82f   :  { %5400 = vadd.xlane.f32.xlu0 %v5399_v49  ;;  %v12538_v49 = vpop.eup %7930 }
 0x830   :  { %v12546_v37 = vpop.eup %7932  ;;  %v5910_v61 = vmul.f32 %v12538_v49, %v12514_v60  ;;  %v5902_v26 = vmul.f32 0.5, %v5901_v4  ;;  %v5898_v4 = vsel %vm12578_vm13, %v12511_v57, %v5894_v8  ;;  %vm5916_vm4 = vweird.f32 %v12538_v49 }
 0x831   :  { %v5920_v62 = vmul.f32 %v12546_v37, %v12522_v18  ;;  %vm5926_vm6 = vweird.f32 %v12546_v37  ;;  %vm12653_vm8 = vmor %vm5915_vm1, %vm5916_vm4 }
 0x832   :  { %v5359_v39 = vpop.xlane.xlu1 %5358  ;;  %v5911_v45 = vmul.f32 %v12538_v49, %v5910_v61  ;;  %v5903_v11 = vsub.f32 1.5, %v5902_v26  ;;  %vm12666_vm11 = vmor %vm5925_vm5, %vm5926_vm6 }
 0x833   :  { %v12495_v58 = vpop.f32.mrf.mxu3  ;;  %v12525_v48 = vmax.f32 %v5359_v39, 1e-24  ;;  %v5888_v39 = vsel %vm12557_vm10, %v12507_v41, %v5884_v38  ;;  %v5921_v15 = vmul.f32 %v12546_v37, %v5920_v62 }
 0x834   :  { %v5212_v19 = vmul.f32 %v12495_v58, %v12495_v58  ;;  %v6150_v20 = vmul.f32 %v5888_v39, %v12317_v2  ;;  %v5904_v61 = vmul.f32 %v12520_v53, %v5903_v11 }
 0x835   :  { %7934 = vrsqrt.f32 %v12525_v48  ;;  %vm5955_vm2 = vweird.f32 %v12525_v48 }
 0x836   :  { %v5402_v22 = vsel %vm1498_vm3, %v5212_v19, 0.0  ;;  %v5908_v40 = vsel %vm12615_vm0, %v12520_v53, %v5904_v61 }
 0x837   :  { %5403 = vadd.xlane.f32.xlu2 %v5402_v22  ;;  %v5874_v22 = vmul.f32 %v12505_v34, %v5873_v31 }
 0x839   :  { %v5878_v3 = vsel %vm12551_vm9, %v12505_v34, %v5874_v22  ;;  %v5912_v22 = vmul.f32 0.5, %v5911_v45 }
 0x83a   :  { %v5362_v28 = vpop.xlane.xlu2 %5361  ;;  %v6149_v30 = vmul.f32 %v5878_v3, %v12304_v59  ;;  %v6151_v3 = vmul.f32 %v5898_v4, %v12331_v14 }
 0x83b   :  { %v12528_v9 = vmax.f32 %v5362_v28, 1e-24  ;;  %v12555_v27 = vpop.eup %7934  ;;  %v5913_v39 = vsub.f32 1.5, %v5912_v22 }
 0x83c   :  { %v5950_v33 = vmul.f32 %v12555_v27, %v12525_v48  ;;  %v6278_v62 = vsel %vm1498_vm3, %v6149_v30, 0.0  ;;  %vm5956_vm7 = vweird.f32 %v12555_v27 }
 0x83d   :  { %7936 = vrsqrt.f32 %v12528_v9  ;;  %v5914_v4 = vmul.f32 %v12538_v49, %v5913_v39  ;;  %vm5965_vm9 = vweird.f32 %v12528_v9  ;;  %vm12678_vm13 = vmor %vm5955_vm2, %vm5956_vm7 }
 0x83e   :  { %7938 = vrsqrt.f32 %v12533_v63  ;;  %v5951_v59 = vmul.f32 %v12555_v27, %v5950_v33 }
 0x83f   :  { %v5918_v48 = vsel %vm12653_vm8, %v12538_v49, %v5914_v4 }
 0x840   :  { %v5952_v11 = vmul.f32 0.5, %v5951_v59 }
 0x842   :  { %v5365_v16 = vpop.xlane.xlu2 %5364  ;;  %v5953_v59 = vsub.f32 1.5, %v5952_v11 }
 0x843   :  { %v12540_v19 = vmax.f32 %v5365_v16, 1e-24  ;;  %v12564_v29 = vpop.eup %7936 }
 0x844   :  { %v12582_v16 = vpop.eup %7938  ;;  %v5960_v34 = vmul.f32 %v12564_v29, %v12528_v9  ;;  %vm5966_vm10 = vweird.f32 %v12564_v29  ;;  %v5954_v11 = vmul.f32 %v12555_v27, %v5953_v59 }
 0x845   :  { %7940 = vrsqrt.f32 %v12540_v19  ;;  %vm12684_vm14 = vmor %vm5965_vm9, %vm5966_vm10  ;;  %vm5936_vm15 = vweird.f32 %v12582_v16  ;;  %vm5975_vm0 = vweird.f32 %v12540_v19 }
 0x846   :  { %v5961_v2 = vmul.f32 %v12564_v29, %v5960_v34  ;;  %vm12715_vm4 = vmor %vm5935_vm12, %vm5936_vm15 }
 0x848   :  { %v5962_v24 = vmul.f32 0.5, %v5961_v2 }
 0x84a   :  { %v5368_v56 = vpop.xlane.xlu1 %5367  ;;  %v5963_v2 = vsub.f32 1.5, %v5962_v24 }
 0x84b   :  { %v12566_v21 = vmax.f32 %v5368_v56, 1e-24  ;;  %v12592_v41 = vpop.eup %7940  ;;  %v5930_v56 = vmul.f32 %v12582_v16, %v12533_v63  ;;  %v6153_v63 = vmul.f32 %v5918_v48, %v12351_v10 }
 0x84c   :  { %v5970_v57 = vmul.f32 %v12592_v41, %v12540_v19  ;;  %v5964_v24 = vmul.f32 %v12564_v29, %v5963_v2  ;;  %vm5976_vm1 = vweird.f32 %v12592_v41 }
 0x84d   :  { %7942 = vrsqrt.f32 %v12566_v21  ;;  %v5931_v45 = vmul.f32 %v12582_v16, %v5930_v56  ;;  %vm12735_vm5 = vmor %vm5975_vm0, %vm5976_vm1  ;;  %vm5985_vm6 = vweird.f32 %v12566_v21 }
 0x84e   :  { %v5971_v14 = vmul.f32 %v12592_v41, %v5970_v57  ;;  %v5968_v49 = vsel %vm12684_vm14, %v12564_v29, %v5964_v24 }
 0x84f   :  { %v5932_v53 = vmul.f32 0.5, %v5931_v45 }
 0x850   :  { %v5972_v28 = vmul.f32 0.5, %v5971_v14 }
 0x851   :  { %v5933_v45 = vsub.f32 1.5, %v5932_v53 }
 0x852   :  { %v5371_v7 = vpop.xlane.xlu0 %5370 }
 0x853   :  { %v12588_v31 = vmax.f32 %v5371_v7, 1e-24  ;;  %v6279_v7 = vsel %vm1498_vm3, %v6150_v20, 0.0  ;;  %v12621_v8 = vpop.eup %7942  ;;  %v6281_v20 = vsel %vm1498_vm3, %v6151_v3, 0.0 }
 0x854   :  { %v6280_v34 = vadd.f32 %v6279_v7, %v6278_v62  ;;  %v5980_v30 = vmul.f32 %v12621_v8, %v12566_v21  ;;  %vm5986_vm2 = vweird.f32 %v12621_v8 }
 0x855   :  { %7944 = vrsqrt.f32 %v12588_v31  ;;  %vm12762_vm7 = vmor %vm5985_vm6, %vm5986_vm2  ;;  %vm5995_vm8 = vweird.f32 %v12588_v31 }
 0x856   :  { %v5981_v39 = vmul.f32 %v12621_v8, %v5980_v30  ;;  %v6282_v62 = vadd.f32 %v6281_v20, %v6280_v34  ;;  %v5973_v34 = vsub.f32 1.5, %v5972_v28 }
 0x85a   :  { %v5374_v1 = vpop.xlane.xlu2 %5373 }
 0x85b   :  { %v12608_v26 = vmax.f32 %v5374_v1, 1e-24  ;;  %v5922_v1 = vmul.f32 0.5, %v5921_v15  ;;  %v12631_v33 = vpop.eup %7944  ;;  %v6152_v15 = vmul.f32 %v5908_v40, %v12344_v6 }
 0x85c   :  { %v5990_v7 = vmul.f32 %v12631_v33, %v12588_v31  ;;  %vm5996_vm9 = vweird.f32 %v12631_v33 }
 0x85d   :  { %7946 = vrsqrt.f32 %v12608_v26  ;;  %v5923_v22 = vsub.f32 1.5, %v5922_v1  ;;  %v6283_v9 = vsel %vm1498_vm3, %v6152_v15, 0.0  ;;  %vm6005_vm10 = vweird.f32 %v12608_v26 }
 0x85e   :  { %v5991_v30 = vmul.f32 %v12631_v33, %v5990_v7  ;;  %v12695_v53 = vadd.f32 %v6283_v9, %v6282_v62  ;;  %v5974_v7 = vmul.f32 %v12592_v41, %v5973_v34 }
 0x85f   :  { %v5924_v1 = vmul.f32 %v12546_v37, %v5923_v22  ;;  %v5982_v22 = vmul.f32 0.5, %v5981_v39 }
 0x860   :  { %v5992_v6 = vmul.f32 0.5, %v5991_v30  ;;  %v5978_v62 = vsel %vm12735_vm5, %v12592_v41, %v5974_v7 }
 0x861   :  { %v5928_v15 = vsel %vm12666_vm11, %v12546_v37, %v5924_v1  ;;  %v5958_v37 = vsel %vm12678_vm13, %v12555_v27, %v5954_v11  ;;  %v5983_v60 = vsub.f32 1.5, %v5982_v22  ;;  %v6285_v11 = vsel %vm1498_vm3, %v6153_v63, 0.0  ;;  %vm12792_vm11 = vmor %vm5995_vm8, %vm5996_vm9 }
 0x862   :  { %v6154_v1 = vmul.f32 %v5928_v15, %v12365_v51  ;;  %v6158_v51 = vmul.f32 %v5968_v49, %v12392_v44  ;;  %v6157_v19 = vmul.f32 %v5958_v37, %v12386_v25  ;;  %v5993_v9 = vsub.f32 1.5, %v5992_v6 }
 0x863   :  { %v12647_v3 = vpop.eup %7946  ;;  %v5984_v21 = vmul.f32 %v12621_v8, %v5983_v60  ;;  %v6286_v63 = vadd.f32 %v6285_v11, %v12695_v53 }
 0x864   :  { %v6000_v20 = vmul.f32 %v12647_v3, %v12608_v26  ;;  %v6287_v44 = vsel %vm1498_vm3, %v6154_v1, 0.0  ;;  %v6299_v30 = vsel %vm1498_vm3, %v6157_v19, 0.0  ;;  %vm6006_vm12 = vweird.f32 %v12647_v3 }
 0x865   :  { %vm12818_vm13 = vmor %vm6005_vm10, %vm6006_vm12  ;;  %v12822_v53 = vadd.f32 %v6287_v44, %v6286_v63 }
 0x866   :  { %v6001_v29 = vmul.f32 %v12647_v3, %v6000_v20 }
 0x872   :  { %v12604_v55 = vpop.xlane.xlu1 %5382 }
 0x87a   :  { %v5386_v38 = vpop.xlane.xlu2 %5385 }
 0x87b   :  { %v12682_v40 = vmax.f32 %v5386_v38, 1e-24  ;;  %v12698_v38 = vmax.f32 %v12604_v55, 1e-24  ;;  %v5994_v55 = vmul.f32 %v12631_v33, %v5993_v9 }
 0x87d   :  { %vm6045_vm10 = vweird.f32 %v12682_v40  ;;  %vm6035_vm12 = vweird.f32 %v12698_v38 }
 0x882   :  { %v5356_v56 = vpop.xlane.xlu2 %5355  ;;  %v5389_v61 = vpop.xlane.xlu1 %5388 }
 0x883   :  { %v12641_v57 = vmax.f32 %v5356_v56, 1e-24  ;;  %v5934_v56 = vmul.f32 %v12582_v16, %v5933_v45  ;;  %v12727_v39 = vmax.f32 %v5389_v61, 1e-24 }
 0x885   :  { %7948 = vrsqrt.f32 %v12641_v57  ;;  %v5938_v61 = vsel %vm12715_vm4, %v12582_v16, %v5934_v56  ;;  %v6002_v16 = vmul.f32 0.5, %v6001_v29  ;;  %v6300_v56 = vsel %vm1498_vm3, %v6158_v51, 0.0 }
 0x886   :  { %7950 = vrsqrt.f32 %v12682_v40  ;;  %v6155_v25 = vmul.f32 %v5938_v61, %v12372_v54  ;;  %v6159_v54 = vmul.f32 %v5978_v62, %v12403_v47  ;;  %v5988_v47 = vsel %vm12762_vm7, %v12621_v8, %v5984_v21 }
 0x887   :  { %7952 = vrsqrt.f32 %v12698_v38  ;;  %v6301_v6 = vadd.f32 %v6300_v56, %v6299_v30  ;;  %v6160_v61 = vmul.f32 %v5988_v47, %v12415_v17  ;;  %v5998_v51 = vsel %vm12792_vm11, %v12631_v33, %v5994_v55 }
 0x888   :  { %v6302_v31 = vsel %vm1498_vm3, %v6159_v54, 0.0  ;;  %v12827_v17 = vsel %vm1498_vm3, %v6155_v25, 0.0  ;;  %v6161_v26 = vmul.f32 %v5998_v51, %v12421_v43  ;;  %vm5945_vm1 = vweird.f32 %v12641_v57 }
 0x889   :  { %v6303_v9 = vadd.f32 %v6302_v31, %v6301_v6  ;;  %v6304_v54 = vsel %vm1498_vm3, %v6160_v61, 0.0 }
 0x88a   :  { %v5377_v2 = vpop.xlane.xlu1 %5376  ;;  %v5392_v4 = vpop.xlane.xlu0 %5391  ;;  %v6306_v55 = vsel %vm1498_vm3, %v6161_v26, 0.0 }
 0x88b   :  { %v12706_v59 = vpop.eup %7948  ;;  %v12723_v28 = vmax.f32 %v5377_v2, 1e-24  ;;  %v12745_v45 = vmax.f32 %v5392_v4, 1e-24  ;;  %v6003_v2 = vsub.f32 1.5, %v6002_v16 }
 0x88c   :  { %v5940_v10 = vmul.f32 %v12706_v59, %v12641_v57  ;;  %v12756_v24 = vpop.eup %7950  ;;  %vm5946_vm0 = vweird.f32 %v12706_v59 }
 0x88d   :  { %7954 = vrsqrt.f32 %v12723_v28  ;;  %v12770_v20 = vpop.eup %7952  ;;  %v6040_v49 = vmul.f32 %v12756_v24, %v12682_v40  ;;  %v6004_v60 = vmul.f32 %v12647_v3, %v6003_v2  ;;  %vm6015_vm14 = vweird.f32 %v12723_v28  ;;  %vm12863_vm5 = vmor %vm5945_vm1, %vm5946_vm0 }
 0x88e   :  { %7956 = vrsqrt.f32 %v12727_v39  ;;  %v5941_v41 = vmul.f32 %v12706_v59, %v5940_v10  ;;  %v6030_v8 = vmul.f32 %v12770_v20, %v12698_v38  ;;  %vm6046_vm7 = vweird.f32 %v12756_v24 }
 0x88f   :  { %7958 = vrsqrt.f32 %v12745_v45  ;;  %v6041_v10 = vmul.f32 %v12756_v24, %v6040_v49  ;;  %v6008_v25 = vsel %vm12818_vm13, %v12647_v3, %v6004_v60  ;;  %vm6036_vm8 = vweird.f32 %v12770_v20  ;;  %vm12902_vm11 = vmor %vm6045_vm10, %vm6046_vm7 }
 0x890   :  { %v5942_v29 = vmul.f32 0.5, %v5941_v41  ;;  %v6031_v11 = vmul.f32 %v12770_v20, %v6030_v8  ;;  %v6162_v8 = vmul.f32 %v6008_v25, %v12429_v23  ;;  %vm6055_vm13 = vweird.f32 %v12727_v39 }
 0x891   :  { %v6042_v30 = vmul.f32 0.5, %v6041_v10  ;;  %vm6065_vm1 = vweird.f32 %v12745_v45 }
 0x892   :  { %v5395_v14 = vpop.xlane.xlu2 %5394  ;;  %v5380_v34 = vpop.xlane.xlu1 %5379  ;;  %v5943_v21 = vsub.f32 1.5, %v5942_v29  ;;  %v6032_v2 = vmul.f32 0.5, %v6031_v11  ;;  %v6305_v29 = vadd.f32 %v6304_v54, %v6303_v9  ;;  %v6308_v11 = vsel %vm1498_vm3, %v6162_v8, 0.0 }
 0x893   :  { %v12774_v48 = vmax.f32 %v5395_v14, 1e-24  ;;  %v12776_v22 = vmax.f32 %v5380_v34, 1e-24  ;;  %v12778_v15 = vpop.eup %7954  ;;  %v6043_v31 = vsub.f32 1.5, %v6042_v30 }
 0x894   :  { %v6010_v4 = vmul.f32 %v12778_v15, %v12723_v28  ;;  %v12799_v7 = vpop.eup %7956  ;;  %vm6016_vm15 = vweird.f32 %v12778_v15  ;;  %v5944_v49 = vmul.f32 %v12706_v59, %v5943_v21  ;;  %v6033_v23 = vsub.f32 1.5, %v6032_v2 }
 0x895   :  { %7960 = vrsqrt.f32 %v12774_v48  ;;  %v12808_v27 = vpop.eup %7958  ;;  %v6050_v62 = vmul.f32 %v12799_v7, %v12727_v39  ;;  %vm12859_vm4 = vmor %vm6015_vm14, %vm6016_vm15  ;;  %vm6025_vm6 = vweird.f32 %v12776_v22  ;;  %v6307_v61 = vadd.f32 %v6306_v55, %v6305_v29 }
 0x896   :  { %7962 = vrsqrt.f32 %v12776_v22  ;;  %v6011_v1 = vmul.f32 %v12778_v15, %v6010_v4  ;;  %v6060_v44 = vmul.f32 %v12808_v27, %v12745_v45  ;;  %v5948_v57 = vsel %vm12863_vm5, %v12706_v59, %v5944_v49  ;;  %vm12917_vm15 = vmor %vm6035_vm12, %vm6036_vm8 }
 0x897   :  { %v6051_v56 = vmul.f32 %v12799_v7, %v6050_v62  ;;  %vm6056_vm14 = vweird.f32 %v12799_v7  ;;  %vm6066_vm0 = vweird.f32 %v12808_v27 }
 0x898   :  { %v6012_v16 = vmul.f32 0.5, %v6011_v1  ;;  %v6061_v47 = vmul.f32 %v12808_v27, %v6060_v44  ;;  %v6156_v44 = vmul.f32 %v5948_v57, %v12452_v35  ;;  %v6290_v35 = vadd.f32 %v12827_v17, %v12822_v53 }
 0x899   :  { %v6052_v1 = vmul.f32 0.5, %v6051_v56 }
 0x89a   :  { %v5398_v33 = vpop.xlane.xlu2 %5397  ;;  %v6013_v41 = vsub.f32 1.5, %v6012_v16  ;;  %v6062_v19 = vmul.f32 0.5, %v6061_v47  ;;  %v6291_v53 = vsel %vm1498_vm3, %v6156_v44, 0.0 }
 0x89b   :  { %v12830_v18 = vpop.eup %7960  ;;  %v12835_v14 = vmax.f32 %v5398_v33, 1e-24  ;;  %v6053_v33 = vsub.f32 1.5, %v6052_v1  ;;  %v6292_v6 = vadd.f32 %v6291_v53, %v6290_v35 }
 0x89c   :  { %v7963_v34 = vpop.eup %7962  ;;  %v6070_v3 = vmul.f32 %v12830_v18, %v12774_v48  ;;  %v6014_v37 = vmul.f32 %v12778_v15, %v6013_v41  ;;  %v6063_v30 = vsub.f32 1.5, %v6062_v19  ;;  %vm6076_vm5 = vweird.f32 %v12830_v18 }
 0x89d   :  { %7964 = vrsqrt.f32 %v12835_v14  ;;  %v6020_v43 = vmul.f32 %v7963_v34, %v12776_v22  ;;  %vm6026_vm2 = vweird.f32 %v7963_v34  ;;  %v6034_v22 = vmul.f32 %v12770_v20, %v6033_v23 }
 0x89e   :  { %v6071_v28 = vmul.f32 %v12830_v18, %v6070_v3  ;;  %v6018_v62 = vsel %vm12859_vm4, %v12778_v15, %v6014_v37  ;;  %vm12887_vm9 = vmor %vm6025_vm6, %vm6026_vm2  ;;  %v6044_v15 = vmul.f32 %v12756_v24, %v6043_v31  ;;  %v6064_v47 = vmul.f32 %v12808_v27, %v6063_v30 }
 0x89f   :  { %v6021_v4 = vmul.f32 %v7963_v34, %v6020_v43  ;;  %v6163_v25 = vmul.f32 %v6018_v62, %v12458_v50  ;;  %v6309_v50 = vadd.f32 %v6308_v11, %v6307_v61  ;;  %v6038_v38 = vsel %vm12917_vm15, %v12770_v20, %v6034_v22  ;;  %vm12942_vm4 = vmor %vm6055_vm13, %vm6056_vm14  ;;  %v7550_v43 = vld [vmem:[%s13213_s8 + $0x74] sm:$0xf]  ;;  %v7340_v62 = vld [vmem:[%s13213_s8 + $0x48] sm:$0xf0] }
 0x8a0   :  { %v6072_v41 = vmul.f32 0.5, %v6071_v28  ;;  %v6048_v40 = vsel %vm12902_vm11, %v12756_v24, %v6044_v15  ;;  %vm12952_vm6 = vmor %vm6065_vm1, %vm6066_vm0  ;;  %vm6075_vm2 = vweird.f32 %v12774_v48  ;;  %v7534_v15 = vld [vmem:[%s13212_s6] sm:$0xff]  ;;  %vm6381_vm1 = vcmask 1045509  }
 0x8a1   :  { %v6022_v60 = vmul.f32 0.5, %v6021_v4  ;;  %v6310_v3 = vsel %vm1498_vm3, %v6163_v25, 0.0  ;;  %v6166_v31 = vmul.f32 %v6048_v40, %v12447_v0  ;;  %v6068_v23 = vsel %vm12952_vm6, %v12808_v27, %v6064_v47  ;;  %vm12966_vm8 = vmor %vm6075_vm2, %vm6076_vm5 }
 0x8a2   :  { %v5401_v10 = vpop.xlane.xlu0 %5400  ;;  %v6073_v17 = vsub.f32 1.5, %v6072_v41  ;;  %v6311_v63 = vadd.f32 %v6310_v3, %v6309_v50  ;;  %v6168_v48 = vmul.f32 %v6068_v23, %v12466_v5  ;;  %vm6385_vm5 = vcmask 1047559  }
 0x8a3   :  { %v12872_v51 = vpop.eup %7964  ;;  %v12877_v16 = vmax.f32 %v5401_v10, 1e-24  ;;  %v6023_v9 = vsub.f32 1.5, %v6022_v60  ;;  %v6165_v60 = vmul.f32 %v6038_v38, %v12440_v52  ;;  %v6321_v28 = vsel %vm1498_vm3, %v6166_v31, 0.0  ;;  %v7546_v31 = vld [vmem:[%s13213_s8 + $0x54] sm:$0xf] }
 0x8a4   :  { %v6080_v59 = vmul.f32 %v12872_v51, %v12835_v14  ;;  %v6074_v1 = vmul.f32 %v12830_v18, %v6073_v17  ;;  %vm6086_vm7 = vweird.f32 %v12872_v51  ;;  %v6293_v10 = vrot.slane %v6292_v6, 4 }
 0x8a5   :  { %7966 = vrsqrt.f32 %v12877_v16  ;;  %v6024_v26 = vmul.f32 %v7963_v34, %v6023_v9  ;;  %v7535_v9 = vld [vmem:[%s13212_s6 + $0x8] sm:$0xff]  ;;  %v6320_v11 = vsel %vm1498_vm3, %v6165_v60, 0.0  ;;  %vm6095_vm12 = vweird.f32 %v12877_v16 }
 0x8a6   :  { %v6081_v54 = vmul.f32 %v12872_v51, %v6080_v59  ;;  %v6078_v52 = vsel %vm12966_vm8, %v12830_v18, %v6074_v1  ;;  %6409 = vmatpush.bf16.msrb.mxu0 %v7535_v9  ;;  %v6294_v41 = vadd.f32 %v6293_v10, %v6292_v6  ;;  %v7348_v6 = vld [vmem:[%s13213_s8 + $0x58] sm:$0xf0]  ;;  %v7542_v59 = vld [vmem:[%s13213_s8 + $0x34] sm:$0xf]  ;;  %vm6821_vm6 = vcmask 57344  }
 0x8a7   :  { %v6028_v56 = vsel %vm12887_vm9, %v7963_v34, %v6024_v26  ;;  %vm6085_vm9 = vweird.f32 %v12835_v14  ;;  %v6169_v44 = vmul.f32 %v6078_v52, %v12479_v32  ;;  %v7362_v32 = vld [vmem:[%s13213_s8 + $0x70] sm:$0xf] }
 0x8a8   :  { %v6082_v2 = vmul.f32 0.5, %v6081_v54  ;;  %v6164_v49 = vmul.f32 %v6028_v56, %v12474_v12  ;;  %v6054_v12 = vmul.f32 %v12799_v7, %v6053_v33  ;;  %vm12980_vm11 = vmor %vm6085_vm9, %vm6086_vm7  ;;  %v6322_v33 = vadd.f32 %v6321_v28, %v6320_v11  ;;  %v7551_v56 = vld [vmem:[%s13213_s8 + $0x74] sm:$0xf0]  ;;  %v7545_v28 = vld [vmem:[%s13213_s8 + $0x44] sm:$0xf0] }
 0x8a9   :  { %v6327_v40 = vsel %vm1498_vm3, %v6169_v44, 0.0  ;;  %v6295_v17 = vrot.slane %v6294_v41, 2  ;;  %v7324_v44 = vld [vmem:[%s13213_s8 + $0x28] sm:$0xf0] }
 0x8aa   :  { %v5404_v24 = vpop.xlane.xlu2 %5403  ;;  %v6083_v4 = vsub.f32 1.5, %v6082_v2  ;;  %v6312_v29 = vsel %vm1498_vm3, %v6164_v49, 0.0  ;;  %v6058_v45 = vsel %vm12942_vm4, %v12799_v7, %v6054_v12  ;;  %6410 = vmatpush.bf16.msrb.mxu0 %v7534_v15  ;;  %v7363_v2 = vor.u32 %v7551_v56, %v7362_v32  ;;  %v7548_v49 = vld [vmem:[%s13213_s8 + $0x64] sm:$0xf]  ;;  %v7356_v12 = vld [vmem:[%s13213_s8 + $0x68] sm:$0xf0] }
 0x8ab   :  { %v12924_v55 = vpop.eup %7966  ;;  %v12931_v37 = vmax.f32 %v5404_v24, 1e-24  ;;  %v6313_v57 = vadd.f32 %v6312_v29, %v6311_v63  ;;  %v6167_v19 = vmul.f32 %v6058_v45, %v12456_v36  ;;  %v7359_v47 = vor.u32 %v7548_v49, %v7356_v12  ;;  %v7346_v63 = vld [vmem:[%s13213_s8 + $0x50] sm:$0xf] }
 0x8ac   :  { %v6090_v8 = vmul.f32 %v12924_v55, %v12877_v16  ;;  %v6084_v7 = vmul.f32 %v12872_v51, %v6083_v4  ;;  %vm6096_vm10 = vweird.f32 %v12924_v55  ;;  %v6325_v16 = vsel %vm1498_vm3, %v6168_v48, 0.0  ;;  %6520 = vmatpush.bf16.msra.mxu1 %v7363_v2  ;;  %v7354_v4 = vld [vmem:[%s13213_s8 + $0x60] sm:$0xf]  ;;  %v7330_v49 = vld [vmem:[%s13213_s8 + $0x30] sm:$0xf] }
 0x8ad   :  { %7968 = vrsqrt.f32 %v12931_v37  ;;  %v6314_v14 = vrot.slane %v6313_v57, 4  ;;  %v6323_v26 = vsel %vm1498_vm3, %v6167_v19, 0.0  ;;  %vm12997_vm13 = vmor %vm6095_vm12, %vm6096_vm10  ;;  %vm6105_vm15 = vweird.f32 %v12931_v37  ;;  %v7544_v19 = vld [vmem:[%s13213_s8 + $0x44] sm:$0xf] }
 0x8ae   :  { %v6091_v39 = vmul.f32 %v12924_v55, %v6090_v8  ;;  %v6088_v18 = vsel %vm12980_vm11, %v12872_v51, %v6084_v7  ;;  %v6324_v35 = vadd.f32 %v6323_v26, %v6322_v33  ;;  %v6296_v1 = vadd.f32 %v6295_v17, %v6294_v41  ;;  %v7540_v26 = vld [vmem:[%s13213_s8 + $0x24] sm:$0xf]  ;;  %v7538_v17 = vld [vmem:[%s13213_s8 + $0x14] sm:$0xf] }
 0x8af   :  { %v6170_v22 = vmul.f32 %v6088_v18, %v12485_v46  ;;  %v6315_v30 = vadd.f32 %v6314_v14, %v6313_v57  ;;  %v7364_v46 = vld [vmem:[%s13213_s8 + $0x78] sm:$0xf0]  ;;  %v7351_v7 = vor.u32 %v7546_v31, %v7348_v6  ;;  %vm6383_vm4 = vcmask 1046534   ;;  %v7537_v31 = vld [vmem:[%s13213_s8 + $0x4] sm:$0xf0] }
 0x8b0   :  { %v6092_v61 = vmul.f32 0.5, %v6091_v39  ;;  %v7367_v53 = vor.u32 %v7550_v43, %v7364_v46  ;;  %v6326_v3 = vadd.f32 %v6325_v16, %v6324_v35  ;;  %v6297_v52 = vrot.slane %v6296_v1, 1  ;;  %v7332_v14 = vld [vmem:[%s13213_s8 + $0x38] sm:$0xf0] }
 0x8b1   :  { %v6316_v38 = vrot.slane %v6315_v30, 2  ;;  %v7335_v15 = vor.u32 %v7542_v59, %v7332_v14  ;;  %v7574_v59 = vld [vmem:[%s13216_s12 + $0x30] sm:$0xff]  ;;  %v7573_v14 = vld [vmem:[%s13216_s12 + $0x28] sm:$0xff] }
 0x8b2   :  { %v6093_v27 = vsub.f32 1.5, %v6092_v61  ;;  %6533 = vmatpush.bf16.msrb.mxu3 %v7367_v53  ;;  %v6328_v8 = vadd.f32 %v6327_v40, %v6326_v3  ;;  %v7338_v61 = vld [vmem:[%s13213_s8 + $0x40] sm:$0xf]  ;;  %v6298_v18 = vadd.f32 %v6297_v52, %v6296_v1  ;;  %v7543_v40 = vld [vmem:[%s13213_s8 + $0x34] sm:$0xf0]  ;;  %v7565_v1 = vld [vmem:[%s13214_s10 + $0x68] sm:$0xff] }
 0x8b3   :  { %v7969_v36 = vpop.eup %7968  ;;  %v6317_v23 = vadd.f32 %v6316_v38, %v6315_v30  ;;  %v7322_v53 = vld [vmem:[%s13213_s8 + $0x20] sm:$0xf]  ;;  %v7316_v3 = vld [vmem:[%s13213_s8 + $0x18] sm:$0xf0]  ;;  %v7539_v38 = vld [vmem:[%s13213_s8 + $0x14] sm:$0xf0] }
 0x8b4   :  { %v6094_v5 = vmul.f32 %v12924_v55, %v6093_v27  ;;  %v6100_v21 = vmul.f32 %v7969_v36, %v12931_v37  ;;  %vm6106_vm14 = vweird.f32 %v7969_v36  ;;  %v7547_v37 = vld [vmem:[%s13213_s8 + $0x54] sm:$0xf0]  ;;  %v7339_v27 = vor.u32 %v7545_v28, %v7338_v61  ;;  %v7583_v61 = vld [vmem:[%s13211_s7] ss:$0 sm:$0xff]  ;;  %v7554_v52 = vld [vmem:[%s13214_s10 + $0x10] sm:$0xff] }
 0x8b5   :  { %vm6107_vm0 = vmor %vm6105_vm15, %vm6106_vm14  ;;  %v7347_v60 = vor.u32 %v7547_v37, %v7346_v63  ;;  %v6318_v9 = vrot.slane %v6317_v23, 1  ;;  %v6346_v51 = vpack.c.bf16 %v6298_v18, %v6298_v18  ;;  %v7559_v63 = vld [vmem:[%s13214_s10 + $0x38] sm:$0xff]  ;;  %v7558_v37 = vld [vmem:[%s13214_s10 + $0x30] sm:$0xff] }
 0x8b6   :  { %v6098_v25 = vsel %vm12997_vm13, %v12924_v55, %v6094_v5  ;;  %v6101_v54 = vmul.f32 %v7969_v36, %v6100_v21  ;;  %v6329_v55 = vsel %vm1498_vm3, %v6170_v22, 0.0  ;;  %6534 = vmatpush.bf16.msrb.mxu3 %v7359_v47  ;;  %v7536_v47 = vld [vmem:[%s13213_s8 + $0x4] sm:$0xf]  ;;  %6682 = vmatpush.bf16.msra.mxu0 %v7559_v63 }
 0x8b7   :  { %v6171_v34 = vmul.f32 %v6098_v25, %v12490_v13  ;;  %v7549_v13 = vld [vmem:[%s13213_s8 + $0x64] sm:$0xf0]  ;;  %v6330_v0 = vadd.f32 %v6329_v55, %v6328_v8  ;;  %v6319_v21 = vadd.f32 %v6318_v9, %v6317_v23  ;;  %v7327_v25 = vor.u32 %v7540_v26, %v7324_v44  ;;  %v7563_v23 = vld [vmem:[%s13214_s10 + $0x58] sm:$0xff]  ;;  %v7572_v18 = vld [vmem:[%s13216_s12 + $0x20] sm:$0xff] }
 0x8b8   :  { %v6102_v50 = vmul.f32 0.5, %v6101_v54  ;;  %v7355_v20 = vor.u32 %v7549_v13, %v7354_v4  ;;  %v6370_v22 = vunpack.c.l.b16 %v6346_v51  ;;  %v7319_v55 = vor.u32 %v7538_v17, %v7316_v3  ;;  %v7308_v4 = vld [vmem:[%s13213_s8 + $0x8] sm:$0xf0]  ;;  %v7570_v26 = vld [vmem:[%s13216_s12 + $0x10] sm:$0xff] }
 0x8b9   :  { %v6331_v45 = vsel %vm1498_vm3, %v6171_v34, 0.0  ;;  %v6347_v16 = vpack.c.bf16 %v6319_v21, %v6319_v21  ;;  %v7331_v34 = vor.u32 %v7543_v40, %v7330_v49  ;;  %v7311_v8 = vor.u32 %v7536_v47, %v7308_v4  ;;  %v7561_v9 = vld [vmem:[%s13214_s10 + $0x48] sm:$0xff]  ;;  %v7571_v21 = vld [vmem:[%s13216_s12 + $0x18] sm:$0xff] }
 0x8ba   :  { %v6103_v24 = vsub.f32 1.5, %v6102_v50  ;;  %6521 = vmatpush.bf16.msra.mxu1 %v7355_v20  ;;  %v6332_v10 = vadd.f32 %v6331_v45, %v6330_v0  ;;  %6535 = vmatpush.bf16.msrb.mxu3 %v7351_v7  ;;  %v6382_v35 = vsel %vm6381_vm1, %v6370_v22, %v12472_v42  ;;  %v7541_v42 = vld [vmem:[%s13213_s8 + $0x24] sm:$0xf0]  ;;  %v7567_v20 = vld [vmem:[%s13214_s10 + $0x78] sm:$0xff]  ;;  %v7566_v45 = vld [vmem:[%s13214_s10 + $0x70] sm:$0xff]  ;;  %v21_v17 = vstv %s13219_s15 }
 0x8bb   :  { %v6371_v32 = vunpack.c.l.b16 %v6347_v16  ;;  %v7323_v12 = vor.u32 %v7541_v42, %v7322_v53  ;;  %6695 = vmatpush.bf16.msra.mxu2 %v7567_v20  ;;  %6683 = vmatpush.bf16.msra.mxu0 %v7558_v37  ;;  %v7557_v0 = vld [vmem:[%s13214_s10 + $0x28] sm:$0xff]  ;;  %v7562_v7 = vld [vmem:[%s13214_s10 + $0x50] sm:$0xff]  ;;  %v8035_v3 = vmov 0   ;;  %22 = vst [vmem:[#allocation2] sm:$0x1] %v21_v17 }
 0x8bc   :  { %v6104_v29 = vmul.f32 %v7969_v36, %v6103_v24  ;;  %v7314_v24 = vld [vmem:[%s13213_s8 + $0x10] sm:$0xf]  ;;  %7581 = vset.pattern.permute.xlu0 %v8035_v3 }
 0x8bd   :  { %v6384_v50 = vsel %vm6383_vm4, %v6371_v32, %v6382_v35  ;;  %v7315_v13 = vor.u32 %v7539_v38, %v7314_v24  ;;  %v7568_v35 = vld [vmem:[%s13216_s12] sm:$0xff] }
 0x8be   :  { %v6108_v39 = vsel %vm6107_vm0, %v7969_v36, %v6104_v29  ;;  %6522 = vmatpush.bf16.msra.mxu1 %v7347_v60  ;;  %v7343_v36 = vor.u32 %v7544_v19, %v7340_v62  ;;  %v7306_v29 = vld [vmem:[%s13213_s8] sm:$0xf] }
 0x8bf   :  { %v6172_v57 = vmul.f32 %v6108_v39, %v12495_v58  ;;  %v7307_v6 = vor.u32 %v7537_v31, %v7306_v29  ;;  %6696 = vmatpush.bf16.msra.mxu2 %v7566_v45  ;;  %v7564_v39 = vld [vmem:[%s13214_s10 + $0x60] sm:$0xff]  ;;  %6684 = vmatpush.bf16.msra.mxu0 %v7557_v0 }
 0x8c0   :  { %6536 = vmatpush.bf16.msrb.mxu3 %v7343_v36  ;;  %v7556_v60 = vld [vmem:[%s13214_s10 + $0x20] sm:$0xff] }
 0x8c1   :  { %v6333_v58 = vsel %vm1498_vm3, %v6172_v57, 0.0  ;;  %v7555_v57 = vld [vmem:[%s13214_s10 + $0x18] sm:$0xff]  ;;  %v7560_v36 = vld [vmem:[%s13214_s10 + $0x40] sm:$0xff] }
 0x8c2   :  { %v6334_v48 = vadd.f32 %v6333_v58, %v6332_v10  ;;  %6523 = vmatpush.bf16.msra.mxu1 %v7339_v27  ;;  %v7552_v27 = vld [vmem:[%s13214_s10] sm:$0xff] }
 0x8c3   :  { %6697 = vmatpush.bf16.msra.mxu2 %v7565_v1  ;;  %6685 = vmatpush.bf16.msra.mxu0 %v7556_v60  ;;  %v6794_v24 = vld [vmem:[#allocation2] sm:$0x1] }
 0x8c4   :  { %v6335_v11 = vrot.slane %v6334_v48, 4  ;;  %6537 = vmatpush.bf16.msrb.mxu3 %v7335_v15  ;;  %6797 = vperm.xlu0 %7581, %v6794_v24   ;;  %v6792_v31 = vld [vmem:[%s13220_s14] sm:$0x1] }
 0x8c6   :  { %v6336_v5 = vadd.f32 %v6335_v11, %v6334_v48  ;;  %6524 = vmatpush.bf16.msra.mxu1 %v7331_v34  ;;  %v7553_v48 = vld [vmem:[%s13214_s10 + $0x8] sm:$0xff]  ;;  %v7575_v11 = vld [vmem:[%s13216_s12 + $0x38] sm:$0xff] }
 0x8c7   :  { %6698 = vmatpush.bf16.msra.mxu2 %v7564_v39  ;;  %6686 = vmatpush.bf16.msra.mxu0 %v7555_v57 }
 0x8c8   :  { %v6337_v33 = vrot.slane %v6336_v5, 2  ;;  %6538 = vmatpush.bf16.msrb.mxu3 %v7327_v25 }
 0x8ca   :  { %v6338_v41 = vadd.f32 %v6337_v33, %v6336_v5  ;;  %6525 = vmatpush.bf16.msra.mxu1 %v7323_v12  ;;  %v6434_v5 = vld [vmem:[%s13217_s9] sm:$0x3] }
 0x8cb   :  { %6699 = vmatpush.bf16.msra.mxu2 %v7563_v23  ;;  %6687 = vmatpush.bf16.msra.mxu0 %v7554_v52  ;;  %v6436_v15 = vperm.slane %v6434_v5, 0  ;;  %v6437_v51 = vperm.slane %v6434_v5, 1 }
 0x8cc   :  { %v6339_v54 = vrot.slane %v6338_v41, 1  ;;  %6539 = vmatpush.bf16.msrb.mxu3 %v7319_v55  ;;  %v7585_v55 = vld [vmem:[%s13218_s13] ss:$0 sm:$0xff] }
 0x8ce   :  { %v6340_v30 = vadd.f32 %v6339_v54, %v6338_v41  ;;  %6526 = vmatpush.bf16.msra.mxu1 %v7315_v13 }
 0x8cf   :  { %6700 = vmatpush.bf16.msra.mxu2 %v7562_v7  ;;  %6688 = vmatpush.bf16.msra.mxu0 %v7553_v48 }
 0x8d0   :  { %v6348_v56 = vpack.c.bf16 %v6340_v30, %v6340_v30  ;;  %6540 = vmatpush.bf16.msrb.mxu3 %v7311_v8 }
 0x8d2   :  { %v6372_v43 = vunpack.c.l.b16 %v6348_v56  ;;  %6527 = vmatpush.bf16.msra.mxu1 %v7307_v6 }
 0x8d3   :  { %6689 = vmatpush.bf16.msra.mxu0 %v7552_v27  ;;  %6701 = vmatpush.bf16.msra.mxu2 %v7561_v9 }
 0x8d4   :  { %v6386_v2 = vsel %vm6385_vm5, %v6372_v43, %v6384_v50  ;;  %6778 = vmatpush.bf16.msra.mxu3 %v7575_v11  ;;  %v7569_v43 = vld [vmem:[%s13216_s12 + $0x8] sm:$0xff] }
 0x8d5   :  { %v6387_v46 = vpack.c.b16 %v6386_v2, %v6386_v2  ;;  %v7584_v2 = vld [vmem:[%s13215_s11] ss:$0 sm:$0xff] }
 0x8d7   :  { %7303 = vmatmul.msk.bf16.vlgmr.msrb.gmra.mxu0 %vm1498_vm3, %v6387_v46  ;;  %6702 = vmatpush.bf16.msra.mxu2 %v7560_v36  ;;  %vm6801_vm3 = vcmask 80896  }
 0x8d8   :  { %6779 = vmatpush.bf16.msra.mxu3 %v7574_v59 }
 0x8dc   :  { %6780 = vmatpush.bf16.msra.mxu3 %v7573_v14 }
 0x8e0   :  { %6781 = vmatpush.bf16.msra.mxu3 %v7572_v18 }
 0x8e4   :  { %6782 = vmatpush.bf16.msra.mxu3 %v7571_v21 }
 0x8e8   :  { %6783 = vmatpush.bf16.msra.mxu3 %v7570_v26 }
 0x8ec   :  { %6784 = vmatpush.bf16.msra.mxu3 %v7569_v43 }
 0x8f0   :  { %6785 = vmatpush.bf16.msra.mxu3 %v7568_v35 }
 0x936   :  { %v6798_v6 = vpop.permute.xlu0 %6797 }
 0x937   :  { %v6800_v20 = vperm.slane %v6798_v6, 0 }
 0x954   :  { %v6412_v28 = vpop.f32.mrf.mxu0 }
 0x955   :  { %v6413_v10 = vadd.f32 %v7583_v61, %v6412_v28 }
 0x957   :  { %v6416_v19 = vmax.f32 %v6413_v10, 0.0 }
 0x959   :  { %v6417_v62 = vpack.c.bf16 %v6416_v19, %v6416_v19 }
 0x95b   :  { %6541 = vmatmul.bf16.vlgmr.msrb.gmra.mxu3 %v6417_v62  ;;  %6528 = vmatmul.bf16.vlgmr.msra.gmra.mxu1 %v6417_v62 }
 0x95c   :  { %v6414_v58 = vpop.f32.mrf.mxu0 }
 0x9d8   :  { %v6529_v33 = vpop.f32.mrf.mxu1 }
 0x9d9   :  { %v6530_v44 = vadd.f32 %v6529_v33, %v6436_v15 }
 0x9db   :  { %v6546_v41 = vmax.f32 %v6530_v44, 0.0 }
 0x9dd   :  { %v6548_v16 = vpack.c.bf16 %v6546_v41, %v6546_v41 }
 0x9de   :  { %v6542_v25 = vpop.f32.mrf.mxu3 }
 0x9df   :  { %v6543_v54 = vadd.f32 %v6542_v25, %v6437_v51  ;;  %6690 = vmatmul.bf16.vlgmr.msra.gmra.mxu0 %v6548_v16 }
 0x9e0   :  { %v6531_v22 = vpop.f32.mrf.mxu1 }
 0x9e1   :  { %v6547_v30 = vmax.f32 %v6543_v54, 0.0 }
 0x9e3   :  { %v6549_v32 = vpack.c.bf16 %v6547_v30, %v6547_v30 }
 0x9e5   :  { %6703 = vmatmul.bf16.vlgmr.msra.gmra.mxu2 %v6549_v32 }
 0x9e6   :  { %v6544_v56 = vpop.f32.mrf.mxu3 }
 0xa5c   :  { %v6691_v50 = vpop.f32.mrf.mxu0 }
 0xa5d   :  { %v6692_v49 = vadd.f32 %v7584_v2, %v6691_v50 }
 0xa64   :  { %v6693_v46 = vpop.f32.mrf.mxu0 }
 0xa68   :  { %v6704_v40 = vpop.f32.mrf.mxu2 }
 0xa69   :  { %v6705_v34 = vadd.f32 %v6704_v40, %v6692_v49 }
 0xa6b   :  { %v6708_v53 = vmax.f32 %v6705_v34, 0.0 }
 0xa6d   :  { %v6709_v42 = vpack.c.bf16 %v6708_v53, %v6708_v53 }
 0xa6f   :  { %6786 = vmatmul.bf16.vlgmr.msra.gmra.mxu3 %v6709_v42 }
 0xa70   :  { %v6706_v12 = vpop.f32.mrf.mxu2 }
 0xaf2   :  { %v6787_v38 = vpop.f32.mrf.mxu3 }
 0xaf3   :  { %v6788_v47 = vadd.f32 %v7585_v55, %v6787_v38 }
 0xaf5   :  { %v6791_v4 = vmax.f32 %v6788_v47, 0.0 }
 0xaf7   :  { %v6793_v13 = vpack.c.bf16 %v6791_v4, %v6791_v4 }
 0xaf9   :  { %v6806_v8 = vsel %vm6801_vm3, %v6793_v13, 0 }
 0xafa   :  { %v6789_v29 = vpop.f32.mrf.mxu3  ;;  %6815 = vmatpush.bf16.xpose.msrb.mxu0 %v6806_v8 }
 0xb01   :  { %7464 = vmatmul.msk.bf16.vlgmr.msrb.gmra.mxu0 %vm6801_vm3, %v6792_v31 }
 0xb7e   :  { %v6817_v63 = vpop.f32.mrf.mxu0 }
 0xb7f   :  { %v6818_v45 = vadd.f32 %v6817_v63, %v6800_v20 }
 0xb81   :  { %6822 = vst.msk [vmem:[%s13221_s16] sm:$0x1] %vm6821_vm6, %v6818_v45 }
 0xb86   :  { %v6819_v37 = vpop.f32.mrf.mxu0 }

</bundles_post_ra>
